<compile_context>
chip_gen: v6e
topology: v6e:2x2x1
jax: 0.10.0
libtpu: 0.0.40
codegen_flags: <defaults>
</compile_context>

<pallas_src>
import jax
import jax.numpy as jnp
from jax.experimental import pallas as pl
from jax.experimental.pallas import tpu as pltpu


# ----------------------------------------------------------------------------
# Fused forward: single pallas_call, no grid (everything fits in VMEM)
# ----------------------------------------------------------------------------
def brain_nn_pretrained_forward(x_nchw, kp, out_dim=5):
    x = x_nchw.astype(jnp.float32)
    B, Cin, H, W = x.shape
    C1 = kp["wc1"].shape[1]
    C2 = kp["wc2"].shape[1]
    hidden = kp["wf2"].shape[0]
    NPAD = kp["wf3"].shape[1]

    assert H % 2 == 0 and W % 2 == 0, "MaxPool2d(2) with odd size unsupported"
    H2, W2 = H // 2, W // 2
    assert H2 % 7 == 0 and W2 % 7 == 0, "adaptive pool: only divisible bins"
    # TODO(synk): general AdaptiveAvgPool2d (overlapping, variable-size bins)
    #             for non-divisible inputs is not implemented.

    Hp, Wp = H + 2, W + 2              # conv1 zero-padded spatial dims
    H2p, W2p = H2 + 2, W2 + 2          # conv2 zero-padded spatial dims
    Np1 = B * Hp * Wp                  # conv1 flat (lane) domain
    Np2 = B * H2p * W2p                # conv2 flat (lane) domain
    Q = H2p * W2p                      # per-image conv2-domain positions
    G1 = 32                            # flat end-guard (>= Wp + 1)
    G2 = W2p + 1                       # flat end-guard for conv2 input buffer
    P2W = G2 + Np2 + G2
    assert G1 >= Wp + 1
    assert kp["s1"].shape == (Np1, P2W)
    assert out_dim <= NPAD

    # Wrapper-side layout plumbing (free, fused by XLA): conv1 zero padding +
    # NCHW -> channels-leading flat (Cin, B*Hp*Wp) + flat end guards so every
    # 3x3 tap is a plain static lane-slice load in the kernel.
    xpad = jnp.pad(x, ((0, 0), (0, 0), (1, 1), (1, 1)))
    xflat = jnp.transpose(xpad, (1, 0, 2, 3)).reshape(Cin, Np1)
    xg = jnp.pad(xflat, ((0, 0), (G1, G1)))

    def kernel(xg_ref, wc1_ref, bc1_ref, s1_ref, wc2_ref, bc2_ref,
               wf1k_ref, bf1_ref, wf2_ref, bf2_ref, wf3_ref, bf3_ref,
               o_ref, h1_ref, p2_ref, g_ref):
        # ---- conv1 (3x3, pad=1) + ReLU: 9 accumulating lane-dense dots ----
        acc = None
        for k in range(9):
            dy, dx = k // 3 - 1, k % 3 - 1
            s = G1 + dy * Wp + dx
            slab = xg_ref[:, s:s + Np1]                       # (Cin, Np1)
            d = jnp.dot(wc1_ref[k], slab, preferred_element_type=jnp.float32)
            acc = d if acc is None else acc + d
        h = jnp.maximum(acc + bc1_ref[...], 0.0)              # (C1, Np1)

        # ---- maxpool 2x2/2: 4 shifted loads + VPU max; decimation on MXU ----
        h1_ref[:, :Np1] = h
        h1_ref[:, Np1:] = jnp.zeros((C1, G1), jnp.float32)    # keep guard finite
        m = jnp.maximum(
            jnp.maximum(h1_ref[:, 0:Np1],        h1_ref[:, 1:1 + Np1]),
            jnp.maximum(h1_ref[:, Wp:Wp + Np1],  h1_ref[:, Wp + 1:Wp + 1 + Np1]))
        # 0/1 selection matmul: picks the 2x2 anchors (valid pool outputs only)
        # and scatters them into conv2's zero-bordered, guard-flanked input
        # buffer in one lane-dense dot (selection is exact in bf16).
        p2_ref[...] = jnp.dot(m.astype(jnp.bfloat16), s1_ref[...],
                              preferred_element_type=jnp.float32)

        # ---- conv2 (3x3, pad=1) + ReLU ----
        acc2 = None
        for k in range(9):
            dy, dx = k // 3 - 1, k % 3 - 1
            s = G2 + dy * W2p + dx
            slab = p2_ref[:, s:s + Np2]                       # (C1, Np2)
            d = jnp.dot(wc2_ref[k], slab, preferred_element_type=jnp.float32)
            acc2 = d if acc2 is None else acc2 + d
        g = jnp.maximum(acc2 + bc2_ref[...], 0.0)             # (C2, Np2)

        # ---- per-image de-interleave through VMEM (128-aligned lane slices) ----
        for b in range(B):
            g_ref[b] = g[:, b * Q:(b + 1) * Q]                # (C2, Q)

        # ---- fc1 (avgpool(7,7) + NCHW flatten folded into wf1k) ----
        z1 = jnp.zeros((B, hidden), jnp.float32)
        for c in range(C2):
            z1 = z1 + jnp.dot(g_ref[:, c, :], wf1k_ref[c],
                              preferred_element_type=jnp.float32)
        z1 = jnp.maximum(z1 + bf1_ref[...], 0.0)

        # ---- fc2 -> ReLU -> fc3 (lane-padded) -> softmax(dim=0) ----
        z2 = jnp.dot(z1, wf2_ref[...], preferred_element_type=jnp.float32)
        z2 = jnp.maximum(z2 + bf2_ref[...], 0.0)
        logits = jnp.dot(z2, wf3_ref[...], preferred_element_type=jnp.float32)
        logits = logits + bf3_ref[...]                        # (B, NPAD) lane-dense
        mx = jnp.max(logits, axis=0, keepdims=True)           # softmax over BATCH
        e = jnp.exp(logits - mx)
        o_ref[...] = e / jnp.sum(e, axis=0, keepdims=True)

    out_full = pl.pallas_call(
        kernel,
        out_shape=jax.ShapeDtypeStruct((B, NPAD), jnp.float32),
        scratch_shapes=[
            pltpu.VMEM((C1, Np1 + G1), jnp.float32),   # guarded conv1 output
            pltpu.VMEM((C1, P2W), jnp.float32),        # guarded conv2 input
            pltpu.VMEM((B, C2, Q), jnp.float32),       # per-image conv2 output
        ],
    )(xg, kp["wc1"], kp["bc1"], kp["s1"], kp["wc2"], kp["bc2"],
      kp["wf1k"], kp["bf1"], kp["wf2"], kp["bf2"], kp["wf3"], kp["bf3"])

    # Kernel writeback is lane-dense; slice the valid columns in XLA.
    return out_full[:, :out_dim]


# ----------------------------------------------------------------------------
# Deterministic scaled-down parameters ("torch-like" layouts)
# ----------------------------------------------------------------------------
def make_params(key, c_in=3, c1=8, c2=16, hidden=128, output_size=5):
    ks = jax.random.split(key, 7)
    feat_dim = c2 * 7 * 7
    return {
        "w_conv1": 0.1 * jax.random.normal(ks[0], (3, 3, c_in, c1), jnp.float32),
        "b_conv1": 0.1 * jax.random.normal(ks[1], (c1,), jnp.float32),
        "w_conv2": 0.1 * jax.random.normal(ks[2], (3, 3, c1, c2), jnp.float32),
        "b_conv2": 0.1 * jax.random.normal(ks[3], (c2,), jnp.float32),
        # fc weights stored (in, out); fc1's input index is NCHW-flatten order
        # (c*49 + i*7 + j), matching torch's x.view(B, -1) on an NCHW tensor.
        "w1": 0.05 * jax.random.normal(ks[4], (feat_dim, hidden), jnp.float32),
        "b1": jnp.zeros((hidden,), jnp.float32),
        "w2": 0.05 * jax.random.normal(ks[5], (hidden, hidden), jnp.float32),
        "b2": jnp.zeros((hidden,), jnp.float32),
        "w3": 0.05 * jax.random.normal(ks[6], (hidden, output_size), jnp.float32),
        "b3": jnp.zeros((output_size,), jnp.float32),
    }


def prepare_params(p, input_shape):
    """One-time transform of torch-layout params into kernel-ready layout."""
    B, c_in, H, W = input_shape
    assert H % 2 == 0 and W % 2 == 0
    H2, W2 = H // 2, W // 2
    assert H2 % 7 == 0 and W2 % 7 == 0
    Hp, Wp = H + 2, W + 2
    H2p, W2p = H2 + 2, W2 + 2
    Np1 = B * Hp * Wp
    Np2 = B * H2p * W2p
    Q = H2p * W2p
    G2 = W2p + 1
    P2W = G2 + Np2 + G2

    c1 = p["w_conv1"].shape[-1]
    c2 = p["w_conv2"].shape[-1]
    hidden = p["w1"].shape[1]
    out_dim = int(p["w3"].shape[1])
    npad = max(128, ((out_dim + 127) // 128) * 128)

    # conv weights HWIO (3,3,Cin,Cout) -> (tap, Cout, Cin) for transposed dots
    wc1 = jnp.transpose(p["w_conv1"], (0, 1, 3, 2)).reshape(9, c1, c_in)
    wc2 = jnp.transpose(p["w_conv2"], (0, 1, 3, 2)).reshape(9, c2, c1)

    # Fold AdaptiveAvgPool2d((7,7)) (exact bins) + NCHW flatten into fc1, and
    # remap onto conv2's zero-bordered padded-flat domain (border rows -> 0).
    kh, kw = H2 // 7, W2 // 7
    q = jnp.arange(Q)
    y2 = q // W2p - 1
    x2 = q % W2p - 1
    valid = (y2 >= 0) & (y2 < H2) & (x2 >= 0) & (x2 < W2)
    bins = (jnp.clip(y2, 0, H2 - 1) // kh) * 7 + (jnp.clip(x2, 0, W2 - 1) // kw)
    w1_3d = p["w1"].reshape(c2, 7 * 7, hidden)
    wf1k = w1_3d[:, bins, :] * (1.0 / float(kh * kw))
    wf1k = jnp.where(valid[None, :, None], wf1k, 0.0)          # (c2, Q, hidden)

    # fc3 zero-padded to a lane-dense 128-wide output tile
    wf3 = jnp.zeros((hidden, npad), jnp.float32).at[:, :out_dim].set(p["w3"])
    bf3 = jnp.zeros((1, npad), jnp.float32).at[:, :out_dim].set(p["b3"])

    # 0/1 selection operator: maxpool-2x2 anchors of the conv1 padded-flat
    # domain scattered into conv2's guard-flanked, zero-bordered input buffer.
    pidx = jnp.arange(Np1)
    b_i = pidx // (Hp * Wp)
    rem = pidx % (Hp * Wp)
    yp = rem // Wp
    xp = rem % Wp
    anchor = (yp % 2 == 1) & (yp < H) & (xp % 2 == 1) & (xp < W)
    dest = G2 + b_i * Q + (((yp - 1) // 2) + 1) * W2p + (((xp - 1) // 2) + 1)
    col = jnp.where(anchor, dest, -1)
    s1 = (col[:, None] == jnp.arange(P2W)[None, :]).astype(jnp.bfloat16)

    kp = {
        "wc1": wc1, "bc1": p["b_conv1"].reshape(c1, 1),
        "wc2": wc2, "bc2": p["b_conv2"].reshape(c2, 1),
        "s1": s1,
        "wf1k": wf1k, "bf1": p["b1"].reshape(1, hidden),
        "wf2": p["w2"], "bf2": p["b2"].reshape(1, hidden),
        "wf3": wf3, "bf3": bf3,
    }
    return kp, out_dim


if __name__ == "__main__":
    key = jax.random.PRNGKey(0)
    k_x, k_p = jax.random.split(key)
    # small input consistent with the module: NCHW, 3 channels, 28x28 spatial
    x = jax.random.normal(k_x, (2, 3, 28, 28), jnp.float32)
    params = make_params(k_p)
    kparams, out_dim = prepare_params(params, x.shape)

    fwd = jax.jit(brain_nn_pretrained_forward, static_argnames=("out_dim",))
    out = jax.block_until_ready(fwd(x, kparams, out_dim=out_dim))

    assert out.shape == (2, 5)
    assert bool(jnp.all(jnp.isfinite(out)))
    # softmax over dim=0 (batch) -> each output column sums to 1
    col_sums = jnp.sum(out, axis=0)
    assert bool(jnp.all(jnp.abs(col_sums - 1.0) < 1e-5))
    print("KERNEL_OK")
</pallas_src>

<mosaic_0001>
module attributes {stable_mosaic.version = 11 : i64} {
  func.func @kernel(%arg0: memref<3x1864xf32, #tpu.memory_space<vmem>>, %arg1: memref<9x8x3xf32, #tpu.memory_space<vmem>>, %arg2: memref<8x1xf32, #tpu.memory_space<vmem>>, %arg3: memref<1800x546xbf16, #tpu.memory_space<vmem>>, %arg4: memref<9x16x8xf32, #tpu.memory_space<vmem>>, %arg5: memref<16x1xf32, #tpu.memory_space<vmem>>, %arg6: memref<16x256x128xf32, #tpu.memory_space<vmem>>, %arg7: memref<1x128xf32, #tpu.memory_space<vmem>>, %arg8: memref<128x128xf32, #tpu.memory_space<vmem>>, %arg9: memref<1x128xf32, #tpu.memory_space<vmem>>, %arg10: memref<128x128xf32, #tpu.memory_space<vmem>>, %arg11: memref<1x128xf32, #tpu.memory_space<vmem>>, %arg12: memref<2x128xf32, #tpu.memory_space<vmem>>, %arg13: memref<8x1832xf32, #tpu.memory_space<vmem>>, %arg14: memref<8x546xf32, #tpu.memory_space<vmem>>, %arg15: memref<2x16x256xf32, #tpu.memory_space<vmem>>) attributes {dimension_semantics = [], scalar_prefetch = 0 : i64, scratch_operands = 3 : i64, tpu.core_type = #tpu.core_type<tc>} {
    %c0 = arith.constant 0 : index
    %c1 = arith.constant 1 : index
    %0 = vector.load %arg0[%c0, %c1] : memref<3x1864xf32, #tpu.memory_space<vmem>>, vector<3x1800xf32>
    %c0_0 = arith.constant 0 : index
    %c0_1 = arith.constant 0 : index
    %c0_2 = arith.constant 0 : index
    %1 = vector.load %arg1[%c0_0, %c0_1, %c0_2] : memref<9x8x3xf32, #tpu.memory_space<vmem>>, vector<1x8x3xf32>
    %2 = vector.shape_cast %1 : vector<1x8x3xf32> to vector<8x3xf32>
    %cst = arith.constant dense<0.000000e+00> : vector<8x1800xf32>
    %3 = tpu.matmul %2, %0, %cst {dimension_numbers = #tpu.dot_dimension_numbers<[1], [0], [0], [1], [0, 0, 1, 1], [], []>} : vector<8x3xf32>, vector<3x1800xf32>, vector<8x1800xf32> -> vector<8x1800xf32>
    %c0_3 = arith.constant 0 : index
    %c2 = arith.constant 2 : index
    %4 = vector.load %arg0[%c0_3, %c2] : memref<3x1864xf32, #tpu.memory_space<vmem>>, vector<3x1800xf32>
    %c1_4 = arith.constant 1 : index
    %c0_5 = arith.constant 0 : index
    %c0_6 = arith.constant 0 : index
    %5 = vector.load %arg1[%c1_4, %c0_5, %c0_6] : memref<9x8x3xf32, #tpu.memory_space<vmem>>, vector<1x8x3xf32>
    %6 = vector.shape_cast %5 : vector<1x8x3xf32> to vector<8x3xf32>
    %cst_7 = arith.constant dense<0.000000e+00> : vector<8x1800xf32>
    %7 = tpu.matmul %6, %4, %cst_7 {dimension_numbers = #tpu.dot_dimension_numbers<[1], [0], [0], [1], [0, 0, 1, 1], [], []>} : vector<8x3xf32>, vector<3x1800xf32>, vector<8x1800xf32> -> vector<8x1800xf32>
    %8 = arith.addf %3, %7 : vector<8x1800xf32>
    %c0_8 = arith.constant 0 : index
    %c3 = arith.constant 3 : index
    %9 = vector.load %arg0[%c0_8, %c3] : memref<3x1864xf32, #tpu.memory_space<vmem>>, vector<3x1800xf32>
    %c2_9 = arith.constant 2 : index
    %c0_10 = arith.constant 0 : index
    %c0_11 = arith.constant 0 : index
    %10 = vector.load %arg1[%c2_9, %c0_10, %c0_11] : memref<9x8x3xf32, #tpu.memory_space<vmem>>, vector<1x8x3xf32>
    %11 = vector.shape_cast %10 : vector<1x8x3xf32> to vector<8x3xf32>
    %cst_12 = arith.constant dense<0.000000e+00> : vector<8x1800xf32>
    %12 = tpu.matmul %11, %9, %cst_12 {dimension_numbers = #tpu.dot_dimension_numbers<[1], [0], [0], [1], [0, 0, 1, 1], [], []>} : vector<8x3xf32>, vector<3x1800xf32>, vector<8x1800xf32> -> vector<8x1800xf32>
    %13 = arith.addf %8, %12 : vector<8x1800xf32>
    %c0_13 = arith.constant 0 : index
    %c31 = arith.constant 31 : index
    %14 = vector.load %arg0[%c0_13, %c31] : memref<3x1864xf32, #tpu.memory_space<vmem>>, vector<3x1800xf32>
    %c3_14 = arith.constant 3 : index
    %c0_15 = arith.constant 0 : index
    %c0_16 = arith.constant 0 : index
    %15 = vector.load %arg1[%c3_14, %c0_15, %c0_16] : memref<9x8x3xf32, #tpu.memory_space<vmem>>, vector<1x8x3xf32>
    %16 = vector.shape_cast %15 : vector<1x8x3xf32> to vector<8x3xf32>
    %cst_17 = arith.constant dense<0.000000e+00> : vector<8x1800xf32>
    %17 = tpu.matmul %16, %14, %cst_17 {dimension_numbers = #tpu.dot_dimension_numbers<[1], [0], [0], [1], [0, 0, 1, 1], [], []>} : vector<8x3xf32>, vector<3x1800xf32>, vector<8x1800xf32> -> vector<8x1800xf32>
    %18 = arith.addf %13, %17 : vector<8x1800xf32>
    %c0_18 = arith.constant 0 : index
    %c32 = arith.constant 32 : index
    %19 = vector.load %arg0[%c0_18, %c32] : memref<3x1864xf32, #tpu.memory_space<vmem>>, vector<3x1800xf32>
    %c4 = arith.constant 4 : index
    %c0_19 = arith.constant 0 : index
    %c0_20 = arith.constant 0 : index
    %20 = vector.load %arg1[%c4, %c0_19, %c0_20] : memref<9x8x3xf32, #tpu.memory_space<vmem>>, vector<1x8x3xf32>
    %21 = vector.shape_cast %20 : vector<1x8x3xf32> to vector<8x3xf32>
    %cst_21 = arith.constant dense<0.000000e+00> : vector<8x1800xf32>
    %22 = tpu.matmul %21, %19, %cst_21 {dimension_numbers = #tpu.dot_dimension_numbers<[1], [0], [0], [1], [0, 0, 1, 1], [], []>} : vector<8x3xf32>, vector<3x1800xf32>, vector<8x1800xf32> -> vector<8x1800xf32>
    %23 = arith.addf %18, %22 : vector<8x1800xf32>
    %c0_22 = arith.constant 0 : index
    %c33 = arith.constant 33 : index
    %24 = vector.load %arg0[%c0_22, %c33] : memref<3x1864xf32, #tpu.memory_space<vmem>>, vector<3x1800xf32>
    %c5 = arith.constant 5 : index
    %c0_23 = arith.constant 0 : index
    %c0_24 = arith.constant 0 : index
    %25 = vector.load %arg1[%c5, %c0_23, %c0_24] : memref<9x8x3xf32, #tpu.memory_space<vmem>>, vector<1x8x3xf32>
    %26 = vector.shape_cast %25 : vector<1x8x3xf32> to vector<8x3xf32>
    %cst_25 = arith.constant dense<0.000000e+00> : vector<8x1800xf32>
    %27 = tpu.matmul %26, %24, %cst_25 {dimension_numbers = #tpu.dot_dimension_numbers<[1], [0], [0], [1], [0, 0, 1, 1], [], []>} : vector<8x3xf32>, vector<3x1800xf32>, vector<8x1800xf32> -> vector<8x1800xf32>
    %28 = arith.addf %23, %27 : vector<8x1800xf32>
    %c0_26 = arith.constant 0 : index
    %c61 = arith.constant 61 : index
    %29 = vector.load %arg0[%c0_26, %c61] : memref<3x1864xf32, #tpu.memory_space<vmem>>, vector<3x1800xf32>
    %c6 = arith.constant 6 : index
    %c0_27 = arith.constant 0 : index
    %c0_28 = arith.constant 0 : index
    %30 = vector.load %arg1[%c6, %c0_27, %c0_28] : memref<9x8x3xf32, #tpu.memory_space<vmem>>, vector<1x8x3xf32>
    %31 = vector.shape_cast %30 : vector<1x8x3xf32> to vector<8x3xf32>
    %cst_29 = arith.constant dense<0.000000e+00> : vector<8x1800xf32>
    %32 = tpu.matmul %31, %29, %cst_29 {dimension_numbers = #tpu.dot_dimension_numbers<[1], [0], [0], [1], [0, 0, 1, 1], [], []>} : vector<8x3xf32>, vector<3x1800xf32>, vector<8x1800xf32> -> vector<8x1800xf32>
    %33 = arith.addf %28, %32 : vector<8x1800xf32>
    %c0_30 = arith.constant 0 : index
    %c62 = arith.constant 62 : index
    %34 = vector.load %arg0[%c0_30, %c62] : memref<3x1864xf32, #tpu.memory_space<vmem>>, vector<3x1800xf32>
    %c7 = arith.constant 7 : index
    %c0_31 = arith.constant 0 : index
    %c0_32 = arith.constant 0 : index
    %35 = vector.load %arg1[%c7, %c0_31, %c0_32] : memref<9x8x3xf32, #tpu.memory_space<vmem>>, vector<1x8x3xf32>
    %36 = vector.shape_cast %35 : vector<1x8x3xf32> to vector<8x3xf32>
    %cst_33 = arith.constant dense<0.000000e+00> : vector<8x1800xf32>
    %37 = tpu.matmul %36, %34, %cst_33 {dimension_numbers = #tpu.dot_dimension_numbers<[1], [0], [0], [1], [0, 0, 1, 1], [], []>} : vector<8x3xf32>, vector<3x1800xf32>, vector<8x1800xf32> -> vector<8x1800xf32>
    %38 = arith.addf %33, %37 : vector<8x1800xf32>
    %c0_34 = arith.constant 0 : index
    %c63 = arith.constant 63 : index
    %39 = vector.load %arg0[%c0_34, %c63] : memref<3x1864xf32, #tpu.memory_space<vmem>>, vector<3x1800xf32>
    %c8 = arith.constant 8 : index
    %c0_35 = arith.constant 0 : index
    %c0_36 = arith.constant 0 : index
    %40 = vector.load %arg1[%c8, %c0_35, %c0_36] : memref<9x8x3xf32, #tpu.memory_space<vmem>>, vector<1x8x3xf32>
    %41 = vector.shape_cast %40 : vector<1x8x3xf32> to vector<8x3xf32>
    %cst_37 = arith.constant dense<0.000000e+00> : vector<8x1800xf32>
    %42 = tpu.matmul %41, %39, %cst_37 {dimension_numbers = #tpu.dot_dimension_numbers<[1], [0], [0], [1], [0, 0, 1, 1], [], []>} : vector<8x3xf32>, vector<3x1800xf32>, vector<8x1800xf32> -> vector<8x1800xf32>
    %43 = arith.addf %38, %42 : vector<8x1800xf32>
    %c0_38 = arith.constant 0 : index
    %c0_39 = arith.constant 0 : index
    %44 = vector.load %arg2[%c0_38, %c0_39] : memref<8x1xf32, #tpu.memory_space<vmem>>, vector<8x1xf32>
    %45 = vector.broadcast %44 : vector<8x1xf32> to vector<8x1800xf32>
    %46 = arith.addf %43, %45 : vector<8x1800xf32>
    %cst_40 = arith.constant 0.000000e+00 : f32
    %47 = vector.broadcast %cst_40 : f32 to vector<8x1800xf32>
    %48 = arith.maximumf %46, %47 : vector<8x1800xf32>
    %c0_41 = arith.constant 0 : index
    %c0_42 = arith.constant 0 : index
    %49 = vector.load %arg13[%c0_41, %c0_42] : memref<8x1832xf32, #tpu.memory_space<vmem>>, vector<8x1800xf32>
    tpu.vector_store %arg13[%c0_41, %c0_42], %48 {strides = array<i32>} : memref<8x1832xf32, #tpu.memory_space<vmem>>, vector<8x1800xf32>,
    %cst_43 = arith.constant 0.000000e+00 : f32
    %50 = vector.broadcast %cst_43 : f32 to vector<8x32xf32>
    %c0_44 = arith.constant 0 : index
    %c1800 = arith.constant 1800 : index
    %51 = vector.load %arg13[%c0_44, %c1800] : memref<8x1832xf32, #tpu.memory_space<vmem>>, vector<8x32xf32>
    tpu.vector_store %arg13[%c0_44, %c1800], %50 {strides = array<i32>} : memref<8x1832xf32, #tpu.memory_space<vmem>>, vector<8x32xf32>,
    %c0_45 = arith.constant 0 : index
    %c0_46 = arith.constant 0 : index
    %52 = vector.load %arg13[%c0_45, %c0_46] : memref<8x1832xf32, #tpu.memory_space<vmem>>, vector<8x1800xf32>
    %c0_47 = arith.constant 0 : index
    %c1_48 = arith.constant 1 : index
    %53 = vector.load %arg13[%c0_47, %c1_48] : memref<8x1832xf32, #tpu.memory_space<vmem>>, vector<8x1800xf32>
    %54 = arith.maximumf %52, %53 : vector<8x1800xf32>
    %c0_49 = arith.constant 0 : index
    %c30 = arith.constant 30 : index
    %55 = vector.load %arg13[%c0_49, %c30] : memref<8x1832xf32, #tpu.memory_space<vmem>>, vector<8x1800xf32>
    %c0_50 = arith.constant 0 : index
    %c31_51 = arith.constant 31 : index
    %56 = vector.load %arg13[%c0_50, %c31_51] : memref<8x1832xf32, #tpu.memory_space<vmem>>, vector<8x1800xf32>
    %57 = arith.maximumf %55, %56 : vector<8x1800xf32>
    %58 = arith.maximumf %54, %57 : vector<8x1800xf32>
    %59 = arith.truncf %58 : vector<8x1800xf32> to vector<8x1800xbf16>
    %c0_52 = arith.constant 0 : index
    %c0_53 = arith.constant 0 : index
    %60 = vector.load %arg3[%c0_52, %c0_53] : memref<1800x546xbf16, #tpu.memory_space<vmem>>, vector<1800x546xbf16>
    %cst_54 = arith.constant dense<0.000000e+00> : vector<8x546xf32>
    %61 = tpu.matmul %59, %60, %cst_54 {dimension_numbers = #tpu.dot_dimension_numbers<[1], [0], [0], [1], [0, 0, 1, 1], [], []>} : vector<8x1800xbf16>, vector<1800x546xbf16>, vector<8x546xf32> -> vector<8x546xf32>
    %c0_55 = arith.constant 0 : index
    %c0_56 = arith.constant 0 : index
    %62 = vector.load %arg14[%c0_55, %c0_56] : memref<8x546xf32, #tpu.memory_space<vmem>>, vector<8x546xf32>
    tpu.vector_store %arg14[%c0_55, %c0_56], %61 {strides = array<i32>} : memref<8x546xf32, #tpu.memory_space<vmem>>, vector<8x546xf32>,
    %c0_57 = arith.constant 0 : index
    %c0_58 = arith.constant 0 : index
    %63 = vector.load %arg14[%c0_57, %c0_58] : memref<8x546xf32, #tpu.memory_space<vmem>>, vector<8x512xf32>
    %c0_59 = arith.constant 0 : index
    %c0_60 = arith.constant 0 : index
    %c0_61 = arith.constant 0 : index
    %64 = vector.load %arg4[%c0_59, %c0_60, %c0_61] : memref<9x16x8xf32, #tpu.memory_space<vmem>>, vector<1x16x8xf32>
    %65 = vector.shape_cast %64 : vector<1x16x8xf32> to vector<16x8xf32>
    %cst_62 = arith.constant dense<0.000000e+00> : vector<16x512xf32>
    %66 = tpu.matmul %65, %63, %cst_62 {dimension_numbers = #tpu.dot_dimension_numbers<[1], [0], [0], [1], [0, 0, 1, 1], [], []>} : vector<16x8xf32>, vector<8x512xf32>, vector<16x512xf32> -> vector<16x512xf32>
    %c0_63 = arith.constant 0 : index
    %c1_64 = arith.constant 1 : index
    %67 = vector.load %arg14[%c0_63, %c1_64] : memref<8x546xf32, #tpu.memory_space<vmem>>, vector<8x512xf32>
    %c1_65 = arith.constant 1 : index
    %c0_66 = arith.constant 0 : index
    %c0_67 = arith.constant 0 : index
    %68 = vector.load %arg4[%c1_65, %c0_66, %c0_67] : memref<9x16x8xf32, #tpu.memory_space<vmem>>, vector<1x16x8xf32>
    %69 = vector.shape_cast %68 : vector<1x16x8xf32> to vector<16x8xf32>
    %cst_68 = arith.constant dense<0.000000e+00> : vector<16x512xf32>
    %70 = tpu.matmul %69, %67, %cst_68 {dimension_numbers = #tpu.dot_dimension_numbers<[1], [0], [0], [1], [0, 0, 1, 1], [], []>} : vector<16x8xf32>, vector<8x512xf32>, vector<16x512xf32> -> vector<16x512xf32>
    %71 = arith.addf %66, %70 : vector<16x512xf32>
    %c0_69 = arith.constant 0 : index
    %c2_70 = arith.constant 2 : index
    %72 = vector.load %arg14[%c0_69, %c2_70] : memref<8x546xf32, #tpu.memory_space<vmem>>, vector<8x512xf32>
    %c2_71 = arith.constant 2 : index
    %c0_72 = arith.constant 0 : index
    %c0_73 = arith.constant 0 : index
    %73 = vector.load %arg4[%c2_71, %c0_72, %c0_73] : memref<9x16x8xf32, #tpu.memory_space<vmem>>, vector<1x16x8xf32>
    %74 = vector.shape_cast %73 : vector<1x16x8xf32> to vector<16x8xf32>
    %cst_74 = arith.constant dense<0.000000e+00> : vector<16x512xf32>
    %75 = tpu.matmul %74, %72, %cst_74 {dimension_numbers = #tpu.dot_dimension_numbers<[1], [0], [0], [1], [0, 0, 1, 1], [], []>} : vector<16x8xf32>, vector<8x512xf32>, vector<16x512xf32> -> vector<16x512xf32>
    %76 = arith.addf %71, %75 : vector<16x512xf32>
    %c0_75 = arith.constant 0 : index
    %c16 = arith.constant 16 : index
    %77 = vector.load %arg14[%c0_75, %c16] : memref<8x546xf32, #tpu.memory_space<vmem>>, vector<8x512xf32>
    %c3_76 = arith.constant 3 : index
    %c0_77 = arith.constant 0 : index
    %c0_78 = arith.constant 0 : index
    %78 = vector.load %arg4[%c3_76, %c0_77, %c0_78] : memref<9x16x8xf32, #tpu.memory_space<vmem>>, vector<1x16x8xf32>
    %79 = vector.shape_cast %78 : vector<1x16x8xf32> to vector<16x8xf32>
    %cst_79 = arith.constant dense<0.000000e+00> : vector<16x512xf32>
    %80 = tpu.matmul %79, %77, %cst_79 {dimension_numbers = #tpu.dot_dimension_numbers<[1], [0], [0], [1], [0, 0, 1, 1], [], []>} : vector<16x8xf32>, vector<8x512xf32>, vector<16x512xf32> -> vector<16x512xf32>
    %81 = arith.addf %76, %80 : vector<16x512xf32>
    %c0_80 = arith.constant 0 : index
    %c17 = arith.constant 17 : index
    %82 = vector.load %arg14[%c0_80, %c17] : memref<8x546xf32, #tpu.memory_space<vmem>>, vector<8x512xf32>
    %c4_81 = arith.constant 4 : index
    %c0_82 = arith.constant 0 : index
    %c0_83 = arith.constant 0 : index
    %83 = vector.load %arg4[%c4_81, %c0_82, %c0_83] : memref<9x16x8xf32, #tpu.memory_space<vmem>>, vector<1x16x8xf32>
    %84 = vector.shape_cast %83 : vector<1x16x8xf32> to vector<16x8xf32>
    %cst_84 = arith.constant dense<0.000000e+00> : vector<16x512xf32>
    %85 = tpu.matmul %84, %82, %cst_84 {dimension_numbers = #tpu.dot_dimension_numbers<[1], [0], [0], [1], [0, 0, 1, 1], [], []>} : vector<16x8xf32>, vector<8x512xf32>, vector<16x512xf32> -> vector<16x512xf32>
    %86 = arith.addf %81, %85 : vector<16x512xf32>
    %c0_85 = arith.constant 0 : index
    %c18 = arith.constant 18 : index
    %87 = vector.load %arg14[%c0_85, %c18] : memref<8x546xf32, #tpu.memory_space<vmem>>, vector<8x512xf32>
    %c5_86 = arith.constant 5 : index
    %c0_87 = arith.constant 0 : index
    %c0_88 = arith.constant 0 : index
    %88 = vector.load %arg4[%c5_86, %c0_87, %c0_88] : memref<9x16x8xf32, #tpu.memory_space<vmem>>, vector<1x16x8xf32>
    %89 = vector.shape_cast %88 : vector<1x16x8xf32> to vector<16x8xf32>
    %cst_89 = arith.constant dense<0.000000e+00> : vector<16x512xf32>
    %90 = tpu.matmul %89, %87, %cst_89 {dimension_numbers = #tpu.dot_dimension_numbers<[1], [0], [0], [1], [0, 0, 1, 1], [], []>} : vector<16x8xf32>, vector<8x512xf32>, vector<16x512xf32> -> vector<16x512xf32>
    %91 = arith.addf %86, %90 : vector<16x512xf32>
    %c0_90 = arith.constant 0 : index
    %c32_91 = arith.constant 32 : index
    %92 = vector.load %arg14[%c0_90, %c32_91] : memref<8x546xf32, #tpu.memory_space<vmem>>, vector<8x512xf32>
    %c6_92 = arith.constant 6 : index
    %c0_93 = arith.constant 0 : index
    %c0_94 = arith.constant 0 : index
    %93 = vector.load %arg4[%c6_92, %c0_93, %c0_94] : memref<9x16x8xf32, #tpu.memory_space<vmem>>, vector<1x16x8xf32>
    %94 = vector.shape_cast %93 : vector<1x16x8xf32> to vector<16x8xf32>
    %cst_95 = arith.constant dense<0.000000e+00> : vector<16x512xf32>
    %95 = tpu.matmul %94, %92, %cst_95 {dimension_numbers = #tpu.dot_dimension_numbers<[1], [0], [0], [1], [0, 0, 1, 1], [], []>} : vector<16x8xf32>, vector<8x512xf32>, vector<16x512xf32> -> vector<16x512xf32>
    %96 = arith.addf %91, %95 : vector<16x512xf32>
    %c0_96 = arith.constant 0 : index
    %c33_97 = arith.constant 33 : index
    %97 = vector.load %arg14[%c0_96, %c33_97] : memref<8x546xf32, #tpu.memory_space<vmem>>, vector<8x512xf32>
    %c7_98 = arith.constant 7 : index
    %c0_99 = arith.constant 0 : index
    %c0_100 = arith.constant 0 : index
    %98 = vector.load %arg4[%c7_98, %c0_99, %c0_100] : memref<9x16x8xf32, #tpu.memory_space<vmem>>, vector<1x16x8xf32>
    %99 = vector.shape_cast %98 : vector<1x16x8xf32> to vector<16x8xf32>
    %cst_101 = arith.constant dense<0.000000e+00> : vector<16x512xf32>
    %100 = tpu.matmul %99, %97, %cst_101 {dimension_numbers = #tpu.dot_dimension_numbers<[1], [0], [0], [1], [0, 0, 1, 1], [], []>} : vector<16x8xf32>, vector<8x512xf32>, vector<16x512xf32> -> vector<16x512xf32>
    %101 = arith.addf %96, %100 : vector<16x512xf32>
    %c0_102 = arith.constant 0 : index
    %c34 = arith.constant 34 : index
    %102 = vector.load %arg14[%c0_102, %c34] : memref<8x546xf32, #tpu.memory_space<vmem>>, vector<8x512xf32>
    %c8_103 = arith.constant 8 : index
    %c0_104 = arith.constant 0 : index
    %c0_105 = arith.constant 0 : index
    %103 = vector.load %arg4[%c8_103, %c0_104, %c0_105] : memref<9x16x8xf32, #tpu.memory_space<vmem>>, vector<1x16x8xf32>
    %104 = vector.shape_cast %103 : vector<1x16x8xf32> to vector<16x8xf32>
    %cst_106 = arith.constant dense<0.000000e+00> : vector<16x512xf32>
    %105 = tpu.matmul %104, %102, %cst_106 {dimension_numbers = #tpu.dot_dimension_numbers<[1], [0], [0], [1], [0, 0, 1, 1], [], []>} : vector<16x8xf32>, vector<8x512xf32>, vector<16x512xf32> -> vector<16x512xf32>
    %106 = arith.addf %101, %105 : vector<16x512xf32>
    %c0_107 = arith.constant 0 : index
    %c0_108 = arith.constant 0 : index
    %107 = vector.load %arg5[%c0_107, %c0_108] : memref<16x1xf32, #tpu.memory_space<vmem>>, vector<16x1xf32>
    %108 = vector.broadcast %107 : vector<16x1xf32> to vector<16x512xf32>
    %109 = arith.addf %106, %108 : vector<16x512xf32>
    %cst_109 = arith.constant 0.000000e+00 : f32
    %110 = vector.broadcast %cst_109 : f32 to vector<16x512xf32>
    %111 = arith.maximumf %109, %110 : vector<16x512xf32>
    %112 = vector.extract_strided_slice %111 {offsets = [0, 0], sizes = [16, 256], strides = [1, 1]} : vector<16x512xf32> to vector<16x256xf32>
    %c0_110 = arith.constant 0 : index
    %c0_111 = arith.constant 0 : index
    %c0_112 = arith.constant 0 : index
    %113 = vector.load %arg15[%c0_110, %c0_111, %c0_112] : memref<2x16x256xf32, #tpu.memory_space<vmem>>, vector<1x16x256xf32>
    %114 = vector.shape_cast %113 : vector<1x16x256xf32> to vector<16x256xf32>
    %115 = vector.shape_cast %112 : vector<16x256xf32> to vector<1x16x256xf32>
    tpu.vector_store %arg15[%c0_110, %c0_111, %c0_112], %115 {strides = array<i32>} : memref<2x16x256xf32, #tpu.memory_space<vmem>>, vector<1x16x256xf32>,
    %116 = vector.extract_strided_slice %111 {offsets = [0, 256], sizes = [16, 256], strides = [1, 1]} : vector<16x512xf32> to vector<16x256xf32>
    %c1_113 = arith.constant 1 : index
    %c0_114 = arith.constant 0 : index
    %c0_115 = arith.constant 0 : index
    %117 = vector.load %arg15[%c1_113, %c0_114, %c0_115] : memref<2x16x256xf32, #tpu.memory_space<vmem>>, vector<1x16x256xf32>
    %118 = vector.shape_cast %117 : vector<1x16x256xf32> to vector<16x256xf32>
    %119 = vector.shape_cast %116 : vector<16x256xf32> to vector<1x16x256xf32>
    tpu.vector_store %arg15[%c1_113, %c0_114, %c0_115], %119 {strides = array<i32>} : memref<2x16x256xf32, #tpu.memory_space<vmem>>, vector<1x16x256xf32>,
    %cst_116 = arith.constant 0.000000e+00 : f32
    %120 = vector.broadcast %cst_116 : f32 to vector<2x128xf32>
    %c0_117 = arith.constant 0 : index
    %c0_118 = arith.constant 0 : index
    %c0_119 = arith.constant 0 : index
    %121 = vector.load %arg15[%c0_117, %c0_118, %c0_119] : memref<2x16x256xf32, #tpu.memory_space<vmem>>, vector<2x1x256xf32>
    %122 = vector.shape_cast %121 : vector<2x1x256xf32> to vector<2x256xf32>
    %c0_120 = arith.constant 0 : index
    %c0_121 = arith.constant 0 : index
    %c0_122 = arith.constant 0 : index
    %123 = vector.load %arg6[%c0_120, %c0_121, %c0_122] : memref<16x256x128xf32, #tpu.memory_space<vmem>>, vector<1x256x128xf32>
    %124 = vector.shape_cast %123 : vector<1x256x128xf32> to vector<256x128xf32>
    %cst_123 = arith.constant dense<0.000000e+00> : vector<2x128xf32>
    %125 = tpu.matmul %122, %124, %cst_123 {dimension_numbers = #tpu.dot_dimension_numbers<[1], [0], [0], [1], [0, 0, 1, 1], [], []>} : vector<2x256xf32>, vector<256x128xf32>, vector<2x128xf32> -> vector<2x128xf32>
    %126 = arith.addf %120, %125 : vector<2x128xf32>
    %c0_124 = arith.constant 0 : index
    %c1_125 = arith.constant 1 : index
    %c0_126 = arith.constant 0 : index
    %127 = vector.load %arg15[%c0_124, %c1_125, %c0_126] : memref<2x16x256xf32, #tpu.memory_space<vmem>>, vector<2x1x256xf32>
    %128 = vector.shape_cast %127 : vector<2x1x256xf32> to vector<2x256xf32>
    %c1_127 = arith.constant 1 : index
    %c0_128 = arith.constant 0 : index
    %c0_129 = arith.constant 0 : index
    %129 = vector.load %arg6[%c1_127, %c0_128, %c0_129] : memref<16x256x128xf32, #tpu.memory_space<vmem>>, vector<1x256x128xf32>
    %130 = vector.shape_cast %129 : vector<1x256x128xf32> to vector<256x128xf32>
    %cst_130 = arith.constant dense<0.000000e+00> : vector<2x128xf32>
    %131 = tpu.matmul %128, %130, %cst_130 {dimension_numbers = #tpu.dot_dimension_numbers<[1], [0], [0], [1], [0, 0, 1, 1], [], []>} : vector<2x256xf32>, vector<256x128xf32>, vector<2x128xf32> -> vector<2x128xf32>
    %132 = arith.addf %126, %131 : vector<2x128xf32>
    %c0_131 = arith.constant 0 : index
    %c2_132 = arith.constant 2 : index
    %c0_133 = arith.constant 0 : index
    %133 = vector.load %arg15[%c0_131, %c2_132, %c0_133] : memref<2x16x256xf32, #tpu.memory_space<vmem>>, vector<2x1x256xf32>
    %134 = vector.shape_cast %133 : vector<2x1x256xf32> to vector<2x256xf32>
    %c2_134 = arith.constant 2 : index
    %c0_135 = arith.constant 0 : index
    %c0_136 = arith.constant 0 : index
    %135 = vector.load %arg6[%c2_134, %c0_135, %c0_136] : memref<16x256x128xf32, #tpu.memory_space<vmem>>, vector<1x256x128xf32>
    %136 = vector.shape_cast %135 : vector<1x256x128xf32> to vector<256x128xf32>
    %cst_137 = arith.constant dense<0.000000e+00> : vector<2x128xf32>
    %137 = tpu.matmul %134, %136, %cst_137 {dimension_numbers = #tpu.dot_dimension_numbers<[1], [0], [0], [1], [0, 0, 1, 1], [], []>} : vector<2x256xf32>, vector<256x128xf32>, vector<2x128xf32> -> vector<2x128xf32>
    %138 = arith.addf %132, %137 : vector<2x128xf32>
    %c0_138 = arith.constant 0 : index
    %c3_139 = arith.constant 3 : index
    %c0_140 = arith.constant 0 : index
    %139 = vector.load %arg15[%c0_138, %c3_139, %c0_140] : memref<2x16x256xf32, #tpu.memory_space<vmem>>, vector<2x1x256xf32>
    %140 = vector.shape_cast %139 : vector<2x1x256xf32> to vector<2x256xf32>
    %c3_141 = arith.constant 3 : index
    %c0_142 = arith.constant 0 : index
    %c0_143 = arith.constant 0 : index
    %141 = vector.load %arg6[%c3_141, %c0_142, %c0_143] : memref<16x256x128xf32, #tpu.memory_space<vmem>>, vector<1x256x128xf32>
    %142 = vector.shape_cast %141 : vector<1x256x128xf32> to vector<256x128xf32>
    %cst_144 = arith.constant dense<0.000000e+00> : vector<2x128xf32>
    %143 = tpu.matmul %140, %142, %cst_144 {dimension_numbers = #tpu.dot_dimension_numbers<[1], [0], [0], [1], [0, 0, 1, 1], [], []>} : vector<2x256xf32>, vector<256x128xf32>, vector<2x128xf32> -> vector<2x128xf32>
    %144 = arith.addf %138, %143 : vector<2x128xf32>
    %c0_145 = arith.constant 0 : index
    %c4_146 = arith.constant 4 : index
    %c0_147 = arith.constant 0 : index
    %145 = vector.load %arg15[%c0_145, %c4_146, %c0_147] : memref<2x16x256xf32, #tpu.memory_space<vmem>>, vector<2x1x256xf32>
    %146 = vector.shape_cast %145 : vector<2x1x256xf32> to vector<2x256xf32>
    %c4_148 = arith.constant 4 : index
    %c0_149 = arith.constant 0 : index
    %c0_150 = arith.constant 0 : index
    %147 = vector.load %arg6[%c4_148, %c0_149, %c0_150] : memref<16x256x128xf32, #tpu.memory_space<vmem>>, vector<1x256x128xf32>
    %148 = vector.shape_cast %147 : vector<1x256x128xf32> to vector<256x128xf32>
    %cst_151 = arith.constant dense<0.000000e+00> : vector<2x128xf32>
    %149 = tpu.matmul %146, %148, %cst_151 {dimension_numbers = #tpu.dot_dimension_numbers<[1], [0], [0], [1], [0, 0, 1, 1], [], []>} : vector<2x256xf32>, vector<256x128xf32>, vector<2x128xf32> -> vector<2x128xf32>
    %150 = arith.addf %144, %149 : vector<2x128xf32>
    %c0_152 = arith.constant 0 : index
    %c5_153 = arith.constant 5 : index
    %c0_154 = arith.constant 0 : index
    %151 = vector.load %arg15[%c0_152, %c5_153, %c0_154] : memref<2x16x256xf32, #tpu.memory_space<vmem>>, vector<2x1x256xf32>
    %152 = vector.shape_cast %151 : vector<2x1x256xf32> to vector<2x256xf32>
    %c5_155 = arith.constant 5 : index
    %c0_156 = arith.constant 0 : index
    %c0_157 = arith.constant 0 : index
    %153 = vector.load %arg6[%c5_155, %c0_156, %c0_157] : memref<16x256x128xf32, #tpu.memory_space<vmem>>, vector<1x256x128xf32>
    %154 = vector.shape_cast %153 : vector<1x256x128xf32> to vector<256x128xf32>
    %cst_158 = arith.constant dense<0.000000e+00> : vector<2x128xf32>
    %155 = tpu.matmul %152, %154, %cst_158 {dimension_numbers = #tpu.dot_dimension_numbers<[1], [0], [0], [1], [0, 0, 1, 1], [], []>} : vector<2x256xf32>, vector<256x128xf32>, vector<2x128xf32> -> vector<2x128xf32>
    %156 = arith.addf %150, %155 : vector<2x128xf32>
    %c0_159 = arith.constant 0 : index
    %c6_160 = arith.constant 6 : index
    %c0_161 = arith.constant 0 : index
    %157 = vector.load %arg15[%c0_159, %c6_160, %c0_161] : memref<2x16x256xf32, #tpu.memory_space<vmem>>, vector<2x1x256xf32>
    %158 = vector.shape_cast %157 : vector<2x1x256xf32> to vector<2x256xf32>
    %c6_162 = arith.constant 6 : index
    %c0_163 = arith.constant 0 : index
    %c0_164 = arith.constant 0 : index
    %159 = vector.load %arg6[%c6_162, %c0_163, %c0_164] : memref<16x256x128xf32, #tpu.memory_space<vmem>>, vector<1x256x128xf32>
    %160 = vector.shape_cast %159 : vector<1x256x128xf32> to vector<256x128xf32>
    %cst_165 = arith.constant dense<0.000000e+00> : vector<2x128xf32>
    %161 = tpu.matmul %158, %160, %cst_165 {dimension_numbers = #tpu.dot_dimension_numbers<[1], [0], [0], [1], [0, 0, 1, 1], [], []>} : vector<2x256xf32>, vector<256x128xf32>, vector<2x128xf32> -> vector<2x128xf32>
    %162 = arith.addf %156, %161 : vector<2x128xf32>
    %c0_166 = arith.constant 0 : index
    %c7_167 = arith.constant 7 : index
    %c0_168 = arith.constant 0 : index
    %163 = vector.load %arg15[%c0_166, %c7_167, %c0_168] : memref<2x16x256xf32, #tpu.memory_space<vmem>>, vector<2x1x256xf32>
    %164 = vector.shape_cast %163 : vector<2x1x256xf32> to vector<2x256xf32>
    %c7_169 = arith.constant 7 : index
    %c0_170 = arith.constant 0 : index
    %c0_171 = arith.constant 0 : index
    %165 = vector.load %arg6[%c7_169, %c0_170, %c0_171] : memref<16x256x128xf32, #tpu.memory_space<vmem>>, vector<1x256x128xf32>
    %166 = vector.shape_cast %165 : vector<1x256x128xf32> to vector<256x128xf32>
    %cst_172 = arith.constant dense<0.000000e+00> : vector<2x128xf32>
    %167 = tpu.matmul %164, %166, %cst_172 {dimension_numbers = #tpu.dot_dimension_numbers<[1], [0], [0], [1], [0, 0, 1, 1], [], []>} : vector<2x256xf32>, vector<256x128xf32>, vector<2x128xf32> -> vector<2x128xf32>
    %168 = arith.addf %162, %167 : vector<2x128xf32>
    %c0_173 = arith.constant 0 : index
    %c8_174 = arith.constant 8 : index
    %c0_175 = arith.constant 0 : index
    %169 = vector.load %arg15[%c0_173, %c8_174, %c0_175] : memref<2x16x256xf32, #tpu.memory_space<vmem>>, vector<2x1x256xf32>
    %170 = vector.shape_cast %169 : vector<2x1x256xf32> to vector<2x256xf32>
    %c8_176 = arith.constant 8 : index
    %c0_177 = arith.constant 0 : index
    %c0_178 = arith.constant 0 : index
    %171 = vector.load %arg6[%c8_176, %c0_177, %c0_178] : memref<16x256x128xf32, #tpu.memory_space<vmem>>, vector<1x256x128xf32>
    %172 = vector.shape_cast %171 : vector<1x256x128xf32> to vector<256x128xf32>
    %cst_179 = arith.constant dense<0.000000e+00> : vector<2x128xf32>
    %173 = tpu.matmul %170, %172, %cst_179 {dimension_numbers = #tpu.dot_dimension_numbers<[1], [0], [0], [1], [0, 0, 1, 1], [], []>} : vector<2x256xf32>, vector<256x128xf32>, vector<2x128xf32> -> vector<2x128xf32>
    %174 = arith.addf %168, %173 : vector<2x128xf32>
    %c0_180 = arith.constant 0 : index
    %c9 = arith.constant 9 : index
    %c0_181 = arith.constant 0 : index
    %175 = vector.load %arg15[%c0_180, %c9, %c0_181] : memref<2x16x256xf32, #tpu.memory_space<vmem>>, vector<2x1x256xf32>
    %176 = vector.shape_cast %175 : vector<2x1x256xf32> to vector<2x256xf32>
    %c9_182 = arith.constant 9 : index
    %c0_183 = arith.constant 0 : index
    %c0_184 = arith.constant 0 : index
    %177 = vector.load %arg6[%c9_182, %c0_183, %c0_184] : memref<16x256x128xf32, #tpu.memory_space<vmem>>, vector<1x256x128xf32>
    %178 = vector.shape_cast %177 : vector<1x256x128xf32> to vector<256x128xf32>
    %cst_185 = arith.constant dense<0.000000e+00> : vector<2x128xf32>
    %179 = tpu.matmul %176, %178, %cst_185 {dimension_numbers = #tpu.dot_dimension_numbers<[1], [0], [0], [1], [0, 0, 1, 1], [], []>} : vector<2x256xf32>, vector<256x128xf32>, vector<2x128xf32> -> vector<2x128xf32>
    %180 = arith.addf %174, %179 : vector<2x128xf32>
    %c0_186 = arith.constant 0 : index
    %c10 = arith.constant 10 : index
    %c0_187 = arith.constant 0 : index
    %181 = vector.load %arg15[%c0_186, %c10, %c0_187] : memref<2x16x256xf32, #tpu.memory_space<vmem>>, vector<2x1x256xf32>
    %182 = vector.shape_cast %181 : vector<2x1x256xf32> to vector<2x256xf32>
    %c10_188 = arith.constant 10 : index
    %c0_189 = arith.constant 0 : index
    %c0_190 = arith.constant 0 : index
    %183 = vector.load %arg6[%c10_188, %c0_189, %c0_190] : memref<16x256x128xf32, #tpu.memory_space<vmem>>, vector<1x256x128xf32>
    %184 = vector.shape_cast %183 : vector<1x256x128xf32> to vector<256x128xf32>
    %cst_191 = arith.constant dense<0.000000e+00> : vector<2x128xf32>
    %185 = tpu.matmul %182, %184, %cst_191 {dimension_numbers = #tpu.dot_dimension_numbers<[1], [0], [0], [1], [0, 0, 1, 1], [], []>} : vector<2x256xf32>, vector<256x128xf32>, vector<2x128xf32> -> vector<2x128xf32>
    %186 = arith.addf %180, %185 : vector<2x128xf32>
    %c0_192 = arith.constant 0 : index
    %c11 = arith.constant 11 : index
    %c0_193 = arith.constant 0 : index
    %187 = vector.load %arg15[%c0_192, %c11, %c0_193] : memref<2x16x256xf32, #tpu.memory_space<vmem>>, vector<2x1x256xf32>
    %188 = vector.shape_cast %187 : vector<2x1x256xf32> to vector<2x256xf32>
    %c11_194 = arith.constant 11 : index
    %c0_195 = arith.constant 0 : index
    %c0_196 = arith.constant 0 : index
    %189 = vector.load %arg6[%c11_194, %c0_195, %c0_196] : memref<16x256x128xf32, #tpu.memory_space<vmem>>, vector<1x256x128xf32>
    %190 = vector.shape_cast %189 : vector<1x256x128xf32> to vector<256x128xf32>
    %cst_197 = arith.constant dense<0.000000e+00> : vector<2x128xf32>
    %191 = tpu.matmul %188, %190, %cst_197 {dimension_numbers = #tpu.dot_dimension_numbers<[1], [0], [0], [1], [0, 0, 1, 1], [], []>} : vector<2x256xf32>, vector<256x128xf32>, vector<2x128xf32> -> vector<2x128xf32>
    %192 = arith.addf %186, %191 : vector<2x128xf32>
    %c0_198 = arith.constant 0 : index
    %c12 = arith.constant 12 : index
    %c0_199 = arith.constant 0 : index
    %193 = vector.load %arg15[%c0_198, %c12, %c0_199] : memref<2x16x256xf32, #tpu.memory_space<vmem>>, vector<2x1x256xf32>
    %194 = vector.shape_cast %193 : vector<2x1x256xf32> to vector<2x256xf32>
    %c12_200 = arith.constant 12 : index
    %c0_201 = arith.constant 0 : index
    %c0_202 = arith.constant 0 : index
    %195 = vector.load %arg6[%c12_200, %c0_201, %c0_202] : memref<16x256x128xf32, #tpu.memory_space<vmem>>, vector<1x256x128xf32>
    %196 = vector.shape_cast %195 : vector<1x256x128xf32> to vector<256x128xf32>
    %cst_203 = arith.constant dense<0.000000e+00> : vector<2x128xf32>
    %197 = tpu.matmul %194, %196, %cst_203 {dimension_numbers = #tpu.dot_dimension_numbers<[1], [0], [0], [1], [0, 0, 1, 1], [], []>} : vector<2x256xf32>, vector<256x128xf32>, vector<2x128xf32> -> vector<2x128xf32>
    %198 = arith.addf %192, %197 : vector<2x128xf32>
    %c0_204 = arith.constant 0 : index
    %c13 = arith.constant 13 : index
    %c0_205 = arith.constant 0 : index
    %199 = vector.load %arg15[%c0_204, %c13, %c0_205] : memref<2x16x256xf32, #tpu.memory_space<vmem>>, vector<2x1x256xf32>
    %200 = vector.shape_cast %199 : vector<2x1x256xf32> to vector<2x256xf32>
    %c13_206 = arith.constant 13 : index
    %c0_207 = arith.constant 0 : index
    %c0_208 = arith.constant 0 : index
    %201 = vector.load %arg6[%c13_206, %c0_207, %c0_208] : memref<16x256x128xf32, #tpu.memory_space<vmem>>, vector<1x256x128xf32>
    %202 = vector.shape_cast %201 : vector<1x256x128xf32> to vector<256x128xf32>
    %cst_209 = arith.constant dense<0.000000e+00> : vector<2x128xf32>
    %203 = tpu.matmul %200, %202, %cst_209 {dimension_numbers = #tpu.dot_dimension_numbers<[1], [0], [0], [1], [0, 0, 1, 1], [], []>} : vector<2x256xf32>, vector<256x128xf32>, vector<2x128xf32> -> vector<2x128xf32>
    %204 = arith.addf %198, %203 : vector<2x128xf32>
    %c0_210 = arith.constant 0 : index
    %c14 = arith.constant 14 : index
    %c0_211 = arith.constant 0 : index
    %205 = vector.load %arg15[%c0_210, %c14, %c0_211] : memref<2x16x256xf32, #tpu.memory_space<vmem>>, vector<2x1x256xf32>
    %206 = vector.shape_cast %205 : vector<2x1x256xf32> to vector<2x256xf32>
    %c14_212 = arith.constant 14 : index
    %c0_213 = arith.constant 0 : index
    %c0_214 = arith.constant 0 : index
    %207 = vector.load %arg6[%c14_212, %c0_213, %c0_214] : memref<16x256x128xf32, #tpu.memory_space<vmem>>, vector<1x256x128xf32>
    %208 = vector.shape_cast %207 : vector<1x256x128xf32> to vector<256x128xf32>
    %cst_215 = arith.constant dense<0.000000e+00> : vector<2x128xf32>
    %209 = tpu.matmul %206, %208, %cst_215 {dimension_numbers = #tpu.dot_dimension_numbers<[1], [0], [0], [1], [0, 0, 1, 1], [], []>} : vector<2x256xf32>, vector<256x128xf32>, vector<2x128xf32> -> vector<2x128xf32>
    %210 = arith.addf %204, %209 : vector<2x128xf32>
    %c0_216 = arith.constant 0 : index
    %c15 = arith.constant 15 : index
    %c0_217 = arith.constant 0 : index
    %211 = vector.load %arg15[%c0_216, %c15, %c0_217] : memref<2x16x256xf32, #tpu.memory_space<vmem>>, vector<2x1x256xf32>
    %212 = vector.shape_cast %211 : vector<2x1x256xf32> to vector<2x256xf32>
    %c15_218 = arith.constant 15 : index
    %c0_219 = arith.constant 0 : index
    %c0_220 = arith.constant 0 : index
    %213 = vector.load %arg6[%c15_218, %c0_219, %c0_220] : memref<16x256x128xf32, #tpu.memory_space<vmem>>, vector<1x256x128xf32>
    %214 = vector.shape_cast %213 : vector<1x256x128xf32> to vector<256x128xf32>
    %cst_221 = arith.constant dense<0.000000e+00> : vector<2x128xf32>
    %215 = tpu.matmul %212, %214, %cst_221 {dimension_numbers = #tpu.dot_dimension_numbers<[1], [0], [0], [1], [0, 0, 1, 1], [], []>} : vector<2x256xf32>, vector<256x128xf32>, vector<2x128xf32> -> vector<2x128xf32>
    %216 = arith.addf %210, %215 : vector<2x128xf32>
    %c0_222 = arith.constant 0 : index
    %c0_223 = arith.constant 0 : index
    %217 = vector.load %arg7[%c0_222, %c0_223] : memref<1x128xf32, #tpu.memory_space<vmem>>, vector<1x128xf32>
    %218 = vector.broadcast %217 : vector<1x128xf32> to vector<2x128xf32>
    %219 = arith.addf %216, %218 : vector<2x128xf32>
    %cst_224 = arith.constant 0.000000e+00 : f32
    %220 = vector.broadcast %cst_224 : f32 to vector<2x128xf32>
    %221 = arith.maximumf %219, %220 : vector<2x128xf32>
    %c0_225 = arith.constant 0 : index
    %c0_226 = arith.constant 0 : index
    %222 = vector.load %arg8[%c0_225, %c0_226] : memref<128x128xf32, #tpu.memory_space<vmem>>, vector<128x128xf32>
    %cst_227 = arith.constant dense<0.000000e+00> : vector<2x128xf32>
    %223 = tpu.matmul %221, %222, %cst_227 {dimension_numbers = #tpu.dot_dimension_numbers<[1], [0], [0], [1], [0, 0, 1, 1], [], []>} : vector<2x128xf32>, vector<128x128xf32>, vector<2x128xf32> -> vector<2x128xf32>
    %c0_228 = arith.constant 0 : index
    %c0_229 = arith.constant 0 : index
    %224 = vector.load %arg9[%c0_228, %c0_229] : memref<1x128xf32, #tpu.memory_space<vmem>>, vector<1x128xf32>
    %225 = vector.broadcast %224 : vector<1x128xf32> to vector<2x128xf32>
    %226 = arith.addf %223, %225 : vector<2x128xf32>
    %cst_230 = arith.constant 0.000000e+00 : f32
    %227 = vector.broadcast %cst_230 : f32 to vector<2x128xf32>
    %228 = arith.maximumf %226, %227 : vector<2x128xf32>
    %c0_231 = arith.constant 0 : index
    %c0_232 = arith.constant 0 : index
    %229 = vector.load %arg10[%c0_231, %c0_232] : memref<128x128xf32, #tpu.memory_space<vmem>>, vector<128x128xf32>
    %cst_233 = arith.constant dense<0.000000e+00> : vector<2x128xf32>
    %230 = tpu.matmul %228, %229, %cst_233 {dimension_numbers = #tpu.dot_dimension_numbers<[1], [0], [0], [1], [0, 0, 1, 1], [], []>} : vector<2x128xf32>, vector<128x128xf32>, vector<2x128xf32> -> vector<2x128xf32>
    %c0_234 = arith.constant 0 : index
    %c0_235 = arith.constant 0 : index
    %231 = vector.load %arg11[%c0_234, %c0_235] : memref<1x128xf32, #tpu.memory_space<vmem>>, vector<1x128xf32>
    %232 = vector.broadcast %231 : vector<1x128xf32> to vector<2x128xf32>
    %233 = arith.addf %230, %232 : vector<2x128xf32>
    %cst_236 = arith.constant dense<0xFF800000> : vector<128xf32>
    %234 = vector.multi_reduction <maximumf>, %233, %cst_236 [0] : vector<2x128xf32> to vector<128xf32>
    %235 = vector.shape_cast %234 : vector<128xf32> to vector<1x128xf32>
    %236 = vector.broadcast %235 : vector<1x128xf32> to vector<2x128xf32>
    %237 = arith.subf %233, %236 : vector<2x128xf32>
    %238 = math.exp %237 : vector<2x128xf32>
    %cst_237 = arith.constant dense<0.000000e+00> : vector<128xf32>
    %239 = vector.multi_reduction <add>, %238, %cst_237 [0] : vector<2x128xf32> to vector<128xf32>
    %240 = vector.shape_cast %239 : vector<128xf32> to vector<1x128xf32>
    %241 = vector.broadcast %240 : vector<1x128xf32> to vector<2x128xf32>
    %242 = arith.divf %238, %241 : vector<2x128xf32>
    %c0_238 = arith.constant 0 : index
    %c0_239 = arith.constant 0 : index
    %243 = vector.load %arg12[%c0_238, %c0_239] : memref<2x128xf32, #tpu.memory_space<vmem>>, vector<2x128xf32>
    tpu.vector_store %arg12[%c0_238, %c0_239], %242 {strides = array<i32>} : memref<2x128xf32, #tpu.memory_space<vmem>>, vector<2x128xf32>,
    return
  }
}

</mosaic_0001>

<bundles_post_ra>
// kernel: brain_nn_pretrained_forward.1
= control target key start
LH: loop header
LB: loop body
LE: loop exit
PB: predicated region body
PF: predicated region fallthrough
CT: control target
= control target key end

     0   :  { %s18290_s25 = smov 126   ;;  %v23658_v9 = vmov 0.0   ;;  %s18292_s20 = smov 127   ;;  %vm99_vm0 = vcmask 1031168   ;;  %vm118_vm1 = vcmask 1042432   ;;  %vm114_vm2 = vcmask 23552   ;;  %s23643_s0 = inlined_call_operand.vmem [shape: f32[3,1864], index: 0, kind: input, shape index: {}]   ;;  %s23644_s1 = inlined_call_operand.vmem [shape: f32[9,8,3], index: 1, kind: input, shape index: {}]   ;;  %s23645_s2 = inlined_call_operand.vmem [shape: f32[8,1], index: 2, kind: input, shape index: {}]   ;;  %s23646_s3 = inlined_call_operand.vmem [shape: bf16[1800,546], index: 3, kind: input, shape index: {}]   ;;  %s23647_s4 = inlined_call_operand.vmem [shape: f32[9,16,8], index: 4, kind: input, shape index: {}]   ;;  %s23648_s5 = inlined_call_operand.vmem [shape: f32[16,1], index: 5, kind: input, shape index: {}]   ;;  %s23649_s6 = inlined_call_operand.vmem [shape: f32[16,256,128], index: 6, kind: input, shape index: {}]   ;;  %s23650_s7 = inlined_call_operand.vmem [shape: f32[1,128], index: 7, kind: input, shape index: {}]   ;;  %s23651_s8 = inlined_call_operand.vmem [shape: f32[128,128], index: 8, kind: input, shape index: {}]   ;;  %s23652_s9 = inlined_call_operand.vmem [shape: f32[1,128], index: 9, kind: input, shape index: {}]   ;;  %s23653_s10 = inlined_call_operand.vmem [shape: f32[128,128], index: 10, kind: input, shape index: {}]   ;;  %s23654_s11 = inlined_call_operand.vmem [shape: f32[1,128], index: 11, kind: input, shape index: {}]   ;;  %s23655_s12 = inlined_call_operand.hbm [shape: f32[2,128], index: 12, kind: output, shape index: {}]  }
   0x1   :  { %v43_v0 = vld [vmem:[%s23643_s0] sm:$0x77]  ;;  %v44_v1 = vld [vmem:[%s23643_s0 + $0x8] sm:$0x77]  ;;  %v45_v4 = vld [vmem:[%s23643_s0 + $0x10] sm:$0x77]  ;;  %213 = vmatprep.mubr.f32.mxu1 %v23658_v9  ;;  %355 = vmatprep.mubr.f32.mxu0 %v23658_v9 }
   0x2   :  { %69 = vrot.lane.b32.xlu1 %v43_v0, %s18290_s25  ;;  %v62_v2 = vcombine.high %v43_v0, %v43_v0  ;;  %v63_v3 = vcombine.high %v44_v1, %v44_v1  ;;  %v64_v5 = vcombine.high %v45_v4, %v45_v4  ;;  %v46_v6 = vld [vmem:[%s23643_s0 + $0x18] sm:$0x77]  ;;  %v47_v8 = vld [vmem:[%s23643_s0 + $0x20] sm:$0x77]  ;;  %v48_v11 = vld [vmem:[%s23643_s0 + $0x28] sm:$0x77] }
   0x3   :  { %v65_v7 = vcombine.high %v46_v6, %v46_v6  ;;  %v66_v10 = vcombine.high %v47_v8, %v47_v8  ;;  %v49_v12 = vld [vmem:[%s23643_s0 + $0x30] sm:$0x77]  ;;  %v67_v13 = vcombine.high %v48_v11, %v48_v11  ;;  %v50_v15 = vld [vmem:[%s23643_s0 + $0x38] sm:$0x7]  ;;  %v1362_v16 = vld [vmem:[%s23643_s0 + $0x8] sm:$0x77] }
   0x4   :  { %71 = vrot.lane.b32.xlu0 %v62_v2, %s18290_s25  ;;  %v68_v14 = vcombine.high %v49_v12, %v49_v12  ;;  %v1361_v17 = vld [vmem:[%s23643_s0] sm:$0x77]  ;;  %v1363_v19 = vld [vmem:[%s23643_s0 + $0x10] sm:$0x77]  ;;  %s18293_s28 = smov 125   ;;  %v1380_v20 = vcombine.high %v1362_v16, %v1362_v16  ;;  %s18294_s27 = smov 97  }
   0x5   :  { %v1379_v18 = vcombine.high %v1361_v17, %v1361_v17  ;;  %v1364_v21 = vld [vmem:[%s23643_s0 + $0x18] sm:$0x77]  ;;  %v1381_v22 = vcombine.high %v1363_v19, %v1363_v19  ;;  %v1365_v23 = vld [vmem:[%s23643_s0 + $0x20] sm:$0x77]  ;;  %v1366_v25 = vld [vmem:[%s23643_s0 + $0x28] sm:$0x77] }
   0x6   :  { %75 = vrot.lane.b32.xlu1 %v63_v3, %s18290_s25  ;;  %v1382_v24 = vcombine.high %v1364_v21, %v1364_v21  ;;  %v1383_v26 = vcombine.high %v1365_v23, %v1365_v23  ;;  %v1367_v27 = vld [vmem:[%s23643_s0 + $0x30] sm:$0x77]  ;;  %v1384_v28 = vcombine.high %v1366_v25, %v1366_v25  ;;  %v2046_v29 = vld [vmem:[%s23643_s0] sm:$0x77]  ;;  %v2047_v31 = vld [vmem:[%s23643_s0 + $0x8] sm:$0x77] }
   0x7   :  { %v1385_v30 = vcombine.high %v1367_v27, %v1367_v27  ;;  %v2064_v32 = vcombine.high %v2046_v29, %v2046_v29  ;;  %v1368_v33 = vld [vmem:[%s23643_s0 + $0x38] sm:$0x7]  ;;  %v2065_v34 = vcombine.high %v2047_v31, %v2047_v31  ;;  %v2048_v35 = vld [vmem:[%s23643_s0 + $0x10] sm:$0x77]  ;;  %v2050_v38 = vld [vmem:[%s23643_s0 + $0x20] sm:$0x77] }
   0x8   :  { %73 = vrot.lane.b32.xlu0 %v44_v1, %s18290_s25  ;;  %v2049_v36 = vld [vmem:[%s23643_s0 + $0x18] sm:$0x77]  ;;  %v2066_v37 = vcombine.high %v2048_v35, %v2048_v35  ;;  %v2051_v40 = vld [vmem:[%s23643_s0 + $0x28] sm:$0x77]  ;;  %v2068_v41 = vcombine.high %v2050_v38, %v2050_v38  ;;  %v2052_v42 = vld [vmem:[%s23643_s0 + $0x30] sm:$0x77] }
   0x9   :  { %v2067_v39 = vcombine.high %v2049_v36, %v2049_v36  ;;  %v2069_v43 = vcombine.high %v2051_v40, %v2051_v40  ;;  %v2053_v44 = vld [vmem:[%s23643_s0 + $0x38] sm:$0x7]  ;;  %v2070_v45 = vcombine.high %v2052_v42, %v2052_v42  ;;  %v2731_v47 = vld [vmem:[%s23643_s0] sm:$0x77]  ;;  %v2732_v49 = vld [vmem:[%s23643_s0 + $0x8] sm:$0x77] }
   0xa   :  { %79 = vrot.lane.b32.xlu1 %v64_v5, %s18290_s25  ;;  %v2749_v51 = vcombine.high %v2731_v47, %v2731_v47  ;;  %v2733_v52 = vld [vmem:[%s23643_s0 + $0x10] sm:$0x77]  ;;  %v18520_v53 = vld [vmem:[%s23644_s1 + $0x8] sm:$0xff]  ;;  %s18295_s15 = smov 96   ;;  %v2750_v56 = vcombine.high %v2732_v49, %v2732_v49  ;;  %v2734_v59 = vld [vmem:[%s23643_s0 + $0x18] sm:$0x77] }
   0xb   :  { %v2751_v60 = vcombine.high %v2733_v52, %v2733_v52  ;;  %vm746_vm3 = vcmask 1039360   ;;  %vm18296_vm4 = vmmov 0   ;;  %vm1416_vm5 = vcmask 1022976   ;;  %s18298_s22 = smov 67   ;;  %s18299_s29 = smov 66  }
   0xc   :  { %77 = vrot.lane.b32.xlu0 %v45_v4, %s18290_s25  ;;  %vm2101_vm6 = vcmask 793600   ;;  %vm2786_vm7 = vcmask 785408   ;;  %s18300_s21 = smov 65  }
   0xe   :  { %83 = vrot.lane.b32.xlu1 %v65_v7, %s18290_s25 }
  0x10   :  { %81 = vrot.lane.b32.xlu0 %v46_v6, %s18290_s25 }
  0x12   :  { %87 = vrot.lane.b32.xlu1 %v66_v10, %s18290_s25 }
  0x14   :  { %85 = vrot.lane.b32.xlu0 %v47_v8, %s18290_s25 }
  0x16   :  { %91 = vrot.lane.b32.xlu1 %v67_v13, %s18290_s25 }
  0x18   :  { %89 = vrot.lane.b32.xlu0 %v48_v11, %s18290_s25 }
  0x1a   :  { %95 = vrot.lane.b32.xlu1 %v68_v14, %s18290_s25 }
  0x1c   :  { %93 = vrot.lane.b32.xlu0 %v49_v12, %s18290_s25 }
  0x1e   :  { %718 = vrot.lane.b32.xlu1 %v62_v2, %s18292_s20 }
  0x20   :  { %97 = vrot.lane.b32.xlu0 %v50_v15, %s18290_s25 }
  0x22   :  { %722 = vrot.lane.b32.xlu1 %v63_v3, %s18292_s20  ;;  %v2752_v3 = vcombine.high %v2734_v59, %v2734_v59 }
  0x24   :  { %720 = vrot.lane.b32.xlu0 %v44_v1, %s18292_s20  ;;  %v2735_v1 = vld [vmem:[%s23643_s0 + $0x20] sm:$0x77] }
  0x26   :  { %716 = vrot.lane.b32.xlu1 %v43_v0, %s18292_s20 }
  0x28   :  { %724 = vrot.lane.b32.xlu0 %v45_v4, %s18292_s20 }
  0x2a   :  { %728 = vrot.lane.b32.xlu1 %v46_v6, %s18292_s20 }
  0x2c   :  { %726 = vrot.lane.b32.xlu0 %v64_v5, %s18292_s20 }
  0x2e   :  { %732 = vrot.lane.b32.xlu1 %v47_v8, %s18292_s20 }
  0x30   :  { %730 = vrot.lane.b32.xlu0 %v65_v7, %s18292_s20  ;;  %v2736_v7 = vld [vmem:[%s23643_s0 + $0x28] sm:$0x77] }
  0x32   :  { %736 = vrot.lane.b32.xlu1 %v48_v11, %s18292_s20 }
  0x34   :  { %734 = vrot.lane.b32.xlu0 %v66_v10, %s18292_s20  ;;  %v2753_v10 = vcombine.high %v2735_v1, %v2735_v1 }
  0x36   :  { %740 = vrot.lane.b32.xlu1 %v49_v12, %s18292_s20 }
  0x38   :  { %738 = vrot.lane.b32.xlu0 %v67_v13, %s18292_s20 }
  0x3a   :  { %744 = vrot.lane.b32.xlu1 %v50_v15, %s18292_s20 }
  0x3c   :  { %742 = vrot.lane.b32.xlu0 %v68_v14, %s18292_s20  ;;  %v2737_v14 = vld [vmem:[%s23643_s0 + $0x30] sm:$0x77] }
  0x3e   :  { %1390 = vrot.lane.b32.xlu1 %v1362_v16, %s18293_s28  ;;  %v2754_v16 = vcombine.high %v2736_v7, %v2736_v7 }
  0x40   :  { %1388 = vrot.lane.b32.xlu0 %v1379_v18, %s18293_s28 }
  0x42   :  { %1394 = vrot.lane.b32.xlu1 %v1363_v19, %s18293_s28 }
  0x44   :  { %1392 = vrot.lane.b32.xlu0 %v1380_v20, %s18293_s28  ;;  %v3416_v20 = vld [vmem:[%s23643_s0] sm:$0x77] }
  0x46   :  { %1396 = vrot.lane.b32.xlu1 %v1381_v22, %s18293_s28  ;;  %v2755_v22 = vcombine.high %v2737_v14, %v2737_v14 }
  0x48   :  { %1386 = vrot.lane.b32.xlu0 %v1361_v17, %s18293_s28 }
  0x4a   :  { %1400 = vrot.lane.b32.xlu1 %v1382_v24, %s18293_s28 }
  0x4c   :  { %1398 = vrot.lane.b32.xlu0 %v1364_v21, %s18293_s28 }
  0x4e   :  { %1404 = vrot.lane.b32.xlu1 %v1383_v26, %s18293_s28 }
  0x50   :  { %1402 = vrot.lane.b32.xlu0 %v1365_v23, %s18293_s28 }
  0x52   :  { %1408 = vrot.lane.b32.xlu1 %v1384_v28, %s18293_s28  ;;  %v3417_v28 = vld [vmem:[%s23643_s0 + $0x8] sm:$0x77] }
  0x54   :  { %1406 = vrot.lane.b32.xlu0 %v1366_v25, %s18293_s28 }
  0x56   :  { %1412 = vrot.lane.b32.xlu1 %v1385_v30, %s18293_s28  ;;  %v2738_v30 = vld [vmem:[%s23643_s0 + $0x38] sm:$0x7] }
  0x58   :  { %1410 = vrot.lane.b32.xlu0 %v1367_v27, %s18293_s28  ;;  %v3434_v27 = vcombine.high %v3416_v20, %v3416_v20 }
  0x5a   :  { %2073 = vrot.lane.b32.xlu1 %v2064_v32, %s18294_s27 }
  0x5c   :  { %1414 = vrot.lane.b32.xlu0 %v1368_v33, %s18293_s28  ;;  %s18297_s28 = smov 95  }
  0x5e   :  { %2077 = vrot.lane.b32.xlu1 %v2065_v34, %s18294_s27  ;;  %v3435_v34 = vcombine.high %v3417_v28, %v3417_v28 }
  0x60   :  { %2075 = vrot.lane.b32.xlu0 %v2047_v31, %s18294_s27 }
  0x62   :  { %2071 = vrot.lane.b32.xlu1 %v2046_v29, %s18294_s27 }
  0x64   :  { %2079 = vrot.lane.b32.xlu0 %v2048_v35, %s18294_s27  ;;  %v18610_v35 = vld [vmem:[%s23644_s1] sm:$0xff] }
  0x66   :  { %2083 = vrot.lane.b32.xlu1 %v2049_v36, %s18294_s27 }
  0x68   :  { %2081 = vrot.lane.b32.xlu0 %v2066_v37, %s18294_s27 }
  0x6a   :  { %2087 = vrot.lane.b32.xlu1 %v2050_v38, %s18294_s27 }
  0x6c   :  { %2085 = vrot.lane.b32.xlu0 %v2067_v39, %s18294_s27 }
  0x6e   :  { %2091 = vrot.lane.b32.xlu1 %v2051_v40, %s18294_s27 }
  0x70   :  { %2089 = vrot.lane.b32.xlu0 %v2068_v41, %s18294_s27  ;;  %v3418_v41 = vld [vmem:[%s23643_s0 + $0x10] sm:$0x77] }
  0x72   :  { %2095 = vrot.lane.b32.xlu1 %v2052_v42, %s18294_s27 }
  0x74   :  { %v70_v46 = vpop.permute.xlu1 %69  ;;  %2093 = vrot.lane.b32.xlu0 %v2069_v43, %s18294_s27 }
  0x76   :  { %2099 = vrot.lane.b32.xlu1 %v2053_v44, %s18294_s27  ;;  %v72_v48 = vpop.permute.xlu0 %71  ;;  %v3419_v44 = vld [vmem:[%s23643_s0 + $0x18] sm:$0x77] }
  0x77   :  { %v100_v58 = vsel %vm99_vm0, %v70_v46, %v72_v48 }
  0x78   :  { %v76_v50 = vpop.permute.xlu1 %75  ;;  %2097 = vrot.lane.b32.xlu0 %v2070_v45, %s18294_s27 }
  0x7a   :  { %2760 = vrot.lane.b32.xlu1 %v2732_v49, %s18295_s15  ;;  %v74_v54 = vpop.permute.xlu0 %73  ;;  %v3436_v49 = vcombine.high %v3418_v41, %v3418_v41 }
  0x7b   :  { %v101_v55 = vsel %vm99_vm0, %v72_v48, %v74_v54  ;;  %v102_v63 = vsel %vm99_vm0, %v74_v54, %v76_v50  ;;  %v3437_v54 = vcombine.high %v3419_v44, %v3419_v44 }
  0x7c   :  { %v80_v57 = vpop.permute.xlu1 %79  ;;  %2758 = vrot.lane.b32.xlu0 %v2749_v51, %s18295_s15  ;;  %15125 = vmatprep.subr.msk.mxu1 %vm118_vm1, %v101_v55 }
  0x7d   :  { %15126 = vmatpush1.msk.msra.mxu1 %vm118_vm1, %v100_v58 }
  0x7e   :  { %2764 = vrot.lane.b32.xlu1 %v2733_v52, %s18295_s15  ;;  %v78_v61 = vpop.permute.xlu0 %77  ;;  %15127 = vmatmul.mubr.msk.f32.vlgmr.msra.gmra.mxu1 %vm114_vm2, %v18520_v53 }
  0x7f   :  { %v103_v62 = vsel %vm99_vm0, %v76_v50, %v78_v61  ;;  %284 = vmatprep.mubr.f32.mxu1 %v23658_v9  ;;  %v104_v6 = vsel %vm99_vm0, %v78_v61, %v80_v57  ;;  %v3420_v50 = vld [vmem:[%s23643_s0 + $0x20] sm:$0x77] }
  0x80   :  { %v84_v0 = vpop.permute.xlu1 %83  ;;  %2762 = vrot.lane.b32.xlu0 %v2750_v56, %s18295_s15  ;;  %15128 = vmatprep.subr.msk.mxu1 %vm118_vm1, %v103_v62  ;;  %v3421_v56 = vld [vmem:[%s23643_s0 + $0x28] sm:$0x77]  ;;  %v3422_v62 = vld [vmem:[%s23643_s0 + $0x30] sm:$0x77] }
  0x81   :  { %15129 = vmatpush1.msk.msra.mxu1 %vm118_vm1, %v102_v63 }
  0x82   :  { %2766 = vrot.lane.b32.xlu1 %v2751_v60, %s18295_s15  ;;  %v82_v2 = vpop.permute.xlu0 %81  ;;  %15130 = vmatmul.mubr.msk.f32.vlgmr.msra.gmra.mxu1 %vm114_vm2, %v18520_v53  ;;  %v3438_v60 = vcombine.high %v3420_v50, %v3420_v50 }
  0x83   :  { %v105_v4 = vsel %vm99_vm0, %v80_v57, %v82_v2  ;;  %426 = vmatprep.mubr.f32.mxu1 %v23658_v9  ;;  %v106_v12 = vsel %vm99_vm0, %v82_v2, %v84_v0  ;;  %v3439_v2 = vcombine.high %v3421_v56, %v3421_v56 }
  0x84   :  { %v88_v5 = vpop.permute.xlu1 %87  ;;  %2756 = vrot.lane.b32.xlu0 %v2731_v47, %s18295_s15  ;;  %15131 = vmatprep.subr.msk.mxu0 %vm118_vm1, %v105_v4  ;;  %v3423_v4 = vld [vmem:[%s23643_s0 + $0x38] sm:$0x7] }
  0x85   :  { %15132 = vmatpush1.msk.msra.mxu0 %vm118_vm1, %v104_v6 }
  0x86   :  { %2770 = vrot.lane.b32.xlu1 %v2752_v3, %s18295_s15  ;;  %v86_v8 = vpop.permute.xlu0 %85  ;;  %15133 = vmatmul.mubr.msk.f32.vlgmr.msra.gmra.mxu0 %vm114_vm2, %v18520_v53 }
  0x87   :  { %v107_v11 = vsel %vm99_vm0, %v84_v0, %v86_v8  ;;  %497 = vmatprep.mubr.f32.mxu0 %v23658_v9  ;;  %v108_v18 = vsel %vm99_vm0, %v86_v8, %v88_v5  ;;  %v3440_v8 = vcombine.high %v3422_v62, %v3422_v62 }
  0x88   :  { %v92_v13 = vpop.permute.xlu1 %91  ;;  %2768 = vrot.lane.b32.xlu0 %v2734_v59, %s18295_s15  ;;  %15134 = vmatprep.subr.msk.mxu1 %vm118_vm1, %v107_v11  ;;  %v4102_v11 = vld [vmem:[%s23643_s0 + $0x8] sm:$0x77] }
  0x89   :  { %15135 = vmatpush1.msk.msra.mxu1 %vm118_vm1, %v106_v12  ;;  %v4101_v12 = vld [vmem:[%s23643_s0] sm:$0x77] }
  0x8a   :  { %2774 = vrot.lane.b32.xlu1 %v2753_v10, %s18295_s15  ;;  %v90_v15 = vpop.permute.xlu0 %89  ;;  %15136 = vmatmul.mubr.msk.f32.vlgmr.msra.gmra.mxu1 %vm114_vm2, %v18520_v53 }
  0x8b   :  { %v109_v17 = vsel %vm99_vm0, %v88_v5, %v90_v15  ;;  %568 = vmatprep.mubr.f32.mxu1 %v23658_v9  ;;  %v110_v24 = vsel %vm99_vm0, %v90_v15, %v92_v13 }
  0x8c   :  { %v96_v19 = vpop.permute.xlu1 %95  ;;  %2772 = vrot.lane.b32.xlu0 %v2735_v1, %s18295_s15  ;;  %15137 = vmatprep.subr.msk.mxu0 %vm118_vm1, %v109_v17  ;;  %v4103_v17 = vld [vmem:[%s23643_s0 + $0x10] sm:$0x77] }
  0x8d   :  { %15138 = vmatpush1.msk.msra.mxu0 %vm118_vm1, %v108_v18 }
  0x8e   :  { %2778 = vrot.lane.b32.xlu1 %v2754_v16, %s18295_s15  ;;  %v94_v21 = vpop.permute.xlu0 %93  ;;  %15139 = vmatmul.mubr.msk.f32.vlgmr.msra.gmra.mxu0 %vm114_vm2, %v18520_v53  ;;  %v4119_v16 = vcombine.high %v4101_v12, %v4101_v12 }
  0x8f   :  { %v111_v23 = vsel %vm99_vm0, %v92_v13, %v94_v21  ;;  %639 = vmatprep.mubr.f32.mxu0 %v23658_v9  ;;  %v112_v32 = vsel %vm99_vm0, %v94_v21, %v96_v19  ;;  %v18723_v21 = vld [vmem:[%s23644_s1 + $0x10] sm:$0xff] }
  0x90   :  { %v719_v25 = vpop.permute.xlu1 %718  ;;  %2776 = vrot.lane.b32.xlu0 %v2736_v7, %s18295_s15  ;;  %15140 = vmatprep.subr.msk.mxu1 %vm118_vm1, %v111_v23 }
  0x91   :  { %15141 = vmatpush1.msk.msra.mxu1 %vm118_vm1, %v110_v24  ;;  %v4104_v24 = vld [vmem:[%s23643_s0 + $0x18] sm:$0x77] }
  0x92   :  { %2782 = vrot.lane.b32.xlu1 %v2755_v22, %s18295_s15  ;;  %17212 = vmatprep.subr.mxu1 %v23658_v9  ;;  %v98_v26 = vpop.permute.xlu0 %97  ;;  %v4120_v22 = vcombine.high %v4102_v11, %v4102_v11 }
  0x93   :  { %15142 = vmatmul.mubr.msk.f32.vlgmr.msra.gmra.mxu1 %vm114_vm2, %v18520_v53  ;;  %v113_v29 = vsel %vm99_vm0, %v96_v19, %v98_v26 }
  0x94   :  { %17213 = vmatpush3.msk.msra.mxu1 %vm118_vm1, %v98_v26  ;;  %v723_v31 = vpop.permute.xlu1 %722  ;;  %2780 = vrot.lane.b32.xlu0 %v2737_v14, %s18295_s15 }
  0x95   :  { %15143 = vmatprep.subr.msk.mxu0 %vm118_vm1, %v113_v29  ;;  %17214 = vmatprep.mubr.msk.f32.mxu1 %vm18296_vm4, %v23658_v9  ;;  %v4105_v29 = vld [vmem:[%s23643_s0 + $0x20] sm:$0x77] }
  0x96   :  { %15144 = vmatpush1.msk.msra.mxu0 %vm118_vm1, %v112_v32  ;;  %3443 = vrot.lane.b32.xlu1 %v3434_v27, %s18297_s28  ;;  %v721_v33 = vpop.permute.xlu0 %720 }
  0x97   :  { %v748_v36 = vsel %vm746_vm3, %v719_v25, %v721_v33  ;;  %15145 = vmatmul.mubr.msk.f32.vlgmr.msra.gmra.mxu0 %vm114_vm2, %v18520_v53  ;;  %17215 = vmatmul.mubr.msk.f32.vlgmr.msra.gmra.mxu1 %vm114_vm2, %v18520_v53  ;;  %v749_v42 = vsel %vm746_vm3, %v721_v33, %v723_v31 }
  0x98   :  { %v717_v37 = vpop.permute.xlu1 %716  ;;  %2784 = vrot.lane.b32.xlu0 %v2738_v30, %s18295_s15  ;;  %15148 = vmatprep.subr.msk.mxu0 %vm118_vm1, %v748_v36 }
  0x99   :  { %v747_v38 = vsel %vm746_vm3, %v717_v37, %v719_v25  ;;  %858 = vmatprep.mubr.f32.mxu0 %v23658_v9  ;;  %929 = vmatprep.mubr.f32.mxu1 %v23658_v9  ;;  %v4121_v25 = vcombine.high %v4103_v17, %v4103_v17  ;;  %v4123_v37 = vcombine.high %v4105_v29, %v4105_v29 }
  0x9a   :  { %3447 = vrot.lane.b32.xlu1 %v3435_v34, %s18297_s28  ;;  %15149 = vmatpush1.msk.msra.mxu0 %vm118_vm1, %v747_v38  ;;  %v725_v39 = vpop.permute.xlu0 %724 }
  0x9b   :  { %v750_v40 = vsel %vm746_vm3, %v723_v31, %v725_v39  ;;  %15150 = vmatmul.mubr.msk.f32.vlgmr.msra.gmra.mxu0 %vm114_vm2, %v18610_v35  ;;  %v4122_v31 = vcombine.high %v4104_v24, %v4104_v24 }
  0x9c   :  { %v729_v43 = vpop.permute.xlu1 %728  ;;  %3445 = vrot.lane.b32.xlu0 %v3417_v28, %s18297_s28  ;;  %15151 = vmatprep.subr.msk.mxu1 %vm118_vm1, %v750_v40 }
  0x9d   :  { %15152 = vmatpush1.msk.msra.mxu1 %vm118_vm1, %v749_v42  ;;  %1000 = vmatprep.mubr.f32.mxu0 %v23658_v9 }
  0x9e   :  { %3441 = vrot.lane.b32.xlu1 %v3416_v20, %s18297_s28  ;;  %v727_v45 = vpop.permute.xlu0 %726  ;;  %15153 = vmatmul.mubr.msk.f32.vlgmr.msra.gmra.mxu1 %vm114_vm2, %v18610_v35 }
  0x9f   :  { %v751_v46 = vsel %vm746_vm3, %v725_v39, %v727_v45  ;;  %v752_v47 = vsel %vm746_vm3, %v727_v45, %v729_v43  ;;  %1071 = vmatprep.mubr.f32.mxu1 %v23658_v9 }
  0xa0   :  { %v733_v48 = vpop.permute.xlu1 %732  ;;  %3449 = vrot.lane.b32.xlu0 %v3418_v41, %s18297_s28  ;;  %15154 = vmatprep.subr.msk.mxu0 %vm118_vm1, %v752_v47  ;;  %v4107_v41 = vld [vmem:[%s23643_s0 + $0x30] sm:$0x77]  ;;  %v4786_v47 = vld [vmem:[%s23643_s0] sm:$0x77] }
  0xa1   :  { %15155 = vmatpush1.msk.msra.mxu0 %vm118_vm1, %v751_v46 }
  0xa2   :  { %3453 = vrot.lane.b32.xlu1 %v3419_v44, %s18297_s28  ;;  %v731_v51 = vpop.permute.xlu0 %730  ;;  %15156 = vmatmul.mubr.msk.f32.vlgmr.msra.gmra.mxu0 %vm114_vm2, %v18610_v35 }
  0xa3   :  { %v753_v52 = vsel %vm746_vm3, %v729_v43, %v731_v51  ;;  %v754_v53 = vsel %vm746_vm3, %v731_v51, %v733_v48  ;;  %1142 = vmatprep.mubr.f32.mxu0 %v23658_v9 }
  0xa4   :  { %v737_v55 = vpop.permute.xlu1 %736  ;;  %3451 = vrot.lane.b32.xlu0 %v3436_v49, %s18297_s28  ;;  %15157 = vmatprep.subr.msk.mxu1 %vm118_vm1, %v754_v53  ;;  %v4125_v49 = vcombine.high %v4107_v41, %v4107_v41 }
  0xa5   :  { %15158 = vmatpush1.msk.msra.mxu1 %vm118_vm1, %v753_v52 }
  0xa6   :  { %3457 = vrot.lane.b32.xlu1 %v3420_v50, %s18297_s28  ;;  %v735_v57 = vpop.permute.xlu0 %734  ;;  %15159 = vmatmul.mubr.msk.f32.vlgmr.msra.gmra.mxu1 %vm114_vm2, %v18610_v35 }
  0xa7   :  { %v755_v58 = vsel %vm746_vm3, %v733_v48, %v735_v57  ;;  %v756_v59 = vsel %vm746_vm3, %v735_v57, %v737_v55  ;;  %1213 = vmatprep.mubr.f32.mxu1 %v23658_v9  ;;  %v4787_v57 = vld [vmem:[%s23643_s0 + $0x8] sm:$0x77] }
  0xa8   :  { %v741_v61 = vpop.permute.xlu1 %740  ;;  %3455 = vrot.lane.b32.xlu0 %v3437_v54, %s18297_s28  ;;  %15160 = vmatprep.subr.msk.mxu0 %vm118_vm1, %v756_v59  ;;  %v4804_v54 = vcombine.high %v4786_v47, %v4786_v47 }
  0xa9   :  { %15161 = vmatpush1.msk.msra.mxu0 %vm118_vm1, %v755_v58 }
  0xaa   :  { %3461 = vrot.lane.b32.xlu1 %v3421_v56, %s18297_s28  ;;  %v739_v63 = vpop.permute.xlu0 %738  ;;  %15162 = vmatmul.mubr.msk.f32.vlgmr.msra.gmra.mxu0 %vm114_vm2, %v18610_v35  ;;  %v4108_v56 = vld [vmem:[%s23643_s0 + $0x38] sm:$0x7] }
  0xab   :  { %v757_v0 = vsel %vm746_vm3, %v737_v55, %v739_v63  ;;  %v758_v1 = vsel %vm746_vm3, %v739_v63, %v741_v61  ;;  %1284 = vmatprep.mubr.f32.mxu0 %v23658_v9 }
  0xac   :  { %v745_v3 = vpop.permute.xlu1 %744  ;;  %3459 = vrot.lane.b32.xlu0 %v3438_v60, %s18297_s28  ;;  %15163 = vmatprep.subr.msk.mxu1 %vm118_vm1, %v758_v1 }
  0xad   :  { %15164 = vmatpush1.msk.msra.mxu1 %vm118_vm1, %v757_v0 }
  0xae   :  { %3465 = vrot.lane.b32.xlu1 %v3422_v62, %s18297_s28  ;;  %v743_v5 = vpop.permute.xlu0 %742  ;;  %17217 = vmatprep.subr.mxu1 %v23658_v9  ;;  %v18808_v62 = vld [vmem:[%s23644_s1 + $0x18] sm:$0xff] }
  0xaf   :  { %v759_v6 = vsel %vm746_vm3, %v741_v61, %v743_v5  ;;  %v760_v7 = vsel %vm746_vm3, %v743_v5, %v745_v3  ;;  %15165 = vmatmul.mubr.msk.f32.vlgmr.msra.gmra.mxu1 %vm114_vm2, %v18610_v35  ;;  %v4805_v61 = vcombine.high %v4787_v57, %v4787_v57 }
  0xb0   :  { %v1391_v10 = vpop.permute.xlu1 %1390  ;;  %3463 = vrot.lane.b32.xlu0 %v3439_v2, %s18297_s28  ;;  %15166 = vmatprep.subr.msk.mxu0 %vm118_vm1, %v760_v7  ;;  %v4789_v7 = vld [vmem:[%s23643_s0 + $0x18] sm:$0x77] }
  0xb1   :  { %15167 = vmatpush1.msk.msra.mxu0 %vm118_vm1, %v759_v6  ;;  %17218 = vmatpush3.msk.msra.mxu1 %vm118_vm1, %v745_v3 }
  0xb2   :  { %3469 = vrot.lane.b32.xlu1 %v3423_v4, %s18297_s28  ;;  %v1389_v13 = vpop.permute.xlu0 %1388  ;;  %17219 = vmatprep.mubr.msk.f32.mxu1 %vm18296_vm4, %v23658_v9  ;;  %v4788_v4 = vld [vmem:[%s23643_s0 + $0x10] sm:$0x77] }
  0xb3   :  { %v1418_v14 = vsel %vm1416_vm5, %v1389_v13, %v1391_v10  ;;  %17220 = vmatmul.mubr.msk.f32.vlgmr.msra.gmra.mxu1 %vm114_vm2, %v18610_v35  ;;  %15168 = vmatmul.mubr.msk.f32.vlgmr.msra.gmra.mxu0 %vm114_vm2, %v18610_v35  ;;  %v4106_v35 = vld [vmem:[%s23643_s0 + $0x28] sm:$0x77] }
  0xb4   :  { %v1395_v15 = vpop.permute.xlu1 %1394  ;;  %3467 = vrot.lane.b32.xlu0 %v3440_v8, %s18297_s28  ;;  %15172 = vmatprep.subr.msk.mxu0 %vm118_vm1, %v1418_v14  ;;  %v4124_v43 = vcombine.high %v4106_v35, %v4106_v35  ;;  %v4790_v14 = vld [vmem:[%s23643_s0 + $0x20] sm:$0x77] }
  0xb5   :  { %1528 = vmatprep.mubr.f32.mxu0 %v23658_v9  ;;  %1599 = vmatprep.mubr.f32.mxu1 %v23658_v9 }
  0xb6   :  { %4130 = vrot.lane.b32.xlu1 %v4102_v11, %s18298_s22  ;;  %v1393_v18 = vpop.permute.xlu0 %1392 }
  0xb7   :  { %v1419_v19 = vsel %vm1416_vm5, %v1391_v10, %v1393_v18  ;;  %v1420_v20 = vsel %vm1416_vm5, %v1393_v18, %v1395_v15  ;;  %v4807_v18 = vcombine.high %v4789_v7, %v4789_v7 }
  0xb8   :  { %v1397_v23 = vpop.permute.xlu1 %1396  ;;  %4128 = vrot.lane.b32.xlu0 %v4119_v16, %s18298_s22  ;;  %15175 = vmatprep.subr.msk.mxu1 %vm118_vm1, %v1420_v20  ;;  %v4791_v20 = vld [vmem:[%s23643_s0 + $0x28] sm:$0x77] }
  0xb9   :  { %15176 = vmatpush1.msk.msra.mxu1 %vm118_vm1, %v1419_v19  ;;  %v1421_v33 = vsel %vm1416_vm5, %v1395_v15, %v1397_v23 }
  0xba   :  { %4134 = vrot.lane.b32.xlu1 %v4103_v17, %s18298_s22  ;;  %v1387_v26 = vpop.permute.xlu0 %1386  ;;  %15177 = vmatmul.mubr.msk.f32.vlgmr.msra.gmra.mxu1 %vm114_vm2, %v18723_v21 }
  0xbb   :  { %v1417_v27 = vsel %vm1416_vm5, %v1387_v26, %v1389_v13  ;;  %1741 = vmatprep.mubr.f32.mxu1 %v23658_v9  ;;  %v4806_v13 = vcombine.high %v4788_v4, %v4788_v4  ;;  %v4792_v26 = vld [vmem:[%s23643_s0 + $0x30] sm:$0x77] }
  0xbc   :  { %v1401_v28 = vpop.permute.xlu1 %1400  ;;  %4132 = vrot.lane.b32.xlu0 %v4120_v22, %s18298_s22  ;;  %15173 = vmatpush1.msk.msra.mxu0 %vm118_vm1, %v1417_v27 }
  0xbd   :  { %15174 = vmatmul.mubr.msk.f32.vlgmr.msra.gmra.mxu0 %vm114_vm2, %v18723_v21 }
  0xbe   :  { %4136 = vrot.lane.b32.xlu1 %v4121_v25, %s18298_s22  ;;  %v1399_v30 = vpop.permute.xlu0 %1398  ;;  %1670 = vmatprep.mubr.f32.mxu0 %v23658_v9 }
  0xbf   :  { %v1422_v32 = vsel %vm1416_vm5, %v1397_v23, %v1399_v30  ;;  %v1423_v39 = vsel %vm1416_vm5, %v1399_v30, %v1401_v28  ;;  %v4809_v30 = vcombine.high %v4791_v20, %v4791_v20 }
  0xc0   :  { %v1405_v34 = vpop.permute.xlu1 %1404  ;;  %4126 = vrot.lane.b32.xlu0 %v4101_v12, %s18298_s22  ;;  %15178 = vmatprep.subr.msk.mxu0 %vm118_vm1, %v1422_v32  ;;  %v4793_v32 = vld [vmem:[%s23643_s0 + $0x38] sm:$0x7] }
  0xc1   :  { %15179 = vmatpush1.msk.msra.mxu0 %vm118_vm1, %v1421_v33 }
  0xc2   :  { %4140 = vrot.lane.b32.xlu1 %v4122_v31, %s18298_s22  ;;  %v1403_v36 = vpop.permute.xlu0 %1402  ;;  %15180 = vmatmul.mubr.msk.f32.vlgmr.msra.gmra.mxu0 %vm114_vm2, %v18723_v21 }
  0xc3   :  { %v1424_v38 = vsel %vm1416_vm5, %v1401_v28, %v1403_v36  ;;  %1812 = vmatprep.mubr.f32.mxu0 %v23658_v9  ;;  %v1425_v45 = vsel %vm1416_vm5, %v1403_v36, %v1405_v34  ;;  %v5471_v36 = vld [vmem:[%s23643_s0] sm:$0x77] }
  0xc4   :  { %v1409_v40 = vpop.permute.xlu1 %1408  ;;  %4138 = vrot.lane.b32.xlu0 %v4104_v24, %s18298_s22  ;;  %15181 = vmatprep.subr.msk.mxu1 %vm118_vm1, %v1424_v38  ;;  %v4808_v24 = vcombine.high %v4790_v14, %v4790_v14 }
  0xc5   :  { %15182 = vmatpush1.msk.msra.mxu1 %vm118_vm1, %v1423_v39  ;;  %v5472_v39 = vld [vmem:[%s23643_s0 + $0x8] sm:$0x77] }
  0xc6   :  { %4144 = vrot.lane.b32.xlu1 %v4123_v37, %s18298_s22  ;;  %v1407_v42 = vpop.permute.xlu0 %1406  ;;  %15183 = vmatmul.mubr.msk.f32.vlgmr.msra.gmra.mxu1 %vm114_vm2, %v18723_v21  ;;  %v4810_v37 = vcombine.high %v4792_v26, %v4792_v26 }
  0xc7   :  { %v1426_v44 = vsel %vm1416_vm5, %v1405_v34, %v1407_v42  ;;  %1883 = vmatprep.mubr.f32.mxu1 %v23658_v9  ;;  %v1427_v51 = vsel %vm1416_vm5, %v1407_v42, %v1409_v40 }
  0xc8   :  { %v1413_v46 = vpop.permute.xlu1 %1412  ;;  %4142 = vrot.lane.b32.xlu0 %v4105_v29, %s18298_s22  ;;  %15184 = vmatprep.subr.msk.mxu0 %vm118_vm1, %v1426_v44  ;;  %v18914_v44 = vld [vmem:[%s23644_s1 + $0x20] sm:$0xff] }
  0xc9   :  { %15185 = vmatpush1.msk.msra.mxu0 %vm118_vm1, %v1425_v45  ;;  %v5473_v45 = vld [vmem:[%s23643_s0 + $0x10] sm:$0x77] }
  0xca   :  { %4148 = vrot.lane.b32.xlu1 %v4124_v43, %s18298_s22  ;;  %v1411_v48 = vpop.permute.xlu0 %1410  ;;  %15186 = vmatmul.mubr.msk.f32.vlgmr.msra.gmra.mxu0 %vm114_vm2, %v18723_v21  ;;  %v5489_v43 = vcombine.high %v5471_v36, %v5471_v36 }
  0xcb   :  { %v1428_v50 = vsel %vm1416_vm5, %v1409_v40, %v1411_v48  ;;  %1954 = vmatprep.mubr.f32.mxu0 %v23658_v9  ;;  %v1429_v59 = vsel %vm1416_vm5, %v1411_v48, %v1413_v46 }
  0xcc   :  { %v2074_v52 = vpop.permute.xlu1 %2073  ;;  %4146 = vrot.lane.b32.xlu0 %v4106_v35, %s18298_s22  ;;  %15187 = vmatprep.subr.msk.mxu1 %vm118_vm1, %v1428_v50 }
  0xcd   :  { %15188 = vmatpush1.msk.msra.mxu1 %vm118_vm1, %v1427_v51 }
  0xce   :  { %4152 = vrot.lane.b32.xlu1 %v4125_v49, %s18298_s22  ;;  %17222 = vmatprep.subr.mxu1 %v23658_v9  ;;  %v1415_v53 = vpop.permute.xlu0 %1414  ;;  %v5490_v49 = vcombine.high %v5472_v39, %v5472_v39 }
  0xcf   :  { %15189 = vmatmul.mubr.msk.f32.vlgmr.msra.gmra.mxu1 %vm114_vm2, %v18723_v21  ;;  %v1430_v55 = vsel %vm1416_vm5, %v1413_v46, %v1415_v53 }
  0xd0   :  { %17223 = vmatpush3.msk.msra.mxu1 %vm118_vm1, %v1415_v53  ;;  %v2078_v58 = vpop.permute.xlu1 %2077  ;;  %4150 = vrot.lane.b32.xlu0 %v4107_v41, %s18298_s22 }
  0xd1   :  { %15190 = vmatprep.subr.msk.mxu0 %vm118_vm1, %v1430_v55  ;;  %17224 = vmatprep.mubr.msk.f32.mxu1 %vm18296_vm4, %v23658_v9 }
  0xd2   :  { %15191 = vmatpush1.msk.msra.mxu0 %vm118_vm1, %v1429_v59  ;;  %4813 = vrot.lane.b32.xlu1 %v4804_v54, %s18299_s29  ;;  %v2076_v60 = vpop.permute.xlu0 %2075  ;;  %v5474_v54 = vld [vmem:[%s23643_s0 + $0x18] sm:$0x77] }
  0xd3   :  { %v2103_v63 = vsel %vm2101_vm6, %v2074_v52, %v2076_v60  ;;  %15192 = vmatmul.mubr.msk.f32.vlgmr.msra.gmra.mxu0 %vm114_vm2, %v18723_v21  ;;  %17225 = vmatmul.mubr.msk.f32.vlgmr.msra.gmra.mxu1 %vm114_vm2, %v18723_v21  ;;  %v2104_v5 = vsel %vm2101_vm6, %v2076_v60, %v2078_v58 }
  0xd4   :  { %v2072_v0 = vpop.permute.xlu1 %2071  ;;  %4154 = vrot.lane.b32.xlu0 %v4108_v56, %s18298_s22  ;;  %15196 = vmatprep.subr.msk.mxu0 %vm118_vm1, %v2103_v63 }
  0xd5   :  { %v2102_v1 = vsel %vm2101_vm6, %v2072_v0, %v2074_v52  ;;  %2213 = vmatprep.mubr.f32.mxu0 %v23658_v9  ;;  %2284 = vmatprep.mubr.f32.mxu1 %v23658_v9  ;;  %v5491_v52 = vcombine.high %v5473_v45, %v5473_v45 }
  0xd6   :  { %4817 = vrot.lane.b32.xlu1 %v4805_v61, %s18299_s29  ;;  %15197 = vmatpush1.msk.msra.mxu0 %vm118_vm1, %v2102_v1  ;;  %v2080_v2 = vpop.permute.xlu0 %2079 }
  0xd7   :  { %v2105_v3 = vsel %vm2101_vm6, %v2078_v58, %v2080_v2  ;;  %15198 = vmatmul.mubr.msk.f32.vlgmr.msra.gmra.mxu0 %vm114_vm2, %v18808_v62 }
  0xd8   :  { %v2084_v6 = vpop.permute.xlu1 %2083  ;;  %4815 = vrot.lane.b32.xlu0 %v4787_v57, %s18299_s29  ;;  %15199 = vmatprep.subr.msk.mxu1 %vm118_vm1, %v2105_v3  ;;  %v5492_v57 = vcombine.high %v5474_v54, %v5474_v54 }
  0xd9   :  { %15200 = vmatpush1.msk.msra.mxu1 %vm118_vm1, %v2104_v5  ;;  %2355 = vmatprep.mubr.f32.mxu0 %v23658_v9 }
  0xda   :  { %4811 = vrot.lane.b32.xlu1 %v4786_v47, %s18299_s29  ;;  %v2082_v8 = vpop.permute.xlu0 %2081  ;;  %15201 = vmatmul.mubr.msk.f32.vlgmr.msra.gmra.mxu1 %vm114_vm2, %v18808_v62 }
  0xdb   :  { %v2106_v10 = vsel %vm2101_vm6, %v2080_v2, %v2082_v8  ;;  %v2107_v11 = vsel %vm2101_vm6, %v2082_v8, %v2084_v6  ;;  %2426 = vmatprep.mubr.f32.mxu1 %v23658_v9 }
  0xdc   :  { %v2088_v12 = vpop.permute.xlu1 %2087  ;;  %4819 = vrot.lane.b32.xlu0 %v4788_v4, %s18299_s29  ;;  %15202 = vmatprep.subr.msk.mxu0 %vm118_vm1, %v2107_v11 }
  0xdd   :  { %15203 = vmatpush1.msk.msra.mxu0 %vm118_vm1, %v2106_v10 }
  0xde   :  { %v2086_v15 = vpop.permute.xlu0 %2085  ;;  %4823 = vrot.lane.b32.xlu1 %v4789_v7, %s18299_s29  ;;  %15204 = vmatmul.mubr.msk.f32.vlgmr.msra.gmra.mxu0 %vm114_vm2, %v18808_v62 }
  0xdf   :  { %v2108_v16 = vsel %vm2101_vm6, %v2084_v6, %v2086_v15  ;;  %v2109_v17 = vsel %vm2101_vm6, %v2086_v15, %v2088_v12  ;;  %2497 = vmatprep.mubr.f32.mxu0 %v23658_v9 }
  0xe0   :  { %v2092_v19 = vpop.permute.xlu1 %2091  ;;  %4821 = vrot.lane.b32.xlu0 %v4806_v13, %s18299_s29  ;;  %15205 = vmatprep.subr.msk.mxu1 %vm118_vm1, %v2109_v17 }
  0xe1   :  { %15206 = vmatpush1.msk.msra.mxu1 %vm118_vm1, %v2108_v16 }
  0xe2   :  { %v2090_v21 = vpop.permute.xlu0 %2089  ;;  %4827 = vrot.lane.b32.xlu1 %v4790_v14, %s18299_s29  ;;  %15207 = vmatmul.mubr.msk.f32.vlgmr.msra.gmra.mxu1 %vm114_vm2, %v18808_v62 }
  0xe3   :  { %v2110_v22 = vsel %vm2101_vm6, %v2088_v12, %v2090_v21  ;;  %v2111_v23 = vsel %vm2101_vm6, %v2090_v21, %v2092_v19  ;;  %2568 = vmatprep.mubr.f32.mxu1 %v23658_v9 }
  0xe4   :  { %v2096_v25 = vpop.permute.xlu1 %2095  ;;  %4825 = vrot.lane.b32.xlu0 %v4807_v18, %s18299_s29  ;;  %15208 = vmatprep.subr.msk.mxu0 %vm118_vm1, %v2111_v23 }
  0xe5   :  { %15209 = vmatpush1.msk.msra.mxu0 %vm118_vm1, %v2110_v22 }
  0xe6   :  { %v2094_v27 = vpop.permute.xlu0 %2093  ;;  %4831 = vrot.lane.b32.xlu1 %v4791_v20, %s18299_s29  ;;  %15210 = vmatmul.mubr.msk.f32.vlgmr.msra.gmra.mxu0 %vm114_vm2, %v18808_v62 }
  0xe7   :  { %v2112_v28 = vsel %vm2101_vm6, %v2092_v19, %v2094_v27  ;;  %v2113_v29 = vsel %vm2101_vm6, %v2094_v27, %v2096_v25  ;;  %2639 = vmatprep.mubr.f32.mxu0 %v23658_v9 }
  0xe8   :  { %v2100_v31 = vpop.permute.xlu1 %2099  ;;  %4829 = vrot.lane.b32.xlu0 %v4808_v24, %s18299_s29  ;;  %15211 = vmatprep.subr.msk.mxu1 %vm118_vm1, %v2113_v29 }
  0xe9   :  { %15212 = vmatpush1.msk.msra.mxu1 %vm118_vm1, %v2112_v28 }
  0xea   :  { %v2098_v33 = vpop.permute.xlu0 %2097  ;;  %4835 = vrot.lane.b32.xlu1 %v4792_v26, %s18299_s29  ;;  %17227 = vmatprep.subr.mxu1 %v23658_v9 }
  0xeb   :  { %v2114_v34 = vsel %vm2101_vm6, %v2096_v25, %v2098_v33  ;;  %v2115_v35 = vsel %vm2101_vm6, %v2098_v33, %v2100_v31  ;;  %15213 = vmatmul.mubr.msk.f32.vlgmr.msra.gmra.mxu1 %vm114_vm2, %v18808_v62 }
  0xec   :  { %v2761_v38 = vpop.permute.xlu1 %2760  ;;  %4833 = vrot.lane.b32.xlu0 %v4809_v30, %s18299_s29  ;;  %15214 = vmatprep.subr.msk.mxu0 %vm118_vm1, %v2115_v35 }
  0xed   :  { %15215 = vmatpush1.msk.msra.mxu0 %vm118_vm1, %v2114_v34  ;;  %17228 = vmatpush3.msk.msra.mxu1 %vm118_vm1, %v2100_v31 }
  0xee   :  { %v2759_v40 = vpop.permute.xlu0 %2758  ;;  %4839 = vrot.lane.b32.xlu1 %v4793_v32, %s18299_s29  ;;  %17229 = vmatprep.mubr.msk.f32.mxu1 %vm18296_vm4, %v23658_v9 }
  0xef   :  { %v2788_v41 = vsel %vm2786_vm7, %v2759_v40, %v2761_v38  ;;  %17230 = vmatmul.mubr.msk.f32.vlgmr.msra.gmra.mxu1 %vm114_vm2, %v18808_v62  ;;  %15216 = vmatmul.mubr.msk.f32.vlgmr.msra.gmra.mxu0 %vm114_vm2, %v18808_v62 }
  0xf0   :  { %v2765_v42 = vpop.permute.xlu1 %2764  ;;  %4837 = vrot.lane.b32.xlu0 %v4810_v37, %s18299_s29  ;;  %15220 = vmatprep.subr.msk.mxu0 %vm118_vm1, %v2788_v41 }
  0xf1   :  { %2969 = vmatprep.mubr.f32.mxu1 %v23658_v9  ;;  %2898 = vmatprep.mubr.f32.mxu0 %v23658_v9 }
  0xf2   :  { %v2763_v46 = vpop.permute.xlu0 %2762  ;;  %5500 = vrot.lane.b32.xlu1 %v5472_v39, %s18300_s21 }
  0xf3   :  { %v2789_v47 = vsel %vm2786_vm7, %v2761_v38, %v2763_v46  ;;  %v2790_v48 = vsel %vm2786_vm7, %v2763_v46, %v2765_v42 }
  0xf4   :  { %v2767_v50 = vpop.permute.xlu1 %2766  ;;  %5498 = vrot.lane.b32.xlu0 %v5489_v43, %s18300_s21  ;;  %15223 = vmatprep.subr.msk.mxu1 %vm118_vm1, %v2790_v48 }
  0xf5   :  { %15224 = vmatpush1.msk.msra.mxu1 %vm118_vm1, %v2789_v47 }
  0xf6   :  { %15225 = vmatmul.mubr.msk.f32.vlgmr.msra.gmra.mxu1 %vm114_vm2, %v18914_v44  ;;  %v2757_v51 = vpop.permute.xlu0 %2756  ;;  %5504 = vrot.lane.b32.xlu1 %v5473_v45, %s18300_s21 }
  0xf7   :  { %v2787_v53 = vsel %vm2786_vm7, %v2757_v51, %v2759_v40  ;;  %3111 = vmatprep.mubr.f32.mxu1 %v23658_v9 }
  0xf8   :  { %v2771_v55 = vpop.permute.xlu1 %2770  ;;  %5502 = vrot.lane.b32.xlu0 %v5490_v49, %s18300_s21  ;;  %15221 = vmatpush1.msk.msra.mxu0 %vm118_vm1, %v2787_v53 }
  0xf9   :  { %15222 = vmatmul.mubr.msk.f32.vlgmr.msra.gmra.mxu0 %vm114_vm2, %v18914_v44 }
  0xfa   :  { %v2769_v56 = vpop.permute.xlu0 %2768  ;;  %5506 = vrot.lane.b32.xlu1 %v5491_v52, %s18300_s21  ;;  %3040 = vmatprep.mubr.f32.mxu0 %v23658_v9 }
  0xfb   :  { %v2792_v58 = vsel %vm2786_vm7, %v2767_v50, %v2769_v56 }
  0xfc   :  { %17 = vsyncpa [#allocation6], 0  ;;  %v2791_v59 = vsel %vm2786_vm7, %v2765_v42, %v2767_v50  ;;  %v2775_v60 = vpop.permute.xlu1 %2774  ;;  %5496 = vrot.lane.b32.xlu0 %v5471_v36, %s18300_s21  ;;  %15226 = vmatprep.subr.msk.mxu0 %vm118_vm1, %v2792_v58  ;;  %v5475_v61 = vld [vmem:[%s23643_s0 + $0x20] sm:$0x77]  ;;  %v2793_v1 = vsel %vm2786_vm7, %v2769_v56, %v2771_v55  ;;  %v5476_v3 = vld [vmem:[%s23643_s0 + $0x28] sm:$0x77] }
  0xfd   :  { %15227 = vmatpush1.msk.msra.mxu0 %vm118_vm1, %v2791_v59  ;;  %v5493_v63 = vcombine.high %v5475_v61, %v5475_v61  ;;  %v5494_v5 = vcombine.high %v5476_v3, %v5476_v3  ;;  %v5477_v14 = vld [vmem:[%s23643_s0 + $0x30] sm:$0x77]  ;;  %vm3471_vm8 = vcmask 777216   ;;  %v5478_v20 = vld [vmem:[%s23643_s0 + $0x38] sm:$0x7]  ;;  %v15243_v24 = vld [vmem:[%s23644_s1 + $0x28] sm:$0xff] }
  0xfe   :  { %15228 = vmatmul.mubr.msk.f32.vlgmr.msra.gmra.mxu0 %vm114_vm2, %v18914_v44  ;;  %v2773_v62 = vpop.permute.xlu0 %2772  ;;  %5510 = vrot.lane.b32.xlu1 %v5492_v57, %s18300_s21  ;;  %v5495_v15 = vcombine.high %v5477_v14, %v5477_v14  ;;  %vm4156_vm9 = vcmask 547840   ;;  %v19060_v56 = vld [vmem:[%s23644_s1 + $0x30] sm:$0xff]  ;;  %v23656_v58 = vmov 0   ;;  %v6156_v59 = vld [vmem:[%s23645_s2] sm:$0xff]  ;;  %vm4841_vm10 = vcmask 539648   ;;  %s18302_s18 = smov 98  }
  0xff   :  { %v2794_v0 = vsel %vm2786_vm7, %v2771_v55, %v2773_v62  ;;  %3182 = vmatprep.mubr.f32.mxu0 %v23658_v9  ;;  %v2795_v7 = vsel %vm2786_vm7, %v2773_v62, %v2775_v60  ;;  %17352 = vset.pattern.permute.xlu1 %v23656_v58  ;;  %vm5526_vm11 = vcmask 531456   ;;  %vm6206_vm12 = vcmask 64512   ;;  %s18304_s2 = smov 111   ;;  %s18305_s14 = smov 110  }
 0x100   :  { %v2779_v2 = vpop.permute.xlu1 %2778  ;;  %5508 = vrot.lane.b32.xlu0 %v5474_v54, %s18300_s21  ;;  %15229 = vmatprep.subr.msk.mxu1 %vm118_vm1, %v2794_v0  ;;  %vm6208_vm13 = vcmask 326720   ;;  %vm6359_vm14 = vcmask 801792   ;;  %vm10022_vm15 = vcmask 1043456   ;;  %vm12523_vm5 = vcmask 769024  }
 0x101   :  { %15230 = vmatpush1.msk.msra.mxu1 %vm118_vm1, %v2793_v1  ;;  %17418 = vset.pattern.permute.xlu0 %v23656_v58 }
 0x102   :  { %15231 = vmatmul.mubr.msk.f32.vlgmr.msra.gmra.mxu1 %vm114_vm2, %v18914_v44  ;;  %v2777_v4 = vpop.permute.xlu0 %2776  ;;  %5514 = vrot.lane.b32.xlu1 %v5493_v63, %s18300_s21 }
 0x103   :  { %v2796_v6 = vsel %vm2786_vm7, %v2775_v60, %v2777_v4  ;;  %3253 = vmatprep.mubr.f32.mxu1 %v23658_v9  ;;  %v2797_v12 = vsel %vm2786_vm7, %v2777_v4, %v2779_v2 }
 0x104   :  { %v2783_v8 = vpop.permute.xlu1 %2782  ;;  %5512 = vrot.lane.b32.xlu0 %v5475_v61, %s18300_s21  ;;  %15232 = vmatprep.subr.msk.mxu0 %vm118_vm1, %v2796_v6 }
 0x105   :  { %15233 = vmatpush1.msk.msra.mxu0 %vm118_vm1, %v2795_v7 }
 0x106   :  { %15234 = vmatmul.mubr.msk.f32.vlgmr.msra.gmra.mxu0 %vm114_vm2, %v18914_v44  ;;  %v2781_v10 = vpop.permute.xlu0 %2780  ;;  %5518 = vrot.lane.b32.xlu1 %v5494_v5, %s18300_s21 }
 0x107   :  { %v2798_v11 = vsel %vm2786_vm7, %v2779_v2, %v2781_v10  ;;  %3324 = vmatprep.mubr.f32.mxu0 %v23658_v9  ;;  %v2799_v18 = vsel %vm2786_vm7, %v2781_v10, %v2783_v8 }
 0x108   :  { %v3444_v13 = vpop.permute.xlu1 %3443  ;;  %5516 = vrot.lane.b32.xlu0 %v5476_v3, %s18300_s21  ;;  %15235 = vmatprep.subr.msk.mxu1 %vm118_vm1, %v2798_v11 }
 0x109   :  { %15236 = vmatpush1.msk.msra.mxu1 %vm118_vm1, %v2797_v12 }
 0x10a   :  { %15237 = vmatmul.mubr.msk.f32.vlgmr.msra.gmra.mxu1 %vm114_vm2, %v18914_v44  ;;  %17232 = vmatprep.subr.mxu1 %v23658_v9  ;;  %v2785_v16 = vpop.permute.xlu0 %2784 }
 0x10b   :  { %17233 = vmatpush3.msk.msra.mxu1 %vm118_vm1, %v2785_v16  ;;  %v2800_v17 = vsel %vm2786_vm7, %v2783_v8, %v2785_v16  ;;  %17234 = vmatprep.mubr.msk.f32.mxu1 %vm18296_vm4, %v23658_v9 }
 0x10c   :  { %v3448_v19 = vpop.permute.xlu1 %3447  ;;  %5520 = vrot.lane.b32.xlu0 %v5477_v14, %s18300_s21  ;;  %15238 = vmatprep.subr.msk.mxu0 %vm118_vm1, %v2800_v17 }
 0x10d   :  { %15239 = vmatpush1.msk.msra.mxu0 %vm118_vm1, %v2799_v18  ;;  %5522 = vrot.lane.b32.xlu1 %v5495_v15, %s18300_s21 }
 0x10e   :  { %15240 = vmatmul.mubr.msk.f32.vlgmr.msra.gmra.mxu0 %vm114_vm2, %v18914_v44  ;;  %17235 = vmatmul.mubr.msk.f32.vlgmr.msra.gmra.mxu1 %vm114_vm2, %v18914_v44  ;;  %v3446_v21 = vpop.permute.xlu0 %3445 }
 0x10f   :  { %v3473_v22 = vsel %vm3471_vm8, %v3444_v13, %v3446_v21  ;;  %3583 = vmatprep.mubr.f32.mxu0 %v23658_v9  ;;  %3654 = vmatprep.mubr.f32.mxu1 %v23658_v9  ;;  %v3474_v28 = vsel %vm3471_vm8, %v3446_v21, %v3448_v19 }
 0x110   :  { %v3442_v23 = vpop.permute.xlu1 %3441  ;;  %5524 = vrot.lane.b32.xlu0 %v5478_v20, %s18300_s21  ;;  %15244 = vmatprep.subr.msk.mxu0 %vm118_vm1, %v3473_v22 }
 0x111   :  { %v3472_v25 = vsel %vm3471_vm8, %v3442_v23, %v3444_v13  ;;  %6159 = vperm.xlu1 %17352, %v6156_v59  }
 0x112   :  { %15245 = vmatpush1.msk.msra.mxu0 %vm118_vm1, %v3472_v25  ;;  %v3450_v26 = vpop.permute.xlu0 %3449 }
 0x113   :  { %15246 = vmatmul.mubr.msk.f32.vlgmr.msra.gmra.mxu0 %vm114_vm2, %v15243_v24  ;;  %v3475_v27 = vsel %vm3471_vm8, %v3448_v19, %v3450_v26 }
 0x114   :  { %v3454_v29 = vpop.permute.xlu1 %3453  ;;  %15247 = vmatprep.subr.msk.mxu1 %vm118_vm1, %v3475_v27  ;;  %3725 = vmatprep.mubr.f32.mxu0 %v23658_v9 }
 0x115   :  { %15248 = vmatpush1.msk.msra.mxu1 %vm118_vm1, %v3474_v28 }
 0x116   :  { %15249 = vmatmul.mubr.msk.f32.vlgmr.msra.gmra.mxu1 %vm114_vm2, %v15243_v24  ;;  %v3452_v30 = vpop.permute.xlu0 %3451 }
 0x117   :  { %v3476_v31 = vsel %vm3471_vm8, %v3450_v26, %v3452_v30  ;;  %v3477_v32 = vsel %vm3471_vm8, %v3452_v30, %v3454_v29  ;;  %3796 = vmatprep.mubr.f32.mxu1 %v23658_v9  ;;  %v19137_v30 = vld [vmem:[%s23644_s1 + $0x38] sm:$0xff] }
 0x118   :  { %v3458_v33 = vpop.permute.xlu1 %3457  ;;  %15250 = vmatprep.subr.msk.mxu0 %vm118_vm1, %v3477_v32 }
 0x119   :  { %15251 = vmatpush1.msk.msra.mxu0 %vm118_vm1, %v3476_v31 }
 0x11a   :  { %15252 = vmatmul.mubr.msk.f32.vlgmr.msra.gmra.mxu0 %vm114_vm2, %v15243_v24  ;;  %v3456_v34 = vpop.permute.xlu0 %3455 }
 0x11b   :  { %v3478_v35 = vsel %vm3471_vm8, %v3454_v29, %v3456_v34  ;;  %v3479_v36 = vsel %vm3471_vm8, %v3456_v34, %v3458_v33  ;;  %3867 = vmatprep.mubr.f32.mxu0 %v23658_v9 }
 0x11c   :  { %v3462_v37 = vpop.permute.xlu1 %3461  ;;  %15253 = vmatprep.subr.msk.mxu1 %vm118_vm1, %v3479_v36 }
 0x11d   :  { %15254 = vmatpush1.msk.msra.mxu1 %vm118_vm1, %v3478_v35 }
 0x11e   :  { %15255 = vmatmul.mubr.msk.f32.vlgmr.msra.gmra.mxu1 %vm114_vm2, %v15243_v24  ;;  %v3460_v38 = vpop.permute.xlu0 %3459 }
 0x11f   :  { %v3480_v39 = vsel %vm3471_vm8, %v3458_v33, %v3460_v38  ;;  %v3481_v40 = vsel %vm3471_vm8, %v3460_v38, %v3462_v37  ;;  %3938 = vmatprep.mubr.f32.mxu1 %v23658_v9 }
 0x120   :  { %v3466_v41 = vpop.permute.xlu1 %3465  ;;  %15256 = vmatprep.subr.msk.mxu0 %vm118_vm1, %v3481_v40 }
 0x121   :  { %15257 = vmatpush1.msk.msra.mxu0 %vm118_vm1, %v3480_v39 }
 0x122   :  { %15258 = vmatmul.mubr.msk.f32.vlgmr.msra.gmra.mxu0 %vm114_vm2, %v15243_v24  ;;  %v3464_v42 = vpop.permute.xlu0 %3463 }
 0x123   :  { %v3482_v43 = vsel %vm3471_vm8, %v3462_v37, %v3464_v42  ;;  %v3483_v44 = vsel %vm3471_vm8, %v3464_v42, %v3466_v41  ;;  %4009 = vmatprep.mubr.f32.mxu0 %v23658_v9 }
 0x124   :  { %v3470_v45 = vpop.permute.xlu1 %3469  ;;  %15259 = vmatprep.subr.msk.mxu1 %vm118_vm1, %v3483_v44 }
 0x125   :  { %15260 = vmatpush1.msk.msra.mxu1 %vm118_vm1, %v3482_v43 }
 0x126   :  { %15261 = vmatmul.mubr.msk.f32.vlgmr.msra.gmra.mxu1 %vm114_vm2, %v15243_v24  ;;  %v3468_v46 = vpop.permute.xlu0 %3467  ;;  %17237 = vmatprep.subr.mxu1 %v23658_v9 }
 0x127   :  { %v3484_v47 = vsel %vm3471_vm8, %v3466_v41, %v3468_v46  ;;  %v3485_v48 = vsel %vm3471_vm8, %v3468_v46, %v3470_v45  ;;  %17238 = vmatpush3.msk.msra.mxu1 %vm118_vm1, %v3470_v45  ;;  %17239 = vmatprep.mubr.msk.f32.mxu1 %vm18296_vm4, %v23658_v9 }
 0x128   :  { %v4131_v49 = vpop.permute.xlu1 %4130  ;;  %15262 = vmatprep.subr.msk.mxu0 %vm118_vm1, %v3485_v48 }
 0x129   :  { %15263 = vmatpush1.msk.msra.mxu0 %vm118_vm1, %v3484_v47 }
 0x12a   :  { %15264 = vmatmul.mubr.msk.f32.vlgmr.msra.gmra.mxu0 %vm114_vm2, %v15243_v24  ;;  %17240 = vmatmul.mubr.msk.f32.vlgmr.msra.gmra.mxu1 %vm114_vm2, %v15243_v24  ;;  %v4129_v50 = vpop.permute.xlu0 %4128 }
 0x12b   :  { %v4158_v51 = vsel %vm4156_vm9, %v4129_v50, %v4131_v49  ;;  %4339 = vmatprep.mubr.f32.mxu1 %v23658_v9  ;;  %4268 = vmatprep.mubr.f32.mxu0 %v23658_v9 }
 0x12c   :  { %v4135_v52 = vpop.permute.xlu1 %4134  ;;  %15268 = vmatprep.subr.msk.mxu0 %vm118_vm1, %v4158_v51 }
 0x12e   :  { %v4133_v53 = vpop.permute.xlu0 %4132 }
 0x12f   :  { %v4159_v54 = vsel %vm4156_vm9, %v4131_v49, %v4133_v53  ;;  %v4160_v55 = vsel %vm4156_vm9, %v4133_v53, %v4135_v52 }
 0x130   :  { %v4137_v57 = vpop.permute.xlu1 %4136  ;;  %15271 = vmatprep.subr.msk.mxu1 %vm118_vm1, %v4160_v55 }
 0x131   :  { %15272 = vmatpush1.msk.msra.mxu1 %vm118_vm1, %v4159_v54  ;;  %v4161_v1 = vsel %vm4156_vm9, %v4135_v52, %v4137_v57 }
 0x132   :  { %15273 = vmatmul.mubr.msk.f32.vlgmr.msra.gmra.mxu1 %vm114_vm2, %v19060_v56  ;;  %v4127_v60 = vpop.permute.xlu0 %4126 }
 0x133   :  { %v4157_v61 = vsel %vm4156_vm9, %v4127_v60, %v4129_v50  ;;  %4481 = vmatprep.mubr.f32.mxu1 %v23658_v9 }
 0x134   :  { %v4141_v62 = vpop.permute.xlu1 %4140  ;;  %15269 = vmatpush1.msk.msra.mxu0 %vm118_vm1, %v4157_v61 }
 0x135   :  { %15270 = vmatmul.mubr.msk.f32.vlgmr.msra.gmra.mxu0 %vm114_vm2, %v19060_v56 }
 0x136   :  { %v4139_v63 = vpop.permute.xlu0 %4138  ;;  %4410 = vmatprep.mubr.f32.mxu0 %v23658_v9 }
 0x137   :  { %v4162_v0 = vsel %vm4156_vm9, %v4137_v57, %v4139_v63  ;;  %v4163_v5 = vsel %vm4156_vm9, %v4139_v63, %v4141_v62 }
 0x138   :  { %v4145_v2 = vpop.permute.xlu1 %4144  ;;  %15274 = vmatprep.subr.msk.mxu0 %vm118_vm1, %v4162_v0 }
 0x139   :  { %15275 = vmatpush1.msk.msra.mxu0 %vm118_vm1, %v4161_v1 }
 0x13a   :  { %15276 = vmatmul.mubr.msk.f32.vlgmr.msra.gmra.mxu0 %vm114_vm2, %v19060_v56  ;;  %v4143_v3 = vpop.permute.xlu0 %4142 }
 0x13b   :  { %v4164_v4 = vsel %vm4156_vm9, %v4141_v62, %v4143_v3  ;;  %4552 = vmatprep.mubr.f32.mxu0 %v23658_v9  ;;  %v4165_v11 = vsel %vm4156_vm9, %v4143_v3, %v4145_v2 }
 0x13c   :  { %v4149_v6 = vpop.permute.xlu1 %4148  ;;  %15277 = vmatprep.subr.msk.mxu1 %vm118_vm1, %v4164_v4 }
 0x13d   :  { %15278 = vmatpush1.msk.msra.mxu1 %vm118_vm1, %v4163_v5 }
 0x13e   :  { %15279 = vmatmul.mubr.msk.f32.vlgmr.msra.gmra.mxu1 %vm114_vm2, %v19060_v56  ;;  %v4147_v7 = vpop.permute.xlu0 %4146  ;;  %v19090_v8 = vpop.f32.mrf.mxu1 }
 0x13f   :  { %v4166_v10 = vsel %vm4156_vm9, %v4145_v2, %v4147_v7  ;;  %4623 = vmatprep.mubr.f32.mxu1 %v23658_v9  ;;  %v4167_v17 = vsel %vm4156_vm9, %v4147_v7, %v4149_v6 }
 0x140   :  { %v4153_v12 = vpop.permute.xlu1 %4152  ;;  %15280 = vmatprep.subr.msk.mxu0 %vm118_vm1, %v4166_v10  ;;  %v19096_v13 = vpop.f32.mrf.mxu1 }
 0x141   :  { %15281 = vmatpush1.msk.msra.mxu0 %vm118_vm1, %v4165_v11 }
 0x142   :  { %15282 = vmatmul.mubr.msk.f32.vlgmr.msra.gmra.mxu0 %vm114_vm2, %v19060_v56  ;;  %v4151_v14 = vpop.permute.xlu0 %4150  ;;  %v19103_v16 = vpop.f32.mrf.mxu1 }
 0x143   :  { %v4168_v15 = vsel %vm4156_vm9, %v4149_v6, %v4151_v14  ;;  %4694 = vmatprep.mubr.f32.mxu0 %v23658_v9  ;;  %v4169_v23 = vsel %vm4156_vm9, %v4151_v14, %v4153_v12 }
 0x144   :  { %v4814_v18 = vpop.permute.xlu1 %4813  ;;  %15283 = vmatprep.subr.msk.mxu1 %vm118_vm1, %v4168_v15  ;;  %v19115_v21 = vpop.f32.mrf.mxu1 }
 0x145   :  { %15284 = vmatpush1.msk.msra.mxu1 %vm118_vm1, %v4167_v17 }
 0x146   :  { %15285 = vmatmul.mubr.msk.f32.vlgmr.msra.gmra.mxu1 %vm114_vm2, %v19060_v56  ;;  %17242 = vmatprep.subr.mxu1 %v23658_v9  ;;  %v4155_v19 = vpop.permute.xlu0 %4154  ;;  %v19117_v22 = vpop.f32.mrf.mxu0 }
 0x147   :  { %v4170_v20 = vsel %vm4156_vm9, %v4153_v12, %v4155_v19  ;;  %17243 = vmatpush3.msk.msra.mxu1 %vm118_vm1, %v4155_v19  ;;  %17244 = vmatprep.mubr.msk.f32.mxu1 %vm18296_vm4, %v23658_v9 }
 0x148   :  { %v4818_v24 = vpop.permute.xlu1 %4817  ;;  %15286 = vmatprep.subr.msk.mxu0 %vm118_vm1, %v4170_v20  ;;  %v19131_v28 = vpop.f32.mrf.mxu0 }
 0x149   :  { %15287 = vmatpush1.msk.msra.mxu0 %vm118_vm1, %v4169_v23  ;;  %v19233_v23 = vld [vmem:[%s23644_s1 + $0x40] sm:$0xff] }
 0x14a   :  { %15288 = vmatmul.mubr.msk.f32.vlgmr.msra.gmra.mxu0 %vm114_vm2, %v19060_v56  ;;  %17245 = vmatmul.mubr.msk.f32.vlgmr.msra.gmra.mxu1 %vm114_vm2, %v19060_v56  ;;  %v4816_v25 = vpop.permute.xlu0 %4815  ;;  %v19129_v27 = vpop.f32.mrf.mxu1 }
 0x14b   :  { %v4843_v26 = vsel %vm4841_vm10, %v4814_v18, %v4816_v25  ;;  %4953 = vmatprep.mubr.f32.mxu0 %v23658_v9  ;;  %5024 = vmatprep.mubr.f32.mxu1 %v23658_v9  ;;  %v4844_v36 = vsel %vm4841_vm10, %v4816_v25, %v4818_v24 }
 0x14c   :  { %v4812_v29 = vpop.permute.xlu1 %4811  ;;  %15292 = vmatprep.subr.msk.mxu0 %vm118_vm1, %v4843_v26  ;;  %v19144_v34 = vpop.f32.mrf.mxu1 }
 0x14d   :  { %v4842_v31 = vsel %vm4841_vm10, %v4812_v29, %v4814_v18 }
 0x14e   :  { %15293 = vmatpush1.msk.msra.mxu0 %vm118_vm1, %v4842_v31  ;;  %v4820_v32 = vpop.permute.xlu0 %4819  ;;  %v19146_v35 = vpop.f32.mrf.mxu0 }
 0x14f   :  { %v4845_v33 = vsel %vm4841_vm10, %v4818_v24, %v4820_v32  ;;  %15294 = vmatmul.mubr.msk.f32.vlgmr.msra.gmra.mxu0 %vm114_vm2, %v19137_v30 }
 0x150   :  { %15295 = vmatprep.subr.msk.mxu1 %vm118_vm1, %v4845_v33  ;;  %v4824_v37 = vpop.permute.xlu1 %4823  ;;  %5095 = vmatprep.mubr.f32.mxu0 %v23658_v9  ;;  %v19159_v42 = vpop.f32.mrf.mxu0 }
 0x151   :  { %15296 = vmatpush1.msk.msra.mxu1 %vm118_vm1, %v4844_v36 }
 0x152   :  { %15297 = vmatmul.mubr.msk.f32.vlgmr.msra.gmra.mxu1 %vm114_vm2, %v19137_v30  ;;  %v4822_v38 = vpop.permute.xlu0 %4821 }
 0x153   :  { %v4846_v39 = vsel %vm4841_vm10, %v4820_v32, %v4822_v38  ;;  %v4847_v40 = vsel %vm4841_vm10, %v4822_v38, %v4824_v37  ;;  %5166 = vmatprep.mubr.f32.mxu1 %v23658_v9  ;;  %v19157_v41 = vpop.f32.mrf.mxu1 }
 0x154   :  { %15298 = vmatprep.subr.msk.mxu0 %vm118_vm1, %v4847_v40  ;;  %v4828_v43 = vpop.permute.xlu1 %4827 }
 0x155   :  { %15299 = vmatpush1.msk.msra.mxu0 %vm118_vm1, %v4846_v39  ;;  %v19163_v44 = vpop.f32.mrf.mxu1 }
 0x156   :  { %15300 = vmatmul.mubr.msk.f32.vlgmr.msra.gmra.mxu0 %vm114_vm2, %v19137_v30  ;;  %v4826_v45 = vpop.permute.xlu0 %4825 }
 0x157   :  { %v4848_v46 = vsel %vm4841_vm10, %v4824_v37, %v4826_v45  ;;  %v4849_v47 = vsel %vm4841_vm10, %v4826_v45, %v4828_v43  ;;  %5237 = vmatprep.mubr.f32.mxu0 %v23658_v9  ;;  %v19170_v48 = vpop.f32.mrf.mxu1  ;;  %v19172_v49 = vpop.f32.mrf.mxu0 }
 0x158   :  { %15301 = vmatprep.subr.msk.mxu1 %vm118_vm1, %v4849_v47  ;;  %v4832_v50 = vpop.permute.xlu1 %4831 }
 0x159   :  { %15302 = vmatpush1.msk.msra.mxu1 %vm118_vm1, %v4848_v46  ;;  %v17216_v51 = vpop.f32.mrf.mxu1  ;;  %v19176_v52 = vpop.f32.mrf.mxu0 }
 0x15a   :  { %15303 = vmatmul.mubr.msk.f32.vlgmr.msra.gmra.mxu1 %vm114_vm2, %v19137_v30  ;;  %v4830_v53 = vpop.permute.xlu0 %4829 }
 0x15b   :  { %v4850_v54 = vsel %vm4841_vm10, %v4828_v43, %v4830_v53  ;;  %v4851_v55 = vsel %vm4841_vm10, %v4830_v53, %v4832_v50  ;;  %5308 = vmatprep.mubr.f32.mxu1 %v23658_v9  ;;  %v860_v56 = vpop.f32.mrf.mxu0 }
 0x15c   :  { %15304 = vmatprep.subr.msk.mxu0 %vm118_vm1, %v4851_v55  ;;  %v4836_v57 = vpop.permute.xlu1 %4835  ;;  %v19185_v59 = vadd.f32 %v860_v56, %v19090_v8 }
 0x15d   :  { %15305 = vmatpush1.msk.msra.mxu0 %vm118_vm1, %v4850_v54  ;;  %v19188_v60 = vpop.f32.mrf.mxu0 }
 0x15e   :  { %15306 = vmatmul.mubr.msk.f32.vlgmr.msra.gmra.mxu0 %vm114_vm2, %v19137_v30  ;;  %v4834_v61 = vpop.permute.xlu0 %4833  ;;  %v931_v62 = vpop.f32.mrf.mxu1 }
 0x15f   :  { %v4852_v63 = vsel %vm4841_vm10, %v4832_v50, %v4834_v61  ;;  %v4853_v0 = vsel %vm4841_vm10, %v4834_v61, %v4836_v57  ;;  %5379 = vmatprep.mubr.f32.mxu0 %v23658_v9  ;;  %v19196_v1 = vadd.f32 %v931_v62, %v19103_v16 }
 0x160   :  { %15307 = vmatprep.subr.msk.mxu1 %vm118_vm1, %v4853_v0  ;;  %v4840_v2 = vpop.permute.xlu1 %4839  ;;  %v19200_v3 = vpop.f32.mrf.mxu1 }
 0x161   :  { %15308 = vmatpush1.msk.msra.mxu1 %vm118_vm1, %v4852_v63 }
 0x162   :  { %15309 = vmatmul.mubr.msk.f32.vlgmr.msra.gmra.mxu1 %vm114_vm2, %v19137_v30  ;;  %v4838_v4 = vpop.permute.xlu0 %4837  ;;  %17247 = vmatprep.subr.mxu1 %v23658_v9  ;;  %v1002_v5 = vpop.f32.mrf.mxu0 }
 0x163   :  { %v4854_v6 = vsel %vm4841_vm10, %v4836_v57, %v4838_v4  ;;  %v4855_v7 = vsel %vm4841_vm10, %v4838_v4, %v4840_v2  ;;  %17248 = vmatpush3.msk.msra.mxu1 %vm118_vm1, %v4840_v2  ;;  %17249 = vmatprep.mubr.msk.f32.mxu1 %vm18296_vm4, %v23658_v9  ;;  %v19211_v8 = vadd.f32 %v1002_v5, %v19117_v22 }
 0x164   :  { %15310 = vmatprep.subr.msk.mxu0 %vm118_vm1, %v4855_v7  ;;  %v5501_v10 = vpop.permute.xlu1 %5500  ;;  %v19215_v11 = vpop.f32.mrf.mxu0 }
 0x165   :  { %15311 = vmatpush1.msk.msra.mxu0 %vm118_vm1, %v4854_v6 }
 0x166   :  { %15312 = vmatmul.mubr.msk.f32.vlgmr.msra.gmra.mxu0 %vm114_vm2, %v19137_v30  ;;  %17250 = vmatmul.mubr.msk.f32.vlgmr.msra.gmra.mxu1 %vm114_vm2, %v19137_v30  ;;  %v5499_v12 = vpop.permute.xlu0 %5498  ;;  %v1073_v14 = vpop.f32.mrf.mxu1 }
 0x167   :  { %v5528_v15 = vsel %vm5526_vm11, %v5499_v12, %v5501_v10  ;;  %5709 = vmatprep.mubr.f32.mxu1 %v23658_v9  ;;  %5638 = vmatprep.mubr.f32.mxu0 %v23658_v9  ;;  %v19225_v16 = vadd.f32 %v1073_v14, %v19129_v27 }
 0x168   :  { %15316 = vmatprep.subr.msk.mxu0 %vm118_vm1, %v5528_v15  ;;  %v5505_v17 = vpop.permute.xlu1 %5504  ;;  %v19235_v24 = vpop.f32.mrf.mxu1 }
 0x16a   :  { %v5503_v18 = vpop.permute.xlu0 %5502  ;;  %v1144_v19 = vpop.f32.mrf.mxu0 }
 0x16b   :  { %v5529_v20 = vsel %vm5526_vm11, %v5501_v10, %v5503_v18  ;;  %v5530_v22 = vsel %vm5526_vm11, %v5503_v18, %v5505_v17  ;;  %v19238_v25 = vadd.f32 %v1144_v19, %v19146_v35 }
 0x16c   :  { %15319 = vmatprep.subr.msk.mxu1 %vm118_vm1, %v5530_v22  ;;  %v5507_v26 = vpop.permute.xlu1 %5506  ;;  %v19246_v31 = vpop.f32.mrf.mxu0 }
 0x16d   :  { %15320 = vmatpush1.msk.msra.mxu1 %vm118_vm1, %v5529_v20  ;;  %v5531_v40 = vsel %vm5526_vm11, %v5505_v17, %v5507_v26 }
 0x16e   :  { %15321 = vmatmul.mubr.msk.f32.vlgmr.msra.gmra.mxu1 %vm114_vm2, %v19233_v23  ;;  %v5497_v27 = vpop.permute.xlu0 %5496 }
 0x16f   :  { %v5527_v29 = vsel %vm5526_vm11, %v5497_v27, %v5499_v12  ;;  %5851 = vmatprep.mubr.f32.mxu1 %v23658_v9  ;;  %v1215_v30 = vpop.f32.mrf.mxu1 }
 0x170   :  { %15317 = vmatpush1.msk.msra.mxu0 %vm118_vm1, %v5527_v29  ;;  %v5511_v32 = vpop.permute.xlu1 %5510  ;;  %v19250_v33 = vadd.f32 %v1215_v30, %v19157_v41 }
 0x171   :  { %15318 = vmatmul.mubr.msk.f32.vlgmr.msra.gmra.mxu0 %vm114_vm2, %v19233_v23  ;;  %v19254_v35 = vpop.f32.mrf.mxu1 }
 0x172   :  { %v5509_v36 = vpop.permute.xlu0 %5508  ;;  %5780 = vmatprep.mubr.f32.mxu0 %v23658_v9 }
 0x173   :  { %v5532_v37 = vsel %vm5526_vm11, %v5507_v26, %v5509_v36  ;;  %v1357_v38 = vpop.f32.mrf.mxu1  ;;  %v1286_v39 = vpop.f32.mrf.mxu0  ;;  %v5533_v47 = vsel %vm5526_vm11, %v5509_v36, %v5511_v32 }
 0x174   :  { %15322 = vmatprep.subr.msk.mxu0 %vm118_vm1, %v5532_v37  ;;  %v5515_v43 = vpop.permute.xlu1 %5514  ;;  %v1358_v41 = vadd.f32 %v1357_v38, %v19170_v48  ;;  %v1287_v45 = vadd.f32 %v1286_v39, %v19172_v49 }
 0x175   :  { %15323 = vmatpush1.msk.msra.mxu0 %vm118_vm1, %v5531_v40  ;;  %v17221_v46 = vpop.f32.mrf.mxu1  ;;  %v19270_v53 = vpop.f32.mrf.mxu0 }
 0x176   :  { %15324 = vmatmul.mubr.msk.f32.vlgmr.msra.gmra.mxu0 %vm114_vm2, %v19233_v23  ;;  %v5513_v50 = vpop.permute.xlu0 %5512 }
 0x177   :  { %v5534_v51 = vsel %vm5526_vm11, %v5511_v32, %v5513_v50  ;;  %5922 = vmatprep.mubr.f32.mxu0 %v23658_v9  ;;  %v5535_v49 = vsel %vm5526_vm11, %v5513_v50, %v5515_v43 }
 0x178   :  { %15325 = vmatprep.subr.msk.mxu1 %vm118_vm1, %v5534_v51  ;;  %v5519_v48 = vpop.permute.xlu1 %5518 }
 0x179   :  { %15326 = vmatpush1.msk.msra.mxu1 %vm118_vm1, %v5533_v47 }
 0x17a   :  { %15327 = vmatmul.mubr.msk.f32.vlgmr.msra.gmra.mxu1 %vm114_vm2, %v19233_v23  ;;  %v5517_v54 = vpop.permute.xlu0 %5516  ;;  %v1601_v55 = vpop.f32.mrf.mxu1 }
 0x17b   :  { %v5536_v56 = vsel %vm5526_vm11, %v5515_v43, %v5517_v54  ;;  %5993 = vmatprep.mubr.f32.mxu1 %v23658_v9  ;;  %v2033_v57 = vadd.f32 %v1601_v55, %v19196_v1  ;;  %v5537_v62 = vsel %vm5526_vm11, %v5517_v54, %v5519_v48 }
 0x17c   :  { %15328 = vmatprep.subr.msk.mxu0 %vm118_vm1, %v5536_v56  ;;  %v19290_v1 = vpop.f32.mrf.mxu1 }
 0x17d   :  { %15329 = vmatpush1.msk.msra.mxu0 %vm118_vm1, %v5535_v49  ;;  %v1530_v61 = vpop.f32.mrf.mxu0 }
 0x17e   :  { %15330 = vmatmul.mubr.msk.f32.vlgmr.msra.gmra.mxu0 %vm114_vm2, %v19233_v23  ;;  %v5521_v63 = vpop.permute.xlu0 %5520  ;;  %v2031_v0 = vadd.f32 %v1530_v61, %v19185_v59 }
 0x17f   :  { %v5538_v2 = vsel %vm5526_vm11, %v5519_v48, %v5521_v63  ;;  %v5523_v4 = vpop.permute.xlu1 %5522  ;;  %6064 = vmatprep.mubr.f32.mxu0 %v23658_v9  ;;  %v19286_v5 = vpop.f32.mrf.mxu0 }
 0x180   :  { %15331 = vmatprep.subr.msk.mxu1 %vm118_vm1, %v5538_v2  ;;  %v5539_v6 = vsel %vm5526_vm11, %v5521_v63, %v5523_v4 }
 0x181   :  { %15332 = vmatpush1.msk.msra.mxu1 %vm118_vm1, %v5537_v62 }
 0x182   :  { %15333 = vmatmul.mubr.msk.f32.vlgmr.msra.gmra.mxu1 %vm114_vm2, %v19233_v23  ;;  %v5525_v7 = vpop.permute.xlu0 %5524  ;;  %17252 = vmatprep.subr.mxu1 %v23658_v9  ;;  %v1672_v59 = vpop.f32.mrf.mxu0 }
 0x183   :  { %v5540_v10 = vsel %vm5526_vm11, %v5523_v4, %v5525_v7  ;;  %17253 = vmatpush3.msk.msra.mxu1 %vm118_vm1, %v5525_v7  ;;  %17254 = vmatprep.mubr.msk.f32.mxu1 %vm18296_vm4, %v23658_v9  ;;  %v2035_v12 = vadd.f32 %v1672_v59, %v19211_v8 }
 0x184   :  { %15334 = vmatprep.subr.msk.mxu0 %vm118_vm1, %v5540_v10  ;;  %v19307_v15 = vpop.f32.mrf.mxu0 }
 0x185   :  { %15335 = vmatpush1.msk.msra.mxu0 %vm118_vm1, %v5539_v6  ;;  %vm11018_vm1 = vcmask 277504  }
 0x186   :  { %15336 = vmatmul.mubr.msk.f32.vlgmr.msra.gmra.mxu0 %vm114_vm2, %v19233_v23  ;;  %17255 = vmatmul.mubr.msk.f32.vlgmr.msra.gmra.mxu1 %vm114_vm2, %v19233_v23  ;;  %v1743_v14 = vpop.f32.mrf.mxu1  ;;  %vm11575_vm2 = vcmask 916480  }
 0x187   :  { %v2037_v17 = vadd.f32 %v1743_v14, %v19225_v16 }
 0x188   :  { %v19310_v19 = vpop.f32.mrf.mxu1 }
 0x18a   :  { %v1814_v18 = vpop.f32.mrf.mxu0 }
 0x18b   :  { %v2039_v8 = vadd.f32 %v1814_v18, %v19238_v25 }
 0x18c   :  { %v19313_v22 = vpop.f32.mrf.mxu0 }
 0x18f   :  { %v1885_v20 = vpop.f32.mrf.mxu1 }
 0x190   :  { %v2041_v26 = vadd.f32 %v1885_v20, %v19250_v33 }
 0x191   :  { %v19316_v27 = vpop.f32.mrf.mxu1 }
 0x193   :  { %v2027_v29 = vpop.f32.mrf.mxu1  ;;  %v1956_v30 = vpop.f32.mrf.mxu0 }
 0x194   :  { %v2045_v23 = vadd.f32 %v2027_v29, %v1358_v41  ;;  %v2043_v32 = vadd.f32 %v1956_v30, %v1287_v45 }
 0x195   :  { %v17226_v36 = vpop.f32.mrf.mxu1  ;;  %v19318_v37 = vpop.f32.mrf.mxu0 }
 0x197   :  { %v2215_v16 = vpop.f32.mrf.mxu0 }
 0x198   :  { %v19320_v38 = vadd.f32 %v2215_v16, %v2031_v0 }
 0x199   :  { %v19322_v40 = vpop.f32.mrf.mxu0 }
 0x19a   :  { %v2286_v39 = vpop.f32.mrf.mxu1 }
 0x19b   :  { %v2718_v25 = vadd.f32 %v2286_v39, %v2033_v57 }
 0x19c   :  { %v19324_v43 = vpop.f32.mrf.mxu1 }
 0x19e   :  { %v2357_v46 = vpop.f32.mrf.mxu0 }
 0x19f   :  { %v19326_v33 = vadd.f32 %v2357_v46, %v2035_v12 }
 0x1a0   :  { %v19328_v50 = vpop.f32.mrf.mxu0 }
 0x1a2   :  { %v2428_v47 = vpop.f32.mrf.mxu1 }
 0x1a3   :  { %v2722_v41 = vadd.f32 %v2428_v47, %v2037_v17 }
 0x1a4   :  { %v19330_v51 = vpop.f32.mrf.mxu1 }
 0x1a6   :  { %v2499_v45 = vpop.f32.mrf.mxu0 }
 0x1a7   :  { %v19332_v48 = vadd.f32 %v2499_v45, %v2039_v8 }
 0x1a8   :  { %v19334_v54 = vpop.f32.mrf.mxu0 }
 0x1ab   :  { %v2570_v49 = vpop.f32.mrf.mxu1 }
 0x1ac   :  { %v2726_v55 = vadd.f32 %v2570_v49, %v2041_v26 }
 0x1ad   :  { %v19336_v56 = vpop.f32.mrf.mxu1 }
 0x1ae   :  { %23661 = vst [vmem:[#allocation8_spill] sm:$0xff] %v19336_v56 }
 0x1af   :  { %v2712_v57 = vpop.f32.mrf.mxu1  ;;  %v2641_v61 = vpop.f32.mrf.mxu0 }
 0x1b0   :  { %v2730_v62 = vadd.f32 %v2712_v57, %v2045_v23  ;;  %v2728_v63 = vadd.f32 %v2641_v61, %v2043_v32 }
 0x1b1   :  { %v17231_v0 = vpop.f32.mrf.mxu1  ;;  %v19338_v4 = vpop.f32.mrf.mxu0 }
 0x1b2   :  { %23662 = vst [vmem:[#allocation9_spill] sm:$0xff] %v19338_v4 }
 0x1b6   :  { %v2971_v2 = vpop.f32.mrf.mxu1 }
 0x1b7   :  { %v3403_v6 = vadd.f32 %v2971_v2, %v2718_v25 }
 0x1b8   :  { %v19344_v10 = vpop.f32.mrf.mxu1 }
 0x1b9   :  { %v19340_v7 = vpop.f32.mrf.mxu0 }
 0x1bb   :  { %v19342_v59 = vpop.f32.mrf.mxu0 }
 0x1be   :  { %v19346_v12 = vpop.f32.mrf.mxu0 }
 0x1c0   :  { %v19348_v18 = vpop.f32.mrf.mxu0 }
 0x1c2   :  { %v3113_v14 = vpop.f32.mrf.mxu1 }
 0x1c3   :  { %v3407_v17 = vadd.f32 %v3113_v14, %v2722_v41 }
 0x1c4   :  { %v19350_v8 = vpop.f32.mrf.mxu1 }
 0x1c6   :  { %v19352_v20 = vpop.f32.mrf.mxu0 }
 0x1c8   :  { %v19354_v30 = vpop.f32.mrf.mxu0 }
 0x1c9   :  { %23663 = vst [vmem:[#allocation10_spill] sm:$0xff] %v19354_v30 }
 0x1ca   :  { %v3255_v26 = vpop.f32.mrf.mxu1 }
 0x1cb   :  { %v3411_v29 = vadd.f32 %v3255_v26, %v2726_v55 }
 0x1cc   :  { %v19356_v23 = vpop.f32.mrf.mxu1 }
 0x1cd   :  { %23664 = vst [vmem:[#allocation11_spill] sm:$0xff] %v19356_v23 }
 0x1ce   :  { %v3326_v32 = vpop.f32.mrf.mxu0  ;;  %v3397_v36 = vpop.f32.mrf.mxu1 }
 0x1cf   :  { %v19358_v16 = vadd.f32 %v3326_v32, %v2728_v63  ;;  %v3415_v39 = vadd.f32 %v3397_v36, %v2730_v62 }
 0x1d0   :  { %v17236_v25 = vpop.f32.mrf.mxu1  ;;  %v19362_v57 = vpop.f32.mrf.mxu0 }
 0x1d1   :  { %23665 = vst [vmem:[#allocation12_spill] sm:$0xff] %v19358_v16  ;;  %23666 = vst [vmem:[#allocation13_spill] sm:$0xff] %v19362_v57 }
 0x1d3   :  { %v3585_v55 = vpop.f32.mrf.mxu0 }
 0x1d5   :  { %v3587_v63 = vpop.f32.mrf.mxu0 }
 0x1d6   :  { %v3656_v46 = vpop.f32.mrf.mxu1 }
 0x1d7   :  { %v4088_v47 = vadd.f32 %v3656_v46, %v3403_v6 }
 0x1d8   :  { %v3658_v41 = vpop.f32.mrf.mxu1 }
 0x1da   :  { %v19370_v62 = vpop.f32.mrf.mxu0 }
 0x1dc   :  { %v19374_v36 = vpop.f32.mrf.mxu0 }
 0x1de   :  { %v3798_v45 = vpop.f32.mrf.mxu1 }
 0x1df   :  { %v19360_v49 = vadd.f32 %v3798_v45, %v3407_v17 }
 0x1e0   :  { %v19364_v61 = vpop.f32.mrf.mxu1 }
 0x1e2   :  { %v19376_v17 = vpop.f32.mrf.mxu0 }
 0x1e3   :  { %23670 = vst [vmem:[#allocation17_spill] sm:$0xff] %v19376_v17 }
 0x1e4   :  { %v19378_v25 = vpop.f32.mrf.mxu0 }
 0x1e5   :  { %23671 = vst [vmem:[#allocation18_spill] sm:$0xff] %v19378_v25 }
 0x1e6   :  { %v3940_v0 = vpop.f32.mrf.mxu1 }
 0x1e7   :  { %v19366_v2 = vadd.f32 %v3940_v0, %v3411_v29 }
 0x1e8   :  { %v19368_v14 = vpop.f32.mrf.mxu1 }
 0x1e9   :  { %23667 = vst [vmem:[#allocation14_spill] sm:$0xff] %v19366_v2  ;;  %23668 = vst [vmem:[#allocation15_spill] sm:$0xff] %v19368_v14 }
 0x1ea   :  { %v4082_v26 = vpop.f32.mrf.mxu1  ;;  %v19380_v46 = vpop.f32.mrf.mxu0 }
 0x1eb   :  { %v19372_v32 = vadd.f32 %v4082_v26, %v3415_v39  ;;  %23672 = vst [vmem:[#allocation19_spill] sm:$0xff] %v19380_v46 }
 0x1ec   :  { %v17241_v6 = vpop.f32.mrf.mxu1  ;;  %v19382_v29 = vpop.f32.mrf.mxu0 }
 0x1ed   :  { %23669 = vst [vmem:[#allocation16_spill] sm:$0xff] %v19372_v32  ;;  %23673 = vst [vmem:[#allocation20_spill] sm:$0xff] %v19382_v29 }
 0x1f2   :  { %v4341_v45 = vpop.f32.mrf.mxu1 }
 0x1f4   :  { %v4343_v58 = vpop.f32.mrf.mxu1 }
 0x1f5   :  { %v4270_v0 = vpop.f32.mrf.mxu0 }
 0x1f7   :  { %v4272_v16 = vpop.f32.mrf.mxu0 }
 0x1fa   :  { %v19388_v39 = vpop.f32.mrf.mxu0 }
 0x1fc   :  { %v19394_v32 = vpop.f32.mrf.mxu0 }
 0x1fe   :  { %v19384_v9 = vpop.f32.mrf.mxu1 }
 0x1ff   :  { %23674 = vst [vmem:[#allocation21_spill] sm:$0xff] %v19384_v9 }
 0x200   :  { %v19386_v57 = vpop.f32.mrf.mxu1 }
 0x201   :  { %23675 = vst [vmem:[#allocation22_spill] sm:$0xff] %v19386_v57 }
 0x202   :  { %v19398_v46 = vpop.f32.mrf.mxu0 }
 0x203   :  { %23679 = vst [vmem:[#allocation26_spill] sm:$0xff] %v19398_v46 }
 0x204   :  { %v19400_v14 = vpop.f32.mrf.mxu0 }
 0x205   :  { %23680 = vst [vmem:[#allocation27_spill] sm:$0xff] %v19400_v14  ;;  %v863_v14 = vadd.f32 %v19188_v60, %v19096_v13 }
 0x206   :  { %v19390_v26 = vpop.f32.mrf.mxu1 }
 0x207   :  { %23676 = vst [vmem:[#allocation23_spill] sm:$0xff] %v19390_v26 }
 0x208   :  { %v19392_v6 = vpop.f32.mrf.mxu1 }
 0x209   :  { %23677 = vst [vmem:[#allocation24_spill] sm:$0xff] %v19392_v6  ;;  %v934_v6 = vadd.f32 %v19200_v3, %v19115_v21  ;;  %v2032_v21 = vadd.f32 %v19286_v5, %v863_v14 }
 0x20a   :  { %v19396_v2 = vpop.f32.mrf.mxu1  ;;  %v19402_v4 = vpop.f32.mrf.mxu0 }
 0x20b   :  { %23678 = vst [vmem:[#allocation25_spill] sm:$0xff] %v19396_v2  ;;  %23681 = vst [vmem:[#allocation28_spill] sm:$0xff] %v19402_v4 }
 0x20c   :  { %v17246_v29 = vpop.f32.mrf.mxu1  ;;  %v19404_v23 = vpop.f32.mrf.mxu0 }
 0x20d   :  { %23682 = vst [vmem:[#allocation29_spill] sm:$0xff] %v19404_v23  ;;  %v2034_v29 = vadd.f32 %v19290_v1, %v934_v6  ;;  %v1005_v1 = vadd.f32 %v19215_v11, %v19131_v28 }
 0x20f   :  { %v4955_v56 = vpop.f32.mrf.mxu0  ;;  %v2036_v5 = vadd.f32 %v19307_v15, %v1005_v1  ;;  %v3409_v1 = vadd.f32 %v19352_v20, %v19332_v48 }
 0x211   :  { %v4957_v26 = vpop.f32.mrf.mxu0  ;;  %v2721_v15 = vadd.f32 %v19328_v50, %v2036_v5 }
 0x212   :  { %v5026_v25 = vpop.f32.mrf.mxu1 }
 0x214   :  { %v5028_v57 = vpop.f32.mrf.mxu1 }
 0x216   :  { %v5097_v30 = vpop.f32.mrf.mxu0 }
 0x218   :  { %v19417_v23 = vpop.f32.mrf.mxu0 }
 0x21a   :  { %v19406_v17 = vpop.f32.mrf.mxu1 }
 0x21b   :  { %23683 = vst [vmem:[#allocation30_spill] sm:$0xff] %v19406_v17  ;;  %v2719_v17 = vadd.f32 %v19324_v43, %v2034_v29  ;;  %v3401_v43 = vadd.f32 %v19340_v7, %v19320_v38  ;;  %v4773_v29 = vadd.f32 %v4341_v45, %v4088_v47  ;;  %v19444_v38 = vpop.permute.xlu1 %6159  ;;  %v3405_v7 = vadd.f32 %v19346_v12, %v19326_v33 }
 0x21c   :  { %v19410_v2 = vpop.f32.mrf.mxu1 }
 0x21d   :  { %v3404_v13 = vadd.f32 %v19344_v10, %v2719_v17  ;;  %v4086_v11 = vadd.f32 %v3585_v55, %v3401_v43  ;;  %v5458_v17 = vadd.f32 %v5026_v25, %v4773_v29  ;;  %v3406_v55 = vadd.f32 %v19348_v18, %v2721_v15  ;;  %v23694_v15 = vld [vmem:[#allocation26_spill] sm:$0xff] }
 0x21e   :  { %v19422_v9 = vpop.f32.mrf.mxu0  ;;  %v4090_v50 = vadd.f32 %v19370_v62, %v3405_v7 }
 0x21f   :  { %v4089_v14 = vadd.f32 %v3658_v41, %v3404_v13  ;;  %v1218_v41 = vadd.f32 %v19254_v35, %v19163_v44 }
 0x220   :  { %v19430_v60 = vpop.f32.mrf.mxu0 }
 0x221   :  { %v4774_v10 = vadd.f32 %v4343_v58, %v4089_v14  ;;  %v2042_v62 = vadd.f32 %v19316_v27, %v1218_v41  ;;  %v23688_v14 = vld [vmem:[#allocation10_spill] sm:$0xff] }
 0x222   :  { %v19415_v4 = vpop.f32.mrf.mxu1 }
 0x223   :  { %23684 = vst [vmem:[#allocation31_spill] sm:$0xff] %v19415_v4  ;;  %v1076_v4 = vadd.f32 %v19235_v24, %v19144_v34  ;;  %v5459_v47 = vadd.f32 %v5028_v57, %v4774_v10  ;;  %v23690_v10 = vld [vmem:[#allocation22_spill] sm:$0xff] }
 0x224   :  { %v19419_v46 = vpop.f32.mrf.mxu1 }
 0x225   :  { %23685 = vst [vmem:[#allocation32_spill] sm:$0xff] %v19419_v46  ;;  %v2717_v46 = vadd.f32 %v19322_v40, %v2032_v21  ;;  %v2038_v34 = vadd.f32 %v19310_v19, %v1076_v4  ;;  %v4771_v40 = vadd.f32 %v4270_v0, %v4086_v11 }
 0x226   :  { %v19425_v3 = vpop.f32.mrf.mxu1 }
 0x227   :  { %23686 = vst [vmem:[#allocation33_spill] sm:$0xff] %v19425_v3  ;;  %v19438_v3 = vpop.f32.mrf.mxu0  ;;  %v3402_v28 = vadd.f32 %v19342_v59, %v2717_v46  ;;  %v5456_v19 = vadd.f32 %v4955_v56, %v4771_v40  ;;  %v2723_v57 = vadd.f32 %v19330_v51, %v2038_v34  ;;  %v23692_v34 = vld [vmem:[#allocation8_spill] sm:$0xff]  ;;  %v23693_v40 = vld [vmem:[#allocation18_spill] sm:$0xff] }
 0x228   :  { %v17251_v6 = vpop.f32.mrf.mxu1 }
 0x229   :  { %v1147_v6 = vadd.f32 %v19246_v31, %v19159_v42  ;;  %v4087_v24 = vadd.f32 %v3587_v63, %v3402_v28  ;;  %v19449_v59 = vpop.f32.mrf.mxu0  ;;  %v1289_v42 = vadd.f32 %v19270_v53, %v19176_v52  ;;  %v4091_v52 = vadd.f32 %v19374_v36, %v3406_v55 }
 0x22a   :  { %v4775_v53 = vadd.f32 %v19388_v39, %v4090_v50  ;;  %v3408_v45 = vadd.f32 %v19350_v8, %v2723_v57  ;;  %v23687_v8 = vld [vmem:[#allocation21_spill] sm:$0xff]  ;;  %v23696_v50 = vld [vmem:[#allocation27_spill] sm:$0xff] }
 0x22b   :  { %v4772_v31 = vadd.f32 %v4272_v16, %v4087_v24  ;;  %v2040_v12 = vadd.f32 %v19313_v22, %v1147_v6  ;;  %v2044_v46 = vadd.f32 %v19318_v37, %v1289_v42  ;;  %v4776_v36 = vadd.f32 %v19394_v32, %v4091_v52 }
 0x22c   :  { %v5460_v0 = vadd.f32 %v5097_v30, %v4775_v53  ;;  %v4093_v43 = vadd.f32 %v19364_v61, %v3408_v45  ;;  %v4777_v5 = vadd.f32 %v23687_v8, %v19360_v49  ;;  %v2727_v24 = vadd.f32 %v23692_v34, %v2042_v62  ;;  %v23698_v53 = vld [vmem:[#allocation15_spill] sm:$0xff]  ;;  %v23699_v62 = vld [vmem:[#allocation14_spill] sm:$0xff]  ;;  %v23702_v8 = vld [vmem:[#allocation12_spill] sm:$0xff] }
 0x22d   :  { %v5457_v44 = vadd.f32 %v4957_v26, %v4772_v31  ;;  %v2725_v26 = vadd.f32 %v19334_v54, %v2040_v12  ;;  %v5461_v30 = vadd.f32 %v19417_v23, %v4776_v36  ;;  %v23689_v54 = vld [vmem:[#allocation17_spill] sm:$0xff] }
 0x22e   :  { %v5711_v21 = vpop.f32.mrf.mxu1  ;;  %v4094_v28 = vadd.f32 %v23689_v54, %v3409_v1  ;;  %v4778_v61 = vadd.f32 %v23690_v10, %v4093_v43  ;;  %v23706_v10 = vld [vmem:[#allocation20_spill] sm:$0xff]  ;;  %v23709_v34 = vld [vmem:[#allocation25_spill] sm:$0xff] }
 0x22f   :  { %v6143_v58 = vadd.f32 %v5711_v21, %v5458_v17  ;;  %v3410_v29 = vadd.f32 %v23688_v14, %v2725_v26  ;;  %v23691_v17 = vld [vmem:[#allocation30_spill] sm:$0xff] }
 0x230   :  { %v5713_v4 = vpop.f32.mrf.mxu1  ;;  %v5462_v6 = vadd.f32 %v23691_v17, %v4777_v5  ;;  %v4779_v7 = vadd.f32 %v23694_v15, %v4094_v28  ;;  %v5463_v41 = vadd.f32 %v19410_v2, %v4778_v61  ;;  %v23703_v5 = vld [vmem:[#allocation19_spill] sm:$0xff]  ;;  %v23707_v17 = vld [vmem:[#allocation28_spill] sm:$0xff] }
 0x231   :  { %v6144_v63 = vadd.f32 %v5713_v4, %v5459_v47  ;;  %v5640_v25 = vpop.f32.mrf.mxu0  ;;  %v19458_v33 = vadd.f32 %v19444_v38, %v6143_v58  ;;  %v4095_v21 = vadd.f32 %v23693_v40, %v3410_v29  ;;  %v23695_v4 = vld [vmem:[#allocation11_spill] sm:$0xff] }
 0x232   :  { %v6141_v35 = vadd.f32 %v5640_v25, %v5456_v19  ;;  %v3412_v55 = vadd.f32 %v23695_v4, %v2727_v24  ;;  %v5464_v12 = vadd.f32 %v19422_v9, %v4779_v7  ;;  %v23705_v29 = vld [vmem:[#allocation31_spill] sm:$0xff] }
 0x233   :  { %v19465_v56 = vadd.f32 %v19444_v38, %v6144_v63  ;;  %v5642_v18 = vpop.f32.mrf.mxu0  ;;  %v6179_v16 = vmax.f32 %v19458_v33, 0.0  ;;  %v4780_v63 = vadd.f32 %v23696_v50, %v4095_v21  ;;  %v23710_v21 = vld [vmem:[#allocation32_spill] sm:$0xff]  ;;  %v23712_v50 = vld [vmem:[#allocation33_spill] sm:$0xff] }
 0x234   :  { %v19471_v22 = vadd.f32 %v19444_v38, %v6141_v35  ;;  %v6142_v51 = vadd.f32 %v5642_v18, %v5457_v44  ;;  %v23697_v35 = vld [vmem:[#allocation9_spill] sm:$0xff]  ;;  %v4097_v18 = vadd.f32 %v23698_v53, %v3412_v55 }
 0x235   :  { %v6180_v39 = vmax.f32 %v19465_v56, 0.0  ;;  %v2729_v52 = vadd.f32 %v23697_v35, %v2044_v46  ;;  %v5465_v36 = vadd.f32 %v19430_v60, %v4780_v63  ;;  %v23701_v46 = vld [vmem:[#allocation13_spill] sm:$0xff] }
 0x236   :  { %v6177_v27 = vmax.f32 %v19471_v22, 0.0  ;;  %v19481_v37 = vadd.f32 %v19444_v38, %v6142_v51  ;;  %v5782_v13 = vpop.f32.mrf.mxu0  ;;  %v23700_v51 = vld [vmem:[#allocation23_spill] sm:$0xff] }
 0x237   :  { %v6145_v32 = vadd.f32 %v5782_v13, %v5460_v0  ;;  %v4781_v45 = vadd.f32 %v23700_v51, %v23699_v62  ;;  %v3414_v43 = vadd.f32 %v23701_v46, %v2729_v52 }
 0x238   :  { %v6178_v48 = vmax.f32 %v19481_v37, 0.0  ;;  %v5784_v20 = vpop.f32.mrf.mxu0  ;;  %v17358_v11 = vpack.i.bf16 %v6177_v27, %v6180_v39 }
 0x239   :  { %v19497_v49 = vadd.f32 %v19444_v38, %v6145_v32  ;;  %v6146_v23 = vadd.f32 %v5784_v20, %v5461_v30  ;;  %v4098_v30 = vadd.f32 %v23703_v5, %v23702_v8  ;;  %v23704_v32 = vld [vmem:[#allocation24_spill] sm:$0xff]  ;;  %v5466_v54 = vadd.f32 %v23705_v29, %v4781_v45 }
 0x23a   :  { %v5853_v47 = vpop.f32.mrf.mxu1  ;;  %17359 = vrot.lane.b32.xlu1 %v17358_v11, %s18292_s20  ;;  %v17353_v58 = vpack.i.bf16 %v6179_v16, %v6178_v48  ;;  %v4782_v14 = vadd.f32 %v23704_v32, %v4097_v18  ;;  %v4099_v61 = vadd.f32 %v23706_v10, %v3414_v43  ;;  %v17475_v18 = vld [vmem:[%s23646_s3 + $0x118] ss:$20 sps:$4 sm:$0xff]   ;;  %v17478_v32 = vld [vmem:[%s23646_s3 + $0xf0] ss:$20 sps:$4 sm:$0xff]  }
 0x23b   :  { %v6181_v42 = vmax.f32 %v19497_v49, 0.0  ;;  %v19510_v31 = vadd.f32 %v19444_v38, %v6146_v23  ;;  %v6147_v19 = vadd.f32 %v5853_v47, %v5462_v6  ;;  %v4783_v6 = vadd.f32 %v23707_v17, %v4098_v30  ;;  %v23708_v23 = vld [vmem:[#allocation16_spill] sm:$0xff]  ;;  %v17573_v49 = vld [vmem:[%s23646_s3 + $0x61c] ss:$20 sps:$4 sm:$0xff]  }
 0x23c   :  { %v5855_v25 = vpop.f32.mrf.mxu1  ;;  %17354 = vrot.lane.b32.xlu0 %v17353_v58, %s18292_s20  ;;  %v4785_v24 = vadd.f32 %v23709_v34, %v23708_v23  ;;  %v5467_v15 = vadd.f32 %v23710_v21, %v4782_v14  ;;  %v17489_v14 = vld [vmem:[%s23646_s3 + $0x374] ss:$20 sps:$4 sm:$0xff]   ;;  %v17487_v10 = vld [vmem:[%s23646_s3 + $0x370] ss:$20 sps:$4 sm:$0xff]  }
 0x23d   :  { %v6182_v57 = vmax.f32 %v19510_v31, 0.0  ;;  %v19518_v44 = vadd.f32 %v19444_v38, %v6147_v19  ;;  %v6148_v2 = vadd.f32 %v5855_v25, %v5463_v41  ;;  %v23711_v41 = vld [vmem:[#allocation29_spill] sm:$0xff]  ;;  %v5468_v4 = vadd.f32 %v19438_v3, %v4783_v6  ;;  %v17492_v23 = vld [vmem:[%s23646_s3 + $0xa4] ss:$20 sps:$4 sm:$0xff]  }
 0x23e   :  { %v5924_v0 = vpop.f32.mrf.mxu0  ;;  %v4784_v19 = vadd.f32 %v23711_v41, %v4099_v61  ;;  %v5470_v63 = vadd.f32 %v23712_v50, %v4785_v24  ;;  %v17477_v3 = vld [vmem:[%s23646_s3 + $0x11c] ss:$20 sps:$4 sm:$0xff]   ;;  %v17495_v61 = vld [vmem:[%s23646_s3 + $0x34c] ss:$20 sps:$4 sm:$0xff]   ;;  %v23713_v6 = vmov 0.0  }
 0x23f   :  { %v6183_v26 = vmax.f32 %v19518_v44, 0.0  ;;  %v19527_v9 = vadd.f32 %v19444_v38, %v6148_v2  ;;  %v6149_v1 = vadd.f32 %v5924_v0, %v5464_v12  ;;  %v17363_v13 = vpack.i.bf16 %v6182_v57, %v6181_v42  ;;  %v17481_v0 = vld [vmem:[%s23646_s3 + $0x398] ss:$20 sps:$4 sm:$0xff]   ;;  %10038 = vmatprep.subr.bf16.mxu0 %v17477_v3  ;;  %v17493_v34 = vld [vmem:[%s23646_s3 + $0x348] ss:$20 sps:$4 sm:$0xff]  }
 0x240   :  { %v5926_v60 = vpop.f32.mrf.mxu0  ;;  %v5469_v35 = vadd.f32 %v19449_v59, %v4784_v19  ;;  %v17480_v59 = vld [vmem:[%s23646_s3 + $0xf4] ss:$20 sps:$4 sm:$0xff]   ;;  %10039 = vmatpush1.bf16.msra.mxu0 %v17475_v18  ;;  %v17501_v24 = vld [vmem:[%s23646_s3 + $0x324] ss:$20 sps:$4 sm:$0xff]   ;;  %v17498_v21 = vld [vmem:[%s23646_s3 + $0x7c] ss:$20 sps:$4 sm:$0xff]  }
 0x241   :  { %v6184_v28 = vmax.f32 %v19527_v9, 0.0  ;;  %v19540_v20 = vadd.f32 %v19444_v38, %v6149_v1  ;;  %v6150_v11 = vadd.f32 %v5926_v60, %v5465_v36  ;;  %17364 = vrot.lane.b32.xlu0 %v17363_v13, %s18292_s20  ;;  %v17483_v13 = vld [vmem:[%s23646_s3 + $0x39c] ss:$20 sps:$4 sm:$0xff]   ;;  %10040 = vmatprep.subr.bf16.mxu0 %v17480_v59  ;;  %v17486_v60 = vld [vmem:[%s23646_s3 + $0xcc] ss:$20 sps:$4 sm:$0xff]  }
 0x242   :  { %v5995_v40 = vpop.f32.mrf.mxu1  ;;  %10079 = vmatprep.subr.bf16.mxu1 %v17483_v13  ;;  %v17496_v41 = vld [vmem:[%s23646_s3 + $0x78] ss:$20 sps:$4 sm:$0xff]   ;;  %v17504_v19 = vld [vmem:[%s23646_s3 + $0x54] ss:$20 sps:$4 sm:$0xff]   ;;  %v17502_v50 = vld [vmem:[%s23646_s3 + $0x50] ss:$20 sps:$4 sm:$0xff]  }
 0x243   :  { %v6185_v7 = vmax.f32 %v19540_v20, 0.0  ;;  %v19550_v47 = vadd.f32 %v19444_v38, %v6150_v11  ;;  %v6151_v58 = vadd.f32 %v5995_v40, %v5466_v54  ;;  %10080 = vmatpush1.bf16.msra.mxu1 %v17481_v0  ;;  %v17490_v40 = vld [vmem:[%s23646_s3 + $0xa0] ss:$20 sps:$4 sm:$0xff]   ;;  %v17517_v18 = vld [vmem:[%s23646_s3 + $0x2a8] ss:$20 sps:$4 sm:$0xff]   ;;  %v17373_v37 = vpack.i.bf16 %v6184_v28, %v6183_v26 }
 0x244   :  { %v5997_v55 = vpop.f32.mrf.mxu1  ;;  %10081 = vmatprep.subr.bf16.mxu1 %v17489_v14  ;;  %10041 = vmatpush1.bf16.msra.mxu0 %v17478_v32  ;;  %v17525_v3 = vld [vmem:[%s23646_s3 + $0x284] ss:$20 sps:$4 sm:$0xff]   ;;  %v17523_v59 = vld [vmem:[%s23646_s3 + $0x280] ss:$20 sps:$4 sm:$0xff]   ;;  %v17531_v0 = vld [vmem:[%s23646_s3 + $0x4dc] ss:$20 sps:$4 sm:$0xff]  }
 0x245   :  { %v6186_v25 = vmax.f32 %v19550_v47, 0.0  ;;  %v19557_v12 = vadd.f32 %v19444_v38, %v6151_v58  ;;  %v6152_v2 = vadd.f32 %v5997_v55, %v5467_v15  ;;  %10042 = vmatprep.subr.bf16.mxu0 %v17486_v60  ;;  %v17499_v15 = vld [vmem:[%s23646_s3 + $0x320] ss:$20 sps:$4 sm:$0xff]   ;;  %v17507_v58 = vld [vmem:[%s23646_s3 + $0x2fc] ss:$20 sps:$4 sm:$0xff]  }
 0x246   :  { %v6066_v52 = vpop.f32.mrf.mxu0  ;;  %v6137_v53 = vpop.f32.mrf.mxu1  ;;  %v17513_v55 = vld [vmem:[%s23646_s3 + $0x2d4] ss:$20 sps:$4 sm:$0xff]   ;;  %v17534_v32 = vld [vmem:[%s23646_s3 + $0x20c] ss:$20 sps:$4 sm:$0xff]   ;;  %v17535_v14 = vld [vmem:[%s23646_s3 + $0x4b0] ss:$20 sps:$4 sm:$0xff]  }
 0x247   :  { %v6187_v62 = vmax.f32 %v19557_v12, 0.0  ;;  %v19568_v51 = vadd.f32 %v19444_v38, %v6152_v2  ;;  %v6153_v45 = vadd.f32 %v6066_v52, %v5468_v4  ;;  %v6155_v36 = vadd.f32 %v6137_v53, %v5470_v63  ;;  %10082 = vmatpush1.bf16.msra.mxu1 %v17487_v10  ;;  %v17505_v4 = vld [vmem:[%s23646_s3 + $0x2f8] ss:$20 sps:$4 sm:$0xff]   ;;  %v17511_v2 = vld [vmem:[%s23646_s3 + $0x2d0] ss:$20 sps:$4 sm:$0xff]  }
 0x248   :  { %v6068_v1 = vpop.f32.mrf.mxu0  ;;  %v17256_v46 = vpop.f32.mrf.mxu1  ;;  %10083 = vmatprep.subr.bf16.mxu1 %v17495_v61  ;;  %v17510_v63 = vld [vmem:[%s23646_s3 + $0x2c] ss:$20 sps:$4 sm:$0xff]   ;;  %v17508_v52 = vld [vmem:[%s23646_s3 + $0x28] ss:$20 sps:$4 sm:$0xff]   ;;  %v17516_v53 = vld [vmem:[%s23646_s3 + $0x4] ss:$20 sps:$4 sm:$0xff]   ;;  %v17383_v56 = vpack.i.bf16 %v6186_v25, %v6185_v7 }
 0x249   :  { %v6188_v43 = vmax.f32 %v19568_v51, 0.0  ;;  %v19581_v8 = vadd.f32 %v19444_v38, %v6153_v45  ;;  %v6176_v5 = vadd.f32 %v19444_v38, %v6155_v36  ;;  %v6154_v30 = vadd.f32 %v6068_v1, %v5469_v35  ;;  %v17519_v35 = vld [vmem:[%s23646_s3 + $0x2ac] ss:$20 sps:$4 sm:$0xff]   ;;  %v17522_v36 = vld [vmem:[%s23646_s3 + $0x25c] ss:$20 sps:$4 sm:$0xff]  }
 0x24a   :  { %v17514_v45 = vld [vmem:[%s23646_s3] ss:$20 sps:$4 sm:$0xff]   ;;  %v17520_v1 = vld [vmem:[%s23646_s3 + $0x258] ss:$20 sps:$4 sm:$0xff]   ;;  %v17541_v61 = vld [vmem:[%s23646_s3 + $0x488] ss:$20 sps:$4 sm:$0xff]  }
 0x24b   :  { %v6189_v29 = vmax.f32 %v19581_v8, 0.0  ;;  %v6191_v54 = vmax.f32 %v6176_v5, 0.0  ;;  %v19595_v11 = vadd.f32 %v19444_v38, %v6154_v30  ;;  %v17484_v38 = vld [vmem:[%s23646_s3 + $0xc8] ss:$20 sps:$4 sm:$0xff]   ;;  %10084 = vmatpush1.bf16.msra.mxu1 %v17493_v34  ;;  %v17529_v46 = vld [vmem:[%s23646_s3 + $0x4d8] ss:$20 sps:$4 sm:$0xff]  }
 0x24c   :  { %10043 = vmatpush1.bf16.msra.mxu0 %v17484_v38  ;;  %10085 = vmatprep.subr.bf16.mxu1 %v17501_v24  ;;  %v17528_v13 = vld [vmem:[%s23646_s3 + $0x234] ss:$20 sps:$4 sm:$0xff]   ;;  %v17526_v30 = vld [vmem:[%s23646_s3 + $0x230] ss:$20 sps:$4 sm:$0xff]   ;;  %v17543_v60 = vld [vmem:[%s23646_s3 + $0x48c] ss:$20 sps:$4 sm:$0xff]  }
 0x24d   :  { %6207 = vst.msk [vmem:[#allocation2 + $0x70] sm:$0xff] %vm6206_vm12, %v6191_v54  ;;  %v6190_v17 = vmax.f32 %v19595_v11, 0.0  ;;  %10044 = vmatprep.subr.bf16.mxu0 %v17492_v23  ;;  %v17537_v5 = vld [vmem:[%s23646_s3 + $0x4b4] ss:$20 sps:$4 sm:$0xff]   ;;  %v17540_v10 = vld [vmem:[%s23646_s3 + $0x1e4] ss:$20 sps:$4 sm:$0xff]  }
 0x24e   :  { %6209 = vst.msk [vmem:[#allocation2 + $0x70] sm:$0xff] %vm6208_vm13, %v23713_v6  ;;  %v17532_v54 = vld [vmem:[%s23646_s3 + $0x208] ss:$20 sps:$4 sm:$0xff]   ;;  %v17549_v38 = vld [vmem:[%s23646_s3 + $0x464] ss:$20 sps:$4 sm:$0xff]  }
 0x24f   :  { %10086 = vmatpush1.bf16.msra.mxu1 %v17499_v15  ;;  %v17538_v23 = vld [vmem:[%s23646_s3 + $0x1e0] ss:$20 sps:$4 sm:$0xff]   ;;  %v17546_v34 = vld [vmem:[%s23646_s3 + $0x1bc] ss:$20 sps:$4 sm:$0xff]   ;;  %v17592_v51 = vld [vmem:[%s23646_s3 + $0x578] ss:$20 sps:$4 sm:$0xff]  }
 0x250   :  { %10045 = vmatpush1.bf16.msra.mxu0 %v17490_v40  ;;  %10087 = vmatprep.subr.bf16.mxu1 %v17507_v58  ;;  %v17547_v24 = vld [vmem:[%s23646_s3 + $0x460] ss:$20 sps:$4 sm:$0xff]   ;;  %v17555_v40 = vld [vmem:[%s23646_s3 + $0x43c] ss:$20 sps:$4 sm:$0xff]   ;;  %v17553_v58 = vld [vmem:[%s23646_s3 + $0x438] ss:$20 sps:$4 sm:$0xff]  }
 0x251   :  { %10046 = vmatprep.subr.bf16.mxu0 %v17498_v21  ;;  %v17544_v21 = vld [vmem:[%s23646_s3 + $0x1b8] ss:$20 sps:$4 sm:$0xff]   ;;  %v17552_v15 = vld [vmem:[%s23646_s3 + $0x194] ss:$20 sps:$4 sm:$0xff]   ;;  %v17574_v44 = vld [vmem:[%s23646_s3 + $0x5f0] ss:$20 sps:$4 sm:$0xff]  }
 0x252   :  { %v17591_v47 = vld [vmem:[%s23646_s3 + $0x84c] ss:$20 sps:$4 sm:$0xff]   ;;  %v17600_v8 = vld [vmem:[%s23646_s3 + $0x554] ss:$20 sps:$4 sm:$0xff]  }
 0x253   :  { %10088 = vmatpush1.bf16.msra.mxu1 %v17505_v4  ;;  %v17556_v4 = vld [vmem:[%s23646_s3 + $0x168] ss:$20 sps:$4 sm:$0xff]   ;;  %v17586_v12 = vld [vmem:[%s23646_s3 + $0x5a0] ss:$20 sps:$4 sm:$0xff]  }
 0x254   :  { %10047 = vmatpush1.bf16.msra.mxu0 %v17496_v41  ;;  %10089 = vmatprep.subr.bf16.mxu1 %v17513_v55  ;;  %v17550_v41 = vld [vmem:[%s23646_s3 + $0x190] ss:$20 sps:$4 sm:$0xff]   ;;  %v17561_v55 = vld [vmem:[%s23646_s3 + $0x414] ss:$20 sps:$4 sm:$0xff]   ;;  %v17678_v11 = vld [vmem:[%s23646_s3 + $0xacc] ss:$20 sps:$4 sm:$0xff]  }
 0x255   :  { %10048 = vmatprep.subr.bf16.mxu0 %v17504_v19  ;;  %v17558_v19 = vld [vmem:[%s23646_s3 + $0x16c] ss:$20 sps:$4 sm:$0xff]  }
 0x257   :  { %10090 = vmatpush1.bf16.msra.mxu1 %v17511_v2  ;;  %v17564_v2 = vld [vmem:[%s23646_s3 + $0x144] ss:$20 sps:$4 sm:$0xff]  }
 0x258   :  { %10049 = vmatpush1.bf16.msra.mxu0 %v17502_v50  ;;  %10091 = vmatprep.subr.bf16.mxu1 %v17519_v35  ;;  %v17559_v50 = vld [vmem:[%s23646_s3 + $0x410] ss:$20 sps:$4 sm:$0xff]   ;;  %v17562_v35 = vld [vmem:[%s23646_s3 + $0x140] ss:$20 sps:$4 sm:$0xff]  }
 0x259   :  { %10050 = vmatprep.subr.bf16.mxu0 %v17510_v63 }
 0x25b   :  { %10092 = vmatpush1.bf16.msra.mxu1 %v17517_v18  ;;  %v17565_v18 = vld [vmem:[%s23646_s3 + $0x3e8] ss:$20 sps:$4 sm:$0xff]  }
 0x25c   :  { %10051 = vmatpush1.bf16.msra.mxu0 %v17508_v52  ;;  %10093 = vmatprep.subr.bf16.mxu1 %v17525_v3  ;;  %v17567_v52 = vld [vmem:[%s23646_s3 + $0x3ec] ss:$20 sps:$4 sm:$0xff]  }
 0x25d   :  { %10052 = vmatprep.subr.bf16.mxu0 %v17516_v53 }
 0x25f   :  { %10094 = vmatpush1.bf16.msra.mxu1 %v17523_v59 }
 0x260   :  { %10053 = vmatpush1.bf16.msra.mxu0 %v17514_v45  ;;  %10095 = vmatprep.subr.bf16.mxu1 %v17531_v0 }
 0x261   :  { %10054 = vmatprep.subr.bf16.mxu0 %v17522_v36 }
 0x263   :  { %10096 = vmatpush2.bf16.msra.mxu1 %v17529_v46  ;;  %v17570_v46 = vld [vmem:[%s23646_s3 + $0x3c4] ss:$20 sps:$4 sm:$0xff]  }
 0x264   :  { %10055 = vmatpush2.bf16.msra.mxu0 %v17520_v1  ;;  %10097 = vmatprep.subr.bf16.mxu1 %v17537_v5 }
 0x265   :  { %10056 = vmatprep.subr.bf16.mxu0 %v17528_v13 }
 0x267   :  { %10098 = vmatpush2.bf16.msra.mxu1 %v17535_v14  ;;  %v17568_v14 = vld [vmem:[%s23646_s3 + $0x3c0] ss:$20 sps:$4 sm:$0xff]  }
 0x268   :  { %10057 = vmatpush2.bf16.msra.mxu0 %v17526_v30  ;;  %10099 = vmatprep.subr.bf16.mxu1 %v17543_v60 }
 0x269   :  { %10058 = vmatprep.subr.bf16.mxu0 %v17534_v32 }
 0x26b   :  { %10100 = vmatpush2.bf16.msra.mxu1 %v17541_v61 }
 0x26c   :  { %10059 = vmatpush2.bf16.msra.mxu0 %v17532_v54  ;;  %10101 = vmatprep.subr.bf16.mxu1 %v17549_v38  ;;  %v17403_v38 = vpack.i.bf16 %v6190_v17, %v6189_v29 }
 0x26d   :  { %10060 = vmatprep.subr.bf16.mxu0 %v17540_v10 }
 0x26f   :  { %10102 = vmatpush2.bf16.msra.mxu1 %v17547_v24 }
 0x270   :  { %10061 = vmatpush2.bf16.msra.mxu0 %v17538_v23  ;;  %10103 = vmatprep.subr.bf16.mxu1 %v17555_v40 }
 0x271   :  { %10062 = vmatprep.subr.bf16.mxu0 %v17546_v34 }
 0x273   :  { %10104 = vmatpush2.bf16.msra.mxu1 %v17553_v58 }
 0x274   :  { %10063 = vmatpush2.bf16.msra.mxu0 %v17544_v21  ;;  %10105 = vmatprep.subr.bf16.mxu1 %v17561_v55 }
 0x275   :  { %10064 = vmatprep.subr.bf16.mxu0 %v17552_v15 }
 0x277   :  { %10106 = vmatpush2.bf16.msra.mxu1 %v17559_v50 }
 0x278   :  { %10065 = vmatpush2.bf16.msra.mxu0 %v17550_v41  ;;  %10107 = vmatprep.subr.bf16.mxu1 %v17567_v52 }
 0x279   :  { %10066 = vmatprep.subr.bf16.mxu0 %v17558_v19 }
 0x27b   :  { %10108 = vmatpush2.bf16.msra.mxu1 %v17565_v18 }
 0x27c   :  { %10067 = vmatpush2.bf16.msra.mxu0 %v17556_v4  ;;  %10109 = vmatprep.subr.bf16.mxu1 %v17570_v46 }
 0x27d   :  { %10068 = vmatprep.subr.bf16.mxu0 %v17564_v2 }
 0x27f   :  { %10110 = vmatpush2.bf16.msra.mxu1 %v17568_v14 }
 0x280   :  { %10069 = vmatpush2.bf16.msra.mxu0 %v17562_v35 }
 0x281   :  { %10120 = vmatprep.subr.bf16.mxu0 %v17573_v49 }
 0x2ac   :  { %v17360_v63 = vpop.permute.xlu1 %17359 }
 0x2ad   :  { %v17362_v3 = vunpack.i.h.bf16 %v17360_v63  ;;  %v17361_v45 = vunpack.i.l.bf16 %v17360_v63 }
 0x2ae   :  { %v17355_v53 = vpop.permute.xlu0 %17354 }
 0x2af   :  { %v17357_v36 = vunpack.i.h.bf16 %v17355_v53  ;;  %v17356_v59 = vunpack.i.l.bf16 %v17355_v53  ;;  %v17571_v53 = vld [vmem:[%s23646_s3 + $0x618] ss:$20 sps:$4 sm:$0xff]  }
 0x2b1   :  { %v6272_v0 = vsel %vm746_vm3, %v17357_v36, %v17361_v45  ;;  %v6270_v1 = vsel %vm746_vm3, %v17362_v3, %v17356_v59  ;;  %v6271_v13 = vsel %vm746_vm3, %v17356_v59, %v17357_v36 }
 0x2b2   :  { %v6301_v5 = vmax.f32 %v6179_v16, %v6272_v0  ;;  %v6299_v30 = vmax.f32 %v6177_v27, %v6270_v1  ;;  %v6300_v32 = vmax.f32 %v6178_v48, %v6271_v13 }
 0x2b3   :  { %v17365_v60 = vpop.permute.xlu0 %17364 }
 0x2b4   :  { %v17367_v54 = vunpack.i.h.bf16 %v17365_v60  ;;  %v17366_v10 = vunpack.i.l.bf16 %v17365_v60  ;;  %6329 = vrot.lane.b32.xlu0 %v6299_v30, %s18302_s18  ;;  %v17368_v61 = vpack.i.bf16 %v6301_v5, %v6300_v32 }
 0x2b6   :  { %v6273_v33 = vsel %vm746_vm3, %v17361_v45, %v17366_v10  ;;  %v6274_v16 = vsel %vm746_vm3, %v17366_v10, %v17367_v54  ;;  %17369 = vrot.lane.b32.xlu1 %v17368_v61, %s18302_s18  ;;  %v17576_v45 = vld [vmem:[%s23646_s3 + $0x5f4] ss:$20 sps:$4 sm:$0xff]   ;;  %v17582_v10 = vld [vmem:[%s23646_s3 + $0x5cc] ss:$20 sps:$4 sm:$0xff]  }
 0x2b7   :  { %v6302_v22 = vmax.f32 %v6180_v39, %v6273_v33  ;;  %v19785_v27 = vmax.f32 %v6181_v42, %v6274_v16  ;;  %v17393_v39 = vpack.i.bf16 %v6188_v43, %v6187_v62  ;;  %v17579_v42 = vld [vmem:[%s23646_s3 + $0x89c] ss:$20 sps:$4 sm:$0xff]  }
 0x2b8   :  { %10161 = vmatprep.subr.bf16.mxu1 %v17579_v42 }
 0x2b9   :  { %v17378_v48 = vpack.i.bf16 %v19785_v27, %v6302_v22 }
 0x2ba   :  { %17374 = vrot.lane.b32.xlu1 %v17373_v37, %s18292_s20 }
 0x2bb   :  { %17379 = vrot.lane.b32.xlu0 %v17378_v48, %s18302_s18 }
 0x2be   :  { %17384 = vrot.lane.b32.xlu1 %v17383_v56, %s18292_s20  ;;  %v17583_v56 = vld [vmem:[%s23646_s3 + $0x870] ss:$20 sps:$4 sm:$0xff]  }
 0x2c2   :  { %17394 = vrot.lane.b32.xlu1 %v17393_v39, %s18292_s20  ;;  %v17588_v39 = vld [vmem:[%s23646_s3 + $0x5a4] ss:$20 sps:$4 sm:$0xff]  }
 0x2c6   :  { %17404 = vrot.lane.b32.xlu1 %v17403_v38, %s18292_s20 }
 0x326   :  { %v6330_v34 = vpop.permute.xlu0 %6329 }
 0x328   :  { %v17370_v23 = vpop.permute.xlu1 %17369 }
 0x329   :  { %v17372_v24 = vunpack.i.h.bf16 %v17370_v23  ;;  %v17371_v40 = vunpack.i.l.bf16 %v17370_v23 }
 0x32b   :  { %v6360_v21 = vsel %vm6359_vm14, %v6330_v34, %v17371_v40  ;;  %v6361_v15 = vsel %vm6359_vm14, %v17371_v40, %v17372_v24 }
 0x32c   :  { %v6389_v58 = vmax.f32 %v6299_v30, %v6360_v21  ;;  %v17375_v41 = vpop.permute.xlu1 %17374  ;;  %v6390_v19 = vmax.f32 %v6300_v32, %v6361_v15  ;;  %v17589_v21 = vld [vmem:[%s23646_s3 + $0x848] ss:$20 sps:$4 sm:$0xff]  }
 0x32d   :  { %v17377_v4 = vunpack.i.h.bf16 %v17375_v41  ;;  %v17376_v55 = vunpack.i.l.bf16 %v17375_v41  ;;  %v19817_v50 = vpop.permute.xlu0 %17379  ;;  %v17594_v15 = vld [vmem:[%s23646_s3 + $0x57c] ss:$20 sps:$4 sm:$0xff]  }
 0x32e   :  { %v17382_v63 = vunpack.i.h.bf16 %v19817_v50  ;;  %v17381_v2 = vunpack.i.l.bf16 %v19817_v50  ;;  %v19821_v35 = vpack.c.bf16 %v6390_v19, %v6390_v19  ;;  %v19823_v52 = vpack.c.bf16 %v6389_v58, %v6389_v58  ;;  %v17597_v19 = vld [vmem:[%s23646_s3 + $0x824] ss:$20 sps:$4 sm:$0xff]  }
 0x32f   :  { %v6275_v18 = vsel %vm746_vm3, %v17367_v54, %v17376_v55  ;;  %v6276_v3 = vsel %vm746_vm3, %v17376_v55, %v17377_v4  ;;  %v17577_v54 = vld [vmem:[%s23646_s3 + $0x898] ss:$20 sps:$4 sm:$0xff]   ;;  %v17598_v55 = vld [vmem:[%s23646_s3 + $0x550] ss:$20 sps:$4 sm:$0xff]  }
 0x330   :  { %v19835_v36 = vmax.f32 %v6182_v57, %v6275_v18  ;;  %v19839_v59 = vmax.f32 %v6183_v26, %v6276_v3  ;;  %v6362_v0 = vsel %vm6359_vm14, %v17372_v24, %v17381_v2  ;;  %v17385_v1 = vpop.permute.xlu1 %17384  ;;  %10070 = vmatprep.mubr.bf16.mxu0 %v19821_v35  ;;  %v6363_v13 = vsel %vm6359_vm14, %v17381_v2, %v17382_v63  ;;  %v19904_v24 = vld [vmem:[#allocation2 + $0x70] sm:$0xff]  ;;  %v17601_v2 = vld [vmem:[%s23646_s3 + $0x7f8] ss:$20 sps:$4 sm:$0xff]   ;;  %v17604_v3 = vld [vmem:[%s23646_s3 + $0x528] ss:$20 sps:$4 sm:$0xff]  }
 0x331   :  { %v6391_v46 = vmax.f32 %v6301_v5, %v6362_v0  ;;  %v17387_v30 = vunpack.i.h.bf16 %v17385_v1  ;;  %v17386_v32 = vunpack.i.l.bf16 %v17385_v1  ;;  %10071 = vmatmul.mubr.bf16.vlgmr.msra.gmra.mxu0 %v19823_v52  ;;  %v6392_v31 = vmax.f32 %v6302_v22, %v6363_v13  ;;  %v17585_v22 = vld [vmem:[%s23646_s3 + $0x874] ss:$20 sps:$4 sm:$0xff]   ;;  %v17612_v0 = vld [vmem:[%s23646_s3 + $0x504] ss:$20 sps:$4 sm:$0xff]   ;;  %v17615_v1 = vld [vmem:[%s23646_s3 + $0x7ac] ss:$20 sps:$4 sm:$0xff]  }
 0x332   :  { %v17388_v57 = vpack.i.bf16 %v19839_v59, %v19835_v36  ;;  %10121 = vmatpush1.bf16.msra.mxu0 %v17571_v53  ;;  %v17606_v53 = vld [vmem:[%s23646_s3 + $0x52c] ss:$20 sps:$4 sm:$0xff]   ;;  %v17609_v18 = vld [vmem:[%s23646_s3 + $0x7d4] ss:$20 sps:$4 sm:$0xff]  }
 0x333   :  { %v6277_v26 = vsel %vm746_vm3, %v17377_v4, %v17386_v32  ;;  %v6278_v14 = vsel %vm746_vm3, %v17386_v32, %v17387_v30  ;;  %v19854_v60 = vpack.c.bf16 %v6392_v31, %v6392_v31  ;;  %v19856_v5 = vpack.c.bf16 %v6391_v46, %v6391_v46  ;;  %10122 = vmatprep.subr.bf16.mxu0 %v17576_v45  ;;  %v17607_v45 = vld [vmem:[%s23646_s3 + $0x7d0] ss:$20 sps:$4 sm:$0xff]   ;;  %v17610_v13 = vld [vmem:[%s23646_s3 + $0x500] ss:$20 sps:$4 sm:$0xff]   ;;  %v17613_v46 = vld [vmem:[%s23646_s3 + $0x7a8] ss:$20 sps:$4 sm:$0xff]  }
 0x334   :  { %v19866_v61 = vmax.f32 %v6184_v28, %v6277_v26  ;;  %v19870_v33 = vmax.f32 %v6185_v7, %v6278_v14  ;;  %v17395_v16 = vpop.permute.xlu1 %17394  ;;  %17389 = vrot.lane.b32.xlu0 %v17388_v57, %s18302_s18  ;;  %v17580_v28 = vld [vmem:[%s23646_s3 + $0x5c8] ss:$20 sps:$4 sm:$0xff]   ;;  %v17621_v32 = vld [vmem:[%s23646_s3 + $0x784] ss:$20 sps:$4 sm:$0xff]   ;;  %v17619_v57 = vld [vmem:[%s23646_s3 + $0x780] ss:$20 sps:$4 sm:$0xff]  }
 0x335   :  { %v17397_v37 = vunpack.i.h.bf16 %v17395_v16  ;;  %v17396_v48 = vunpack.i.l.bf16 %v17395_v16  ;;  %10111 = vmatprep.mubr.bf16.mxu1 %v19854_v60  ;;  %v17616_v31 = vld [vmem:[%s23646_s3 + $0x758] ss:$20 sps:$4 sm:$0xff]   ;;  %v17627_v26 = vld [vmem:[%s23646_s3 + $0x9dc] ss:$20 sps:$4 sm:$0xff]   ;;  %v17633_v16 = vld [vmem:[%s23646_s3 + $0x9b4] ss:$20 sps:$4 sm:$0xff]  }
 0x336   :  { %10112 = vmatmul.mubr.bf16.vlgmr.msra.gmra.mxu1 %v19856_v5  ;;  %v17398_v9 = vpack.i.bf16 %v19870_v33, %v19866_v61  ;;  %10123 = vmatpush1.bf16.msra.mxu0 %v17574_v44  ;;  %v17624_v44 = vld [vmem:[%s23646_s3 + $0x734] ss:$20 sps:$4 sm:$0xff]   ;;  %v17622_v14 = vld [vmem:[%s23646_s3 + $0x730] ss:$20 sps:$4 sm:$0xff]  }
 0x337   :  { %v6279_v20 = vsel %vm746_vm3, %v17387_v30, %v17396_v48  ;;  %v6280_v7 = vsel %vm746_vm3, %v17396_v48, %v17397_v37  ;;  %10162 = vmatpush1.bf16.msra.mxu1 %v17577_v54  ;;  %10124 = vmatprep.subr.bf16.mxu0 %v17582_v10  ;;  %v17618_v30 = vld [vmem:[%s23646_s3 + $0x75c] ss:$20 sps:$4 sm:$0xff]   ;;  %v17625_v54 = vld [vmem:[%s23646_s3 + $0x9d8] ss:$20 sps:$4 sm:$0xff]  }
 0x338   :  { %v19893_v49 = vmax.f32 %v6186_v25, %v6279_v20  ;;  %v19897_v42 = vmax.f32 %v6187_v62, %v6280_v7  ;;  %v19899_v38 = vpop.permute.xlu1 %17404  ;;  %17399 = vrot.lane.b32.xlu0 %v17398_v9, %s18302_s18  ;;  %10163 = vmatprep.subr.bf16.mxu1 %v17585_v22  ;;  %v17630_v10 = vld [vmem:[%s23646_s3 + $0x70c] ss:$20 sps:$4 sm:$0xff]   ;;  %v17628_v22 = vld [vmem:[%s23646_s3 + $0x708] ss:$20 sps:$4 sm:$0xff]   ;;  %v17636_v48 = vld [vmem:[%s23646_s3 + $0x6e4] ss:$20 sps:$4 sm:$0xff]  }
 0x339   :  { %v17407_v23 = vunpack.i.h.bf16 %v19899_v38  ;;  %v17406_v34 = vunpack.i.l.bf16 %v19899_v38  ;;  %v17639_v9 = vld [vmem:[%s23646_s3 + $0x98c] ss:$20 sps:$4 sm:$0xff]   ;;  %v17637_v20 = vld [vmem:[%s23646_s3 + $0x988] ss:$20 sps:$4 sm:$0xff]  }
 0x33a   :  { %v17408_v25 = vpack.i.bf16 %v19897_v42, %v19893_v49  ;;  %10125 = vmatpush1.bf16.msra.mxu0 %v17580_v28  ;;  %v17634_v28 = vld [vmem:[%s23646_s3 + $0x6e0] ss:$20 sps:$4 sm:$0xff]   ;;  %v17642_v7 = vld [vmem:[%s23646_s3 + $0x6bc] ss:$20 sps:$4 sm:$0xff]   ;;  %v17673_v38 = vld [vmem:[%s23646_s3 + $0xd98] ss:$20 sps:$4 sm:$0xff]  }
 0x33b   :  { %v6281_v62 = vsel %vm746_vm3, %v17397_v37, %v17406_v34  ;;  %v6282_v40 = vsel %vm746_vm3, %v17406_v34, %v17407_v23  ;;  %10164 = vmatpush1.bf16.msra.mxu1 %v17583_v56  ;;  %10126 = vmatprep.subr.bf16.mxu0 %v17588_v39  ;;  %v17631_v37 = vld [vmem:[%s23646_s3 + $0x9b0] ss:$20 sps:$4 sm:$0xff]   ;;  %v17640_v39 = vld [vmem:[%s23646_s3 + $0x6b8] ss:$20 sps:$4 sm:$0xff]   ;;  %v17643_v34 = vld [vmem:[%s23646_s3 + $0x960] ss:$20 sps:$4 sm:$0xff]  }
 0x33c   :  { %v19926_v58 = vmax.f32 %v6188_v43, %v6281_v62  ;;  %v19930_v41 = vmax.f32 %v6189_v29, %v6282_v40  ;;  %17409 = vrot.lane.b32.xlu1 %v17408_v25, %s18302_s18  ;;  %6268 = vrot.lane.b32.xlu0 %v19904_v24, %s18292_s20  ;;  %v17595_v43 = vld [vmem:[%s23646_s3 + $0x820] ss:$20 sps:$4 sm:$0xff]   ;;  %v17603_v29 = vld [vmem:[%s23646_s3 + $0x7fc] ss:$20 sps:$4 sm:$0xff]  }
 0x33d   :  { %10165 = vmatprep.subr.bf16.mxu1 %v17591_v47  ;;  %v17645_v56 = vld [vmem:[%s23646_s3 + $0x964] ss:$20 sps:$4 sm:$0xff]   ;;  %v17648_v47 = vld [vmem:[%s23646_s3 + $0x694] ss:$20 sps:$4 sm:$0xff]   ;;  %v17651_v25 = vld [vmem:[%s23646_s3 + $0x93c] ss:$20 sps:$4 sm:$0xff]  }
 0x33e   :  { %v17413_v4 = vpack.i.bf16 %v19930_v41, %v19926_v58  ;;  %10127 = vmatpush1.bf16.msra.mxu0 %v17586_v12  ;;  %v17646_v12 = vld [vmem:[%s23646_s3 + $0x690] ss:$20 sps:$4 sm:$0xff]   ;;  %v17649_v62 = vld [vmem:[%s23646_s3 + $0x938] ss:$20 sps:$4 sm:$0xff]  }
 0x33f   :  { %10166 = vmatpush1.bf16.msra.mxu1 %v17589_v21  ;;  %10128 = vmatprep.subr.bf16.mxu0 %v17594_v15  ;;  %v17654_v40 = vld [vmem:[%s23646_s3 + $0x66c] ss:$20 sps:$4 sm:$0xff]   ;;  %v17657_v21 = vld [vmem:[%s23646_s3 + $0x914] ss:$20 sps:$4 sm:$0xff]  }
 0x340   :  { %17414 = vrot.lane.b32.xlu0 %v17413_v4, %s18302_s18  ;;  %10167 = vmatprep.subr.bf16.mxu1 %v17597_v19  ;;  %v17652_v15 = vld [vmem:[%s23646_s3 + $0x668] ss:$20 sps:$4 sm:$0xff]   ;;  %v17655_v19 = vld [vmem:[%s23646_s3 + $0x910] ss:$20 sps:$4 sm:$0xff]  }
 0x341   :  { %v17660_v4 = vld [vmem:[%s23646_s3 + $0x644] ss:$20 sps:$4 sm:$0xff]  }
 0x342   :  { %10129 = vmatpush1.bf16.msra.mxu0 %v17592_v51  ;;  %v17663_v51 = vld [vmem:[%s23646_s3 + $0x8ec] ss:$20 sps:$4 sm:$0xff]  }
 0x343   :  { %10168 = vmatpush1.bf16.msra.mxu1 %v17595_v43  ;;  %10130 = vmatprep.subr.bf16.mxu0 %v17600_v8  ;;  %v17658_v43 = vld [vmem:[%s23646_s3 + $0x640] ss:$20 sps:$4 sm:$0xff]   ;;  %v17661_v8 = vld [vmem:[%s23646_s3 + $0x8e8] ss:$20 sps:$4 sm:$0xff]  }
 0x344   :  { %10169 = vmatprep.subr.bf16.mxu1 %v17603_v29  ;;  %v17666_v29 = vld [vmem:[%s23646_s3 + $0xb1c] ss:$20 sps:$4 sm:$0xff]  }
 0x346   :  { %10131 = vmatpush1.bf16.msra.mxu0 %v17598_v55  ;;  %v17669_v55 = vld [vmem:[%s23646_s3 + $0x8c4] ss:$20 sps:$4 sm:$0xff]  }
 0x347   :  { %10170 = vmatpush1.bf16.msra.mxu1 %v17601_v2  ;;  %10132 = vmatprep.subr.bf16.mxu0 %v17606_v53  ;;  %v17667_v2 = vld [vmem:[%s23646_s3 + $0x8c0] ss:$20 sps:$4 sm:$0xff]   ;;  %v17675_v53 = vld [vmem:[%s23646_s3 + $0xd9c] ss:$20 sps:$4 sm:$0xff]  }
 0x348   :  { %10171 = vmatprep.subr.bf16.mxu1 %v17609_v18 }
 0x34a   :  { %10133 = vmatpush1.bf16.msra.mxu0 %v17604_v3 }
 0x34b   :  { %10172 = vmatpush1.bf16.msra.mxu1 %v17607_v45  ;;  %10134 = vmatprep.subr.bf16.mxu0 %v17612_v0 }
 0x34c   :  { %10173 = vmatprep.subr.bf16.mxu1 %v17615_v1 }
 0x34e   :  { %10135 = vmatpush1.bf16.msra.mxu0 %v17610_v13 }
 0x34f   :  { %10174 = vmatpush1.bf16.msra.mxu1 %v17613_v46  ;;  %10136 = vmatprep.subr.bf16.mxu0 %v17618_v30 }
 0x350   :  { %10175 = vmatprep.subr.bf16.mxu1 %v17621_v32 }
 0x352   :  { %10137 = vmatpush2.bf16.msra.mxu0 %v17616_v31 }
 0x353   :  { %10176 = vmatpush1.bf16.msra.mxu1 %v17619_v57  ;;  %10138 = vmatprep.subr.bf16.mxu0 %v17624_v44  ;;  %v17664_v57 = vld [vmem:[%s23646_s3 + $0xb18] ss:$20 sps:$4 sm:$0xff]  }
 0x354   :  { %10177 = vmatprep.subr.bf16.mxu1 %v17627_v26 }
 0x356   :  { %10139 = vmatpush2.bf16.msra.mxu0 %v17622_v14 }
 0x357   :  { %10178 = vmatpush2.bf16.msra.mxu1 %v17625_v54  ;;  %10140 = vmatprep.subr.bf16.mxu0 %v17630_v10 }
 0x358   :  { %10179 = vmatprep.subr.bf16.mxu1 %v17633_v16 }
 0x35a   :  { %10141 = vmatpush2.bf16.msra.mxu0 %v17628_v22 }
 0x35b   :  { %10180 = vmatpush2.bf16.msra.mxu1 %v17631_v37  ;;  %10142 = vmatprep.subr.bf16.mxu0 %v17636_v48 }
 0x35c   :  { %10181 = vmatprep.subr.bf16.mxu1 %v17639_v9 }
 0x35e   :  { %10143 = vmatpush2.bf16.msra.mxu0 %v17634_v28 }
 0x35f   :  { %10182 = vmatpush2.bf16.msra.mxu1 %v17637_v20  ;;  %10144 = vmatprep.subr.bf16.mxu0 %v17642_v7 }
 0x360   :  { %10183 = vmatprep.subr.bf16.mxu1 %v17645_v56 }
 0x362   :  { %10145 = vmatpush2.bf16.msra.mxu0 %v17640_v39  ;;  %v17676_v39 = vld [vmem:[%s23646_s3 + $0xac8] ss:$20 sps:$4 sm:$0xff]  }
 0x363   :  { %10184 = vmatpush2.bf16.msra.mxu1 %v17643_v34  ;;  %10146 = vmatprep.subr.bf16.mxu0 %v17648_v47  ;;  %v17679_v47 = vld [vmem:[%s23646_s3 + $0xd70] ss:$20 sps:$4 sm:$0xff]  }
 0x364   :  { %10185 = vmatprep.subr.bf16.mxu1 %v17651_v25  ;;  %v17687_v25 = vld [vmem:[%s23646_s3 + $0xd4c] ss:$20 sps:$4 sm:$0xff]  }
 0x366   :  { %10147 = vmatpush2.bf16.msra.mxu0 %v17646_v12 }
 0x367   :  { %10186 = vmatpush2.bf16.msra.mxu1 %v17649_v62  ;;  %10148 = vmatprep.subr.bf16.mxu0 %v17654_v40  ;;  %v17682_v40 = vld [vmem:[%s23646_s3 + $0xaa0] ss:$20 sps:$4 sm:$0xff]  }
 0x368   :  { %10187 = vmatprep.subr.bf16.mxu1 %v17657_v21  ;;  %v17685_v21 = vld [vmem:[%s23646_s3 + $0xd48] ss:$20 sps:$4 sm:$0xff]  }
 0x36a   :  { %10149 = vmatpush2.bf16.msra.mxu0 %v17652_v15 }
 0x36b   :  { %10188 = vmatpush2.bf16.msra.mxu1 %v17655_v19  ;;  %10150 = vmatprep.subr.bf16.mxu0 %v17660_v4  ;;  %v17690_v19 = vld [vmem:[%s23646_s3 + $0xa7c] ss:$20 sps:$4 sm:$0xff]   ;;  %v17688_v4 = vld [vmem:[%s23646_s3 + $0xa78] ss:$20 sps:$4 sm:$0xff]  }
 0x36c   :  { %10189 = vmatprep.subr.bf16.mxu1 %v17663_v51  ;;  %v17691_v51 = vld [vmem:[%s23646_s3 + $0xd20] ss:$20 sps:$4 sm:$0xff]  }
 0x36e   :  { %10151 = vmatpush2.bf16.msra.mxu0 %v17658_v43  ;;  %v17696_v43 = vld [vmem:[%s23646_s3 + $0xa54] ss:$20 sps:$4 sm:$0xff]  }
 0x36f   :  { %10190 = vmatpush2.bf16.msra.mxu1 %v17661_v8  ;;  %10202 = vmatprep.subr.bf16.mxu0 %v17666_v29  ;;  %v17699_v8 = vld [vmem:[%s23646_s3 + $0xcfc] ss:$20 sps:$4 sm:$0xff]  }
 0x370   :  { %10191 = vmatprep.subr.bf16.mxu1 %v17669_v55  ;;  %v17694_v29 = vld [vmem:[%s23646_s3 + $0xa50] ss:$20 sps:$4 sm:$0xff]   ;;  %v17697_v55 = vld [vmem:[%s23646_s3 + $0xcf8] ss:$20 sps:$4 sm:$0xff]  }
 0x373   :  { %10192 = vmatpush2.bf16.msra.mxu1 %v17667_v2  ;;  %v17702_v2 = vld [vmem:[%s23646_s3 + $0xa2c] ss:$20 sps:$4 sm:$0xff]  }
 0x374   :  { %10243 = vmatprep.subr.bf16.mxu1 %v17675_v53  ;;  %v17705_v53 = vld [vmem:[%s23646_s3 + $0xcd4] ss:$20 sps:$4 sm:$0xff]  }
 0x3a6   :  { %v17390_v18 = vpop.permute.xlu0 %17389 }
 0x3a7   :  { %v17392_v3 = vunpack.i.h.bf16 %v17390_v18  ;;  %v17391_v45 = vunpack.i.l.bf16 %v17390_v18  ;;  %v17700_v18 = vld [vmem:[%s23646_s3 + $0xa28] ss:$20 sps:$4 sm:$0xff]  }
 0x3a9   :  { %v6364_v0 = vsel %vm6359_vm14, %v17382_v63, %v17391_v45  ;;  %v6365_v1 = vsel %vm6359_vm14, %v17391_v45, %v17392_v3  ;;  %v17708_v45 = vld [vmem:[%s23646_s3 + $0xa04] ss:$20 sps:$4 sm:$0xff]  }
 0x3aa   :  { %v6393_v13 = vmax.f32 %v19785_v27, %v6364_v0  ;;  %v20096_v46 = vpop.permute.xlu0 %17399  ;;  %v6394_v30 = vmax.f32 %v19835_v36, %v6365_v1  ;;  %v17672_v36 = vld [vmem:[%s23646_s3 + $0xaf4] ss:$20 sps:$4 sm:$0xff]   ;;  %v17711_v0 = vld [vmem:[%s23646_s3 + $0xcac] ss:$20 sps:$4 sm:$0xff]  }
 0x3ab   :  { %v17402_v32 = vunpack.i.h.bf16 %v20096_v46  ;;  %v17401_v31 = vunpack.i.l.bf16 %v20096_v46  ;;  %v17706_v1 = vld [vmem:[%s23646_s3 + $0xa00] ss:$20 sps:$4 sm:$0xff]   ;;  %v17762_v46 = vld [vmem:[%s23646_s3 + $0xdc4] ss:$20 sps:$4 sm:$0xff]  }
 0x3ac   :  { %v20104_v44 = vpack.c.bf16 %v6394_v30, %v6394_v30  ;;  %v20106_v50 = vpack.c.bf16 %v6393_v13, %v6393_v13  ;;  %v17709_v13 = vld [vmem:[%s23646_s3 + $0xca8] ss:$20 sps:$4 sm:$0xff]  }
 0x3ad   :  { %v6366_v63 = vsel %vm6359_vm14, %v17392_v3, %v17401_v31  ;;  %v6367_v27 = vsel %vm6359_vm14, %v17401_v31, %v17402_v32  ;;  %v17703_v3 = vld [vmem:[%s23646_s3 + $0xcd0] ss:$20 sps:$4 sm:$0xff]  }
 0x3ae   :  { %v6395_v26 = vmax.f32 %v19839_v59, %v6366_v63  ;;  %v20116_v14 = vpop.permute.xlu1 %17409  ;;  %v6269_v54 = vpop.permute.xlu0 %6268  ;;  %10152 = vmatprep.mubr.bf16.mxu0 %v20104_v44  ;;  %v6396_v10 = vmax.f32 %v19866_v61, %v6367_v27  ;;  %v17670_v61 = vld [vmem:[%s23646_s3 + $0xaf0] ss:$20 sps:$4 sm:$0xff]   ;;  %v17715_v63 = vld [vmem:[%s23646_s3 + $0xc80] ss:$20 sps:$4 sm:$0xff]  }
 0x3af   :  { %v17412_v16 = vunpack.i.h.bf16 %v20116_v14  ;;  %v17411_v22 = vunpack.i.l.bf16 %v20116_v14  ;;  %v6283_v37 = vsel %vm746_vm3, %v17407_v23, %v6269_v54  ;;  %v20126_v48 = vmax.f32 %v19904_v24, %v6269_v54  ;;  %10153 = vmatmul.mubr.bf16.vlgmr.msra.gmra.mxu0 %v20106_v50  ;;  %v17681_v24 = vld [vmem:[%s23646_s3 + $0xd74] ss:$20 sps:$4 sm:$0xff]   ;;  %v17714_v30 = vld [vmem:[%s23646_s3 + $0xc5c] ss:$20 sps:$4 sm:$0xff]   ;;  %v17717_v31 = vld [vmem:[%s23646_s3 + $0xc84] ss:$20 sps:$4 sm:$0xff]  }
 0x3b0   :  { %v20131_v59 = vmax.f32 %v6190_v17, %v6283_v37  ;;  %10203 = vmatpush1.bf16.msra.mxu0 %v17664_v57  ;;  %v20133_v9 = vpack.c.bf16 %v6396_v10, %v6396_v10  ;;  %v20141_v23 = vpack.c.bf16 %v6395_v26, %v6395_v26  ;;  %v17712_v57 = vld [vmem:[%s23646_s3 + $0xc58] ss:$20 sps:$4 sm:$0xff]   ;;  %v17720_v27 = vld [vmem:[%s23646_s3 + $0xc34] ss:$20 sps:$4 sm:$0xff]   ;;  %v17718_v26 = vld [vmem:[%s23646_s3 + $0xc30] ss:$20 sps:$4 sm:$0xff]  }
 0x3b1   :  { %6357 = vrot.lane.b32.xlu1 %v20126_v48, %s18302_s18  ;;  %10204 = vmatprep.subr.bf16.mxu0 %v17672_v36  ;;  %v6369_v17 = vsel %vm6359_vm14, %v17411_v22, %v17412_v16  ;;  %v17723_v36 = vld [vmem:[%s23646_s3 + $0xedc] ss:$20 sps:$4 sm:$0xff]   ;;  %v17721_v54 = vld [vmem:[%s23646_s3 + $0xed8] ss:$20 sps:$4 sm:$0xff]   ;;  %v17729_v37 = vld [vmem:[%s23646_s3 + $0xeb4] ss:$20 sps:$4 sm:$0xff]  }
 0x3b2   :  { %6355 = vrot.lane.b32.xlu0 %v20131_v59, %s18302_s18  ;;  %v20158_v28 = vpop.permute.xlu0 %17414  ;;  %10193 = vmatprep.mubr.bf16.mxu1 %v20133_v9  ;;  %v6398_v20 = vmax.f32 %v19893_v49, %v6369_v17  ;;  %v17684_v49 = vld [vmem:[%s23646_s3 + $0xaa4] ss:$20 sps:$4 sm:$0xff]   ;;  %v17726_v10 = vld [vmem:[%s23646_s3 + $0xc0c] ss:$20 sps:$4 sm:$0xff]   ;;  %v17768_v14 = vld [vmem:[%s23646_s3 + $0xff4] ss:$20 sps:$4 sm:$0xff]  }
 0x3b3   :  { %v17417_v7 = vunpack.i.h.bf16 %v20158_v28  ;;  %v17416_v56 = vunpack.i.l.bf16 %v20158_v28  ;;  %10194 = vmatmul.mubr.bf16.vlgmr.msra.gmra.mxu1 %v20141_v23  ;;  %v17735_v17 = vld [vmem:[%s23646_s3 + $0xe8c] ss:$20 sps:$4 sm:$0xff]  }
 0x3b4   :  { %10205 = vmatpush1.bf16.msra.mxu0 %v17670_v61  ;;  %10244 = vmatpush1.bf16.msra.mxu1 %v17673_v38  ;;  %v20168_v34 = vpack.c.bf16 %v6398_v20, %v6398_v20  ;;  %v17724_v61 = vld [vmem:[%s23646_s3 + $0xc08] ss:$20 sps:$4 sm:$0xff]   ;;  %v17727_v38 = vld [vmem:[%s23646_s3 + $0xeb0] ss:$20 sps:$4 sm:$0xff]   ;;  %v17813_v28 = vld [vmem:[%s23646_s3 + $0x1040] ss:$20 sps:$4 sm:$0xff]  }
 0x3b5   :  { %10206 = vmatprep.subr.bf16.mxu0 %v17678_v11  ;;  %10245 = vmatprep.subr.bf16.mxu1 %v17681_v24  ;;  %v6371_v12 = vsel %vm6359_vm14, %v17416_v56, %v17417_v7  ;;  %v17732_v11 = vld [vmem:[%s23646_s3 + $0xbe4] ss:$20 sps:$4 sm:$0xff]   ;;  %v17730_v24 = vld [vmem:[%s23646_s3 + $0xbe0] ss:$20 sps:$4 sm:$0xff]   ;;  %v17733_v20 = vld [vmem:[%s23646_s3 + $0xe88] ss:$20 sps:$4 sm:$0xff]  }
 0x3b6   :  { %10234 = vmatprep.mubr.bf16.mxu0 %v20168_v34  ;;  %v6400_v62 = vmax.f32 %v19926_v58, %v6371_v12  ;;  %v17693_v58 = vld [vmem:[%s23646_s3 + $0xd24] ss:$20 sps:$4 sm:$0xff]   ;;  %v17744_v12 = vld [vmem:[%s23646_s3 + $0xb94] ss:$20 sps:$4 sm:$0xff]  }
 0x3b8   :  { %10207 = vmatpush1.bf16.msra.mxu0 %v17676_v39  ;;  %10246 = vmatpush1.bf16.msra.mxu1 %v17679_v47  ;;  %v20192_v15 = vpack.c.bf16 %v6400_v62, %v6400_v62  ;;  %v17738_v39 = vld [vmem:[%s23646_s3 + $0xbbc] ss:$20 sps:$4 sm:$0xff]   ;;  %v17741_v47 = vld [vmem:[%s23646_s3 + $0xe64] ss:$20 sps:$4 sm:$0xff]  }
 0x3b9   :  { %10208 = vmatprep.subr.bf16.mxu0 %v17684_v49  ;;  %10247 = vmatprep.subr.bf16.mxu1 %v17687_v25  ;;  %v17736_v49 = vld [vmem:[%s23646_s3 + $0xbb8] ss:$20 sps:$4 sm:$0xff]   ;;  %v17739_v25 = vld [vmem:[%s23646_s3 + $0xe60] ss:$20 sps:$4 sm:$0xff]   ;;  %v17747_v62 = vld [vmem:[%s23646_s3 + $0xe3c] ss:$20 sps:$4 sm:$0xff]  }
 0x3ba   :  { %10275 = vmatprep.mubr.bf16.mxu1 %v20192_v15 }
 0x3bc   :  { %10209 = vmatpush1.bf16.msra.mxu0 %v17682_v40  ;;  %10248 = vmatpush1.bf16.msra.mxu1 %v17685_v21  ;;  %v17742_v40 = vld [vmem:[%s23646_s3 + $0xb90] ss:$20 sps:$4 sm:$0xff]   ;;  %v17745_v21 = vld [vmem:[%s23646_s3 + $0xe38] ss:$20 sps:$4 sm:$0xff]  }
 0x3bd   :  { %10210 = vmatprep.subr.bf16.mxu0 %v17690_v19  ;;  %10249 = vmatprep.subr.bf16.mxu1 %v17693_v58  ;;  %v17750_v19 = vld [vmem:[%s23646_s3 + $0xb6c] ss:$20 sps:$4 sm:$0xff]   ;;  %v17753_v58 = vld [vmem:[%s23646_s3 + $0xe14] ss:$20 sps:$4 sm:$0xff]  }
 0x3c0   :  { %10211 = vmatpush1.bf16.msra.mxu0 %v17688_v4  ;;  %10250 = vmatpush1.bf16.msra.mxu1 %v17691_v51  ;;  %v17748_v4 = vld [vmem:[%s23646_s3 + $0xb68] ss:$20 sps:$4 sm:$0xff]   ;;  %v17751_v51 = vld [vmem:[%s23646_s3 + $0xe10] ss:$20 sps:$4 sm:$0xff]  }
 0x3c1   :  { %10212 = vmatprep.subr.bf16.mxu0 %v17696_v43  ;;  %10251 = vmatprep.subr.bf16.mxu1 %v17699_v8  ;;  %v17756_v43 = vld [vmem:[%s23646_s3 + $0xb44] ss:$20 sps:$4 sm:$0xff]   ;;  %v17759_v8 = vld [vmem:[%s23646_s3 + $0xdec] ss:$20 sps:$4 sm:$0xff]  }
 0x3c4   :  { %10213 = vmatpush1.bf16.msra.mxu0 %v17694_v29  ;;  %10252 = vmatpush1.bf16.msra.mxu1 %v17697_v55  ;;  %v6368_v29 = vsel %vm6359_vm14, %v17402_v32, %v17411_v22  ;;  %v17754_v55 = vld [vmem:[%s23646_s3 + $0xb40] ss:$20 sps:$4 sm:$0xff]   ;;  %v17765_v32 = vld [vmem:[%s23646_s3 + $0x101c] ss:$20 sps:$4 sm:$0xff]  }
 0x3c5   :  { %10214 = vmatprep.subr.bf16.mxu0 %v17702_v2  ;;  %10253 = vmatprep.subr.bf16.mxu1 %v17705_v53  ;;  %v17757_v2 = vld [vmem:[%s23646_s3 + $0xde8] ss:$20 sps:$4 sm:$0xff]   ;;  %v6397_v53 = vmax.f32 %v19870_v33, %v6368_v29  ;;  %v7091_v22 = vld [vmem:[%s23646_s3 + $0x1180] sm:$0xff]  ;;  %v6370_v33 = vsel %vm6359_vm14, %v17412_v16, %v17416_v56 }
 0x3c6   :  { %v15899_v16 = vcombine.low %v7091_v22, %v7091_v22  ;;  %v17766_v56 = vld [vmem:[%s23646_s3 + $0xff0] ss:$20 sps:$4 sm:$0xff]  }
 0x3c7   :  { %v17798_v29 = vld [vmem:[%s23646_s3 + $0x10e4] ss:$20 sps:$4 sm:$0xff]  }
 0x3c8   :  { %10215 = vmatpush1.bf16.msra.mxu0 %v17700_v18  ;;  %10254 = vmatpush1.bf16.msra.mxu1 %v17703_v3  ;;  %v17760_v18 = vld [vmem:[%s23646_s3 + $0xdc0] ss:$20 sps:$4 sm:$0xff]   ;;  %v17763_v3 = vld [vmem:[%s23646_s3 + $0x1018] ss:$20 sps:$4 sm:$0xff]  }
 0x3c9   :  { %10216 = vmatprep.subr.bf16.mxu0 %v17708_v45  ;;  %10255 = vmatprep.subr.bf16.mxu1 %v17711_v0  ;;  %v15900_v45 = vcombine.high %v7091_v22, %v7091_v22  ;;  %v6399_v0 = vmax.f32 %v19897_v42, %v6370_v33  ;;  %v17809_v22 = vld [vmem:[%s23646_s3 + $0x106c] ss:$20 sps:$4 sm:$0xff]  }
 0x3cb   :  { %v20375_v42 = vpack.c.bf16 %v6399_v0, %v6399_v0 }
 0x3cc   :  { %10217 = vmatpush1.bf16.msra.mxu0 %v17706_v1  ;;  %10256 = vmatpush1.bf16.msra.mxu1 %v17709_v13  ;;  %v20366_v1 = vpack.c.bf16 %v6397_v53, %v6397_v53  ;;  %v17799_v53 = vld [vmem:[%s23646_s3 + $0x10b8] ss:$20 sps:$4 sm:$0xff]  }
 0x3cd   :  { %10218 = vmatprep.subr.bf16.mxu0 %v17714_v30  ;;  %10257 = vmatprep.subr.bf16.mxu1 %v17717_v31  ;;  %v17771_v30 = vld [vmem:[%s23646_s3 + $0xfcc] ss:$20 sps:$4 sm:$0xff]   ;;  %v10024_v31 = vsel %vm10022_vm15, %v15899_v16, 0 }
 0x3d0   :  { %10219 = vmatpush2.bf16.msra.mxu0 %v17712_v57  ;;  %10258 = vmatpush1.bf16.msra.mxu1 %v17715_v63  ;;  %v17812_v57 = vld [vmem:[%s23646_s3 + $0x124] ss:$20 sps:$4 sm:$0xff]  }
 0x3d1   :  { %10220 = vmatprep.subr.bf16.mxu0 %v17720_v27  ;;  %10259 = vmatprep.subr.bf16.mxu1 %v17723_v36  ;;  %v17769_v27 = vld [vmem:[%s23646_s3 + $0xfc8] ss:$20 sps:$4 sm:$0xff]  }
 0x3d4   :  { %10221 = vmatpush2.bf16.msra.mxu0 %v17718_v26  ;;  %10260 = vmatpush2.bf16.msra.mxu1 %v17721_v54  ;;  %v17774_v26 = vld [vmem:[%s23646_s3 + $0xfa4] ss:$20 sps:$4 sm:$0xff]   ;;  %v23714_v54 = vmov 0  }
 0x3d5   :  { %10222 = vmatprep.subr.bf16.mxu0 %v17726_v10  ;;  %10261 = vmatprep.subr.bf16.mxu1 %v17729_v37 }
 0x3d8   :  { %10223 = vmatpush2.bf16.msra.mxu0 %v17724_v61  ;;  %10262 = vmatpush2.bf16.msra.mxu1 %v17727_v38 }
 0x3d9   :  { %10224 = vmatprep.subr.bf16.mxu0 %v17732_v11  ;;  %10263 = vmatprep.subr.bf16.mxu1 %v17735_v17  ;;  %v17772_v11 = vld [vmem:[%s23646_s3 + $0xfa0] ss:$20 sps:$4 sm:$0xff]  }
 0x3dc   :  { %10225 = vmatpush2.bf16.msra.mxu0 %v17730_v24  ;;  %10264 = vmatpush2.bf16.msra.mxu1 %v17733_v20  ;;  %v17777_v24 = vld [vmem:[%s23646_s3 + $0xf7c] ss:$20 sps:$4 sm:$0xff]  }
 0x3dd   :  { %10226 = vmatprep.subr.bf16.mxu0 %v17738_v39  ;;  %10265 = vmatprep.subr.bf16.mxu1 %v17741_v47  ;;  %v17775_v47 = vld [vmem:[%s23646_s3 + $0xf78] ss:$20 sps:$4 sm:$0xff]  }
 0x3e0   :  { %10227 = vmatpush2.bf16.msra.mxu0 %v17736_v49  ;;  %10266 = vmatpush2.bf16.msra.mxu1 %v17739_v25  ;;  %v17780_v49 = vld [vmem:[%s23646_s3 + $0xf54] ss:$20 sps:$4 sm:$0xff]   ;;  %v17778_v25 = vld [vmem:[%s23646_s3 + $0xf50] ss:$20 sps:$4 sm:$0xff]  }
 0x3e1   :  { %10228 = vmatprep.subr.bf16.mxu0 %v17744_v12  ;;  %10267 = vmatprep.subr.bf16.mxu1 %v17747_v62  ;;  %v17783_v12 = vld [vmem:[%s23646_s3 + $0xf2c] ss:$20 sps:$4 sm:$0xff]   ;;  %v17781_v62 = vld [vmem:[%s23646_s3 + $0xf28] ss:$20 sps:$4 sm:$0xff]  }
 0x3e4   :  { %10229 = vmatpush2.bf16.msra.mxu0 %v17742_v40  ;;  %10268 = vmatpush2.bf16.msra.mxu1 %v17745_v21  ;;  %v17786_v40 = vld [vmem:[%s23646_s3 + $0xf04] ss:$20 sps:$4 sm:$0xff]   ;;  %v17784_v21 = vld [vmem:[%s23646_s3 + $0xf00] ss:$20 sps:$4 sm:$0xff]  }
 0x3e5   :  { %10230 = vmatprep.subr.bf16.mxu0 %v17750_v19  ;;  %10269 = vmatprep.subr.bf16.mxu1 %v17753_v58  ;;  %v17789_v19 = vld [vmem:[%s23646_s3 + $0x115c] ss:$20 sps:$4 sm:$0xff]   ;;  %v17787_v58 = vld [vmem:[%s23646_s3 + $0x1158] ss:$20 sps:$4 sm:$0xff]  }
 0x3e8   :  { %10231 = vmatpush2.bf16.msra.mxu0 %v17748_v4  ;;  %10270 = vmatpush2.bf16.msra.mxu1 %v17751_v51  ;;  %v17792_v4 = vld [vmem:[%s23646_s3 + $0x1134] ss:$20 sps:$4 sm:$0xff]   ;;  %v17790_v51 = vld [vmem:[%s23646_s3 + $0x1130] ss:$20 sps:$4 sm:$0xff]  }
 0x3e9   :  { %10232 = vmatprep.subr.bf16.mxu0 %v17756_v43  ;;  %10271 = vmatprep.subr.bf16.mxu1 %v17759_v8  ;;  %v17795_v43 = vld [vmem:[%s23646_s3 + $0x110c] ss:$20 sps:$4 sm:$0xff]   ;;  %v17793_v8 = vld [vmem:[%s23646_s3 + $0x1108] ss:$20 sps:$4 sm:$0xff]  }
 0x3ec   :  { %10233 = vmatpush2.bf16.msra.mxu0 %v17754_v55  ;;  %10272 = vmatpush2.bf16.msra.mxu1 %v17757_v2  ;;  %v17796_v55 = vld [vmem:[%s23646_s3 + $0x10e0] ss:$20 sps:$4 sm:$0xff]   ;;  %v17801_v2 = vld [vmem:[%s23646_s3 + $0x10bc] ss:$20 sps:$4 sm:$0xff]  }
 0x3ed   :  { %10273 = vmatprep.subr.bf16.mxu1 %v17762_v46  ;;  %10284 = vmatprep.subr.bf16.mxu0 %v17765_v32  ;;  %v17804_v46 = vld [vmem:[%s23646_s3 + $0x1094] ss:$20 sps:$4 sm:$0xff]   ;;  %v17802_v32 = vld [vmem:[%s23646_s3 + $0x1090] ss:$20 sps:$4 sm:$0xff]  }
 0x3ef   :  { %10235 = vmatmul.mubr.bf16.vlgmr.msra.gmra.mxu0 %v20366_v1 }
 0x3f0   :  { %10274 = vmatpush2.bf16.msra.mxu1 %v17760_v18  ;;  %10285 = vmatpush1.bf16.msra.mxu0 %v17763_v3 }
 0x3f1   :  { %v10072_v13 = vpop.f32.mrf.mxu0  ;;  %10286 = vmatprep.subr.bf16.mxu0 %v17768_v14  ;;  %15904 = vmatprep.subr.msk.bf16.mxu1 %vm10022_vm15, %v15900_v45  ;;  %v17807_v45 = vld [vmem:[%s23646_s3 + $0x1068] ss:$20 sps:$4 sm:$0xff]   ;;  %v17810_v14 = vld [vmem:[%s23646_s3 + $0x120] ss:$20 sps:$4 sm:$0xff]  }
 0x3f3   :  { %10276 = vmatmul.mubr.bf16.vlgmr.msra.gmra.mxu1 %v20375_v42  ;;  %v10074_v63 = vpop.f32.mrf.mxu0 }
 0x3f4   :  { %10287 = vmatpush1.bf16.msra.mxu0 %v17766_v56  ;;  %10340 = vmatpush1.bf16.msra.mxu1 %v10024_v31 }
 0x3f5   :  { %v10076_v36 = vpop.f32.mrf.mxu0  ;;  %10288 = vmatprep.subr.bf16.mxu0 %v17771_v30  ;;  %10357 = vmatprep.mubr.bf16.mxu1 %v23714_v54  ;;  %v17818_v30 = vld [vmem:[%s23646_s3 + $0xfc] ss:$20 sps:$4 sm:$0xff]  }
 0x3f6   :  { %v10113_v10 = vpop.f32.mrf.mxu1  ;;  %10366 = vmatprep.subr.bf16.mxu1 %v17812_v57  ;;  %v17821_v57 = vld [vmem:[%s23646_s3 + $0x3a4] ss:$20 sps:$4 sm:$0xff]  }
 0x3f7   :  { %v20393_v37 = vadd.f32 %v10113_v10, %v10072_v13  ;;  %v10077_v61 = vpop.f32.mrf.mxu0  ;;  %v17815_v13 = vld [vmem:[%s23646_s3 + $0x1044] ss:$20 sps:$4 sm:$0xff]   ;;  %v17830_v10 = vld [vmem:[%s23646_s3 + $0xac] ss:$20 sps:$4 sm:$0xff]  }
 0x3f8   :  { %10289 = vmatpush1.bf16.msra.mxu0 %v17769_v27  ;;  %v10115_v38 = vpop.f32.mrf.mxu1  ;;  %v17822_v36 = vld [vmem:[%s23646_s3 + $0xd0] ss:$20 sps:$4 sm:$0xff]   ;;  %v17825_v61 = vld [vmem:[%s23646_s3 + $0x378] ss:$20 sps:$4 sm:$0xff]  }
 0x3f9   :  { %v20398_v17 = vadd.f32 %v10115_v38, %v10074_v63  ;;  %10290 = vmatprep.subr.bf16.mxu0 %v17774_v26  ;;  %v17824_v63 = vld [vmem:[%s23646_s3 + $0xd4] ss:$20 sps:$4 sm:$0xff]   ;;  %v17827_v26 = vld [vmem:[%s23646_s3 + $0x37c] ss:$20 sps:$4 sm:$0xff]  }
 0x3fa   :  { %v10117_v20 = vpop.f32.mrf.mxu1  ;;  %v17828_v38 = vld [vmem:[%s23646_s3 + $0xa8] ss:$20 sps:$4 sm:$0xff]  }
 0x3fb   :  { %v17831_v20 = vld [vmem:[%s23646_s3 + $0x350] ss:$20 sps:$4 sm:$0xff]  }
 0x3fc   :  { %10291 = vmatpush1.bf16.msra.mxu0 %v17772_v11  ;;  %v10118_v39 = vpop.f32.mrf.mxu1  ;;  %v17833_v11 = vld [vmem:[%s23646_s3 + $0x354] ss:$20 sps:$4 sm:$0xff]  }
 0x3fd   :  { %10292 = vmatprep.subr.bf16.mxu0 %v17777_v24  ;;  %v17836_v24 = vld [vmem:[%s23646_s3 + $0x84] ss:$20 sps:$4 sm:$0xff]   ;;  %v17834_v39 = vld [vmem:[%s23646_s3 + $0x80] ss:$20 sps:$4 sm:$0xff]  }
 0x400   :  { %10293 = vmatpush1.bf16.msra.mxu0 %v17775_v47  ;;  %v17839_v47 = vld [vmem:[%s23646_s3 + $0x32c] ss:$20 sps:$4 sm:$0xff]  }
 0x401   :  { %10294 = vmatprep.subr.bf16.mxu0 %v17780_v49  ;;  %v17842_v49 = vld [vmem:[%s23646_s3 + $0x5c] ss:$20 sps:$4 sm:$0xff]  }
 0x404   :  { %10295 = vmatpush1.bf16.msra.mxu0 %v17778_v25  ;;  %v17837_v25 = vld [vmem:[%s23646_s3 + $0x328] ss:$20 sps:$4 sm:$0xff]  }
 0x405   :  { %10296 = vmatprep.subr.bf16.mxu0 %v17783_v12  ;;  %v17840_v12 = vld [vmem:[%s23646_s3 + $0x58] ss:$20 sps:$4 sm:$0xff]  }
 0x408   :  { %10297 = vmatpush1.bf16.msra.mxu0 %v17781_v62  ;;  %v17845_v62 = vld [vmem:[%s23646_s3 + $0x304] ss:$20 sps:$4 sm:$0xff]  }
 0x409   :  { %10298 = vmatprep.subr.bf16.mxu0 %v17786_v40  ;;  %v17848_v40 = vld [vmem:[%s23646_s3 + $0x34] ss:$20 sps:$4 sm:$0xff]  }
 0x40c   :  { %10299 = vmatpush1.bf16.msra.mxu0 %v17784_v21  ;;  %v17843_v21 = vld [vmem:[%s23646_s3 + $0x300] ss:$20 sps:$4 sm:$0xff]  }
 0x40d   :  { %10300 = vmatprep.subr.bf16.mxu0 %v17789_v19  ;;  %v17846_v19 = vld [vmem:[%s23646_s3 + $0x30] ss:$20 sps:$4 sm:$0xff]  }
 0x410   :  { %10301 = vmatpush2.bf16.msra.mxu0 %v17787_v58  ;;  %v17851_v58 = vld [vmem:[%s23646_s3 + $0x2dc] ss:$20 sps:$4 sm:$0xff]  }
 0x411   :  { %10302 = vmatprep.subr.bf16.mxu0 %v17792_v4  ;;  %v17854_v4 = vld [vmem:[%s23646_s3 + $0xc] ss:$20 sps:$4 sm:$0xff]  }
 0x414   :  { %10303 = vmatpush2.bf16.msra.mxu0 %v17790_v51  ;;  %v17849_v51 = vld [vmem:[%s23646_s3 + $0x2d8] ss:$20 sps:$4 sm:$0xff]  }
 0x415   :  { %10304 = vmatprep.subr.bf16.mxu0 %v17795_v43  ;;  %v17852_v43 = vld [vmem:[%s23646_s3 + $0x8] ss:$20 sps:$4 sm:$0xff]  }
 0x418   :  { %10305 = vmatpush2.bf16.msra.mxu0 %v17793_v8  ;;  %v17857_v8 = vld [vmem:[%s23646_s3 + $0x2b4] ss:$20 sps:$4 sm:$0xff]  }
 0x419   :  { %10306 = vmatprep.subr.bf16.mxu0 %v17798_v29  ;;  %v17860_v29 = vld [vmem:[%s23646_s3 + $0x264] ss:$20 sps:$4 sm:$0xff]  }
 0x41c   :  { %10307 = vmatpush2.bf16.msra.mxu0 %v17796_v55  ;;  %v17855_v55 = vld [vmem:[%s23646_s3 + $0x2b0] ss:$20 sps:$4 sm:$0xff]  }
 0x41d   :  { %10308 = vmatprep.subr.bf16.mxu0 %v17801_v2  ;;  %v17858_v2 = vld [vmem:[%s23646_s3 + $0x260] ss:$20 sps:$4 sm:$0xff]  }
 0x420   :  { %10309 = vmatpush2.bf16.msra.mxu0 %v17799_v53  ;;  %v17863_v53 = vld [vmem:[%s23646_s3 + $0x28c] ss:$20 sps:$4 sm:$0xff]  }
 0x421   :  { %10310 = vmatprep.subr.bf16.mxu0 %v17804_v46  ;;  %v17866_v46 = vld [vmem:[%s23646_s3 + $0x23c] ss:$20 sps:$4 sm:$0xff]  }
 0x423   :  { %v6358_v33 = vpop.permute.xlu1 %6357 }
 0x424   :  { %v6403_v18 = vmax.f32 %v20126_v48, %v6358_v33  ;;  %10311 = vmatpush2.bf16.msra.mxu0 %v17802_v32  ;;  %v6356_v3 = vpop.permute.xlu0 %6355  ;;  %v17861_v32 = vld [vmem:[%s23646_s3 + $0x288] ss:$20 sps:$4 sm:$0xff]  }
 0x425   :  { %v6373_v0 = vsel %vm6359_vm14, %v6356_v3, %v6358_v33  ;;  %10312 = vmatprep.subr.bf16.mxu0 %v17809_v22  ;;  %v6372_v56 = vsel %vm6359_vm14, %v17417_v7, %v6356_v3  ;;  %v17816_v7 = vld [vmem:[%s23646_s3 + $0xf8] ss:$20 sps:$4 sm:$0xff]   ;;  %v17867_v3 = vld [vmem:[%s23646_s3 + $0x4e0] ss:$20 sps:$4 sm:$0xff]  }
 0x426   :  { %v20471_v16 = vpack.c.bf16 %v6403_v18, %v6403_v18  ;;  %v6402_v48 = vmax.f32 %v20131_v59, %v6373_v0  ;;  %v6401_v59 = vmax.f32 %v19930_v41, %v6372_v56  ;;  %v17819_v41 = vld [vmem:[%s23646_s3 + $0x3a0] ss:$20 sps:$4 sm:$0xff]   ;;  %v17864_v22 = vld [vmem:[%s23646_s3 + $0x238] ss:$20 sps:$4 sm:$0xff]   ;;  %v17875_v0 = vld [vmem:[%s23646_s3 + $0x4bc] ss:$20 sps:$4 sm:$0xff]  }
 0x427   :  { %v17869_v33 = vld [vmem:[%s23646_s3 + $0x4e4] ss:$20 sps:$4 sm:$0xff]   ;;  %v17872_v18 = vld [vmem:[%s23646_s3 + $0x214] ss:$20 sps:$4 sm:$0xff]  }
 0x428   :  { %v20483_v31 = vpack.c.bf16 %v6402_v48, %v6402_v48  ;;  %10313 = vmatpush2.bf16.msra.mxu0 %v17807_v45  ;;  %15905 = vmatmul.mubr.msk.bf16.vlgmr.msra.gmra.mxu1 %vm6206_vm12, %v20471_v16  ;;  %v20505_v27 = vpack.c.bf16 %v6401_v59, %v6401_v59  ;;  %v17870_v45 = vld [vmem:[%s23646_s3 + $0x210] ss:$20 sps:$4 sm:$0xff]   ;;  %v17873_v56 = vld [vmem:[%s23646_s3 + $0x4b8] ss:$20 sps:$4 sm:$0xff]   ;;  %v17876_v48 = vld [vmem:[%s23646_s3 + $0x1e8] ss:$20 sps:$4 sm:$0xff]  }
 0x429   :  { %10367 = vmatpush1.bf16.msra.mxu1 %v17810_v14  ;;  %10398 = vmatprep.mubr.bf16.mxu1 %v19821_v35  ;;  %v17878_v14 = vld [vmem:[%s23646_s3 + $0x1ec] ss:$20 sps:$4 sm:$0xff]  }
 0x42a   :  { %10314 = vmatprep.subr.bf16.mxu0 %v17815_v13  ;;  %10316 = vmatprep.mubr.bf16.mxu0 %v20483_v31  ;;  %v17881_v13 = vld [vmem:[%s23646_s3 + $0x494] ss:$20 sps:$4 sm:$0xff]  }
 0x42b   :  { %10368 = vmatprep.subr.bf16.mxu1 %v17818_v30  ;;  %v17884_v30 = vld [vmem:[%s23646_s3 + $0x1c4] ss:$20 sps:$4 sm:$0xff]   ;;  %v17882_v59 = vld [vmem:[%s23646_s3 + $0x1c0] ss:$20 sps:$4 sm:$0xff]  }
 0x42c   :  { %10315 = vmatpush2.bf16.msra.mxu0 %v17813_v28  ;;  %v17879_v28 = vld [vmem:[%s23646_s3 + $0x490] ss:$20 sps:$4 sm:$0xff]  }
 0x42d   :  { %10369 = vmatpush1.bf16.msra.mxu1 %v17816_v7  ;;  %10407 = vmatprep.subr.bf16.mxu0 %v17821_v57  ;;  %v17887_v7 = vld [vmem:[%s23646_s3 + $0x46c] ss:$20 sps:$4 sm:$0xff]   ;;  %v17890_v57 = vld [vmem:[%s23646_s3 + $0x19c] ss:$20 sps:$4 sm:$0xff]  }
 0x42e   :  { %10370 = vmatprep.subr.bf16.mxu1 %v17824_v63  ;;  %v17885_v63 = vld [vmem:[%s23646_s3 + $0x468] ss:$20 sps:$4 sm:$0xff]  }
 0x42f   :  { %10317 = vmatmul.mubr.bf16.vlgmr.msra.gmra.mxu0 %v20505_v27 }
 0x430   :  { %10408 = vmatpush1.bf16.msra.mxu0 %v17819_v41  ;;  %10439 = vmatprep.mubr.bf16.mxu0 %v19854_v60  ;;  %v17888_v41 = vld [vmem:[%s23646_s3 + $0x198] ss:$20 sps:$4 sm:$0xff]  }
 0x431   :  { %10371 = vmatpush1.bf16.msra.mxu1 %v17822_v36  ;;  %10409 = vmatprep.subr.bf16.mxu0 %v17827_v26  ;;  %v17893_v36 = vld [vmem:[%s23646_s3 + $0x444] ss:$20 sps:$4 sm:$0xff]   ;;  %v17896_v26 = vld [vmem:[%s23646_s3 + $0x174] ss:$20 sps:$4 sm:$0xff]  }
 0x432   :  { %10372 = vmatprep.subr.bf16.mxu1 %v17830_v10  ;;  %v17891_v10 = vld [vmem:[%s23646_s3 + $0x440] ss:$20 sps:$4 sm:$0xff]  }
 0x434   :  { %10410 = vmatpush1.bf16.msra.mxu0 %v17825_v61  ;;  %v17894_v61 = vld [vmem:[%s23646_s3 + $0x170] ss:$20 sps:$4 sm:$0xff]  }
 0x435   :  { %10373 = vmatpush1.bf16.msra.mxu1 %v17828_v38  ;;  %10411 = vmatprep.subr.bf16.mxu0 %v17833_v11  ;;  %v17899_v38 = vld [vmem:[%s23646_s3 + $0x41c] ss:$20 sps:$4 sm:$0xff]   ;;  %v17902_v11 = vld [vmem:[%s23646_s3 + $0x14c] ss:$20 sps:$4 sm:$0xff]  }
 0x436   :  { %10374 = vmatprep.subr.bf16.mxu1 %v17836_v24  ;;  %v17897_v24 = vld [vmem:[%s23646_s3 + $0x418] ss:$20 sps:$4 sm:$0xff]  }
 0x438   :  { %10412 = vmatpush1.bf16.msra.mxu0 %v17831_v20  ;;  %v17900_v20 = vld [vmem:[%s23646_s3 + $0x148] ss:$20 sps:$4 sm:$0xff]  }
 0x439   :  { %10375 = vmatpush1.bf16.msra.mxu1 %v17834_v39  ;;  %10413 = vmatprep.subr.bf16.mxu0 %v17839_v47  ;;  %v17905_v39 = vld [vmem:[%s23646_s3 + $0x3f4] ss:$20 sps:$4 sm:$0xff]   ;;  %v17908_v47 = vld [vmem:[%s23646_s3 + $0x624] ss:$20 sps:$4 sm:$0xff]  }
 0x43a   :  { %10376 = vmatprep.subr.bf16.mxu1 %v17842_v49  ;;  %v17903_v49 = vld [vmem:[%s23646_s3 + $0x3f0] ss:$20 sps:$4 sm:$0xff]  }
 0x43c   :  { %10414 = vmatpush1.bf16.msra.mxu0 %v17837_v25  ;;  %v17906_v25 = vld [vmem:[%s23646_s3 + $0x620] ss:$20 sps:$4 sm:$0xff]  }
 0x43d   :  { %10377 = vmatpush1.bf16.msra.mxu1 %v17840_v12  ;;  %10415 = vmatprep.subr.bf16.mxu0 %v17845_v62  ;;  %v17911_v12 = vld [vmem:[%s23646_s3 + $0x3cc] ss:$20 sps:$4 sm:$0xff]   ;;  %v17914_v62 = vld [vmem:[%s23646_s3 + $0x5fc] ss:$20 sps:$4 sm:$0xff]  }
 0x43e   :  { %10378 = vmatprep.subr.bf16.mxu1 %v17848_v40  ;;  %v17909_v40 = vld [vmem:[%s23646_s3 + $0x3c8] ss:$20 sps:$4 sm:$0xff]  }
 0x440   :  { %10416 = vmatpush1.bf16.msra.mxu0 %v17843_v21  ;;  %v17912_v21 = vld [vmem:[%s23646_s3 + $0x5f8] ss:$20 sps:$4 sm:$0xff]  }
 0x441   :  { %10379 = vmatpush1.bf16.msra.mxu1 %v17846_v19  ;;  %10417 = vmatprep.subr.bf16.mxu0 %v17851_v58  ;;  %v17917_v19 = vld [vmem:[%s23646_s3 + $0x8a4] ss:$20 sps:$4 sm:$0xff]   ;;  %v17920_v58 = vld [vmem:[%s23646_s3 + $0x5d4] ss:$20 sps:$4 sm:$0xff]  }
 0x442   :  { %10380 = vmatprep.subr.bf16.mxu1 %v17854_v4  ;;  %v17915_v4 = vld [vmem:[%s23646_s3 + $0x8a0] ss:$20 sps:$4 sm:$0xff]  }
 0x444   :  { %10418 = vmatpush1.bf16.msra.mxu0 %v17849_v51  ;;  %v17918_v51 = vld [vmem:[%s23646_s3 + $0x5d0] ss:$20 sps:$4 sm:$0xff]  }
 0x445   :  { %10381 = vmatpush1.bf16.msra.mxu1 %v17852_v43  ;;  %10419 = vmatprep.subr.bf16.mxu0 %v17857_v8  ;;  %v17923_v43 = vld [vmem:[%s23646_s3 + $0x87c] ss:$20 sps:$4 sm:$0xff]   ;;  %v17926_v8 = vld [vmem:[%s23646_s3 + $0x5ac] ss:$20 sps:$4 sm:$0xff]  }
 0x446   :  { %10382 = vmatprep.subr.bf16.mxu1 %v17860_v29 }
 0x448   :  { %10420 = vmatpush1.bf16.msra.mxu0 %v17855_v55 }
 0x449   :  { %10383 = vmatpush2.bf16.msra.mxu1 %v17858_v2  ;;  %10421 = vmatprep.subr.bf16.mxu0 %v17863_v53  ;;  %v17921_v2 = vld [vmem:[%s23646_s3 + $0x878] ss:$20 sps:$4 sm:$0xff]  }
 0x44a   :  { %10384 = vmatprep.subr.bf16.mxu1 %v17866_v46  ;;  %v17924_v46 = vld [vmem:[%s23646_s3 + $0x5a8] ss:$20 sps:$4 sm:$0xff]  }
 0x44c   :  { %10422 = vmatpush1.bf16.msra.mxu0 %v17861_v32  ;;  %v17929_v32 = vld [vmem:[%s23646_s3 + $0x854] ss:$20 sps:$4 sm:$0xff]  }
 0x44d   :  { %10385 = vmatpush2.bf16.msra.mxu1 %v17864_v22  ;;  %10423 = vmatprep.subr.bf16.mxu0 %v17869_v33  ;;  %v17932_v22 = vld [vmem:[%s23646_s3 + $0x584] ss:$20 sps:$4 sm:$0xff]  }
 0x44e   :  { %10386 = vmatprep.subr.bf16.mxu1 %v17872_v18 }
 0x450   :  { %10424 = vmatpush2.bf16.msra.mxu0 %v17867_v3 }
 0x451   :  { %10387 = vmatpush2.bf16.msra.mxu1 %v17870_v45  ;;  %10425 = vmatprep.subr.bf16.mxu0 %v17875_v0  ;;  %v17927_v45 = vld [vmem:[%s23646_s3 + $0x850] ss:$20 sps:$4 sm:$0xff]  }
 0x452   :  { %10388 = vmatprep.subr.bf16.mxu1 %v17878_v14 }
 0x454   :  { %10426 = vmatpush2.bf16.msra.mxu0 %v17873_v56  ;;  %v17935_v56 = vld [vmem:[%s23646_s3 + $0x82c] ss:$20 sps:$4 sm:$0xff]  }
 0x455   :  { %10389 = vmatpush2.bf16.msra.mxu1 %v17876_v48  ;;  %10427 = vmatprep.subr.bf16.mxu0 %v17881_v13  ;;  %v17938_v13 = vld [vmem:[%s23646_s3 + $0x55c] ss:$20 sps:$4 sm:$0xff]  }
 0x456   :  { %10390 = vmatprep.subr.bf16.mxu1 %v17884_v30 }
 0x458   :  { %10428 = vmatpush2.bf16.msra.mxu0 %v17879_v28  ;;  %v17933_v28 = vld [vmem:[%s23646_s3 + $0x828] ss:$20 sps:$4 sm:$0xff]  }
 0x459   :  { %10391 = vmatpush2.bf16.msra.mxu1 %v17882_v59  ;;  %10429 = vmatprep.subr.bf16.mxu0 %v17887_v7  ;;  %v17936_v7 = vld [vmem:[%s23646_s3 + $0x558] ss:$20 sps:$4 sm:$0xff]  }
 0x45a   :  { %10392 = vmatprep.subr.bf16.mxu1 %v17890_v57  ;;  %v17941_v57 = vld [vmem:[%s23646_s3 + $0x804] ss:$20 sps:$4 sm:$0xff]  }
 0x45c   :  { %10430 = vmatpush2.bf16.msra.mxu0 %v17885_v63  ;;  %v17944_v63 = vld [vmem:[%s23646_s3 + $0x534] ss:$20 sps:$4 sm:$0xff]  }
 0x45d   :  { %10393 = vmatpush2.bf16.msra.mxu1 %v17888_v41  ;;  %10431 = vmatprep.subr.bf16.mxu0 %v17893_v36  ;;  %v17939_v41 = vld [vmem:[%s23646_s3 + $0x800] ss:$20 sps:$4 sm:$0xff]   ;;  %v17942_v36 = vld [vmem:[%s23646_s3 + $0x530] ss:$20 sps:$4 sm:$0xff]  }
 0x45e   :  { %10394 = vmatprep.subr.bf16.mxu1 %v17896_v26  ;;  %v17947_v26 = vld [vmem:[%s23646_s3 + $0x7dc] ss:$20 sps:$4 sm:$0xff]  }
 0x460   :  { %10432 = vmatpush2.bf16.msra.mxu0 %v17891_v10  ;;  %v17950_v10 = vld [vmem:[%s23646_s3 + $0x50c] ss:$20 sps:$4 sm:$0xff]  }
 0x461   :  { %10395 = vmatpush2.bf16.msra.mxu1 %v17894_v61  ;;  %10433 = vmatprep.subr.bf16.mxu0 %v17899_v38  ;;  %v17945_v61 = vld [vmem:[%s23646_s3 + $0x7d8] ss:$20 sps:$4 sm:$0xff]   ;;  %v17948_v38 = vld [vmem:[%s23646_s3 + $0x508] ss:$20 sps:$4 sm:$0xff]  }
 0x462   :  { %10396 = vmatprep.subr.bf16.mxu1 %v17902_v11  ;;  %v17953_v11 = vld [vmem:[%s23646_s3 + $0x7b4] ss:$20 sps:$4 sm:$0xff]  }
 0x464   :  { %10434 = vmatpush2.bf16.msra.mxu0 %v17897_v24  ;;  %v17956_v24 = vld [vmem:[%s23646_s3 + $0x764] ss:$20 sps:$4 sm:$0xff]  }
 0x465   :  { %10397 = vmatpush2.bf16.msra.mxu1 %v17900_v20  ;;  %10435 = vmatprep.subr.bf16.mxu0 %v17905_v39  ;;  %v17951_v20 = vld [vmem:[%s23646_s3 + $0x7b0] ss:$20 sps:$4 sm:$0xff]   ;;  %v17954_v39 = vld [vmem:[%s23646_s3 + $0x760] ss:$20 sps:$4 sm:$0xff]  }
 0x466   :  { %10448 = vmatprep.subr.bf16.mxu1 %v17908_v47  ;;  %v17959_v47 = vld [vmem:[%s23646_s3 + $0x78c] ss:$20 sps:$4 sm:$0xff]  }
 0x468   :  { %10399 = vmatmul.mubr.bf16.vlgmr.msra.gmra.mxu1 %v19823_v52  ;;  %10436 = vmatpush2.bf16.msra.mxu0 %v17903_v49  ;;  %v17962_v49 = vld [vmem:[%s23646_s3 + $0x73c] ss:$20 sps:$4 sm:$0xff]  }
 0x469   :  { %10449 = vmatpush1.bf16.msra.mxu1 %v17906_v25  ;;  %10480 = vmatprep.mubr.bf16.mxu1 %v20104_v44  ;;  %v17957_v25 = vld [vmem:[%s23646_s3 + $0x788] ss:$20 sps:$4 sm:$0xff]  }
 0x46a   :  { %10437 = vmatprep.subr.bf16.mxu0 %v17911_v12  ;;  %10450 = vmatprep.subr.bf16.mxu1 %v17914_v62  ;;  %v17960_v12 = vld [vmem:[%s23646_s3 + $0x738] ss:$20 sps:$4 sm:$0xff]  }
 0x46b   :  { %v17965_v62 = vld [vmem:[%s23646_s3 + $0x9e4] ss:$20 sps:$4 sm:$0xff]  }
 0x46c   :  { %10438 = vmatpush2.bf16.msra.mxu0 %v17909_v40  ;;  %v17968_v40 = vld [vmem:[%s23646_s3 + $0x714] ss:$20 sps:$4 sm:$0xff]  }
 0x46d   :  { %10451 = vmatpush1.bf16.msra.mxu1 %v17912_v21  ;;  %10489 = vmatprep.subr.bf16.mxu0 %v17917_v19  ;;  %v17963_v21 = vld [vmem:[%s23646_s3 + $0x9e0] ss:$20 sps:$4 sm:$0xff]   ;;  %v17966_v19 = vld [vmem:[%s23646_s3 + $0x710] ss:$20 sps:$4 sm:$0xff]  }
 0x46e   :  { %10452 = vmatprep.subr.bf16.mxu1 %v17920_v58  ;;  %v17971_v58 = vld [vmem:[%s23646_s3 + $0x9bc] ss:$20 sps:$4 sm:$0xff]  }
 0x46f   :  { %10440 = vmatmul.mubr.bf16.vlgmr.msra.gmra.mxu0 %v19856_v5  ;;  %v10154_v29 = vpop.f32.mrf.mxu0 }
 0x470   :  { %v10155_v55 = vadd.f32 %v10154_v29, %v20393_v37  ;;  %10490 = vmatpush1.bf16.msra.mxu0 %v17915_v4  ;;  %10521 = vmatprep.mubr.bf16.mxu0 %v20133_v9  ;;  %v17974_v4 = vld [vmem:[%s23646_s3 + $0x6ec] ss:$20 sps:$4 sm:$0xff]   ;;  %v17980_v29 = vld [vmem:[%s23646_s3 + $0x6c4] ss:$20 sps:$4 sm:$0xff]  }
 0x471   :  { %10453 = vmatpush1.bf16.msra.mxu1 %v17918_v51  ;;  %v10156_v53 = vpop.f32.mrf.mxu0  ;;  %10491 = vmatprep.subr.bf16.mxu0 %v17923_v43  ;;  %v17969_v51 = vld [vmem:[%s23646_s3 + $0x9b8] ss:$20 sps:$4 sm:$0xff]   ;;  %v17972_v43 = vld [vmem:[%s23646_s3 + $0x6e8] ss:$20 sps:$4 sm:$0xff]  }
 0x472   :  { %v10157_v37 = vadd.f32 %v10156_v53, %v20398_v17  ;;  %10454 = vmatprep.subr.bf16.mxu1 %v17926_v8  ;;  %v17930_v17 = vld [vmem:[%s23646_s3 + $0x580] ss:$20 sps:$4 sm:$0xff]  }
 0x473   :  { %v10158_v33 = vpop.f32.mrf.mxu0  ;;  %v10195_v18 = vpop.f32.mrf.mxu1  ;;  %v17977_v8 = vld [vmem:[%s23646_s3 + $0x994] ss:$20 sps:$4 sm:$0xff]   ;;  %v17983_v53 = vld [vmem:[%s23646_s3 + $0x96c] ss:$20 sps:$4 sm:$0xff]  }
 0x474   :  { %v20728_v3 = vadd.f32 %v10195_v18, %v10155_v55  ;;  %10492 = vmatpush1.bf16.msra.mxu0 %v17921_v2  ;;  %v17975_v55 = vld [vmem:[%s23646_s3 + $0x990] ss:$20 sps:$4 sm:$0xff]   ;;  %v17978_v2 = vld [vmem:[%s23646_s3 + $0x6c0] ss:$20 sps:$4 sm:$0xff]  }
 0x475   :  { %10455 = vmatpush1.bf16.msra.mxu1 %v17924_v46  ;;  %v10159_v0 = vpop.f32.mrf.mxu0  ;;  %v10197_v14 = vpop.f32.mrf.mxu1  ;;  %10493 = vmatprep.subr.bf16.mxu0 %v17929_v32  ;;  %v17986_v46 = vld [vmem:[%s23646_s3 + $0x69c] ss:$20 sps:$4 sm:$0xff]   ;;  %v17992_v33 = vld [vmem:[%s23646_s3 + $0x674] ss:$20 sps:$4 sm:$0xff]  }
 0x476   :  { %v20739_v48 = vadd.f32 %v10197_v14, %v10157_v37  ;;  %10456 = vmatprep.subr.bf16.mxu1 %v17932_v22  ;;  %v17981_v32 = vld [vmem:[%s23646_s3 + $0x968] ss:$20 sps:$4 sm:$0xff]   ;;  %v17984_v37 = vld [vmem:[%s23646_s3 + $0x698] ss:$20 sps:$4 sm:$0xff]   ;;  %v17987_v18 = vld [vmem:[%s23646_s3 + $0x940] ss:$20 sps:$4 sm:$0xff]  }
 0x477   :  { %v10199_v30 = vpop.f32.mrf.mxu1  ;;  %v17989_v22 = vld [vmem:[%s23646_s3 + $0x944] ss:$20 sps:$4 sm:$0xff]   ;;  %v17995_v0 = vld [vmem:[%s23646_s3 + $0x91c] ss:$20 sps:$4 sm:$0xff]   ;;  %v17998_v14 = vld [vmem:[%s23646_s3 + $0x64c] ss:$20 sps:$4 sm:$0xff]  }
 0x478   :  { %10494 = vmatpush1.bf16.msra.mxu0 %v17927_v45  ;;  %v17990_v45 = vld [vmem:[%s23646_s3 + $0x670] ss:$20 sps:$4 sm:$0xff]  }
 0x479   :  { %10457 = vmatpush1.bf16.msra.mxu1 %v17930_v17  ;;  %v10200_v59 = vpop.f32.mrf.mxu1  ;;  %10495 = vmatprep.subr.bf16.mxu0 %v17935_v56  ;;  %v17993_v17 = vld [vmem:[%s23646_s3 + $0x918] ss:$20 sps:$4 sm:$0xff]   ;;  %v17996_v56 = vld [vmem:[%s23646_s3 + $0x648] ss:$20 sps:$4 sm:$0xff]  }
 0x47a   :  { %10458 = vmatprep.subr.bf16.mxu1 %v17938_v13  ;;  %v18001_v13 = vld [vmem:[%s23646_s3 + $0x8f4] ss:$20 sps:$4 sm:$0xff]   ;;  %v18004_v30 = vld [vmem:[%s23646_s3 + $0xb24] ss:$20 sps:$4 sm:$0xff]  }
 0x47b   :  { %v18002_v59 = vld [vmem:[%s23646_s3 + $0xb20] ss:$20 sps:$4 sm:$0xff]  }
 0x47c   :  { %10496 = vmatpush1.bf16.msra.mxu0 %v17933_v28  ;;  %v17999_v28 = vld [vmem:[%s23646_s3 + $0x8f0] ss:$20 sps:$4 sm:$0xff]  }
 0x47d   :  { %10459 = vmatpush1.bf16.msra.mxu1 %v17936_v7  ;;  %10497 = vmatprep.subr.bf16.mxu0 %v17941_v57  ;;  %v18007_v7 = vld [vmem:[%s23646_s3 + $0x8cc] ss:$20 sps:$4 sm:$0xff]   ;;  %v18010_v57 = vld [vmem:[%s23646_s3 + $0xafc] ss:$20 sps:$4 sm:$0xff]  }
 0x47e   :  { %10460 = vmatprep.subr.bf16.mxu1 %v17944_v63  ;;  %v18005_v63 = vld [vmem:[%s23646_s3 + $0x8c8] ss:$20 sps:$4 sm:$0xff]  }
 0x480   :  { %10498 = vmatpush1.bf16.msra.mxu0 %v17939_v41  ;;  %v18008_v41 = vld [vmem:[%s23646_s3 + $0xaf8] ss:$20 sps:$4 sm:$0xff]  }
 0x481   :  { %10461 = vmatpush1.bf16.msra.mxu1 %v17942_v36  ;;  %10499 = vmatprep.subr.bf16.mxu0 %v17947_v26  ;;  %v18013_v36 = vld [vmem:[%s23646_s3 + $0xda4] ss:$20 sps:$4 sm:$0xff]   ;;  %v18016_v26 = vld [vmem:[%s23646_s3 + $0xad4] ss:$20 sps:$4 sm:$0xff]  }
 0x482   :  { %10462 = vmatprep.subr.bf16.mxu1 %v17950_v10  ;;  %v18011_v10 = vld [vmem:[%s23646_s3 + $0xda0] ss:$20 sps:$4 sm:$0xff]  }
 0x484   :  { %10500 = vmatpush1.bf16.msra.mxu0 %v17945_v61  ;;  %v18014_v61 = vld [vmem:[%s23646_s3 + $0xad0] ss:$20 sps:$4 sm:$0xff]  }
 0x485   :  { %10463 = vmatpush1.bf16.msra.mxu1 %v17948_v38  ;;  %10501 = vmatprep.subr.bf16.mxu0 %v17953_v11  ;;  %v18019_v38 = vld [vmem:[%s23646_s3 + $0xd7c] ss:$20 sps:$4 sm:$0xff]   ;;  %v18022_v11 = vld [vmem:[%s23646_s3 + $0xaac] ss:$20 sps:$4 sm:$0xff]  }
 0x486   :  { %10464 = vmatprep.subr.bf16.mxu1 %v17956_v24 }
 0x488   :  { %10502 = vmatpush1.bf16.msra.mxu0 %v17951_v20  ;;  %v18017_v20 = vld [vmem:[%s23646_s3 + $0xd78] ss:$20 sps:$4 sm:$0xff]  }
 0x489   :  { %10465 = vmatpush2.bf16.msra.mxu1 %v17954_v39  ;;  %10503 = vmatprep.subr.bf16.mxu0 %v17959_v47  ;;  %v18020_v47 = vld [vmem:[%s23646_s3 + $0xaa8] ss:$20 sps:$4 sm:$0xff]  }
 0x48a   :  { %10466 = vmatprep.subr.bf16.mxu1 %v17962_v49  ;;  %v18025_v49 = vld [vmem:[%s23646_s3 + $0xd54] ss:$20 sps:$4 sm:$0xff]  }
 0x48c   :  { %10504 = vmatpush1.bf16.msra.mxu0 %v17957_v25  ;;  %v18028_v25 = vld [vmem:[%s23646_s3 + $0xa84] ss:$20 sps:$4 sm:$0xff]  }
 0x48d   :  { %10467 = vmatpush2.bf16.msra.mxu1 %v17960_v12  ;;  %10505 = vmatprep.subr.bf16.mxu0 %v17965_v62 }
 0x48e   :  { %10468 = vmatprep.subr.bf16.mxu1 %v17968_v40  ;;  %v18023_v40 = vld [vmem:[%s23646_s3 + $0xd50] ss:$20 sps:$4 sm:$0xff]  }
 0x490   :  { %10506 = vmatpush2.bf16.msra.mxu0 %v17963_v21 }
 0x491   :  { %10469 = vmatpush2.bf16.msra.mxu1 %v17966_v19  ;;  %10507 = vmatprep.subr.bf16.mxu0 %v17971_v58  ;;  %v18026_v58 = vld [vmem:[%s23646_s3 + $0xa80] ss:$20 sps:$4 sm:$0xff]  }
 0x492   :  { %10470 = vmatprep.subr.bf16.mxu1 %v17974_v4  ;;  %v18031_v4 = vld [vmem:[%s23646_s3 + $0xd2c] ss:$20 sps:$4 sm:$0xff]  }
 0x494   :  { %10508 = vmatpush2.bf16.msra.mxu0 %v17969_v51  ;;  %v18034_v51 = vld [vmem:[%s23646_s3 + $0xa5c] ss:$20 sps:$4 sm:$0xff]  }
 0x495   :  { %10471 = vmatpush2.bf16.msra.mxu1 %v17972_v43  ;;  %10509 = vmatprep.subr.bf16.mxu0 %v17977_v8  ;;  %v18029_v8 = vld [vmem:[%s23646_s3 + $0xd28] ss:$20 sps:$4 sm:$0xff]  }
 0x496   :  { %10472 = vmatprep.subr.bf16.mxu1 %v17980_v29 }
 0x498   :  { %10510 = vmatpush2.bf16.msra.mxu0 %v17975_v55  ;;  %v18032_v55 = vld [vmem:[%s23646_s3 + $0xa58] ss:$20 sps:$4 sm:$0xff]  }
 0x499   :  { %10473 = vmatpush2.bf16.msra.mxu1 %v17978_v2  ;;  %10511 = vmatprep.subr.bf16.mxu0 %v17983_v53  ;;  %v18037_v2 = vld [vmem:[%s23646_s3 + $0xd04] ss:$20 sps:$4 sm:$0xff]   ;;  %v18040_v53 = vld [vmem:[%s23646_s3 + $0xa34] ss:$20 sps:$4 sm:$0xff]  }
 0x49a   :  { %10474 = vmatprep.subr.bf16.mxu1 %v17986_v46  ;;  %v18035_v46 = vld [vmem:[%s23646_s3 + $0xd00] ss:$20 sps:$4 sm:$0xff]  }
 0x49c   :  { %10512 = vmatpush2.bf16.msra.mxu0 %v17981_v32  ;;  %v18038_v32 = vld [vmem:[%s23646_s3 + $0xa30] ss:$20 sps:$4 sm:$0xff]  }
 0x49d   :  { %10475 = vmatpush2.bf16.msra.mxu1 %v17984_v37  ;;  %10513 = vmatprep.subr.bf16.mxu0 %v17989_v22  ;;  %v18043_v37 = vld [vmem:[%s23646_s3 + $0xcdc] ss:$20 sps:$4 sm:$0xff]   ;;  %v18046_v22 = vld [vmem:[%s23646_s3 + $0xa0c] ss:$20 sps:$4 sm:$0xff]  }
 0x49e   :  { %10476 = vmatprep.subr.bf16.mxu1 %v17992_v33  ;;  %v18041_v33 = vld [vmem:[%s23646_s3 + $0xcd8] ss:$20 sps:$4 sm:$0xff]  }
 0x4a0   :  { %10514 = vmatpush2.bf16.msra.mxu0 %v17987_v18  ;;  %v18044_v18 = vld [vmem:[%s23646_s3 + $0xa08] ss:$20 sps:$4 sm:$0xff]  }
 0x4a1   :  { %10477 = vmatpush2.bf16.msra.mxu1 %v17990_v45  ;;  %10515 = vmatprep.subr.bf16.mxu0 %v17995_v0  ;;  %v18049_v45 = vld [vmem:[%s23646_s3 + $0xcb4] ss:$20 sps:$4 sm:$0xff]   ;;  %v18052_v0 = vld [vmem:[%s23646_s3 + $0xc64] ss:$20 sps:$4 sm:$0xff]  }
 0x4a2   :  { %10478 = vmatprep.subr.bf16.mxu1 %v17998_v14  ;;  %v18047_v14 = vld [vmem:[%s23646_s3 + $0xcb0] ss:$20 sps:$4 sm:$0xff]  }
 0x4a4   :  { %10516 = vmatpush2.bf16.msra.mxu0 %v17993_v17  ;;  %v18050_v17 = vld [vmem:[%s23646_s3 + $0xc60] ss:$20 sps:$4 sm:$0xff]  }
 0x4a5   :  { %10479 = vmatpush2.bf16.msra.mxu1 %v17996_v56  ;;  %10517 = vmatprep.subr.bf16.mxu0 %v18001_v13  ;;  %v18055_v56 = vld [vmem:[%s23646_s3 + $0xc8c] ss:$20 sps:$4 sm:$0xff]   ;;  %v18058_v13 = vld [vmem:[%s23646_s3 + $0xc3c] ss:$20 sps:$4 sm:$0xff]  }
 0x4a6   :  { %10530 = vmatprep.subr.bf16.mxu1 %v18004_v30  ;;  %v18053_v30 = vld [vmem:[%s23646_s3 + $0xc88] ss:$20 sps:$4 sm:$0xff]  }
 0x4a8   :  { %10481 = vmatmul.mubr.bf16.vlgmr.msra.gmra.mxu1 %v20106_v50  ;;  %10518 = vmatpush2.bf16.msra.mxu0 %v17999_v28  ;;  %v18056_v28 = vld [vmem:[%s23646_s3 + $0xc38] ss:$20 sps:$4 sm:$0xff]  }
 0x4a9   :  { %10531 = vmatpush1.bf16.msra.mxu1 %v18002_v59  ;;  %10562 = vmatprep.mubr.bf16.mxu1 %v20168_v34  ;;  %v18061_v59 = vld [vmem:[%s23646_s3 + $0xee4] ss:$20 sps:$4 sm:$0xff]  }
 0x4aa   :  { %10519 = vmatprep.subr.bf16.mxu0 %v18007_v7  ;;  %10532 = vmatprep.subr.bf16.mxu1 %v18010_v57  ;;  %v18064_v7 = vld [vmem:[%s23646_s3 + $0xc14] ss:$20 sps:$4 sm:$0xff]  }
 0x4ab   :  { %v18059_v57 = vld [vmem:[%s23646_s3 + $0xee0] ss:$20 sps:$4 sm:$0xff]  }
 0x4ac   :  { %10520 = vmatpush2.bf16.msra.mxu0 %v18005_v63  ;;  %v18062_v63 = vld [vmem:[%s23646_s3 + $0xc10] ss:$20 sps:$4 sm:$0xff]  }
 0x4ad   :  { %10533 = vmatpush1.bf16.msra.mxu1 %v18008_v41  ;;  %10571 = vmatprep.subr.bf16.mxu0 %v18013_v36  ;;  %v18067_v41 = vld [vmem:[%s23646_s3 + $0xebc] ss:$20 sps:$4 sm:$0xff]   ;;  %v18070_v36 = vld [vmem:[%s23646_s3 + $0xbec] ss:$20 sps:$4 sm:$0xff]  }
 0x4ae   :  { %10534 = vmatprep.subr.bf16.mxu1 %v18016_v26  ;;  %v18065_v26 = vld [vmem:[%s23646_s3 + $0xeb8] ss:$20 sps:$4 sm:$0xff]  }
 0x4af   :  { %v20914_v24 = vpop.f32.mrf.mxu0  ;;  %10522 = vmatmul.mubr.bf16.vlgmr.msra.gmra.mxu0 %v20141_v23 }
 0x4b0   :  { %10572 = vmatpush1.bf16.msra.mxu0 %v18011_v10  ;;  %10603 = vmatprep.mubr.bf16.mxu0 %v20192_v15  ;;  %v18068_v10 = vld [vmem:[%s23646_s3 + $0xbe8] ss:$20 sps:$4 sm:$0xff]  }
 0x4b1   :  { %v20921_v39 = vpop.f32.mrf.mxu0  ;;  %10535 = vmatpush1.bf16.msra.mxu1 %v18014_v61  ;;  %10573 = vmatprep.subr.bf16.mxu0 %v18019_v38  ;;  %v18073_v61 = vld [vmem:[%s23646_s3 + $0xe94] ss:$20 sps:$4 sm:$0xff]   ;;  %v18076_v38 = vld [vmem:[%s23646_s3 + $0xbc4] ss:$20 sps:$4 sm:$0xff]  }
 0x4b2   :  { %10536 = vmatprep.subr.bf16.mxu1 %v18022_v11  ;;  %v18071_v11 = vld [vmem:[%s23646_s3 + $0xe90] ss:$20 sps:$4 sm:$0xff]  }
 0x4b3   :  { %v10240_v12 = vpop.f32.mrf.mxu0  ;;  %v20932_v62 = vpop.f32.mrf.mxu1 }
 0x4b4   :  { %10574 = vmatpush1.bf16.msra.mxu0 %v18017_v20  ;;  %v18074_v20 = vld [vmem:[%s23646_s3 + $0xbc0] ss:$20 sps:$4 sm:$0xff]   ;;  %v18080_v12 = vld [vmem:[%s23646_s3 + $0xb98] ss:$20 sps:$4 sm:$0xff]  }
 0x4b5   :  { %v10241_v21 = vpop.f32.mrf.mxu0  ;;  %v20937_v19 = vpop.f32.mrf.mxu1  ;;  %10537 = vmatpush1.bf16.msra.mxu1 %v18020_v47  ;;  %10575 = vmatprep.subr.bf16.mxu0 %v18025_v49  ;;  %v18079_v47 = vld [vmem:[%s23646_s3 + $0xe6c] ss:$20 sps:$4 sm:$0xff]   ;;  %v18082_v49 = vld [vmem:[%s23646_s3 + $0xb9c] ss:$20 sps:$4 sm:$0xff]  }
 0x4b6   :  { %10538 = vmatprep.subr.bf16.mxu1 %v18028_v25  ;;  %v18077_v25 = vld [vmem:[%s23646_s3 + $0xe68] ss:$20 sps:$4 sm:$0xff]  }
 0x4b7   :  { %v10281_v43 = vpop.f32.mrf.mxu1  ;;  %v18088_v21 = vld [vmem:[%s23646_s3 + $0xb74] ss:$20 sps:$4 sm:$0xff]  }
 0x4b8   :  { %10576 = vmatpush1.bf16.msra.mxu0 %v18023_v40  ;;  %v18085_v40 = vld [vmem:[%s23646_s3 + $0xe44] ss:$20 sps:$4 sm:$0xff]   ;;  %v18094_v43 = vld [vmem:[%s23646_s3 + $0xb4c] ss:$20 sps:$4 sm:$0xff]  }
 0x4b9   :  { %v10282_v29 = vpop.f32.mrf.mxu1  ;;  %10539 = vmatpush1.bf16.msra.mxu1 %v18026_v58  ;;  %10577 = vmatprep.subr.bf16.mxu0 %v18031_v4  ;;  %v18083_v58 = vld [vmem:[%s23646_s3 + $0xe40] ss:$20 sps:$4 sm:$0xff]   ;;  %v18086_v4 = vld [vmem:[%s23646_s3 + $0xb70] ss:$20 sps:$4 sm:$0xff]  }
 0x4ba   :  { %10540 = vmatprep.subr.bf16.mxu1 %v18034_v51  ;;  %v18091_v51 = vld [vmem:[%s23646_s3 + $0xe1c] ss:$20 sps:$4 sm:$0xff]  }
 0x4bb   :  { %v18092_v29 = vld [vmem:[%s23646_s3 + $0xb48] ss:$20 sps:$4 sm:$0xff]  }
 0x4bc   :  { %10578 = vmatpush1.bf16.msra.mxu0 %v18029_v8  ;;  %v18089_v8 = vld [vmem:[%s23646_s3 + $0xe18] ss:$20 sps:$4 sm:$0xff]  }
 0x4bd   :  { %10541 = vmatpush1.bf16.msra.mxu1 %v18032_v55  ;;  %10579 = vmatprep.subr.bf16.mxu0 %v18037_v2  ;;  %v18097_v55 = vld [vmem:[%s23646_s3 + $0xdf4] ss:$20 sps:$4 sm:$0xff]   ;;  %v18100_v2 = vld [vmem:[%s23646_s3 + $0x1024] ss:$20 sps:$4 sm:$0xff]  }
 0x4be   :  { %10542 = vmatprep.subr.bf16.mxu1 %v18040_v53  ;;  %v18095_v53 = vld [vmem:[%s23646_s3 + $0xdf0] ss:$20 sps:$4 sm:$0xff]  }
 0x4c0   :  { %10580 = vmatpush1.bf16.msra.mxu0 %v18035_v46  ;;  %v18098_v46 = vld [vmem:[%s23646_s3 + $0x1020] ss:$20 sps:$4 sm:$0xff]  }
 0x4c1   :  { %10543 = vmatpush1.bf16.msra.mxu1 %v18038_v32  ;;  %10581 = vmatprep.subr.bf16.mxu0 %v18043_v37  ;;  %v18103_v32 = vld [vmem:[%s23646_s3 + $0xdcc] ss:$20 sps:$4 sm:$0xff]   ;;  %v18106_v37 = vld [vmem:[%s23646_s3 + $0xffc] ss:$20 sps:$4 sm:$0xff]  }
 0x4c2   :  { %10544 = vmatprep.subr.bf16.mxu1 %v18046_v22  ;;  %v7092_v22 = vld [vmem:[%s23646_s3 + $0x1188] sm:$0xff] }
 0x4c4   :  { %10582 = vmatpush1.bf16.msra.mxu0 %v18041_v33 }
 0x4c5   :  { %10545 = vmatpush1.bf16.msra.mxu1 %v18044_v18  ;;  %10583 = vmatprep.subr.bf16.mxu0 %v18049_v45  ;;  %v18101_v18 = vld [vmem:[%s23646_s3 + $0xdc8] ss:$20 sps:$4 sm:$0xff]   ;;  %v18104_v45 = vld [vmem:[%s23646_s3 + $0xff8] ss:$20 sps:$4 sm:$0xff]  }
 0x4c6   :  { %10546 = vmatprep.subr.bf16.mxu1 %v18052_v0  ;;  %v15902_v0 = vcombine.high %v7092_v22, %v7092_v22 }
 0x4c8   :  { %10584 = vmatpush1.bf16.msra.mxu0 %v18047_v14  ;;  %v15901_v14 = vcombine.low %v7092_v22, %v7092_v22  ;;  %v18142_v22 = vld [vmem:[%s23646_s3 + $0x1138] ss:$20 sps:$4 sm:$0xff]  }
 0x4c9   :  { %10547 = vmatpush2.bf16.msra.mxu1 %v18050_v17  ;;  %10585 = vmatprep.subr.bf16.mxu0 %v18055_v56  ;;  %v18109_v56 = vld [vmem:[%s23646_s3 + $0xfd4] ss:$20 sps:$4 sm:$0xff]  }
 0x4ca   :  { %10548 = vmatprep.subr.bf16.mxu1 %v18058_v13  ;;  %v10237_v13 = vadd.f32 %v20914_v24, %v20728_v3 }
 0x4cc   :  { %10586 = vmatpush1.bf16.msra.mxu0 %v18053_v30  ;;  %v10278_v3 = vadd.f32 %v20932_v62, %v10237_v13  ;;  %v18152_v13 = vld [vmem:[%s23646_s3 + $0x10e8] ss:$20 sps:$4 sm:$0xff]  }
 0x4cd   :  { %10549 = vmatpush2.bf16.msra.mxu1 %v18056_v28  ;;  %10587 = vmatprep.subr.bf16.mxu0 %v18061_v59  ;;  %v18107_v28 = vld [vmem:[%s23646_s3 + $0xfd0] ss:$20 sps:$4 sm:$0xff]   ;;  %v10030_v59 = vsel %vm10022_vm15, %v15901_v14, 0 }
 0x4ce   :  { %10550 = vmatprep.subr.bf16.mxu1 %v18064_v7  ;;  %v18115_v7 = vld [vmem:[%s23646_s3 + $0x268] ss:$20 sps:$4 sm:$0xff]   ;;  %v18150_v14 = vld [vmem:[%s23646_s3 + $0x150] ss:$20 sps:$4 sm:$0xff]  }
 0x4d0   :  { %10588 = vmatpush2.bf16.msra.mxu0 %v18059_v57  ;;  %v10239_v57 = vadd.f32 %v20921_v39, %v20739_v48  ;;  %v18112_v48 = vld [vmem:[%s23646_s3 + $0xfa8] ss:$20 sps:$4 sm:$0xff]  }
 0x4d1   :  { %10551 = vmatpush2.bf16.msra.mxu1 %v18062_v63  ;;  %10589 = vmatprep.subr.bf16.mxu0 %v18067_v41  ;;  %v18114_v63 = vld [vmem:[%s23646_s3 + $0xfac] ss:$20 sps:$4 sm:$0xff]  }
 0x4d2   :  { %10552 = vmatprep.subr.bf16.mxu1 %v18070_v36  ;;  %v10280_v36 = vadd.f32 %v20937_v19, %v10239_v57  ;;  %v18160_v57 = vld [vmem:[%s23646_s3 + $0x740] ss:$20 sps:$4 sm:$0xff]  }
 0x4d4   :  { %10590 = vmatpush2.bf16.msra.mxu0 %v18065_v26 }
 0x4d5   :  { %10553 = vmatpush2.bf16.msra.mxu1 %v18068_v10  ;;  %10591 = vmatprep.subr.bf16.mxu0 %v18073_v61  ;;  %v18119_v61 = vld [vmem:[%s23646_s3 + $0xf84] ss:$20 sps:$4 sm:$0xff]  }
 0x4d6   :  { %10554 = vmatprep.subr.bf16.mxu1 %v18076_v38 }
 0x4d8   :  { %10592 = vmatpush2.bf16.msra.mxu0 %v18071_v11 }
 0x4d9   :  { %10555 = vmatpush2.bf16.msra.mxu1 %v18074_v20  ;;  %10593 = vmatprep.subr.bf16.mxu0 %v18079_v47  ;;  %v18117_v20 = vld [vmem:[%s23646_s3 + $0xf80] ss:$20 sps:$4 sm:$0xff]  }
 0x4da   :  { %10556 = vmatprep.subr.bf16.mxu1 %v18082_v49  ;;  %v18120_v47 = vld [vmem:[%s23646_s3 + $0x240] ss:$20 sps:$4 sm:$0xff]   ;;  %v18124_v49 = vld [vmem:[%s23646_s3 + $0xf5c] ss:$20 sps:$4 sm:$0xff]  }
 0x4dc   :  { %10594 = vmatpush2.bf16.msra.mxu0 %v18077_v25  ;;  %v18121_v25 = vld [vmem:[%s23646_s3 + $0x100] ss:$20 sps:$4 sm:$0xff]  }
 0x4dd   :  { %10557 = vmatpush2.bf16.msra.mxu1 %v18080_v12  ;;  %10595 = vmatprep.subr.bf16.mxu0 %v18085_v40  ;;  %v18122_v12 = vld [vmem:[%s23646_s3 + $0xf58] ss:$20 sps:$4 sm:$0xff]  }
 0x4de   :  { %10558 = vmatprep.subr.bf16.mxu1 %v18088_v21  ;;  %v18125_v40 = vld [vmem:[%s23646_s3 + $0x218] ss:$20 sps:$4 sm:$0xff]   ;;  %v18129_v21 = vld [vmem:[%s23646_s3 + $0xf34] ss:$20 sps:$4 sm:$0xff]  }
 0x4e0   :  { %10596 = vmatpush2.bf16.msra.mxu0 %v18083_v58  ;;  %v18127_v58 = vld [vmem:[%s23646_s3 + $0xf30] ss:$20 sps:$4 sm:$0xff]  }
 0x4e1   :  { %10559 = vmatpush2.bf16.msra.mxu1 %v18086_v4  ;;  %10597 = vmatprep.subr.bf16.mxu0 %v18091_v51  ;;  %v18130_v4 = vld [vmem:[%s23646_s3 + $0x1f0] ss:$20 sps:$4 sm:$0xff]   ;;  %v18134_v51 = vld [vmem:[%s23646_s3 + $0xf0c] ss:$20 sps:$4 sm:$0xff]  }
 0x4e2   :  { %10560 = vmatprep.subr.bf16.mxu1 %v18094_v43  ;;  %v18131_v43 = vld [vmem:[%s23646_s3 + $0xb0] ss:$20 sps:$4 sm:$0xff]  }
 0x4e4   :  { %10598 = vmatpush2.bf16.msra.mxu0 %v18089_v8  ;;  %v18132_v8 = vld [vmem:[%s23646_s3 + $0xf08] ss:$20 sps:$4 sm:$0xff]  }
 0x4e5   :  { %10561 = vmatpush2.bf16.msra.mxu1 %v18092_v29  ;;  %10599 = vmatprep.subr.bf16.mxu0 %v18097_v55  ;;  %v18135_v29 = vld [vmem:[%s23646_s3 + $0x1c8] ss:$20 sps:$4 sm:$0xff]   ;;  %v18139_v55 = vld [vmem:[%s23646_s3 + $0x1164] ss:$20 sps:$4 sm:$0xff]  }
 0x4e6   :  { %10612 = vmatprep.subr.bf16.mxu1 %v18100_v2  ;;  %v18136_v2 = vld [vmem:[%s23646_s3 + $0x88] ss:$20 sps:$4 sm:$0xff]  }
 0x4e8   :  { %10563 = vmatmul.mubr.bf16.vlgmr.msra.gmra.mxu1 %v20366_v1  ;;  %10600 = vmatpush2.bf16.msra.mxu0 %v18095_v53  ;;  %v10359_v33 = vpop.f32.mrf.mxu1  ;;  %v18137_v53 = vld [vmem:[%s23646_s3 + $0x1160] ss:$20 sps:$4 sm:$0xff]  }
 0x4e9   :  { %10613 = vmatpush1.bf16.msra.mxu1 %v18098_v46  ;;  %10644 = vmatprep.mubr.bf16.mxu1 %v20483_v31  ;;  %v18140_v46 = vld [vmem:[%s23646_s3 + $0x1a0] ss:$20 sps:$4 sm:$0xff]  }
 0x4ea   :  { %v10361_v17 = vpop.f32.mrf.mxu1  ;;  %10601 = vmatprep.subr.bf16.mxu0 %v18103_v32  ;;  %10614 = vmatprep.subr.bf16.mxu1 %v18106_v37  ;;  %v18144_v32 = vld [vmem:[%s23646_s3 + $0x113c] ss:$20 sps:$4 sm:$0xff]   ;;  %v18141_v37 = vld [vmem:[%s23646_s3 + $0x60] ss:$20 sps:$4 sm:$0xff]  }
 0x4ec   :  { %10602 = vmatpush2.bf16.msra.mxu0 %v18101_v18  ;;  %v10363_v30 = vpop.f32.mrf.mxu1  ;;  %v18149_v18 = vld [vmem:[%s23646_s3 + $0x1114] ss:$20 sps:$4 sm:$0xff]  }
 0x4ed   :  { %10615 = vmatpush1.bf16.msra.mxu1 %v18104_v45  ;;  %15906 = vmatprep.subr.msk.bf16.mxu0 %vm10022_vm15, %v15902_v0  ;;  %v18146_v45 = vld [vmem:[%s23646_s3 + $0x38] ss:$20 sps:$4 sm:$0xff]   ;;  %v18147_v0 = vld [vmem:[%s23646_s3 + $0x1110] ss:$20 sps:$4 sm:$0xff]   ;;  %v18155_v30 = vld [vmem:[%s23646_s3 + $0x768] ss:$20 sps:$4 sm:$0xff]  }
 0x4ee   :  { %v10364_v24 = vpop.f32.mrf.mxu1  ;;  %10616 = vmatprep.subr.bf16.mxu1 %v18109_v56  ;;  %v18151_v56 = vld [vmem:[%s23646_s3 + $0x10] ss:$20 sps:$4 sm:$0xff]  }
 0x4ef   :  { %v10318_v41 = vpop.f32.mrf.mxu0  ;;  %10604 = vmatmul.mubr.bf16.vlgmr.msra.gmra.mxu0 %v20375_v42  ;;  %v18161_v24 = vld [vmem:[%s23646_s3 + $0x600] ss:$20 sps:$4 sm:$0xff]  }
 0x4f0   :  { %v10319_v26 = vadd.f32 %v10318_v41, %v10278_v3  ;;  %10668 = vmatpush1.bf16.msra.mxu0 %v10030_v59  ;;  %10685 = vmatprep.mubr.bf16.mxu0 %v23714_v54  ;;  %v18116_v54 = vld [vmem:[%s23646_s3 + $0x128] ss:$20 sps:$4 sm:$0xff]   ;;  %v18165_v41 = vld [vmem:[%s23646_s3 + $0x718] ss:$20 sps:$4 sm:$0xff]  }
 0x4f1   :  { %v10320_v10 = vpop.f32.mrf.mxu0  ;;  %10617 = vmatpush1.bf16.msra.mxu1 %v18107_v28  ;;  %16462 = vmatprep.subr.bf16.mxu0 %v18115_v7  ;;  %v18159_v28 = vld [vmem:[%s23646_s3 + $0x10c4] ss:$20 sps:$4 sm:$0xff]   ;;  %v18156_v59 = vld [vmem:[%s23646_s3 + $0x628] ss:$20 sps:$4 sm:$0xff]   ;;  %v18157_v7 = vld [vmem:[%s23646_s3 + $0x10c0] ss:$20 sps:$4 sm:$0xff]  }
 0x4f2   :  { %v21128_v39 = vadd.f32 %v10359_v33, %v10319_v26  ;;  %v10321_v62 = vadd.f32 %v10320_v10, %v10280_v36  ;;  %10618 = vmatprep.subr.bf16.mxu1 %v18114_v63  ;;  %v18145_v33 = vld [vmem:[%s23646_s3 + $0x178] ss:$20 sps:$4 sm:$0xff]   ;;  %v18164_v3 = vld [vmem:[%s23646_s3 + $0x109c] ss:$20 sps:$4 sm:$0xff]  }
 0x4f3   :  { %v10322_v19 = vpop.f32.mrf.mxu0  ;;  %v18162_v63 = vld [vmem:[%s23646_s3 + $0x1098] ss:$20 sps:$4 sm:$0xff]   ;;  %v18167_v36 = vld [vmem:[%s23646_s3 + $0x1070] ss:$20 sps:$4 sm:$0xff]  }
 0x4f4   :  { %v21133_v38 = vadd.f32 %v10361_v17, %v10321_v62  ;;  %11035 = vrot.lane.b32.xlu1 %v21128_v39, %s18292_s20  ;;  %v18154_v17 = vld [vmem:[%s23646_s3 + $0x10ec] ss:$20 sps:$4 sm:$0xff]   ;;  %v18170_v26 = vld [vmem:[%s23646_s3 + $0x6f0] ss:$20 sps:$4 sm:$0xff]   ;;  %v18172_v62 = vld [vmem:[%s23646_s3 + $0x1048] ss:$20 sps:$4 sm:$0xff]  }
 0x4f5   :  { %v10323_v11 = vpop.f32.mrf.mxu0  ;;  %10619 = vmatpush1.bf16.msra.mxu1 %v18112_v48  ;;  %v18174_v10 = vld [vmem:[%s23646_s3 + $0x104c] ss:$20 sps:$4 sm:$0xff]   ;;  %v18171_v48 = vld [vmem:[%s23646_s3 + $0x5b0] ss:$20 sps:$4 sm:$0xff]   ;;  %v18177_v19 = vld [vmem:[%s23646_s3 + $0x4e8] ss:$20 sps:$4 sm:$0xff]  }
 0x4f6   :  { %10620 = vmatprep.subr.bf16.mxu1 %v18119_v61  ;;  %v18175_v61 = vld [vmem:[%s23646_s3 + $0x6c8] ss:$20 sps:$4 sm:$0xff]  }
 0x4f7   :  { %15907 = vmatmul.mubr.msk.bf16.vlgmr.msra.gmra.mxu0 %vm6206_vm12, %v20471_v16  ;;  %v18178_v11 = vld [vmem:[%s23646_s3 + $0x3a8] ss:$20 sps:$4 sm:$0xff]  }
 0x4f8   :  { %16463 = vmatpush3.bf16.msra.mxu0 %v18116_v54  ;;  %10726 = vmatprep.mubr.bf16.mxu0 %v19821_v35  ;;  %v18126_v35 = vld [vmem:[%s23646_s3 + $0xd8] ss:$20 sps:$4 sm:$0xff]   ;;  %v18176_v54 = vld [vmem:[%s23646_s3 + $0x588] ss:$20 sps:$4 sm:$0xff]  }
 0x4f9   :  { %10621 = vmatpush1.bf16.msra.mxu1 %v18117_v20  ;;  %16464 = vmatprep.subr.bf16.mxu0 %v18120_v47  ;;  %v18179_v20 = vld [vmem:[%s23646_s3 + $0x6a0] ss:$20 sps:$4 sm:$0xff]  }
 0x4fa   :  { %10622 = vmatprep.subr.bf16.mxu1 %v18124_v49  ;;  %11037 = vrot.lane.b32.xlu1 %v21133_v38, %s18292_s20  ;;  %v18181_v47 = vld [vmem:[%s23646_s3 + $0x4c0] ss:$20 sps:$4 sm:$0xff]  }
 0x4fc   :  { %16465 = vmatpush3.bf16.msra.mxu0 %v18121_v25  ;;  %v18180_v25 = vld [vmem:[%s23646_s3 + $0x560] ss:$20 sps:$4 sm:$0xff]  }
 0x4fd   :  { %10623 = vmatpush1.bf16.msra.mxu1 %v18122_v12  ;;  %16466 = vmatprep.subr.bf16.mxu0 %v18125_v40  ;;  %v18182_v12 = vld [vmem:[%s23646_s3 + $0x380] ss:$20 sps:$4 sm:$0xff]   ;;  %v18183_v40 = vld [vmem:[%s23646_s3 + $0x678] ss:$20 sps:$4 sm:$0xff]  }
 0x4fe   :  { %10624 = vmatprep.subr.bf16.mxu1 %v18129_v21 }
 0x500   :  { %16467 = vmatpush3.bf16.msra.mxu0 %v18126_v35  ;;  %v18185_v35 = vld [vmem:[%s23646_s3 + $0x498] ss:$20 sps:$4 sm:$0xff]  }
 0x501   :  { %10625 = vmatpush1.bf16.msra.mxu1 %v18127_v58  ;;  %16468 = vmatprep.subr.bf16.mxu0 %v18130_v4  ;;  %v18186_v4 = vld [vmem:[%s23646_s3 + $0x358] ss:$20 sps:$4 sm:$0xff]  }
 0x502   :  { %10626 = vmatprep.subr.bf16.mxu1 %v18134_v51  ;;  %v18187_v51 = vld [vmem:[%s23646_s3 + $0x650] ss:$20 sps:$4 sm:$0xff]  }
 0x504   :  { %16469 = vmatpush3.bf16.msra.mxu0 %v18131_v43 }
 0x505   :  { %10627 = vmatpush1.bf16.msra.mxu1 %v18132_v8  ;;  %16470 = vmatprep.subr.bf16.mxu0 %v18135_v29  ;;  %v18189_v8 = vld [vmem:[%s23646_s3 + $0x470] ss:$20 sps:$4 sm:$0xff]  }
 0x506   :  { %10628 = vmatprep.subr.bf16.mxu1 %v18139_v55 }
 0x508   :  { %16471 = vmatpush3.bf16.msra.mxu0 %v18136_v2  ;;  %v18188_v2 = vld [vmem:[%s23646_s3 + $0x510] ss:$20 sps:$4 sm:$0xff]  }
 0x509   :  { %10629 = vmatpush2.bf16.msra.mxu1 %v18137_v53  ;;  %16472 = vmatprep.subr.bf16.mxu0 %v18140_v46  ;;  %v18190_v46 = vld [vmem:[%s23646_s3 + $0x330] ss:$20 sps:$4 sm:$0xff]  }
 0x50a   :  { %10630 = vmatprep.subr.bf16.mxu1 %v18144_v32  ;;  %v18191_v32 = vld [vmem:[%s23646_s3 + $0xc68] ss:$20 sps:$4 sm:$0xff]  }
 0x50c   :  { %16473 = vmatpush3.bf16.msra.mxu0 %v18141_v37 }
 0x50d   :  { %10631 = vmatpush2.bf16.msra.mxu1 %v18142_v22  ;;  %16474 = vmatprep.subr.bf16.mxu0 %v18145_v33  ;;  %v18193_v22 = vld [vmem:[%s23646_s3 + $0x448] ss:$20 sps:$4 sm:$0xff]  }
 0x50e   :  { %10632 = vmatprep.subr.bf16.mxu1 %v18149_v18  ;;  %v18192_v18 = vld [vmem:[%s23646_s3 + $0xb28] ss:$20 sps:$4 sm:$0xff]  }
 0x510   :  { %16475 = vmatpush3.bf16.msra.mxu0 %v18146_v45 }
 0x511   :  { %10633 = vmatpush2.bf16.msra.mxu1 %v18147_v0  ;;  %16476 = vmatprep.subr.bf16.mxu0 %v18150_v14  ;;  %v18194_v0 = vld [vmem:[%s23646_s3 + $0x308] ss:$20 sps:$4 sm:$0xff]   ;;  %v18195_v14 = vld [vmem:[%s23646_s3 + $0xc40] ss:$20 sps:$4 sm:$0xff]  }
 0x512   :  { %10634 = vmatprep.subr.bf16.mxu1 %v18154_v17  ;;  %v18197_v17 = vld [vmem:[%s23646_s3 + $0x420] ss:$20 sps:$4 sm:$0xff]  }
 0x514   :  { %16477 = vmatpush3.bf16.msra.mxu0 %v18151_v56  ;;  %v18196_v56 = vld [vmem:[%s23646_s3 + $0xb00] ss:$20 sps:$4 sm:$0xff]  }
 0x515   :  { %10635 = vmatpush2.bf16.msra.mxu1 %v18152_v13  ;;  %16506 = vmatprep.subr.bf16.mxu0 %v18155_v30  ;;  %v18198_v13 = vld [vmem:[%s23646_s3 + $0x2e0] ss:$20 sps:$4 sm:$0xff]   ;;  %v18199_v30 = vld [vmem:[%s23646_s3 + $0xc18] ss:$20 sps:$4 sm:$0xff]  }
 0x516   :  { %10636 = vmatprep.subr.bf16.mxu1 %v18159_v28  ;;  %v18202_v28 = vld [vmem:[%s23646_s3 + $0x2b8] ss:$20 sps:$4 sm:$0xff]  }
 0x517   :  { %10727 = vmatmul.mubr.bf16.vlgmr.msra.gmra.mxu0 %v19823_v52  ;;  %v18169_v52 = vld [vmem:[%s23646_s3 + $0x1074] ss:$20 sps:$4 sm:$0xff]  }
 0x518   :  { %16507 = vmatpush3.bf16.msra.mxu0 %v18156_v59  ;;  %10806 = vmatprep.mubr.bf16.mxu0 %v20104_v44  ;;  %v18166_v44 = vld [vmem:[%s23646_s3 + $0x5d8] ss:$20 sps:$4 sm:$0xff]   ;;  %v18203_v59 = vld [vmem:[%s23646_s3 + $0xbf0] ss:$20 sps:$4 sm:$0xff]  }
 0x519   :  { %10637 = vmatpush2.bf16.msra.mxu1 %v18157_v7  ;;  %16508 = vmatprep.subr.bf16.mxu0 %v18160_v57  ;;  %v18205_v7 = vld [vmem:[%s23646_s3 + $0x3d0] ss:$20 sps:$4 sm:$0xff]  }
 0x51a   :  { %10638 = vmatprep.subr.bf16.mxu1 %v18164_v3  ;;  %v18204_v57 = vld [vmem:[%s23646_s3 + $0xab0] ss:$20 sps:$4 sm:$0xff]  }
 0x51b   :  { %v18206_v3 = vld [vmem:[%s23646_s3 + $0x290] ss:$20 sps:$4 sm:$0xff]  }
 0x51c   :  { %16509 = vmatpush3.bf16.msra.mxu0 %v18161_v24  ;;  %v18207_v24 = vld [vmem:[%s23646_s3 + $0xbc8] ss:$20 sps:$4 sm:$0xff]  }
 0x51d   :  { %10639 = vmatpush2.bf16.msra.mxu1 %v18162_v63  ;;  %16510 = vmatprep.subr.bf16.mxu0 %v18165_v41  ;;  %v18209_v63 = vld [vmem:[%s23646_s3 + $0x9e8] ss:$20 sps:$4 sm:$0xff]  }
 0x51e   :  { %10640 = vmatprep.subr.bf16.mxu1 %v18169_v52  ;;  %v18208_v41 = vld [vmem:[%s23646_s3 + $0xa88] ss:$20 sps:$4 sm:$0xff]  }
 0x51f   :  { %v18210_v52 = vld [vmem:[%s23646_s3 + $0x8a8] ss:$20 sps:$4 sm:$0xff]  }
 0x520   :  { %16511 = vmatpush3.bf16.msra.mxu0 %v18166_v44  ;;  %v18211_v44 = vld [vmem:[%s23646_s3 + $0xba0] ss:$20 sps:$4 sm:$0xff]  }
 0x521   :  { %10641 = vmatpush2.bf16.msra.mxu1 %v18167_v36  ;;  %16512 = vmatprep.subr.bf16.mxu0 %v18170_v26  ;;  %v18213_v36 = vld [vmem:[%s23646_s3 + $0x9c0] ss:$20 sps:$4 sm:$0xff]  }
 0x522   :  { %10642 = vmatprep.subr.bf16.mxu1 %v18174_v10  ;;  %v18212_v26 = vld [vmem:[%s23646_s3 + $0xa60] ss:$20 sps:$4 sm:$0xff]  }
 0x523   :  { %v18214_v10 = vld [vmem:[%s23646_s3 + $0x880] ss:$20 sps:$4 sm:$0xff]  }
 0x524   :  { %16513 = vmatpush3.bf16.msra.mxu0 %v18171_v48  ;;  %v18215_v48 = vld [vmem:[%s23646_s3 + $0xb78] ss:$20 sps:$4 sm:$0xff]  }
 0x525   :  { %10643 = vmatpush2.bf16.msra.mxu1 %v18172_v62  ;;  %16514 = vmatprep.subr.bf16.mxu0 %v18175_v61  ;;  %v18216_v62 = vld [vmem:[%s23646_s3 + $0xa38] ss:$20 sps:$4 sm:$0xff]   ;;  %v18219_v61 = vld [vmem:[%s23646_s3 + $0xb50] ss:$20 sps:$4 sm:$0xff]  }
 0x526   :  { %16484 = vmatprep.subr.bf16.mxu1 %v18177_v19  ;;  %v18221_v19 = vld [vmem:[%s23646_s3 + $0x970] ss:$20 sps:$4 sm:$0xff]  }
 0x528   :  { %16515 = vmatpush3.bf16.msra.mxu0 %v18176_v54  ;;  %v10400_v49 = vpop.f32.mrf.mxu1  ;;  %10645 = vmatmul.mubr.bf16.vlgmr.msra.gmra.mxu1 %v20505_v27  ;;  %v18220_v54 = vld [vmem:[%s23646_s3 + $0xa10] ss:$20 sps:$4 sm:$0xff]  }
 0x529   :  { %16485 = vmatpush3.bf16.msra.mxu1 %v18178_v11  ;;  %10766 = vmatprep.mubr.bf16.mxu1 %v19854_v60  ;;  %v18184_v60 = vld [vmem:[%s23646_s3 + $0x538] ss:$20 sps:$4 sm:$0xff]   ;;  %v18222_v11 = vld [vmem:[%s23646_s3 + $0x830] ss:$20 sps:$4 sm:$0xff]  }
 0x52a   :  { %v10402_v21 = vpop.f32.mrf.mxu1  ;;  %16516 = vmatprep.subr.bf16.mxu0 %v18179_v20  ;;  %16486 = vmatprep.subr.bf16.mxu1 %v18181_v47  ;;  %v18223_v20 = vld [vmem:[%s23646_s3 + $0x1168] ss:$20 sps:$4 sm:$0xff]  }
 0x52b   :  { %v18225_v47 = vld [vmem:[%s23646_s3 + $0x948] ss:$20 sps:$4 sm:$0xff]  }
 0x52c   :  { %16517 = vmatpush3.bf16.msra.mxu0 %v18180_v25  ;;  %v10404_v58 = vpop.f32.mrf.mxu1  ;;  %v18226_v25 = vld [vmem:[%s23646_s3 + $0x808] ss:$20 sps:$4 sm:$0xff]  }
 0x52d   :  { %16487 = vmatpush3.bf16.msra.mxu1 %v18182_v12  ;;  %16518 = vmatprep.subr.bf16.mxu0 %v18183_v40  ;;  %v18227_v12 = vld [vmem:[%s23646_s3 + $0x1140] ss:$20 sps:$4 sm:$0xff]   ;;  %v18231_v58 = vld [vmem:[%s23646_s3 + $0x1118] ss:$20 sps:$4 sm:$0xff]  }
 0x52e   :  { %v10405_v43 = vpop.f32.mrf.mxu1  ;;  %16488 = vmatprep.subr.bf16.mxu1 %v18185_v35  ;;  %v18229_v40 = vld [vmem:[%s23646_s3 + $0x920] ss:$20 sps:$4 sm:$0xff]  }
 0x52f   :  { %v10441_v29 = vpop.f32.mrf.mxu0  ;;  %v18230_v35 = vld [vmem:[%s23646_s3 + $0x7e0] ss:$20 sps:$4 sm:$0xff]   ;;  %v18236_v43 = vld [vmem:[%s23646_s3 + $0xfb0] ss:$20 sps:$4 sm:$0xff]  }
 0x530   :  { %v21326_v55 = vadd.f32 %v10441_v29, %v10400_v49  ;;  %16519 = vmatpush3.bf16.msra.mxu0 %v18184_v60  ;;  %v18224_v49 = vld [vmem:[%s23646_s3 + $0x1028] ss:$20 sps:$4 sm:$0xff]   ;;  %v18234_v60 = vld [vmem:[%s23646_s3 + $0x7b8] ss:$20 sps:$4 sm:$0xff]  }
 0x531   :  { %v10443_v53 = vpop.f32.mrf.mxu0  ;;  %16489 = vmatpush3.bf16.msra.mxu1 %v18186_v4  ;;  %16520 = vmatprep.subr.bf16.mxu0 %v18187_v51  ;;  %v18235_v4 = vld [vmem:[%s23646_s3 + $0x10f0] ss:$20 sps:$4 sm:$0xff]   ;;  %v18239_v29 = vld [vmem:[%s23646_s3 + $0x10c8] ss:$20 sps:$4 sm:$0xff]  }
 0x532   :  { %v21337_v37 = vadd.f32 %v10443_v53, %v10402_v21  ;;  %16490 = vmatprep.subr.bf16.mxu1 %v18189_v8  ;;  %v18228_v21 = vld [vmem:[%s23646_s3 + $0x1000] ss:$20 sps:$4 sm:$0xff]   ;;  %v18237_v51 = vld [vmem:[%s23646_s3 + $0x8d0] ss:$20 sps:$4 sm:$0xff]   ;;  %v18240_v53 = vld [vmem:[%s23646_s3 + $0xf88] ss:$20 sps:$4 sm:$0xff]  }
 0x533   :  { %v10445_v33 = vpop.f32.mrf.mxu0  ;;  %v18238_v8 = vld [vmem:[%s23646_s3 + $0x790] ss:$20 sps:$4 sm:$0xff]  }
 0x534   :  { %16521 = vmatpush3.bf16.msra.mxu0 %v18188_v2  ;;  %v18241_v2 = vld [vmem:[%s23646_s3 + $0xee8] ss:$20 sps:$4 sm:$0xff]  }
 0x535   :  { %v10446_v45 = vpop.f32.mrf.mxu0  ;;  %16491 = vmatpush3.bf16.msra.mxu1 %v18190_v46  ;;  %16550 = vmatprep.subr.bf16.mxu0 %v18191_v32  ;;  %v18242_v46 = vld [vmem:[%s23646_s3 + $0xda8] ss:$20 sps:$4 sm:$0xff]   ;;  %v18243_v32 = vld [vmem:[%s23646_s3 + $0x10a0] ss:$20 sps:$4 sm:$0xff]  }
 0x536   :  { %16492 = vmatprep.subr.bf16.mxu1 %v18193_v22  ;;  %v18245_v22 = vld [vmem:[%s23646_s3 + $0xec0] ss:$20 sps:$4 sm:$0xff]  }
 0x537   :  { %10807 = vmatmul.mubr.bf16.vlgmr.msra.gmra.mxu0 %v20106_v50  ;;  %v18201_v50 = vld [vmem:[%s23646_s3 + $0x3f8] ss:$20 sps:$4 sm:$0xff]  }
 0x538   :  { %16551 = vmatpush3.bf16.msra.mxu0 %v18192_v18  ;;  %10886 = vmatprep.mubr.bf16.mxu0 %v20168_v34  ;;  %v18200_v34 = vld [vmem:[%s23646_s3 + $0xad8] ss:$20 sps:$4 sm:$0xff]   ;;  %v18244_v18 = vld [vmem:[%s23646_s3 + $0xf60] ss:$20 sps:$4 sm:$0xff]  }
 0x539   :  { %16493 = vmatpush3.bf16.msra.mxu1 %v18194_v0  ;;  %16552 = vmatprep.subr.bf16.mxu0 %v18195_v14  ;;  %v18246_v0 = vld [vmem:[%s23646_s3 + $0xd80] ss:$20 sps:$4 sm:$0xff]   ;;  %v18247_v14 = vld [vmem:[%s23646_s3 + $0x1078] ss:$20 sps:$4 sm:$0xff]  }
 0x53a   :  { %16494 = vmatprep.subr.bf16.mxu1 %v18197_v17 }
 0x53c   :  { %16553 = vmatpush3.bf16.msra.mxu0 %v18196_v56 }
 0x53d   :  { %16495 = vmatpush3.bf16.msra.mxu1 %v18198_v13  ;;  %16554 = vmatprep.subr.bf16.mxu0 %v18199_v30  ;;  %v18250_v13 = vld [vmem:[%s23646_s3 + $0xd58] ss:$20 sps:$4 sm:$0xff]   ;;  %v18251_v30 = vld [vmem:[%s23646_s3 + $0x1050] ss:$20 sps:$4 sm:$0xff]  }
 0x53e   :  { %16496 = vmatprep.subr.bf16.mxu1 %v18201_v50 }
 0x540   :  { %16555 = vmatpush3.bf16.msra.mxu0 %v18200_v34 }
 0x541   :  { %16497 = vmatpush3.bf16.msra.mxu1 %v18202_v28  ;;  %16556 = vmatprep.subr.bf16.mxu0 %v18203_v59  ;;  %v18252_v59 = vld [vmem:[%s23646_s3 + $0xf10] ss:$20 sps:$4 sm:$0xff]  }
 0x542   :  { %16498 = vmatprep.subr.bf16.mxu1 %v18205_v7 }
 0x544   :  { %16557 = vmatpush3.bf16.msra.mxu0 %v18204_v57  ;;  %v18254_v57 = vld [vmem:[%s23646_s3 + $0xd30] ss:$20 sps:$4 sm:$0xff]  }
 0x545   :  { %16499 = vmatpush3.bf16.msra.mxu1 %v18206_v3  ;;  %16558 = vmatprep.subr.bf16.mxu0 %v18207_v24  ;;  %v18255_v24 = vld [vmem:[%s23646_s3 + $0xe48] ss:$20 sps:$4 sm:$0xff]  }
 0x546   :  { %16528 = vmatprep.subr.bf16.mxu1 %v18209_v63 }
 0x548   :  { %16559 = vmatpush3.bf16.msra.mxu0 %v18208_v41  ;;  %10767 = vmatmul.mubr.bf16.vlgmr.msra.gmra.mxu1 %v19856_v5  ;;  %v18217_v5 = vld [vmem:[%s23646_s3 + $0x998] ss:$20 sps:$4 sm:$0xff]  }
 0x549   :  { %16529 = vmatpush3.bf16.msra.mxu1 %v18210_v52  ;;  %10846 = vmatprep.mubr.bf16.mxu1 %v20133_v9  ;;  %v18218_v9 = vld [vmem:[%s23646_s3 + $0x858] ss:$20 sps:$4 sm:$0xff]   ;;  %v18256_v52 = vld [vmem:[%s23646_s3 + $0xd08] ss:$20 sps:$4 sm:$0xff]  }
 0x54a   :  { %16560 = vmatprep.subr.bf16.mxu0 %v18211_v44  ;;  %16530 = vmatprep.subr.bf16.mxu1 %v18213_v36  ;;  %v18257_v44 = vld [vmem:[%s23646_s3 + $0xe20] ss:$20 sps:$4 sm:$0xff]  }
 0x54b   :  { %v18258_v36 = vld [vmem:[%s23646_s3 + $0xce0] ss:$20 sps:$4 sm:$0xff]  }
 0x54c   :  { %16561 = vmatpush3.bf16.msra.mxu0 %v18212_v26  ;;  %v18259_v26 = vld [vmem:[%s23646_s3 + $0xdf8] ss:$20 sps:$4 sm:$0xff]  }
 0x54d   :  { %16531 = vmatpush3.bf16.msra.mxu1 %v18214_v10  ;;  %16562 = vmatprep.subr.bf16.mxu0 %v18215_v48  ;;  %v18260_v10 = vld [vmem:[%s23646_s3 + $0xcb8] ss:$20 sps:$4 sm:$0xff]   ;;  %v18262_v48 = vld [vmem:[%s23646_s3 + $0xc90] ss:$20 sps:$4 sm:$0xff]  }
 0x54e   :  { %16532 = vmatprep.subr.bf16.mxu1 %v18217_v5  ;;  %v18263_v5 = vld [vmem:[%s23646_s3 + $0x1190] ss:$0 sps:$4 sm:$0xff]  }
 0x550   :  { %16563 = vmatpush3.bf16.msra.mxu0 %v18216_v62  ;;  %v10036_v62 = vsel %vm10022_vm15, %v18263_v5, 0 }
 0x551   :  { %16533 = vmatpush3.bf16.msra.mxu1 %v18218_v9  ;;  %16564 = vmatprep.subr.bf16.mxu0 %v18219_v61 }
 0x552   :  { %16534 = vmatprep.subr.bf16.mxu1 %v18221_v19 }
 0x554   :  { %16565 = vmatpush3.bf16.msra.mxu0 %v18220_v54 }
 0x555   :  { %16535 = vmatpush3.bf16.msra.mxu1 %v18222_v11  ;;  %16594 = vmatprep.subr.bf16.mxu0 %v18223_v20 }
 0x556   :  { %16536 = vmatprep.subr.bf16.mxu1 %v18225_v47 }
 0x557   :  { %10887 = vmatmul.mubr.bf16.vlgmr.msra.gmra.mxu0 %v20366_v1  ;;  %v18233_v1 = vld [vmem:[%s23646_s3 + $0x8f8] ss:$20 sps:$4 sm:$0xff]  }
 0x558   :  { %16595 = vmatpush3.bf16.msra.mxu0 %v18224_v49  ;;  %10966 = vmatprep.mubr.bf16.mxu0 %v20483_v31  ;;  %v18232_v31 = vld [vmem:[%s23646_s3 + $0xfd8] ss:$20 sps:$4 sm:$0xff]  }
 0x559   :  { %16537 = vmatpush3.bf16.msra.mxu1 %v18226_v25  ;;  %16596 = vmatprep.subr.bf16.mxu0 %v18227_v12 }
 0x55a   :  { %16538 = vmatprep.subr.bf16.mxu1 %v18229_v40 }
 0x55c   :  { %16597 = vmatpush3.bf16.msra.mxu0 %v18228_v21 }
 0x55d   :  { %16539 = vmatpush3.bf16.msra.mxu1 %v18230_v35  ;;  %16598 = vmatprep.subr.bf16.mxu0 %v18231_v58 }
 0x55e   :  { %16540 = vmatprep.subr.bf16.mxu1 %v18233_v1 }
 0x560   :  { %16599 = vmatpush3.bf16.msra.mxu0 %v18232_v31 }
 0x561   :  { %16541 = vmatpush3.bf16.msra.mxu1 %v18234_v60  ;;  %16600 = vmatprep.subr.bf16.mxu0 %v18235_v4 }
 0x562   :  { %16542 = vmatprep.subr.bf16.mxu1 %v18237_v51 }
 0x564   :  { %16601 = vmatpush3.bf16.msra.mxu0 %v18236_v43 }
 0x565   :  { %16543 = vmatpush3.bf16.msra.mxu1 %v18238_v8  ;;  %16602 = vmatprep.subr.bf16.mxu0 %v18239_v29 }
 0x566   :  { %16572 = vmatprep.subr.bf16.mxu1 %v18241_v2 }
 0x568   :  { %16603 = vmatpush3.bf16.msra.mxu0 %v18240_v53  ;;  %v10482_v33 = vpop.f32.mrf.mxu1  ;;  %10847 = vmatmul.mubr.bf16.vlgmr.msra.gmra.mxu1 %v20141_v23  ;;  %v18249_v23 = vld [vmem:[%s23646_s3 + $0xe98] ss:$20 sps:$4 sm:$0xff]  }
 0x569   :  { %v10483_v45 = vadd.f32 %v10482_v33, %v21326_v55  ;;  %16573 = vmatpush3.bf16.msra.mxu1 %v18242_v46  ;;  %10926 = vmatprep.mubr.bf16.mxu1 %v20192_v15  ;;  %v18248_v15 = vld [vmem:[%s23646_s3 + $0xf38] ss:$20 sps:$4 sm:$0xff]  }
 0x56a   :  { %v10484_v17 = vpop.f32.mrf.mxu1  ;;  %16604 = vmatprep.subr.bf16.mxu0 %v18243_v32  ;;  %16574 = vmatprep.subr.bf16.mxu1 %v18245_v22 }
 0x56b   :  { %v10485_v55 = vadd.f32 %v10484_v17, %v21337_v37  ;;  %v18253_v37 = vld [vmem:[%s23646_s3 + $0xe70] ss:$20 sps:$4 sm:$0xff]  }
 0x56c   :  { %16605 = vmatpush3.bf16.msra.mxu0 %v18244_v18  ;;  %v10486_v56 = vpop.f32.mrf.mxu1 }
 0x56d   :  { %16575 = vmatpush3.bf16.msra.mxu1 %v18246_v0  ;;  %16606 = vmatprep.subr.bf16.mxu0 %v18247_v14 }
 0x56e   :  { %v10487_v50 = vpop.f32.mrf.mxu1  ;;  %16576 = vmatprep.subr.bf16.mxu1 %v18249_v23 }
 0x56f   :  { %v10523_v34 = vpop.f32.mrf.mxu0 }
 0x570   :  { %v10524_v28 = vadd.f32 %v10523_v34, %v10483_v45  ;;  %16607 = vmatpush3.bf16.msra.mxu0 %v18248_v15 }
 0x571   :  { %v10525_v7 = vpop.f32.mrf.mxu0  ;;  %16577 = vmatpush3.bf16.msra.mxu1 %v18250_v13  ;;  %16608 = vmatprep.subr.bf16.mxu0 %v18251_v30 }
 0x572   :  { %v10526_v3 = vadd.f32 %v10525_v7, %v10485_v55  ;;  %16578 = vmatprep.subr.bf16.mxu1 %v18253_v37 }
 0x573   :  { %v10527_v63 = vpop.f32.mrf.mxu0 }
 0x574   :  { %16609 = vmatpush3.bf16.msra.mxu0 %v18252_v59 }
 0x575   :  { %v10528_v41 = vpop.f32.mrf.mxu0  ;;  %16579 = vmatpush3.bf16.msra.mxu1 %v18254_v57 }
 0x576   :  { %16580 = vmatprep.subr.bf16.mxu1 %v18255_v24 }
 0x577   :  { %10967 = vmatmul.mubr.bf16.vlgmr.msra.gmra.mxu0 %v20505_v27  ;;  %v18261_v27 = vld [vmem:[%s23646_s3 + $0xdd0] ss:$20 sps:$4 sm:$0xff]   ;;  %s18303_s3 = smov 112  }
 0x578   :  { %11360 = vmatprep.mubr.f32.mxu0 %v23713_v6 }
 0x579   :  { %16581 = vmatpush3.bf16.msra.mxu1 %v18256_v52 }
 0x57a   :  { %16582 = vmatprep.subr.bf16.mxu1 %v18257_v44 }
 0x57d   :  { %16583 = vmatpush3.bf16.msra.mxu1 %v18258_v36 }
 0x57e   :  { %16584 = vmatprep.subr.bf16.mxu1 %v18259_v26 }
 0x581   :  { %16585 = vmatpush3.bf16.msra.mxu1 %v18260_v10 }
 0x582   :  { %16586 = vmatprep.subr.bf16.mxu1 %v18261_v27 }
 0x585   :  { %16587 = vmatpush3.bf16.msra.mxu1 %v18262_v48 }
 0x586   :  { %17257 = vmatprep.subr.bf16.mxu1 %v23713_v6 }
 0x588   :  { %10927 = vmatmul.mubr.bf16.vlgmr.msra.gmra.mxu1 %v20375_v42 }
 0x589   :  { %17258 = vmatpush3.bf16.msra.mxu1 %v10036_v62  ;;  %17259 = vmatprep.mubr.msk.bf16.mxu1 %vm18296_vm4, %v23713_v6 }
 0x590   :  { %17260 = vmatmul.mubr.msk.bf16.vlgmr.msra.gmra.mxu1 %vm6206_vm12, %v20471_v16 }
 0x591   :  { %11123 = vmatprep.mubr.f32.mxu1 %v23713_v6 }
 0x5a8   :  { %v10564_v9 = vpop.f32.mrf.mxu1 }
 0x5a9   :  { %v10565_v16 = vadd.f32 %v10564_v9, %v10524_v28 }
 0x5aa   :  { %v10566_v61 = vpop.f32.mrf.mxu1 }
 0x5ab   :  { %v10567_v60 = vadd.f32 %v10566_v61, %v10526_v3 }
 0x5ac   :  { %v10568_v19 = vpop.f32.mrf.mxu1 }
 0x5ae   :  { %v10569_v54 = vpop.f32.mrf.mxu1 }
 0x5af   :  { %v10605_v11 = vpop.f32.mrf.mxu0 }
 0x5b0   :  { %v10606_v4 = vadd.f32 %v10605_v11, %v10565_v16  ;;  %v15909_v16 = vld [vmem:[%s23647_s4 + $0x10] sm:$0xff] }
 0x5b1   :  { %v10607_v20 = vpop.f32.mrf.mxu0 }
 0x5b2   :  { %v10608_v43 = vadd.f32 %v10607_v20, %v10567_v60  ;;  %v15910_v60 = vld [vmem:[%s23647_s4 + $0x18] sm:$0xff] }
 0x5b3   :  { %v10609_v47 = vpop.f32.mrf.mxu0 }
 0x5b5   :  { %v10610_v49 = vpop.f32.mrf.mxu0 }
 0x5b6   :  { %v21602_v49 = vld [vmem:[%s23647_s4] sm:$0xff] }
 0x5b7   :  { %v10687_v25 = vpop.f32.mrf.mxu0 }
 0x5b9   :  { %v10689_v12 = vpop.f32.mrf.mxu0 }
 0x5bb   :  { %v10691_v42 = vpop.f32.mrf.mxu0 }
 0x5bc   :  { %v21610_v42 = vld [vmem:[%s23647_s4 + $0x8] sm:$0xff] }
 0x5bd   :  { %v10692_v40 = vpop.f32.mrf.mxu0 }
 0x5be   :  { %v11036_v40 = vpop.permute.xlu1 %11035 }
 0x5d7   :  { %v16478_v21 = vpop.f32.mrf.mxu0 }
 0x5d9   :  { %v16479_v35 = vpop.f32.mrf.mxu0 }
 0x5da   :  { %v16480_v58 = vadd.f32 %v16479_v35, %v16478_v21  ;;  %v11038_v35 = vpop.permute.xlu1 %11037 }
 0x5db   :  { %v16481_v1 = vpop.f32.mrf.mxu0 }
 0x5dd   :  { %v16482_v31 = vpop.f32.mrf.mxu0 }
 0x5de   :  { %v11045_v31 = vsel %vm746_vm3, %v11036_v40, %v11038_v35  ;;  %v15937_v40 = vld [vmem:[%s23647_s4 + $0x50] sm:$0xff] }
 0x5e8   :  { %v10646_v51 = vpop.f32.mrf.mxu1 }
 0x5e9   :  { %v10647_v8 = vadd.f32 %v10646_v51, %v10606_v4  ;;  %v12701_v4 = vld [vmem:[%s23648_s5 + $0x8] sm:$0xff]  ;;  %v12700_v51 = vld [vmem:[%s23648_s5] sm:$0xff] }
 0x5ea   :  { %v10648_v29 = vpop.f32.mrf.mxu1 }
 0x5eb   :  { %v21575_v2 = vadd.f32 %v10687_v25, %v10647_v8  ;;  %v10649_v53 = vadd.f32 %v10648_v29, %v10608_v43 }
 0x5ec   :  { %v10650_v46 = vpop.f32.mrf.mxu1 }
 0x5ed   :  { %v21577_v32 = vadd.f32 %v10689_v12, %v10649_v53  ;;  %11039 = vrot.lane.b32.xlu0 %v21575_v2, %s18292_s20  ;;  %11380 = vrot.lane.b32.xlu1 %v21575_v2, %s18290_s25 }
 0x5ee   :  { %v10651_v22 = vpop.f32.mrf.mxu1 }
 0x5ef   :  { %11326 = vmatprep.subr.mxu0 %v21577_v32 }
 0x5f0   :  { %11327 = vmatpush1.msra.mxu0 %v21575_v2 }
 0x5f1   :  { %11378 = vrot.lane.b32.xlu0 %v21133_v38, %s18290_s25  ;;  %15917 = vmatmul.mubr.msk.f32.vlgmr.msra.gmra.mxu0 %vm6206_vm12, %v21602_v49 }
 0x5f2   :  { %11366 = vmatprep.mubr.f32.mxu0 %v23713_v6 }
 0x5f5   :  { %11041 = vrot.lane.b32.xlu0 %v21577_v32, %s18292_s20  ;;  %15918 = vmatmul.mubr.msk.f32.gmra.mxu0 %vm6206_vm12, %v21610_v42 }
 0x5f6   :  { %11541 = vmatprep.mubr.f32.mxu0 %v23713_v6 }
 0x5f7   :  { %v16522_v33 = vpop.f32.mrf.mxu0 }
 0x5f9   :  { %v16523_v18 = vpop.f32.mrf.mxu0  ;;  %11376 = vrot.lane.b32.xlu0 %v21128_v39, %s18290_s25 }
 0x5fa   :  { %v16524_v45 = vadd.f32 %v16523_v18, %v16522_v33 }
 0x5fb   :  { %v16525_v0 = vpop.f32.mrf.mxu0 }
 0x5fd   :  { %v16526_v14 = vpop.f32.mrf.mxu0  ;;  %11382 = vrot.lane.b32.xlu0 %v21577_v32, %s18290_s25 }
 0x601   :  { %11569 = vrot.lane.b32.xlu0 %v21575_v2, %s18303_s3 }
 0x605   :  { %11757 = vrot.lane.b32.xlu0 %v21133_v38, %s18304_s2 }
 0x608   :  { %v16500_v17 = vpop.f32.mrf.mxu1 }
 0x609   :  { %11761 = vrot.lane.b32.xlu0 %v21577_v32, %s18304_s2 }
 0x60a   :  { %v16501_v23 = vpop.f32.mrf.mxu1 }
 0x60b   :  { %v16502_v55 = vadd.f32 %v16501_v23, %v16500_v17 }
 0x60c   :  { %v16503_v56 = vpop.f32.mrf.mxu1 }
 0x60d   :  { %v10769_v15 = vadd.f32 %v16502_v55, %v16480_v58 }
 0x60e   :  { %v16504_v13 = vpop.f32.mrf.mxu1 }
 0x60f   :  { %v10809_v30 = vadd.f32 %v16524_v45, %v10769_v15 }
 0x617   :  { %v16566_v50 = vpop.f32.mrf.mxu0 }
 0x619   :  { %v16567_v37 = vpop.f32.mrf.mxu0 }
 0x61a   :  { %v16568_v10 = vadd.f32 %v16567_v37, %v16566_v50 }
 0x61b   :  { %v16569_v34 = vpop.f32.mrf.mxu0 }
 0x61c   :  { %v15919_v34 = vld [vmem:[%s23647_s4 + $0x20] sm:$0xff] }
 0x61d   :  { %v16570_v28 = vpop.f32.mrf.mxu0 }
 0x628   :  { %v16544_v59 = vpop.f32.mrf.mxu1 }
 0x62a   :  { %v16545_v7 = vpop.f32.mrf.mxu1 }
 0x62b   :  { %v16546_v44 = vadd.f32 %v16545_v7, %v16544_v59 }
 0x62c   :  { %v16547_v57 = vpop.f32.mrf.mxu1 }
 0x62d   :  { %v10849_v36 = vadd.f32 %v16546_v44, %v10809_v30  ;;  %v15925_v44 = vld [vmem:[%s23647_s4 + $0x30] sm:$0xff] }
 0x62e   :  { %v16548_v3 = vpop.f32.mrf.mxu1 }
 0x62f   :  { %v10889_v48 = vadd.f32 %v16568_v10, %v10849_v36 }
 0x637   :  { %v16610_v24 = vpop.f32.mrf.mxu0 }
 0x639   :  { %v16611_v63 = vpop.f32.mrf.mxu0 }
 0x63a   :  { %v16612_v9 = vadd.f32 %v16611_v63, %v16610_v24  ;;  %v15920_v63 = vld [vmem:[%s23647_s4 + $0x28] sm:$0xff] }
 0x63b   :  { %v16613_v41 = vpop.f32.mrf.mxu0 }
 0x63d   :  { %v16614_v52 = vpop.f32.mrf.mxu0 }
 0x648   :  { %v16588_v26 = vpop.f32.mrf.mxu1 }
 0x64a   :  { %v16589_v27 = vpop.f32.mrf.mxu1 }
 0x64b   :  { %v16590_v5 = vadd.f32 %v16589_v27, %v16588_v26 }
 0x64c   :  { %v16591_v62 = vpop.f32.mrf.mxu1 }
 0x64d   :  { %v10929_v61 = vadd.f32 %v16590_v5, %v10889_v48  ;;  %v15926_v48 = vld [vmem:[%s23647_s4 + $0x38] sm:$0xff] }
 0x64e   :  { %v16592_v19 = vpop.f32.mrf.mxu1 }
 0x64f   :  { %v10969_v54 = vadd.f32 %v16612_v9, %v10929_v61  ;;  %v15931_v9 = vld [vmem:[%s23647_s4 + $0x40] sm:$0xff] }
 0x650   :  { %v11008_v11 = vpop.f32.mrf.mxu1 }
 0x651   :  { %v11009_v20 = vadd.f32 %v11008_v11, %v10969_v54 }
 0x652   :  { %v17261_v47 = vpop.f32.mrf.mxu1 }
 0x653   :  { %11019 = vst.msk [vmem:[#allocation3 + $0x20] sm:$0xff] %vm11018_vm1, %v11009_v20 }
 0x654   :  { %v11011_v25 = vpop.f32.mrf.mxu1 }
 0x656   :  { %v17262_v12 = vpop.f32.mrf.mxu1 }
 0x65a   :  { %v11026_v21 = vld [vmem:[#allocation3 + $0x20] sm:$0xff] }
 0x65b   :  { %11573 = vrot.lane.b32.xlu0 %v11026_v21, %s18303_s3  ;;  %11043 = vrot.lane.b32.xlu1 %v11026_v21, %s18292_s20 }
 0x65f   :  { %11755 = vrot.lane.b32.xlu0 %v21128_v39, %s18304_s2  ;;  %11567 = vrot.lane.b32.xlu1 %v21133_v38, %s18303_s3  ;;  %v11040_v58 = vpop.permute.xlu0 %11039  ;;  %v11381_v22 = vpop.permute.xlu1 %11380 }
 0x660   :  { %v11046_v1 = vsel %vm746_vm3, %v11038_v35, %v11040_v58 }
 0x661   :  { %11089 = vmatprep.subr.mxu1 %v11046_v1  ;;  %v15938_v1 = vld [vmem:[%s23647_s4 + $0x58] sm:$0xff] }
 0x662   :  { %11090 = vmatpush1.msra.mxu1 %v11045_v31 }
 0x663   :  { %11949 = vrot.lane.b32.xlu0 %v21575_v2, %s18305_s14  ;;  %11571 = vrot.lane.b32.xlu1 %v21577_v32, %s18303_s3  ;;  %v11379_v43 = vpop.permute.xlu0 %11378 }
 0x664   :  { %15911 = vmatmul.mubr.msk.f32.vlgmr.msra.gmra.mxu1 %vm6206_vm12, %v15909_v16  ;;  %v11387_v23 = vsel %vm99_vm0, %v11379_v43, %v11381_v22 }
 0x665   :  { %11129 = vmatprep.mubr.f32.mxu1 %v23713_v6 }
 0x667   :  { %12137 = vrot.lane.b32.xlu0 %v21133_v38, %s18295_s15  ;;  %11565 = vrot.lane.b32.xlu1 %v21128_v39, %s18303_s3  ;;  %v11042_v8 = vpop.permute.xlu0 %11041 }
 0x668   :  { %15912 = vmatmul.mubr.msk.f32.gmra.mxu1 %vm6206_vm12, %v15910_v60  ;;  %v11047_v0 = vsel %vm746_vm3, %v11040_v58, %v11042_v8 }
 0x669   :  { %11200 = vmatprep.mubr.f32.mxu1 %v23713_v6 }
 0x66b   :  { %11953 = vrot.lane.b32.xlu0 %v11026_v21, %s18305_s14  ;;  %11384 = vrot.lane.b32.xlu1 %v11026_v21, %s18290_s25  ;;  %s18306_s25 = smov 94   ;;  %v11377_v29 = vpop.permute.xlu0 %11376 }
 0x66c   :  { %v11386_v15 = vsel %vm99_vm0, %v11377_v29, %v11379_v43 }
 0x66f   :  { %12141 = vrot.lane.b32.xlu0 %v21577_v32, %s18295_s15  ;;  %11759 = vrot.lane.b32.xlu1 %v21575_v2, %s18304_s2  ;;  %v11383_v53 = vpop.permute.xlu0 %11382 }
 0x670   :  { %v11388_v28 = vsel %vm99_vm0, %v11381_v22, %v11383_v53 }
 0x673   :  { %12135 = vrot.lane.b32.xlu0 %v21128_v39, %s18295_s15  ;;  %11947 = vrot.lane.b32.xlu1 %v21133_v38, %s18305_s14  ;;  %v11570_v46 = vpop.permute.xlu0 %11569 }
 0x677   :  { %12328 = vrot.lane.b32.xlu0 %v21575_v2, %s18297_s28  ;;  %11951 = vrot.lane.b32.xlu1 %v21577_v32, %s18305_s14 }
 0x67b   :  { %12332 = vrot.lane.b32.xlu0 %v11026_v21, %s18297_s28  ;;  %11763 = vrot.lane.b32.xlu1 %v11026_v21, %s18304_s2 }
 0x67f   :  { %12515 = vrot.lane.b32.xlu0 %v21133_v38, %s18306_s25  ;;  %11945 = vrot.lane.b32.xlu1 %v21128_v39, %s18305_s14 }
 0x683   :  { %12519 = vrot.lane.b32.xlu0 %v21577_v32, %s18306_s25  ;;  %12139 = vrot.lane.b32.xlu1 %v21575_v2, %s18295_s15 }
 0x687   :  { %12513 = vrot.lane.b32.xlu0 %v21128_v39, %s18306_s25  ;;  %12326 = vrot.lane.b32.xlu1 %v21133_v38, %s18297_s28 }
 0x68b   :  { %12143 = vrot.lane.b32.xlu1 %v11026_v21, %s18295_s15  ;;  %12709 = vperm.xlu0 %17418, %v12701_v4   ;;  %v15943_v4 = vld [vmem:[%s23647_s4 + $0x60] sm:$0xff] }
 0x68f   :  { %12330 = vrot.lane.b32.xlu1 %v21577_v32, %s18297_s28  ;;  %v21673_v32 = vpop.permute.xlu0 %11757 }
 0x693   :  { %12324 = vrot.lane.b32.xlu1 %v21128_v39, %s18297_s28 }
 0x697   :  { %12517 = vrot.lane.b32.xlu1 %v21575_v2, %s18306_s25  ;;  %v21675_v2 = vpop.permute.xlu0 %11761 }
 0x69b   :  { %12521 = vrot.lane.b32.xlu1 %v11026_v21, %s18306_s25 }
 0x69f   :  { %12704 = vperm.xlu1 %17352, %v12700_v51  }
 0x6cd   :  { %v11574_v33 = vpop.permute.xlu0 %11573  ;;  %v11044_v18 = vpop.permute.xlu1 %11043 }
 0x6ce   :  { %v11048_v45 = vsel %vm746_vm3, %v11042_v8, %v11044_v18  ;;  %vm11765_vm3 = vcmask 908288  }
 0x6cf   :  { %11166 = vmatprep.subr.mxu1 %v11048_v45 }
 0x6d0   :  { %11167 = vmatpush1.msra.mxu1 %v11047_v0  ;;  %v15950_v0 = vld [vmem:[%s23647_s4 + $0x78] sm:$0xff] }
 0x6d1   :  { %v11756_v14 = vpop.permute.xlu0 %11755  ;;  %15913 = vmatmul.mubr.msk.f32.vlgmr.msra.gmra.mxu1 %vm6206_vm12, %v15909_v16  ;;  %11249 = vmatprep.subr.mxu1 %v21133_v38  ;;  %v11568_v17 = vpop.permute.xlu1 %11567 }
 0x6d2   :  { %11250 = vmatpush1.msra.mxu1 %v21128_v39  ;;  %11206 = vmatprep.mubr.f32.mxu1 %v23713_v6  ;;  %v11577_v38 = vsel %vm11575_vm2, %v11568_v17, %v11570_v46  ;;  %v11766_v36 = vsel %vm11765_vm3, %v11756_v14, %v21673_v32 }
 0x6d3   :  { %11430 = vmatprep.subr.mxu1 %v11387_v23 }
 0x6d5   :  { %v21684_v55 = vpop.permute.xlu0 %11949  ;;  %15914 = vmatmul.mubr.msk.f32.gmra.mxu1 %vm6206_vm12, %v15910_v60  ;;  %v11572_v56 = vpop.permute.xlu1 %11571 }
 0x6d6   :  { %11283 = vmatprep.mubr.f32.mxu1 %v23713_v6  ;;  %v11579_v7 = vsel %vm11575_vm2, %v11572_v56, %v11574_v33  ;;  %v11578_v3 = vsel %vm11575_vm2, %v11570_v46, %v11572_v56  ;;  %v15944_v46 = vld [vmem:[%s23647_s4 + $0x68] sm:$0xff] }
 0x6d9   :  { %v21689_v13 = vpop.permute.xlu0 %12137  ;;  %15915 = vmatmul.mubr.msk.f32.vlgmr.msra.gmra.mxu1 %vm6206_vm12, %v21602_v49  ;;  %v11566_v39 = vpop.permute.xlu1 %11565  ;;  %v15932_v49 = vld [vmem:[%s23647_s4 + $0x48] sm:$0xff] }
 0x6da   :  { %11431 = vmatpush1.msra.mxu1 %v11386_v15  ;;  %11289 = vmatprep.mubr.f32.mxu1 %v23713_v6  ;;  %v11576_v59 = vsel %vm11575_vm2, %v11566_v39, %v11568_v17  ;;  %v15956_v15 = vld [vmem:[%s23647_s4 + $0x88] sm:$0xff]  ;;  %v12771_v39 = vld [vmem:[%s23649_s6 + $0xf8] sm:$0xff] }
 0x6db   :  { %11620 = vmatprep.subr.mxu1 %v11577_v38  ;;  %v15976_v38 = vld [vmem:[%s23649_s6 + $0x178] sm:$0xff] }
 0x6dd   :  { %15916 = vmatmul.mubr.msk.f32.gmra.mxu1 %vm6206_vm12, %v21610_v42  ;;  %v11385_v30 = vpop.permute.xlu1 %11384  ;;  %v11954_v50 = vpop.permute.xlu0 %11953 }
 0x6de   :  { %v11389_v37 = vsel %vm99_vm0, %v11383_v53, %v11385_v30  ;;  %11464 = vmatprep.mubr.f32.mxu1 %v23713_v6  ;;  %vm11955_vm0 = vcmask 900096   ;;  %v12755_v30 = vld [vmem:[%s23649_s6 + $0x78] sm:$0xff] }
 0x6df   :  { %11507 = vmatprep.subr.mxu0 %v11389_v37  ;;  %v12770_v37 = vld [vmem:[%s23649_s6 + $0xf0] sm:$0xff] }
 0x6e0   :  { %11508 = vmatpush1.msra.mxu0 %v11388_v28  ;;  %v12754_v28 = vld [vmem:[%s23649_s6 + $0x70] sm:$0xff] }
 0x6e1   :  { %15921 = vmatmul.mubr.msk.f32.vlgmr.msra.gmra.mxu1 %vm6206_vm12, %v15919_v34  ;;  %15923 = vmatmul.mubr.msk.f32.vlgmr.msra.gmra.mxu0 %vm6206_vm12, %v15919_v34  ;;  %v11760_v57 = vpop.permute.xlu1 %11759  ;;  %v21713_v41 = vpop.permute.xlu0 %12141  ;;  %v15975_v34 = vld [vmem:[%s23649_s6 + $0x170] sm:$0xff] }
 0x6e2   :  { %11621 = vmatpush1.msra.mxu1 %v11576_v59  ;;  %11697 = vmatprep.subr.mxu0 %v11579_v7  ;;  %v11767_v24 = vsel %vm11765_vm3, %v21673_v32, %v11760_v57  ;;  %v11768_v61 = vsel %vm11765_vm3, %v11760_v57, %v21675_v2  ;;  %v15990_v59 = vld [vmem:[%s23649_s6 + $0x1e8] sm:$0xff] }
 0x6e3   :  { %11698 = vmatpush1.msra.mxu0 %v11578_v3  ;;  %11810 = vmatprep.subr.mxu1 %v11767_v24  ;;  %v12769_v7 = vld [vmem:[%s23649_s6 + $0xe8] sm:$0xff]  ;;  %v15989_v24 = vld [vmem:[%s23649_s6 + $0x1e0] sm:$0xff] }
 0x6e4   :  { %11470 = vmatprep.mubr.f32.mxu1 %v23713_v6  ;;  %11547 = vmatprep.mubr.f32.mxu0 %v23713_v6  ;;  %v15974_v57 = vld [vmem:[%s23649_s6 + $0x168] sm:$0xff] }
 0x6e5   :  { %15922 = vmatmul.mubr.msk.f32.gmra.mxu1 %vm6206_vm12, %v15920_v63  ;;  %15924 = vmatmul.mubr.msk.f32.gmra.mxu0 %vm6206_vm12, %v15920_v63  ;;  %v11948_v52 = vpop.permute.xlu1 %11947  ;;  %v12136_v10 = vpop.permute.xlu0 %12135  ;;  %v12753_v3 = vld [vmem:[%s23649_s6 + $0x68] sm:$0xff]  ;;  %v12768_v63 = vld [vmem:[%s23649_s6 + $0xe0] sm:$0xff] }
 0x6e6   :  { %11654 = vmatprep.mubr.f32.mxu1 %v23713_v6  ;;  %11731 = vmatprep.mubr.f32.mxu0 %v23713_v6  ;;  %v11957_v27 = vsel %vm11955_vm0, %v11948_v52, %v21684_v55  ;;  %v12145_v21 = vsel %vm2786_vm7, %v12136_v10, %v21689_v13  ;;  %v12751_v10 = vld [vmem:[%s23649_s6 + $0x58] sm:$0xff] }
 0x6e9   :  { %15927 = vmatmul.mubr.msk.f32.vlgmr.msra.gmra.mxu1 %vm6206_vm12, %v15925_v44  ;;  %15929 = vmatmul.mubr.msk.f32.vlgmr.msra.gmra.mxu0 %vm6206_vm12, %v15925_v44  ;;  %v11952_v26 = vpop.permute.xlu1 %11951  ;;  %v12329_v19 = vpop.permute.xlu0 %12328  ;;  %v15988_v44 = vld [vmem:[%s23649_s6 + $0x1d8] sm:$0xff] }
 0x6ea   :  { %11811 = vmatpush1.msra.mxu1 %v11766_v36  ;;  %11660 = vmatprep.mubr.f32.mxu1 %v23713_v6  ;;  %v11959_v54 = vsel %vm11955_vm0, %v11952_v26, %v11954_v50  ;;  %v11958_v20 = vsel %vm11955_vm0, %v21684_v55, %v11952_v26  ;;  %v15955_v55 = vld [vmem:[%s23647_s4 + $0x80] sm:$0xff]  ;;  %v15991_v50 = vld [vmem:[%s23649_s6 + $0x1f0] sm:$0xff]  ;;  %v12767_v36 = vld [vmem:[%s23649_s6 + $0xd8] sm:$0xff] }
 0x6eb   :  { %12000 = vmatprep.subr.mxu1 %v11957_v27  ;;  %11737 = vmatprep.mubr.f32.mxu0 %v23713_v6  ;;  %v15972_v26 = vld [vmem:[%s23649_s6 + $0x158] sm:$0xff]  ;;  %v15987_v27 = vld [vmem:[%s23649_s6 + $0x1d0] sm:$0xff] }
 0x6ed   :  { %15928 = vmatmul.mubr.msk.f32.gmra.mxu1 %vm6206_vm12, %v15926_v48  ;;  %15930 = vmatmul.mubr.msk.f32.gmra.mxu0 %vm6206_vm12, %v15926_v48  ;;  %v11764_v5 = vpop.permute.xlu1 %11763  ;;  %v12333_v12 = vpop.permute.xlu0 %12332  ;;  %v12766_v48 = vld [vmem:[%s23649_s6 + $0xd0] sm:$0xff] }
 0x6ee   :  { %v11769_v62 = vsel %vm11765_vm3, %v21675_v2, %v11764_v5  ;;  %11844 = vmatprep.mubr.f32.mxu1 %v23713_v6  ;;  %11921 = vmatprep.mubr.f32.mxu0 %v23713_v6  ;;  %v15949_v2 = vld [vmem:[%s23647_s4 + $0x70] sm:$0xff] }
 0x6ef   :  { %11887 = vmatprep.subr.mxu0 %v11769_v62  ;;  %v15971_v5 = vld [vmem:[%s23649_s6 + $0x150] sm:$0xff] }
 0x6f0   :  { %11888 = vmatpush1.msra.mxu0 %v11768_v61  ;;  %v12750_v62 = vld [vmem:[%s23649_s6 + $0x50] sm:$0xff]  ;;  %v12765_v61 = vld [vmem:[%s23649_s6 + $0xc8] sm:$0xff] }
 0x6f1   :  { %15933 = vmatmul.mubr.msk.f32.vlgmr.msra.gmra.mxu1 %vm6206_vm12, %v15931_v9  ;;  %15935 = vmatmul.mubr.msk.f32.vlgmr.msra.gmra.mxu0 %vm6206_vm12, %v15931_v9  ;;  %v11946_v11 = vpop.permute.xlu1 %11945  ;;  %v12516_v31 = vpop.permute.xlu0 %12515  ;;  %v15986_v9 = vld [vmem:[%s23649_s6 + $0x1c8] sm:$0xff] }
 0x6f2   :  { %12077 = vmatprep.subr.mxu0 %v11959_v54  ;;  %v11956_v47 = vsel %vm11955_vm0, %v11946_v11, %v11948_v52  ;;  %11850 = vmatprep.mubr.f32.mxu1 %v23713_v6  ;;  %v12752_v52 = vld [vmem:[%s23649_s6 + $0x60] sm:$0xff]  ;;  %v12749_v54 = vld [vmem:[%s23649_s6 + $0x48] sm:$0xff] }
 0x6f3   :  { %12078 = vmatpush1.msra.mxu0 %v11958_v20  ;;  %12001 = vmatpush1.msra.mxu1 %v11956_v47  ;;  %v15985_v11 = vld [vmem:[%s23649_s6 + $0x1c0] sm:$0xff] }
 0x6f4   :  { %11927 = vmatprep.mubr.f32.mxu0 %v23713_v6  ;;  %v12764_v20 = vld [vmem:[%s23649_s6 + $0xc0] sm:$0xff] }
 0x6f5   :  { %15934 = vmatmul.mubr.msk.f32.gmra.mxu1 %vm6206_vm12, %v15932_v49  ;;  %15936 = vmatmul.mubr.msk.f32.gmra.mxu0 %vm6206_vm12, %v15932_v49  ;;  %v12140_v25 = vpop.permute.xlu1 %12139  ;;  %v12520_v8 = vpop.permute.xlu0 %12519  ;;  %v15969_v47 = vld [vmem:[%s23649_s6 + $0x140] sm:$0xff] }
 0x6f6   :  { %v12146_v42 = vsel %vm2786_vm7, %v21689_v13, %v12140_v25  ;;  %12034 = vmatprep.mubr.f32.mxu1 %v23713_v6  ;;  %12111 = vmatprep.mubr.f32.mxu0 %v23713_v6  ;;  %v12147_v51 = vsel %vm2786_vm7, %v12140_v25, %v21713_v41  ;;  %v15992_v13 = vld [vmem:[%s23649_s6 + $0x1f8] sm:$0xff]  ;;  %v12748_v49 = vld [vmem:[%s23649_s6 + $0x40] sm:$0xff] }
 0x6f7   :  { %12189 = vmatprep.subr.mxu1 %v12146_v42  ;;  %v15984_v25 = vld [vmem:[%s23649_s6 + $0x1b8] sm:$0xff] }
 0x6f8   :  { %v15968_v42 = vld [vmem:[%s23649_s6 + $0x138] sm:$0xff] }
 0x6f9   :  { %15939 = vmatmul.mubr.msk.f32.vlgmr.msra.gmra.mxu1 %vm6206_vm12, %v15937_v40  ;;  %15941 = vmatmul.mubr.msk.f32.vlgmr.msra.gmra.mxu0 %vm6206_vm12, %v15937_v40  ;;  %v12327_v35 = vpop.permute.xlu1 %12326  ;;  %v12514_v33 = vpop.permute.xlu0 %12513  ;;  %v12747_v40 = vld [vmem:[%s23649_s6 + $0x38] sm:$0xff] }
 0x6fa   :  { %12190 = vmatpush1.msra.mxu1 %v12145_v21  ;;  %v12335_v58 = vsel %vm3471_vm8, %v12327_v35, %v12329_v19  ;;  %12040 = vmatprep.mubr.f32.mxu1 %v23713_v6  ;;  %v12524_v14 = vsel %vm12523_vm5, %v12514_v33, %v12516_v31  ;;  %v15983_v21 = vld [vmem:[%s23649_s6 + $0x1b0] sm:$0xff] }
 0x6fb   :  { %12378 = vmatprep.subr.mxu1 %v12335_v58  ;;  %12117 = vmatprep.mubr.f32.mxu0 %v23713_v6  ;;  %v15967_v58 = vld [vmem:[%s23649_s6 + $0x130] sm:$0xff] }
 0x6fc   :  { %v12758_v33 = vld [vmem:[%s23649_s6 + $0x90] sm:$0xff] }
 0x6fd   :  { %15940 = vmatmul.mubr.msk.f32.gmra.mxu1 %vm6206_vm12, %v15938_v1  ;;  %15942 = vmatmul.mubr.msk.f32.gmra.mxu0 %vm6206_vm12, %v15938_v1  ;;  %v12144_v16 = vpop.permute.xlu1 %12143  ;;  %v12746_v1 = vld [vmem:[%s23649_s6 + $0x30] sm:$0xff] }
 0x6fe   :  { %v12148_v60 = vsel %vm2786_vm7, %v21713_v41, %v12144_v16  ;;  %12223 = vmatprep.mubr.f32.mxu1 %v23713_v6  ;;  %12300 = vmatprep.mubr.f32.mxu0 %v23713_v6  ;;  %v15973_v41 = vld [vmem:[%s23649_s6 + $0x160] sm:$0xff]  ;;  %v12761_v16 = vld [vmem:[%s23649_s6 + $0xa8] sm:$0xff] }
 0x6ff   :  { %12266 = vmatprep.subr.mxu0 %v12148_v60  ;;  %v15966_v60 = vld [vmem:[%s23649_s6 + $0x128] sm:$0xff] }
 0x700   :  { %12267 = vmatpush1.msra.mxu0 %v12147_v51  ;;  %v15981_v51 = vld [vmem:[%s23649_s6 + $0x1a0] sm:$0xff] }
 0x701   :  { %15945 = vmatmul.mubr.msk.f32.vlgmr.msra.gmra.mxu1 %vm6206_vm12, %v15943_v4  ;;  %15947 = vmatmul.mubr.msk.f32.vlgmr.msra.gmra.mxu0 %vm6206_vm12, %v15943_v4  ;;  %v12331_v43 = vpop.permute.xlu1 %12330  ;;  %v12745_v4 = vld [vmem:[%s23649_s6 + $0x28] sm:$0xff] }
 0x702   :  { %v12336_v29 = vsel %vm3471_vm8, %v12329_v19, %v12331_v43  ;;  %v12337_v53 = vsel %vm3471_vm8, %v12331_v43, %v12333_v12  ;;  %12229 = vmatprep.mubr.f32.mxu1 %v23713_v6  ;;  %12306 = vmatprep.mubr.f32.mxu0 %v23713_v6  ;;  %v15970_v19 = vld [vmem:[%s23649_s6 + $0x148] sm:$0xff]  ;;  %v12763_v12 = vld [vmem:[%s23649_s6 + $0xb8] sm:$0xff]  ;;  %v12760_v43 = vld [vmem:[%s23649_s6 + $0xa0] sm:$0xff] }
 0x703   :  { %12455 = vmatprep.subr.mxu0 %v12337_v53  ;;  %v15980_v53 = vld [vmem:[%s23649_s6 + $0x198] sm:$0xff] }
 0x704   :  { %12456 = vmatpush1.msra.mxu0 %v12336_v29  ;;  %v12744_v29 = vld [vmem:[%s23649_s6 + $0x20] sm:$0xff] }
 0x705   :  { %15946 = vmatmul.mubr.msk.f32.gmra.mxu1 %vm6206_vm12, %v15944_v46  ;;  %15948 = vmatmul.mubr.msk.f32.gmra.mxu0 %vm6206_vm12, %v15944_v46  ;;  %v12325_v32 = vpop.permute.xlu1 %12324  ;;  %v12759_v46 = vld [vmem:[%s23649_s6 + $0x98] sm:$0xff] }
 0x706   :  { %v12334_v22 = vsel %vm3471_vm8, %v12325_v32, %v12327_v35  ;;  %12412 = vmatprep.mubr.f32.mxu1 %v23713_v6  ;;  %12489 = vmatprep.mubr.f32.mxu0 %v23713_v6  ;;  %v12762_v35 = vld [vmem:[%s23649_s6 + $0xb0] sm:$0xff]  ;;  %v15964_v32 = vld [vmem:[%s23649_s6 + $0x118] sm:$0xff] }
 0x707   :  { %12379 = vmatpush1.msra.mxu1 %v12334_v22  ;;  %v12743_v22 = vld [vmem:[%s23649_s6 + $0x18] sm:$0xff] }
 0x709   :  { %15951 = vmatmul.mubr.msk.f32.vlgmr.msra.gmra.mxu1 %vm6206_vm12, %v15949_v2  ;;  %15953 = vmatmul.mubr.msk.f32.vlgmr.msra.gmra.mxu0 %vm6206_vm12, %v15949_v2  ;;  %v12518_v18 = vpop.permute.xlu1 %12517  ;;  %v15979_v2 = vld [vmem:[%s23649_s6 + $0x190] sm:$0xff] }
 0x70a   :  { %v12525_v45 = vsel %vm12523_vm5, %v12516_v31, %v12518_v18  ;;  %12418 = vmatprep.mubr.f32.mxu1 %v23713_v6  ;;  %12495 = vmatprep.mubr.f32.mxu0 %v23713_v6  ;;  %v12526_v56 = vsel %vm12523_vm5, %v12518_v18, %v12520_v8  ;;  %v15982_v31 = vld [vmem:[%s23649_s6 + $0x1a8] sm:$0xff]  ;;  %v15963_v18 = vld [vmem:[%s23649_s6 + $0x110] sm:$0xff] }
 0x70b   :  { %12568 = vmatprep.subr.mxu1 %v12525_v45  ;;  %v12742_v45 = vld [vmem:[%s23649_s6 + $0x10] sm:$0xff] }
 0x70c   :  { %12569 = vmatpush1.msra.mxu1 %v12524_v14  ;;  %v12757_v14 = vld [vmem:[%s23649_s6 + $0x88] sm:$0xff] }
 0x70d   :  { %15952 = vmatmul.mubr.msk.f32.gmra.mxu1 %vm6206_vm12, %v15950_v0  ;;  %15954 = vmatmul.mubr.msk.f32.gmra.mxu0 %vm6206_vm12, %v15950_v0  ;;  %v12522_v17 = vpop.permute.xlu1 %12521  ;;  %v15978_v0 = vld [vmem:[%s23649_s6 + $0x188] sm:$0xff] }
 0x70e   :  { %v12527_v23 = vsel %vm12523_vm5, %v12520_v8, %v12522_v17  ;;  %12602 = vmatprep.mubr.f32.mxu1 %v23713_v6  ;;  %12679 = vmatprep.mubr.f32.mxu0 %v23713_v6  ;;  %v15965_v8 = vld [vmem:[%s23649_s6 + $0x120] sm:$0xff]  ;;  %v15962_v17 = vld [vmem:[%s23649_s6 + $0x108] sm:$0xff] }
 0x70f   :  { %12645 = vmatprep.subr.mxu0 %v12527_v23  ;;  %16618 = vmatprep.subr.mxu1 %v15992_v13  ;;  %v12741_v23 = vld [vmem:[%s23649_s6 + $0x8] sm:$0xff]  ;;  %v12740_v13 = vld [vmem:[%s23649_s6] sm:$0xff] }
 0x710   :  { %12646 = vmatpush1.msra.mxu0 %v12526_v56  ;;  %v12756_v56 = vld [vmem:[%s23649_s6 + $0x80] sm:$0xff] }
 0x711   :  { %15957 = vmatmul.mubr.msk.f32.vlgmr.msra.gmra.mxu1 %vm6206_vm12, %v15955_v55  ;;  %15959 = vmatmul.mubr.msk.f32.vlgmr.msra.gmra.mxu0 %vm6206_vm12, %v15955_v55  ;;  %v15977_v55 = vld [vmem:[%s23649_s6 + $0x180] sm:$0xff] }
 0x712   :  { %12608 = vmatprep.mubr.f32.mxu1 %v23713_v6  ;;  %12685 = vmatprep.mubr.f32.mxu0 %v23713_v6 }
 0x713   :  { %16653 = vmatprep.subr.mxu0 %v12771_v39  ;;  %16619 = vmatpush3.msra.mxu1 %v15976_v38  ;;  %v16024_v39 = vld [vmem:[%s23649_s6 + $0x2f8] sm:$0xff] }
 0x714   :  { %16654 = vmatpush3.msra.mxu0 %v12755_v30  ;;  %16620 = vmatprep.subr.mxu1 %v15991_v50  ;;  %v16056_v38 = vld [vmem:[%s23649_s6 + $0x3f8] sm:$0xff] }
 0x715   :  { %15958 = vmatmul.mubr.msk.f32.gmra.mxu1 %vm6206_vm12, %v15956_v15  ;;  %15960 = vmatmul.mubr.msk.f32.gmra.mxu0 %vm6206_vm12, %v15956_v15  ;;  %v15961_v15 = vld [vmem:[%s23649_s6 + $0x100] sm:$0xff] }
 0x716   :  { %16655 = vmatprep.subr.mxu0 %v12770_v37  ;;  %16621 = vmatpush3.msra.mxu1 %v15975_v34 }
 0x717   :  { %16656 = vmatpush3.msra.mxu0 %v12754_v28  ;;  %16622 = vmatprep.subr.mxu1 %v15990_v59 }
 0x718   :  { %16657 = vmatprep.subr.mxu0 %v12769_v7  ;;  %16623 = vmatpush3.msra.mxu1 %v15974_v57  ;;  %v11362_v7 = vpop.f32.mrf.mxu0 }
 0x719   :  { %16658 = vmatpush3.msra.mxu0 %v12753_v3  ;;  %16624 = vmatprep.subr.mxu1 %v15989_v24 }
 0x71a   :  { %16659 = vmatprep.subr.mxu0 %v12768_v63  ;;  %16625 = vmatpush3.msra.mxu1 %v15973_v41  ;;  %v11364_v24 = vpop.f32.mrf.mxu0 }
 0x71b   :  { %16660 = vmatpush3.msra.mxu0 %v12752_v52  ;;  %16626 = vmatprep.subr.mxu1 %v15988_v44 }
 0x71c   :  { %16661 = vmatprep.subr.mxu0 %v12767_v36  ;;  %16627 = vmatpush3.msra.mxu1 %v15972_v26  ;;  %v11368_v41 = vpop.f32.mrf.mxu0 }
 0x71d   :  { %16662 = vmatpush3.msra.mxu0 %v12751_v10  ;;  %16628 = vmatprep.subr.mxu1 %v15987_v27 }
 0x71e   :  { %16663 = vmatprep.subr.mxu0 %v12766_v48  ;;  %16629 = vmatpush3.msra.mxu1 %v15971_v5  ;;  %v11370_v36 = vpop.f32.mrf.mxu0 }
 0x71f   :  { %16664 = vmatpush3.msra.mxu0 %v12750_v62  ;;  %16630 = vmatprep.subr.mxu1 %v15986_v9 }
 0x720   :  { %16665 = vmatprep.subr.mxu0 %v12765_v61  ;;  %16631 = vmatpush3.msra.mxu1 %v15970_v19 }
 0x721   :  { %16666 = vmatpush3.msra.mxu0 %v12749_v54  ;;  %16632 = vmatprep.subr.mxu1 %v15985_v11 }
 0x722   :  { %16667 = vmatprep.subr.mxu0 %v12764_v20  ;;  %16633 = vmatpush3.msra.mxu1 %v15969_v47 }
 0x723   :  { %16668 = vmatpush3.msra.mxu0 %v12748_v49  ;;  %16634 = vmatprep.subr.mxu1 %v15984_v25 }
 0x724   :  { %16669 = vmatprep.subr.mxu0 %v12763_v12  ;;  %16635 = vmatpush3.msra.mxu1 %v15968_v42  ;;  %v11125_v30 = vpop.f32.mrf.mxu1 }
 0x725   :  { %16670 = vmatpush3.msra.mxu0 %v12747_v40  ;;  %16636 = vmatprep.subr.mxu1 %v15983_v21 }
 0x726   :  { %16671 = vmatprep.subr.mxu0 %v12762_v35  ;;  %16637 = vmatpush3.msra.mxu1 %v15967_v58  ;;  %v11127_v50 = vpop.f32.mrf.mxu1 }
 0x727   :  { %16672 = vmatpush3.msra.mxu0 %v12746_v1  ;;  %16638 = vmatprep.subr.mxu1 %v15982_v31 }
 0x728   :  { %16673 = vmatprep.subr.mxu0 %v12761_v16  ;;  %16639 = vmatpush3.msra.mxu1 %v15966_v60  ;;  %v22029_v37 = vpop.f32.mrf.mxu1 }
 0x729   :  { %16674 = vmatpush3.msra.mxu0 %v12745_v4  ;;  %16640 = vmatprep.subr.mxu1 %v15981_v51  ;;  %23715 = vst [vmem:[#allocation21_spill] sm:$0xff] %v22029_v37 }
 0x72a   :  { %16675 = vmatprep.subr.mxu0 %v12760_v43  ;;  %16641 = vmatpush3.msra.mxu1 %v15965_v8  ;;  %v22031_v34 = vpop.f32.mrf.mxu1 }
 0x72b   :  { %16676 = vmatpush3.msra.mxu0 %v12744_v29  ;;  %16642 = vmatprep.subr.mxu1 %v15980_v53  ;;  %23716 = vst [vmem:[#allocation10_spill] sm:$0xff] %v22031_v34 }
 0x72c   :  { %16677 = vmatprep.subr.mxu0 %v12759_v46  ;;  %16643 = vmatpush3.msra.mxu1 %v15964_v32 }
 0x72d   :  { %16678 = vmatpush3.msra.mxu0 %v12743_v22  ;;  %16644 = vmatprep.subr.mxu1 %v15979_v2 }
 0x72e   :  { %16679 = vmatprep.subr.mxu0 %v12758_v33  ;;  %16645 = vmatpush3.msra.mxu1 %v15963_v18 }
 0x72f   :  { %16680 = vmatpush3.msra.mxu0 %v12742_v45  ;;  %16646 = vmatprep.subr.mxu1 %v15978_v0 }
 0x730   :  { %16681 = vmatprep.subr.mxu0 %v12757_v14  ;;  %16647 = vmatpush3.msra.mxu1 %v15962_v17 }
 0x731   :  { %16682 = vmatpush3.msra.mxu0 %v12741_v23  ;;  %16648 = vmatprep.subr.mxu1 %v15977_v55 }
 0x732   :  { %16683 = vmatprep.subr.mxu0 %v12756_v56  ;;  %16649 = vmatpush3.msra.mxu1 %v15961_v15 }
 0x733   :  { %16684 = vmatpush3.msra.mxu0 %v12740_v13  ;;  %16688 = vmatprep.subr.mxu1 %v16024_v39 }
 0x734   :  { %16723 = vmatprep.subr.mxu0 %v16056_v38 }
 0x791   :  { %v11202_v28 = vpop.f32.mrf.mxu1 }
 0x792   :  { %v11363_v45 = vadd.f32 %v11362_v7, %v11202_v28 }
 0x793   :  { %v11204_v59 = vpop.f32.mrf.mxu1 }
 0x794   :  { %v11365_v23 = vadd.f32 %v11364_v24, %v11204_v59 }
 0x795   :  { %v11208_v57 = vpop.f32.mrf.mxu1 }
 0x796   :  { %v11369_v7 = vadd.f32 %v11368_v41, %v11208_v57 }
 0x797   :  { %v11210_v3 = vpop.f32.mrf.mxu1 }
 0x798   :  { %v11371_v28 = vadd.f32 %v11370_v36, %v11210_v3 }
 0x799   :  { %v11285_v63 = vpop.f32.mrf.mxu1 }
 0x79a   :  { %v11286_v0 = vadd.f32 %v11285_v63, %v11125_v30  ;;  %v23719_v30 = vld [vmem:[#allocation21_spill] sm:$0xff] }
 0x79b   :  { %v11287_v52 = vpop.f32.mrf.mxu1 }
 0x79c   :  { %v11288_v55 = vadd.f32 %v11287_v52, %v11127_v50 }
 0x79d   :  { %v11291_v44 = vpop.f32.mrf.mxu1 }
 0x79e   :  { %v11292_v63 = vadd.f32 %v11291_v44, %v23719_v30 }
 0x79f   :  { %v11293_v26 = vpop.f32.mrf.mxu1 }
 0x7a1   :  { %v11466_v10 = vpop.f32.mrf.mxu1  ;;  %v11543_v27 = vpop.f32.mrf.mxu0 }
 0x7a2   :  { %v11554_v56 = vadd.f32 %v11466_v10, %v11286_v0  ;;  %v11556_v15 = vadd.f32 %v11543_v27, %v11363_v45 }
 0x7a3   :  { %v11468_v48 = vpop.f32.mrf.mxu1  ;;  %v11545_v5 = vpop.f32.mrf.mxu0 }
 0x7a4   :  { %v11555_v38 = vadd.f32 %v11468_v48, %v11288_v55  ;;  %v11557_v6 = vadd.f32 %v11545_v5, %v11365_v23 }
 0x7a5   :  { %v11472_v62 = vpop.f32.mrf.mxu1  ;;  %v11549_v9 = vpop.f32.mrf.mxu0 }
 0x7a6   :  { %v11558_v27 = vadd.f32 %v11472_v62, %v11292_v63  ;;  %v11560_v45 = vadd.f32 %v11549_v9, %v11369_v7 }
 0x7a7   :  { %v11474_v61 = vpop.f32.mrf.mxu1  ;;  %v11551_v19 = vpop.f32.mrf.mxu0 }
 0x7a8   :  { %v11561_v55 = vadd.f32 %v11551_v19, %v11371_v28 }
 0x7a9   :  { %v11656_v54 = vpop.f32.mrf.mxu1  ;;  %v11733_v11 = vpop.f32.mrf.mxu0 }
 0x7aa   :  { %v11744_v34 = vadd.f32 %v11656_v54, %v11554_v56  ;;  %v11746_v37 = vadd.f32 %v11733_v11, %v11556_v15 }
 0x7ab   :  { %v11658_v20 = vpop.f32.mrf.mxu1  ;;  %v11735_v47 = vpop.f32.mrf.mxu0 }
 0x7ac   :  { %v11745_v50 = vadd.f32 %v11658_v20, %v11555_v38  ;;  %v11747_v52 = vadd.f32 %v11735_v47, %v11557_v6 }
 0x7ad   :  { %v11662_v49 = vpop.f32.mrf.mxu1  ;;  %v11739_v25 = vpop.f32.mrf.mxu0 }
 0x7ae   :  { %v11748_v41 = vadd.f32 %v11662_v49, %v11558_v27  ;;  %v11750_v44 = vadd.f32 %v11739_v25, %v11560_v45  ;;  %v12710_v45 = vpop.permute.xlu0 %12709 }
 0x7af   :  { %v11664_v12 = vpop.f32.mrf.mxu1  ;;  %v11741_v42 = vpop.f32.mrf.mxu0 }
 0x7b1   :  { %v11846_v40 = vpop.f32.mrf.mxu1  ;;  %v11923_v21 = vpop.f32.mrf.mxu0 }
 0x7b2   :  { %v11934_v0 = vadd.f32 %v11846_v40, %v11744_v34  ;;  %v11936_v10 = vadd.f32 %v11923_v21, %v11746_v37 }
 0x7b3   :  { %v11848_v35 = vpop.f32.mrf.mxu1  ;;  %v11925_v58 = vpop.f32.mrf.mxu0 }
 0x7b4   :  { %v11935_v54 = vadd.f32 %v11848_v35, %v11745_v50  ;;  %v11937_v11 = vadd.f32 %v11925_v58, %v11747_v52 }
 0x7b5   :  { %v11852_v1 = vpop.f32.mrf.mxu1  ;;  %v11929_v31 = vpop.f32.mrf.mxu0 }
 0x7b6   :  { %v11938_v62 = vadd.f32 %v11852_v1, %v11748_v41  ;;  %v11940_v9 = vadd.f32 %v11929_v31, %v11750_v44 }
 0x7b7   :  { %v11854_v16 = vpop.f32.mrf.mxu1  ;;  %v11931_v60 = vpop.f32.mrf.mxu0 }
 0x7b9   :  { %v12036_v4 = vpop.f32.mrf.mxu1  ;;  %v12113_v51 = vpop.f32.mrf.mxu0 }
 0x7ba   :  { %v12124_v57 = vadd.f32 %v12036_v4, %v11934_v0  ;;  %v12126_v3 = vadd.f32 %v12113_v51, %v11936_v10 }
 0x7bb   :  { %v12038_v43 = vpop.f32.mrf.mxu1  ;;  %v12115_v8 = vpop.f32.mrf.mxu0 }
 0x7bc   :  { %v12125_v20 = vadd.f32 %v12038_v43, %v11935_v54  ;;  %v12127_v6 = vadd.f32 %v12115_v8, %v11937_v11  ;;  %v12705_v43 = vpop.permute.xlu1 %12704  ;;  %v12815_v54 = vlaneseq }
 0x7bd   :  { %v12042_v29 = vpop.f32.mrf.mxu1  ;;  %v12119_v53 = vpop.f32.mrf.mxu0 }
 0x7be   :  { %v12128_v49 = vadd.f32 %v12042_v29, %v11938_v62  ;;  %v12130_v25 = vadd.f32 %v12119_v53, %v11940_v9  ;;  %v12816_v62 = vshrl.u32 %v12815_v54, 7  ;;  %v16018_v54 = vld [vmem:[%s23649_s6 + $0x2c8] sm:$0xff] }
 0x7bf   :  { %v12044_v46 = vpop.f32.mrf.mxu1  ;;  %v12121_v32 = vpop.f32.mrf.mxu0 }
 0x7c1   :  { %v12225_v22 = vpop.f32.mrf.mxu1  ;;  %v12302_v2 = vpop.f32.mrf.mxu0 }
 0x7c2   :  { %v12313_v34 = vadd.f32 %v12225_v22, %v12124_v57  ;;  %v12315_v37 = vadd.f32 %v12302_v2, %v12126_v3 }
 0x7c3   :  { %v12227_v33 = vpop.f32.mrf.mxu1  ;;  %v12304_v18 = vpop.f32.mrf.mxu0 }
 0x7c4   :  { %v12314_v21 = vadd.f32 %v12227_v33, %v12125_v20  ;;  %v12316_v35 = vadd.f32 %v12304_v18, %v12127_v6 }
 0x7c5   :  { %v22033_v14 = vpop.f32.mrf.mxu1  ;;  %v22035_v17 = vpop.f32.mrf.mxu0 }
 0x7c6   :  { %23717 = vst [vmem:[#allocation17_spill] sm:$0xff] %v22033_v14  ;;  %23718 = vst [vmem:[#allocation22_spill] sm:$0xff] %v22035_v17  ;;  %v23720_v14 = vld [vmem:[#allocation10_spill] sm:$0xff] }
 0x7c7   :  { %v12233_v13 = vpop.f32.mrf.mxu1  ;;  %v12310_v39 = vpop.f32.mrf.mxu0  ;;  %v11294_v17 = vadd.f32 %v11293_v26, %v23720_v14  ;;  %v11751_v26 = vadd.f32 %v11741_v42, %v11561_v55 }
 0x7c9   :  { %v12414_v24 = vpop.f32.mrf.mxu1  ;;  %v12491_v59 = vpop.f32.mrf.mxu0  ;;  %v11559_v48 = vadd.f32 %v11474_v61, %v11294_v17  ;;  %v11941_v19 = vadd.f32 %v11931_v60, %v11751_v26 }
 0x7ca   :  { %v12502_v58 = vadd.f32 %v12414_v24, %v12313_v34  ;;  %v12504_v4 = vadd.f32 %v12491_v59, %v12315_v37 }
 0x7cb   :  { %v12416_v5 = vpop.f32.mrf.mxu1  ;;  %v12493_v23 = vpop.f32.mrf.mxu0  ;;  %v11749_v36 = vadd.f32 %v11664_v12, %v11559_v48  ;;  %v12131_v42 = vadd.f32 %v12121_v32, %v11941_v19 }
 0x7cc   :  { %v12503_v8 = vadd.f32 %v12416_v5, %v12314_v21  ;;  %v12505_v22 = vadd.f32 %v12493_v23, %v12316_v35  ;;  %v18307_v5 = vmov 1966171168  }
 0x7cd   :  { %v12420_v14 = vpop.f32.mrf.mxu1  ;;  %v12497_v56 = vpop.f32.mrf.mxu0  ;;  %v11939_v61 = vadd.f32 %v11854_v16, %v11749_v36  ;;  %v23721_v31 = vld [vmem:[#allocation17_spill] sm:$0xff]  ;;  %v23722_v60 = vld [vmem:[#allocation22_spill] sm:$0xff]  ;;  %v12320_v33 = vadd.f32 %v12310_v39, %v12131_v42  ;;  %v12813_v23 = vunpack.c.l.s4 %v18307_v5 }
 0x7ce   :  { %v12317_v16 = vadd.f32 %v23721_v31, %v12128_v49  ;;  %v12319_v15 = vadd.f32 %v23722_v60, %v12130_v25  ;;  %v16003_v5 = vld [vmem:[%s23649_s6 + $0x250] sm:$0xff] }
 0x7cf   :  { %v12422_v47 = vpop.f32.mrf.mxu1  ;;  %v12499_v40 = vpop.f32.mrf.mxu0  ;;  %v12129_v12 = vadd.f32 %v12044_v46, %v11939_v61  ;;  %v12814_v37 = vunpack.c.0.s8 %v12813_v23  ;;  %v16035_v23 = vld [vmem:[%s23649_s6 + $0x350] sm:$0xff] }
 0x7d0   :  { %v12506_v32 = vadd.f32 %v12420_v14, %v12317_v16  ;;  %v12508_v30 = vadd.f32 %v12497_v56, %v12319_v15  ;;  %v12509_v24 = vadd.f32 %v12499_v40, %v12320_v33  ;;  %v16008_v15 = vld [vmem:[%s23649_s6 + $0x278] sm:$0xff] }
 0x7d1   :  { %v12604_v51 = vpop.f32.mrf.mxu1  ;;  %v12681_v17 = vpop.f32.mrf.mxu0  ;;  %v12318_v38 = vadd.f32 %v12233_v13, %v12129_v12  ;;  %v22041_v9 = vsub.s32 %v12814_v37, %v12816_v62  ;;  %v16047_v37 = vld [vmem:[%s23649_s6 + $0x3b0] sm:$0xff] }
 0x7d2   :  { %v12692_v2 = vadd.f32 %v12604_v51, %v12502_v58  ;;  %v12694_v1 = vadd.f32 %v12681_v17, %v12504_v4  ;;  %v15999_v62 = vld [vmem:[%s23649_s6 + $0x230] sm:$0xff] }
 0x7d3   :  { %v12606_v18 = vpop.f32.mrf.mxu1  ;;  %v12683_v7 = vpop.f32.mrf.mxu0  ;;  %v12507_v63 = vadd.f32 %v12422_v47, %v12318_v38 }
 0x7d4   :  { %v12712_v28 = vadd.f32 %v12705_v43, %v12692_v2  ;;  %v12714_v29 = vadd.f32 %v12705_v43, %v12694_v1  ;;  %v12693_v53 = vadd.f32 %v12606_v18, %v12503_v8  ;;  %v12695_v46 = vadd.f32 %v12683_v7, %v12505_v22  ;;  %v16040_v18 = vld [vmem:[%s23649_s6 + $0x378] sm:$0xff]  ;;  %v16023_v7 = vld [vmem:[%s23649_s6 + $0x2f0] sm:$0xff] }
 0x7d5   :  { %v12610_v59 = vpop.f32.mrf.mxu1  ;;  %v12687_v50 = vpop.f32.mrf.mxu0 }
 0x7d6   :  { %v12720_v52 = vmax.f32 %v12712_v28, 0.0  ;;  %v12722_v0 = vmax.f32 %v12714_v29, 0.0  ;;  %v12713_v10 = vadd.f32 %v12705_v43, %v12693_v53  ;;  %v12715_v27 = vadd.f32 %v12705_v43, %v12695_v46  ;;  %v16055_v28 = vld [vmem:[%s23649_s6 + $0x3f0] sm:$0xff] }
 0x7d7   :  { %v12696_v48 = vadd.f32 %v12610_v59, %v12506_v32  ;;  %v12698_v13 = vadd.f32 %v12687_v50, %v12508_v30  ;;  %v12612_v39 = vpop.f32.mrf.mxu1  ;;  %v12689_v55 = vpop.f32.mrf.mxu0  ;;  %v16007_v53 = vld [vmem:[%s23649_s6 + $0x270] sm:$0xff]  ;;  %v16022_v30 = vld [vmem:[%s23649_s6 + $0x2e8] sm:$0xff]  ;;  %v16021_v50 = vld [vmem:[%s23649_s6 + $0x2e0] sm:$0xff] }
 0x7d8   :  { %12728 = vst [vmem:[#allocation4] sm:$0xff] %v12720_v52  ;;  %12733 = vst [vmem:[#allocation4 + $0x20] sm:$0xff] %v12722_v0  ;;  %v12721_v11 = vmax.f32 %v12713_v10, 0.0  ;;  %v12723_v57 = vmax.f32 %v12715_v27, 0.0  ;;  %v12697_v3 = vadd.f32 %v12612_v39, %v12507_v63  ;;  %v12699_v41 = vadd.f32 %v12689_v55, %v12509_v24  ;;  %v16039_v32 = vld [vmem:[%s23649_s6 + $0x370] sm:$0xff]  ;;  %v16054_v63 = vld [vmem:[%s23649_s6 + $0x3e8] sm:$0xff] }
 0x7d9   :  { %v12716_v44 = vadd.f32 %v12710_v45, %v12696_v48  ;;  %v12718_v36 = vadd.f32 %v12710_v45, %v12698_v13  ;;  %v16006_v24 = vld [vmem:[%s23649_s6 + $0x268] sm:$0xff]  ;;  %v16053_v52 = vld [vmem:[%s23649_s6 + $0x3e0] sm:$0xff]  ;;  %v16020_v27 = vld [vmem:[%s23649_s6 + $0x2d8] sm:$0xff] }
 0x7da   :  { %12729 = vst [vmem:[#allocation4 + $0x8] sm:$0xff] %v12721_v11  ;;  %12734 = vst [vmem:[#allocation4 + $0x28] sm:$0xff] %v12723_v57  ;;  %v12717_v26 = vadd.f32 %v12710_v45, %v12697_v3  ;;  %v12719_v14 = vadd.f32 %v12710_v45, %v12699_v41  ;;  %v16038_v59 = vld [vmem:[%s23649_s6 + $0x368] sm:$0xff]  ;;  %v16005_v0 = vld [vmem:[%s23649_s6 + $0x260] sm:$0xff] }
 0x7db   :  { %v12724_v56 = vmax.f32 %v12716_v44, 0.0  ;;  %v12726_v20 = vmax.f32 %v12718_v36, 0.0  ;;  %v16037_v10 = vld [vmem:[%s23649_s6 + $0x360] sm:$0xff]  ;;  %v16052_v45 = vld [vmem:[%s23649_s6 + $0x3d8] sm:$0xff]  ;;  %v16019_v39 = vld [vmem:[%s23649_s6 + $0x2d0] sm:$0xff] }
 0x7dc   :  { %v12725_v6 = vmax.f32 %v12717_v26, 0.0  ;;  %v12727_v34 = vmax.f32 %v12719_v14, 0.0  ;;  %v16004_v48 = vld [vmem:[%s23649_s6 + $0x258] sm:$0xff]  ;;  %v16051_v55 = vld [vmem:[%s23649_s6 + $0x3d0] sm:$0xff]  ;;  %v16050_v11 = vld [vmem:[%s23649_s6 + $0x3c8] sm:$0xff] }
 0x7dd   :  { %12730 = vst [vmem:[#allocation4 + $0x10] sm:$0xff] %v12724_v56  ;;  %12735 = vst [vmem:[#allocation4 + $0x30] sm:$0xff] %v12726_v20  ;;  %v16036_v13 = vld [vmem:[%s23649_s6 + $0x358] sm:$0xff]  ;;  %v16002_v57 = vld [vmem:[%s23649_s6 + $0x248] sm:$0xff] }
 0x7de   :  { %12731 = vst [vmem:[#allocation4 + $0x18] sm:$0xff] %v12725_v6  ;;  %12736 = vst [vmem:[#allocation4 + $0x38] sm:$0xff] %v12727_v34  ;;  %v16034_v3 = vld [vmem:[%s23649_s6 + $0x348] sm:$0xff]  ;;  %v16017_v41 = vld [vmem:[%s23649_s6 + $0x2c0] sm:$0xff] }
 0x7df   :  { %v16049_v44 = vld [vmem:[%s23649_s6 + $0x3c0] sm:$0xff]  ;;  %v16016_v14 = vld [vmem:[%s23649_s6 + $0x2b8] sm:$0xff]  ;;  %v16015_v34 = vld [vmem:[%s23649_s6 + $0x2b0] sm:$0xff] }
 0x7e0   :  { %v16001_v36 = vld [vmem:[%s23649_s6 + $0x240] sm:$0xff]  ;;  %v16048_v56 = vld [vmem:[%s23649_s6 + $0x3b8] sm:$0xff] }
 0x7e1   :  { %v12773_v61 = vld [vmem:[#allocation4 + $0x1] ss:$8 sm:$0x3]  ;;  %v12737_v40 = vld [vmem:[#allocation4] ss:$8 sm:$0x3] }
 0x7e2   :  { %v12775_v19 = vld [vmem:[#allocation4 + $0x21] ss:$8 sm:$0x3]  ;;  %v12739_v21 = vld [vmem:[#allocation4 + $0x20] ss:$8 sm:$0x3] }
 0x7e3   :  { %v12811_v47 = vcombine.low %v12773_v61, %v12775_v19  ;;  %v12908_v35 = vcombine.low %v12737_v40, %v12739_v21  ;;  %v13004_v58 = vld [vmem:[#allocation4 + $0x2] ss:$8 sm:$0x3]  ;;  %v13139_v12 = vld [vmem:[#allocation4 + $0x3] ss:$8 sm:$0x3] }
 0x7e4   :  { %v13006_v4 = vld [vmem:[#allocation4 + $0x22] ss:$8 sm:$0x3]  ;;  %v13141_v42 = vld [vmem:[#allocation4 + $0x23] ss:$8 sm:$0x3] }
 0x7e5   :  { %v12818_v49 = vrot.slane %v12811_v47, %v22041_v9  ;;  %v13042_v25 = vcombine.low %v13004_v58, %v13006_v4  ;;  %v12915_v51 = vrot.slane %v12908_v35, %v22041_v9  ;;  %v13177_v17 = vcombine.low %v13139_v12, %v13141_v42  ;;  %v16033_v26 = vld [vmem:[%s23649_s6 + $0x340] sm:$0xff]  ;;  %v16000_v20 = vld [vmem:[%s23649_s6 + $0x238] sm:$0xff]  ;;  %v16031_v61 = vld [vmem:[%s23649_s6 + $0x330] sm:$0xff] }
 0x7e6   :  { %v16032_v6 = vld [vmem:[%s23649_s6 + $0x338] sm:$0xff]  ;;  %v16014_v19 = vld [vmem:[%s23649_s6 + $0x2a8] sm:$0xff]  ;;  %v16013_v35 = vld [vmem:[%s23649_s6 + $0x2a0] sm:$0xff] }
 0x7e7   :  { %v12819_v43 = vcombine.high %v12818_v49, %v12818_v49  ;;  %v22046_v8 = vrot.slane %v13042_v25, %v22041_v9  ;;  %v12916_v22 = vcombine.high %v12915_v51, %v12915_v51  ;;  %v22049_v2 = vrot.slane %v13177_v17, %v22041_v9  ;;  %v16046_v47 = vld [vmem:[%s23649_s6 + $0x3a8] sm:$0xff]  ;;  %v16045_v12 = vld [vmem:[%s23649_s6 + $0x3a0] sm:$0xff]  ;;  %v16012_v17 = vld [vmem:[%s23649_s6 + $0x298] sm:$0xff] }
 0x7e8   :  { %v12826_v16 = vrot.slane %v12818_v49, %v22041_v9  ;;  %v12923_v33 = vrot.slane %v12915_v51, %v22041_v9  ;;  %v15998_v40 = vld [vmem:[%s23649_s6 + $0x228] sm:$0xff]  ;;  %v15997_v42 = vld [vmem:[%s23649_s6 + $0x220] sm:$0xff] }
 0x7e9   :  { %v12833_v1 = vrot.slane %v12819_v43, %v22041_v9  ;;  %v13050_v31 = vcombine.high %v22046_v8, %v22046_v8  ;;  %v12930_v60 = vrot.slane %v12916_v22, %v22041_v9  ;;  %v13185_v38 = vcombine.high %v22049_v2, %v22049_v2  ;;  %v16030_v21 = vld [vmem:[%s23649_s6 + $0x328] sm:$0xff]  ;;  %v16029_v51 = vld [vmem:[%s23649_s6 + $0x320] sm:$0xff]  ;;  %v16044_v22 = vld [vmem:[%s23649_s6 + $0x398] sm:$0xff] }
 0x7ea   :  { %v13274_v58 = vld [vmem:[#allocation4 + $0x4] ss:$8 sm:$0x3]  ;;  %v13409_v49 = vld [vmem:[#allocation4 + $0x5] ss:$8 sm:$0x3] }
 0x7eb   :  { %12900 = vmatprep.mubr.f32.mxu1 %v12833_v1  ;;  %12997 = vmatprep.mubr.f32.mxu0 %v12930_v60  ;;  %v13064_v29 = vrot.slane %v13050_v31, %v22041_v9  ;;  %v13199_v46 = vrot.slane %v13185_v38, %v22041_v9  ;;  %v13276_v4 = vld [vmem:[#allocation4 + $0x24] ss:$8 sm:$0x3]  ;;  %v13411_v25 = vld [vmem:[#allocation4 + $0x25] ss:$8 sm:$0x3] }
 0x7ec   :  { %12901 = vmatmul.mubr.f32.vlgmr.msra.gmra.mxu1 %v12826_v16  ;;  %12998 = vmatmul.mubr.f32.vlgmr.msra.gmra.mxu0 %v12923_v33  ;;  %v13312_v43 = vcombine.low %v13274_v58, %v13276_v4  ;;  %v15996_v1 = vld [vmem:[%s23649_s6 + $0x218] sm:$0xff]  ;;  %v13447_v31 = vcombine.low %v13409_v49, %v13411_v25  ;;  %v16011_v60 = vld [vmem:[%s23649_s6 + $0x290] sm:$0xff]  ;;  %v16065_v58 = vld [vmem:[%s23649_s6 + $0x440] sm:$0xff] }
 0x7ed   :  { %16689 = vmatpush3.msra.mxu1 %v16008_v15  ;;  %16724 = vmatpush3.msra.mxu0 %v16040_v18  ;;  %v16028_v16 = vld [vmem:[%s23649_s6 + $0x318] sm:$0xff]  ;;  %v16043_v15 = vld [vmem:[%s23649_s6 + $0x390] sm:$0xff]  ;;  %v16010_v18 = vld [vmem:[%s23649_s6 + $0x288] sm:$0xff] }
 0x7ee   :  { %16690 = vmatprep.subr.mxu1 %v16023_v7  ;;  %13131 = vmatprep.mubr.f32.mxu1 %v13064_v29  ;;  %v15995_v38 = vld [vmem:[%s23649_s6 + $0x210] sm:$0xff]  ;;  %v22227_v7 = vrot.slane %v13312_v43, %v22041_v9  ;;  %v15994_v29 = vld [vmem:[%s23649_s6 + $0x208] sm:$0xff]  ;;  %v16097_v4 = vld [vmem:[%s23649_s6 + $0x540] sm:$0xff] }
 0x7ef   :  { %16725 = vmatprep.subr.mxu0 %v16055_v28  ;;  %13266 = vmatprep.mubr.f32.mxu0 %v13199_v46  ;;  %v16027_v33 = vld [vmem:[%s23649_s6 + $0x310] sm:$0xff]  ;;  %v16042_v28 = vld [vmem:[%s23649_s6 + $0x388] sm:$0xff]  ;;  %v16080_v49 = vld [vmem:[%s23649_s6 + $0x4b8] sm:$0xff] }
 0x7f0   :  { %16691 = vmatpush3.msra.mxu1 %v16007_v53  ;;  %16726 = vmatpush3.msra.mxu0 %v16039_v32  ;;  %v22236_v53 = vrot.slane %v13447_v31, %v22041_v9  ;;  %v16026_v46 = vld [vmem:[%s23649_s6 + $0x308] sm:$0xff]  ;;  %v16009_v32 = vld [vmem:[%s23649_s6 + $0x280] sm:$0xff]  ;;  %v16112_v25 = vld [vmem:[%s23649_s6 + $0x5b8] sm:$0xff] }
 0x7f1   :  { %16692 = vmatprep.subr.mxu1 %v16022_v30  ;;  %16727 = vmatprep.subr.mxu0 %v16054_v63  ;;  %v16041_v30 = vld [vmem:[%s23649_s6 + $0x380] sm:$0xff]  ;;  %v16063_v43 = vld [vmem:[%s23649_s6 + $0x430] sm:$0xff]  ;;  %v16110_v31 = vld [vmem:[%s23649_s6 + $0x5a8] sm:$0xff] }
 0x7f2   :  { %16693 = vmatpush3.msra.mxu1 %v16006_v24  ;;  %16728 = vmatpush3.msra.mxu0 %v16038_v59  ;;  %v15993_v63 = vld [vmem:[%s23649_s6 + $0x200] sm:$0xff]  ;;  %v13320_v59 = vcombine.high %v22227_v7, %v22227_v7 }
 0x7f3   :  { %16694 = vmatprep.subr.mxu1 %v16021_v50  ;;  %16729 = vmatprep.subr.mxu0 %v16053_v52  ;;  %v16025_v24 = vld [vmem:[%s23649_s6 + $0x300] sm:$0xff]  ;;  %v13057_v50 = vrot.slane %v22046_v8, %v22041_v9  ;;  %v16088_v52 = vld [vmem:[%s23649_s6 + $0x4f8] sm:$0xff] }
 0x7f4   :  { %16695 = vmatpush3.msra.mxu1 %v16005_v0  ;;  %16730 = vmatpush3.msra.mxu0 %v16037_v10  ;;  %v13455_v0 = vcombine.high %v22236_v53, %v22236_v53  ;;  %v13192_v10 = vrot.slane %v22049_v2, %v22041_v9  ;;  %v16072_v8 = vld [vmem:[%s23649_s6 + $0x478] sm:$0xff]  ;;  %v13334_v2 = vrot.slane %v13320_v59, %v22041_v9 }
 0x7f5   :  { %16696 = vmatprep.subr.mxu1 %v16020_v27  ;;  %16731 = vmatprep.subr.mxu0 %v16052_v45  ;;  %v16120_v27 = vld [vmem:[%s23649_s6 + $0x5f8] sm:$0xff] }
 0x7f6   :  { %16697 = vmatpush3.msra.mxu1 %v16004_v48  ;;  %16732 = vmatpush3.msra.mxu0 %v16036_v13  ;;  %v16104_v45 = vld [vmem:[%s23649_s6 + $0x578] sm:$0xff]  ;;  %v16087_v48 = vld [vmem:[%s23649_s6 + $0x4f0] sm:$0xff]  ;;  %v13469_v13 = vrot.slane %v13455_v0, %v22041_v9 }
 0x7f7   :  { %16698 = vmatprep.subr.mxu1 %v16019_v39  ;;  %16733 = vmatprep.subr.mxu0 %v16051_v55  ;;  %v16119_v39 = vld [vmem:[%s23649_s6 + $0x5f0] sm:$0xff]  ;;  %v16060_v59 = vld [vmem:[%s23649_s6 + $0x418] sm:$0xff] }
 0x7f8   :  { %16699 = vmatpush3.msra.mxu1 %v16003_v5  ;;  %16734 = vmatpush3.msra.mxu0 %v16035_v23  ;;  %v16071_v55 = vld [vmem:[%s23649_s6 + $0x470] sm:$0xff]  ;;  %v16086_v23 = vld [vmem:[%s23649_s6 + $0x4e8] sm:$0xff] }
 0x7f9   :  { %16700 = vmatprep.subr.mxu1 %v16018_v54  ;;  %16735 = vmatprep.subr.mxu0 %v16050_v11  ;;  %v16103_v5 = vld [vmem:[%s23649_s6 + $0x570] sm:$0xff]  ;;  %v16118_v54 = vld [vmem:[%s23649_s6 + $0x5e8] sm:$0xff] }
 0x7fa   :  { %16701 = vmatpush3.msra.mxu1 %v16002_v57  ;;  %16736 = vmatpush3.msra.mxu0 %v16034_v3  ;;  %v16070_v11 = vld [vmem:[%s23649_s6 + $0x468] sm:$0xff]  ;;  %v16085_v3 = vld [vmem:[%s23649_s6 + $0x4e0] sm:$0xff]  ;;  %v16075_v0 = vld [vmem:[%s23649_s6 + $0x490] sm:$0xff] }
 0x7fb   :  { %16702 = vmatprep.subr.mxu1 %v16017_v41  ;;  %16737 = vmatprep.subr.mxu0 %v16049_v44  ;;  %v16102_v57 = vld [vmem:[%s23649_s6 + $0x568] sm:$0xff]  ;;  %v16117_v41 = vld [vmem:[%s23649_s6 + $0x5e0] sm:$0xff] }
 0x7fc   :  { %16703 = vmatpush3.msra.mxu1 %v16001_v36  ;;  %16738 = vmatpush3.msra.mxu0 %v16033_v26  ;;  %v16069_v44 = vld [vmem:[%s23649_s6 + $0x460] sm:$0xff]  ;;  %v16084_v26 = vld [vmem:[%s23649_s6 + $0x4d8] sm:$0xff] }
 0x7fd   :  { %16704 = vmatprep.subr.mxu1 %v16016_v14  ;;  %16739 = vmatprep.subr.mxu0 %v16048_v56  ;;  %v16101_v36 = vld [vmem:[%s23649_s6 + $0x560] sm:$0xff]  ;;  %v16116_v14 = vld [vmem:[%s23649_s6 + $0x5d8] sm:$0xff] }
 0x7fe   :  { %16705 = vmatpush3.msra.mxu1 %v16000_v20  ;;  %16740 = vmatpush3.msra.mxu0 %v16032_v6  ;;  %v16068_v56 = vld [vmem:[%s23649_s6 + $0x458] sm:$0xff]  ;;  %v16083_v6 = vld [vmem:[%s23649_s6 + $0x4d0] sm:$0xff] }
 0x7ff   :  { %16706 = vmatprep.subr.mxu1 %v16015_v34  ;;  %16741 = vmatprep.subr.mxu0 %v16047_v37  ;;  %v16100_v20 = vld [vmem:[%s23649_s6 + $0x558] sm:$0xff]  ;;  %v16115_v34 = vld [vmem:[%s23649_s6 + $0x5d0] sm:$0xff] }
 0x800   :  { %16707 = vmatpush3.msra.mxu1 %v15999_v62  ;;  %16742 = vmatpush3.msra.mxu0 %v16031_v61  ;;  %v16067_v37 = vld [vmem:[%s23649_s6 + $0x450] sm:$0xff]  ;;  %v16082_v61 = vld [vmem:[%s23649_s6 + $0x4c8] sm:$0xff] }
 0x801   :  { %16708 = vmatprep.subr.mxu1 %v16014_v19  ;;  %16743 = vmatprep.subr.mxu0 %v16046_v47  ;;  %v16099_v62 = vld [vmem:[%s23649_s6 + $0x550] sm:$0xff]  ;;  %v16114_v19 = vld [vmem:[%s23649_s6 + $0x5c8] sm:$0xff] }
 0x802   :  { %16709 = vmatpush3.msra.mxu1 %v15998_v40  ;;  %16744 = vmatpush3.msra.mxu0 %v16030_v21  ;;  %v16066_v47 = vld [vmem:[%s23649_s6 + $0x448] sm:$0xff]  ;;  %v16081_v21 = vld [vmem:[%s23649_s6 + $0x4c0] sm:$0xff] }
 0x803   :  { %16710 = vmatprep.subr.mxu1 %v16013_v35  ;;  %16745 = vmatprep.subr.mxu0 %v16045_v12  ;;  %v16098_v40 = vld [vmem:[%s23649_s6 + $0x548] sm:$0xff]  ;;  %v16113_v35 = vld [vmem:[%s23649_s6 + $0x5c0] sm:$0xff]  ;;  %v16064_v12 = vld [vmem:[%s23649_s6 + $0x438] sm:$0xff] }
 0x804   :  { %16711 = vmatpush3.msra.mxu1 %v15997_v42  ;;  %16746 = vmatpush3.msra.mxu0 %v16029_v51  ;;  %v16096_v42 = vld [vmem:[%s23649_s6 + $0x538] sm:$0xff]  ;;  %v16079_v51 = vld [vmem:[%s23649_s6 + $0x4b0] sm:$0xff] }
 0x805   :  { %16712 = vmatprep.subr.mxu1 %v16012_v17  ;;  %16747 = vmatprep.subr.mxu0 %v16044_v22  ;;  %v16111_v17 = vld [vmem:[%s23649_s6 + $0x5b0] sm:$0xff] }
 0x806   :  { %16713 = vmatpush3.msra.mxu1 %v15996_v1  ;;  %16748 = vmatpush3.msra.mxu0 %v16028_v16  ;;  %v16095_v22 = vld [vmem:[%s23649_s6 + $0x530] sm:$0xff]  ;;  %v16078_v1 = vld [vmem:[%s23649_s6 + $0x4a8] sm:$0xff] }
 0x807   :  { %16714 = vmatprep.subr.mxu1 %v16011_v60  ;;  %16749 = vmatprep.subr.mxu0 %v16043_v15  ;;  %v16062_v16 = vld [vmem:[%s23649_s6 + $0x428] sm:$0xff]  ;;  %v16077_v15 = vld [vmem:[%s23649_s6 + $0x4a0] sm:$0xff] }
 0x808   :  { %16715 = vmatpush3.msra.mxu1 %v15995_v38  ;;  %16750 = vmatpush3.msra.mxu0 %v16027_v33  ;;  %v16094_v60 = vld [vmem:[%s23649_s6 + $0x528] sm:$0xff] }
 0x809   :  { %16716 = vmatprep.subr.mxu1 %v16010_v18  ;;  %16751 = vmatprep.subr.mxu0 %v16042_v28  ;;  %v13544_v38 = vld [vmem:[#allocation4 + $0x6] ss:$8 sm:$0x3]  ;;  %v13679_v18 = vld [vmem:[#allocation4 + $0x7] ss:$8 sm:$0x3] }
 0x80a   :  { %16717 = vmatpush3.msra.mxu1 %v15994_v29  ;;  %16752 = vmatpush3.msra.mxu0 %v16026_v46  ;;  %v13546_v33 = vld [vmem:[#allocation4 + $0x26] ss:$8 sm:$0x3]  ;;  %v13681_v28 = vld [vmem:[#allocation4 + $0x27] ss:$8 sm:$0x3] }
 0x80b   :  { %16718 = vmatprep.subr.mxu1 %v16009_v32  ;;  %16753 = vmatprep.subr.mxu0 %v16041_v30  ;;  %v16109_v29 = vld [vmem:[%s23649_s6 + $0x5a0] sm:$0xff]  ;;  %v16076_v30 = vld [vmem:[%s23649_s6 + $0x498] sm:$0xff] }
 0x80c   :  { %16719 = vmatpush3.msra.mxu1 %v15993_v63  ;;  %16754 = vmatpush3.msra.mxu0 %v16025_v24  ;;  %v16061_v46 = vld [vmem:[%s23649_s6 + $0x420] sm:$0xff]  ;;  %v13582_v63 = vcombine.low %v13544_v38, %v13546_v33  ;;  %v16108_v24 = vld [vmem:[%s23649_s6 + $0x598] sm:$0xff] }
 0x80d   :  { %13132 = vmatmul.mubr.f32.vlgmr.msra.gmra.mxu1 %v13057_v50  ;;  %13267 = vmatmul.mubr.f32.vlgmr.msra.gmra.mxu0 %v13192_v10  ;;  %v16093_v32 = vld [vmem:[%s23649_s6 + $0x520] sm:$0xff]  ;;  %v13717_v50 = vcombine.low %v13679_v18, %v13681_v28  ;;  %v16107_v10 = vld [vmem:[%s23649_s6 + $0x590] sm:$0xff]  ;;  %v16144_v18 = vld [vmem:[%s23649_s6 + $0x6b8] sm:$0xff] }
 0x80e   :  { %16758 = vmatprep.subr.mxu1 %v16088_v52  ;;  %16793 = vmatprep.subr.mxu0 %v16120_v27  ;;  %v16092_v52 = vld [vmem:[%s23649_s6 + $0x518] sm:$0xff]  ;;  %v16059_v27 = vld [vmem:[%s23649_s6 + $0x410] sm:$0xff]  ;;  %v16129_v38 = vld [vmem:[%s23649_s6 + $0x640] sm:$0xff] }
 0x80f   :  { %16759 = vmatpush3.msra.mxu1 %v16072_v8  ;;  %13401 = vmatprep.mubr.f32.mxu1 %v13334_v2  ;;  %v16091_v8 = vld [vmem:[%s23649_s6 + $0x510] sm:$0xff]  ;;  %v22435_v2 = vrot.slane %v13582_v63, %v22041_v9  ;;  %v16161_v33 = vld [vmem:[%s23649_s6 + $0x740] sm:$0xff]  ;;  %v16176_v28 = vld [vmem:[%s23649_s6 + $0x7b8] sm:$0xff] }
 0x810   :  { %16794 = vmatpush3.msra.mxu0 %v16104_v45  ;;  %13536 = vmatprep.mubr.f32.mxu0 %v13469_v13  ;;  %v16074_v45 = vld [vmem:[%s23649_s6 + $0x488] sm:$0xff]  ;;  %v16127_v63 = vld [vmem:[%s23649_s6 + $0x630] sm:$0xff] }
 0x811   :  { %16760 = vmatprep.subr.mxu1 %v16087_v48  ;;  %16795 = vmatprep.subr.mxu0 %v16119_v39  ;;  %v16106_v48 = vld [vmem:[%s23649_s6 + $0x588] sm:$0xff]  ;;  %v22444_v39 = vrot.slane %v13717_v50, %v22041_v9 }
 0x812   :  { %16761 = vmatpush3.msra.mxu1 %v16071_v55  ;;  %16796 = vmatpush3.msra.mxu0 %v16103_v5  ;;  %v16058_v13 = vld [vmem:[%s23649_s6 + $0x408] sm:$0xff]  ;;  %v16073_v5 = vld [vmem:[%s23649_s6 + $0x480] sm:$0xff] }
 0x813   :  { %16762 = vmatprep.subr.mxu1 %v16086_v23  ;;  %16797 = vmatprep.subr.mxu0 %v16118_v54  ;;  %v16090_v55 = vld [vmem:[%s23649_s6 + $0x508] sm:$0xff]  ;;  %v16105_v23 = vld [vmem:[%s23649_s6 + $0x580] sm:$0xff] }
 0x814   :  { %16763 = vmatpush3.msra.mxu1 %v16070_v11  ;;  %16798 = vmatpush3.msra.mxu0 %v16102_v57  ;;  %v16057_v54 = vld [vmem:[%s23649_s6 + $0x400] sm:$0xff]  ;;  %v13590_v57 = vcombine.high %v22435_v2, %v22435_v2  ;;  %v16174_v50 = vld [vmem:[%s23649_s6 + $0x7a8] sm:$0xff] }
 0x815   :  { %16764 = vmatprep.subr.mxu1 %v16085_v3  ;;  %16799 = vmatprep.subr.mxu0 %v16117_v41  ;;  %v16089_v11 = vld [vmem:[%s23649_s6 + $0x500] sm:$0xff]  ;;  %v13327_v3 = vrot.slane %v22227_v7, %v22041_v9  ;;  %v16152_v41 = vld [vmem:[%s23649_s6 + $0x6f8] sm:$0xff] }
 0x816   :  { %16765 = vmatpush3.msra.mxu1 %v16069_v44  ;;  %16800 = vmatpush3.msra.mxu0 %v16101_v36  ;;  %v13725_v44 = vcombine.high %v22444_v39, %v22444_v39  ;;  %v13462_v36 = vrot.slane %v22236_v53, %v22041_v9  ;;  %v16136_v7 = vld [vmem:[%s23649_s6 + $0x678] sm:$0xff]  ;;  %v13604_v53 = vrot.slane %v13590_v57, %v22041_v9 }
 0x817   :  { %16766 = vmatprep.subr.mxu1 %v16084_v26  ;;  %16801 = vmatprep.subr.mxu0 %v16116_v14  ;;  %v16184_v26 = vld [vmem:[%s23649_s6 + $0x7f8] sm:$0xff] }
 0x818   :  { %16767 = vmatpush3.msra.mxu1 %v16068_v56  ;;  %16802 = vmatpush3.msra.mxu0 %v16100_v20  ;;  %v16168_v14 = vld [vmem:[%s23649_s6 + $0x778] sm:$0xff]  ;;  %v16151_v56 = vld [vmem:[%s23649_s6 + $0x6f0] sm:$0xff]  ;;  %v13739_v20 = vrot.slane %v13725_v44, %v22041_v9 }
 0x819   :  { %16768 = vmatprep.subr.mxu1 %v16083_v6  ;;  %16803 = vmatprep.subr.mxu0 %v16115_v34  ;;  %v16183_v6 = vld [vmem:[%s23649_s6 + $0x7f0] sm:$0xff]  ;;  %v16124_v57 = vld [vmem:[%s23649_s6 + $0x618] sm:$0xff] }
 0x81a   :  { %16769 = vmatpush3.msra.mxu1 %v16067_v37  ;;  %16804 = vmatpush3.msra.mxu0 %v16099_v62  ;;  %v16135_v34 = vld [vmem:[%s23649_s6 + $0x670] sm:$0xff]  ;;  %v16150_v62 = vld [vmem:[%s23649_s6 + $0x6e8] sm:$0xff] }
 0x81b   :  { %16770 = vmatprep.subr.mxu1 %v16082_v61  ;;  %16805 = vmatprep.subr.mxu0 %v16114_v19  ;;  %v16167_v37 = vld [vmem:[%s23649_s6 + $0x770] sm:$0xff]  ;;  %v16182_v61 = vld [vmem:[%s23649_s6 + $0x7e8] sm:$0xff] }
 0x81c   :  { %16771 = vmatpush3.msra.mxu1 %v16066_v47  ;;  %16806 = vmatpush3.msra.mxu0 %v16098_v40  ;;  %v16134_v19 = vld [vmem:[%s23649_s6 + $0x668] sm:$0xff]  ;;  %v16149_v40 = vld [vmem:[%s23649_s6 + $0x6e0] sm:$0xff]  ;;  %v16139_v44 = vld [vmem:[%s23649_s6 + $0x690] sm:$0xff] }
 0x81d   :  { %16772 = vmatprep.subr.mxu1 %v16081_v21  ;;  %16807 = vmatprep.subr.mxu0 %v16113_v35  ;;  %v16166_v47 = vld [vmem:[%s23649_s6 + $0x768] sm:$0xff]  ;;  %v16181_v21 = vld [vmem:[%s23649_s6 + $0x7e0] sm:$0xff] }
 0x81e   :  { %16773 = vmatpush3.msra.mxu1 %v16065_v58  ;;  %16808 = vmatpush3.msra.mxu0 %v16097_v4  ;;  %v16133_v35 = vld [vmem:[%s23649_s6 + $0x660] sm:$0xff]  ;;  %v16148_v4 = vld [vmem:[%s23649_s6 + $0x6d8] sm:$0xff] }
 0x81f   :  { %16774 = vmatprep.subr.mxu1 %v16080_v49  ;;  %16809 = vmatprep.subr.mxu0 %v16112_v25  ;;  %v16165_v58 = vld [vmem:[%s23649_s6 + $0x760] sm:$0xff]  ;;  %v16180_v49 = vld [vmem:[%s23649_s6 + $0x7d8] sm:$0xff] }
 0x820   :  { %16775 = vmatpush3.msra.mxu1 %v16064_v12  ;;  %16810 = vmatpush3.msra.mxu0 %v16096_v42  ;;  %v16132_v25 = vld [vmem:[%s23649_s6 + $0x658] sm:$0xff]  ;;  %v16147_v42 = vld [vmem:[%s23649_s6 + $0x6d0] sm:$0xff] }
 0x821   :  { %16776 = vmatprep.subr.mxu1 %v16079_v51  ;;  %16811 = vmatprep.subr.mxu0 %v16111_v17  ;;  %v16164_v12 = vld [vmem:[%s23649_s6 + $0x758] sm:$0xff]  ;;  %v16179_v51 = vld [vmem:[%s23649_s6 + $0x7d0] sm:$0xff] }
 0x822   :  { %16777 = vmatpush3.msra.mxu1 %v16063_v43  ;;  %16812 = vmatpush3.msra.mxu0 %v16095_v22  ;;  %v16131_v17 = vld [vmem:[%s23649_s6 + $0x650] sm:$0xff]  ;;  %v16146_v22 = vld [vmem:[%s23649_s6 + $0x6c8] sm:$0xff] }
 0x823   :  { %16778 = vmatprep.subr.mxu1 %v16078_v1  ;;  %16813 = vmatprep.subr.mxu0 %v16110_v31  ;;  %v16163_v43 = vld [vmem:[%s23649_s6 + $0x750] sm:$0xff]  ;;  %v16178_v1 = vld [vmem:[%s23649_s6 + $0x7c8] sm:$0xff] }
 0x824   :  { %16779 = vmatpush3.msra.mxu1 %v16062_v16  ;;  %16814 = vmatpush3.msra.mxu0 %v16094_v60  ;;  %v16130_v31 = vld [vmem:[%s23649_s6 + $0x648] sm:$0xff]  ;;  %v16145_v60 = vld [vmem:[%s23649_s6 + $0x6c0] sm:$0xff] }
 0x825   :  { %16780 = vmatprep.subr.mxu1 %v16077_v15  ;;  %16815 = vmatprep.subr.mxu0 %v16109_v29  ;;  %v16162_v16 = vld [vmem:[%s23649_s6 + $0x748] sm:$0xff]  ;;  %v16177_v15 = vld [vmem:[%s23649_s6 + $0x7c0] sm:$0xff]  ;;  %v16128_v29 = vld [vmem:[%s23649_s6 + $0x638] sm:$0xff] }
 0x826   :  { %16781 = vmatpush3.msra.mxu1 %v16061_v46  ;;  %16816 = vmatpush3.msra.mxu0 %v16093_v32  ;;  %v16160_v46 = vld [vmem:[%s23649_s6 + $0x738] sm:$0xff]  ;;  %v16143_v32 = vld [vmem:[%s23649_s6 + $0x6b0] sm:$0xff] }
 0x827   :  { %16782 = vmatprep.subr.mxu1 %v16076_v30  ;;  %16817 = vmatprep.subr.mxu0 %v16108_v24  ;;  %v16175_v30 = vld [vmem:[%s23649_s6 + $0x7b0] sm:$0xff] }
 0x828   :  { %16783 = vmatpush3.msra.mxu1 %v16060_v59  ;;  %16818 = vmatpush3.msra.mxu0 %v16092_v52  ;;  %v16159_v24 = vld [vmem:[%s23649_s6 + $0x730] sm:$0xff]  ;;  %v16142_v59 = vld [vmem:[%s23649_s6 + $0x6a8] sm:$0xff] }
 0x829   :  { %16784 = vmatprep.subr.mxu1 %v16075_v0  ;;  %16819 = vmatprep.subr.mxu0 %v16107_v10  ;;  %v16126_v52 = vld [vmem:[%s23649_s6 + $0x628] sm:$0xff]  ;;  %v16141_v10 = vld [vmem:[%s23649_s6 + $0x6a0] sm:$0xff] }
 0x82a   :  { %16785 = vmatpush3.msra.mxu1 %v16059_v27  ;;  %16820 = vmatpush3.msra.mxu0 %v16091_v8  ;;  %v16158_v0 = vld [vmem:[%s23649_s6 + $0x728] sm:$0xff]  ;;  %v13814_v27 = vld [vmem:[#allocation4 + $0x10] ss:$8 sm:$0x3] }
 0x82b   :  { %16786 = vmatprep.subr.mxu1 %v16074_v45  ;;  %16821 = vmatprep.subr.mxu0 %v16106_v48  ;;  %v13816_v8 = vld [vmem:[#allocation4 + $0x30] ss:$8 sm:$0x3]  ;;  %v13949_v45 = vld [vmem:[#allocation4 + $0x11] ss:$8 sm:$0x3] }
 0x82c   :  { %16787 = vmatpush3.msra.mxu1 %v16058_v13  ;;  %16822 = vmatpush3.msra.mxu0 %v16090_v55  ;;  %v13951_v48 = vld [vmem:[#allocation4 + $0x31] ss:$8 sm:$0x3]  ;;  %v16173_v13 = vld [vmem:[%s23649_s6 + $0x7a0] sm:$0xff] }
 0x82d   :  { %16788 = vmatprep.subr.mxu1 %v16073_v5  ;;  %16823 = vmatprep.subr.mxu0 %v16105_v23  ;;  %v16125_v55 = vld [vmem:[%s23649_s6 + $0x620] sm:$0xff]  ;;  %v16140_v23 = vld [vmem:[%s23649_s6 + $0x698] sm:$0xff] }
 0x82e   :  { %16789 = vmatpush3.msra.mxu1 %v16057_v54  ;;  %16824 = vmatpush3.msra.mxu0 %v16089_v11  ;;  %v16157_v5 = vld [vmem:[%s23649_s6 + $0x720] sm:$0xff]  ;;  %v13852_v54 = vcombine.low %v13814_v27, %v13816_v8  ;;  %v16172_v11 = vld [vmem:[%s23649_s6 + $0x798] sm:$0xff] }
 0x82f   :  { %13402 = vmatmul.mubr.f32.vlgmr.msra.gmra.mxu1 %v13327_v3  ;;  %13537 = vmatmul.mubr.f32.vlgmr.msra.gmra.mxu0 %v13462_v36  ;;  %v13987_v3 = vcombine.low %v13949_v45, %v13951_v48  ;;  %v16171_v36 = vld [vmem:[%s23649_s6 + $0x790] sm:$0xff]  ;;  %v16193_v27 = vld [vmem:[%s23649_s6 + $0x840] sm:$0xff]  ;;  %v16208_v45 = vld [vmem:[%s23649_s6 + $0x8b8] sm:$0xff] }
 0x830   :  { %16828 = vmatprep.subr.mxu1 %v16152_v41  ;;  %16863 = vmatprep.subr.mxu0 %v16184_v26  ;;  %v16156_v41 = vld [vmem:[%s23649_s6 + $0x718] sm:$0xff]  ;;  %v16123_v26 = vld [vmem:[%s23649_s6 + $0x610] sm:$0xff]  ;;  %v16225_v8 = vld [vmem:[%s23649_s6 + $0x940] sm:$0xff] }
 0x831   :  { %16829 = vmatpush3.msra.mxu1 %v16136_v7  ;;  %13671 = vmatprep.mubr.f32.mxu1 %v13604_v53  ;;  %v16155_v7 = vld [vmem:[%s23649_s6 + $0x710] sm:$0xff]  ;;  %v22643_v53 = vrot.slane %v13852_v54, %v22041_v9  ;;  %v16240_v48 = vld [vmem:[%s23649_s6 + $0x9b8] sm:$0xff] }
 0x832   :  { %16864 = vmatpush3.msra.mxu0 %v16168_v14  ;;  %13806 = vmatprep.mubr.f32.mxu0 %v13739_v20  ;;  %v16138_v14 = vld [vmem:[%s23649_s6 + $0x688] sm:$0xff]  ;;  %v16191_v54 = vld [vmem:[%s23649_s6 + $0x830] sm:$0xff] }
 0x833   :  { %16830 = vmatprep.subr.mxu1 %v16151_v56  ;;  %16865 = vmatprep.subr.mxu0 %v16183_v6  ;;  %v16170_v56 = vld [vmem:[%s23649_s6 + $0x788] sm:$0xff]  ;;  %v22652_v6 = vrot.slane %v13987_v3, %v22041_v9 }
 0x834   :  { %16831 = vmatpush3.msra.mxu1 %v16135_v34  ;;  %16866 = vmatpush3.msra.mxu0 %v16167_v37  ;;  %v16122_v20 = vld [vmem:[%s23649_s6 + $0x608] sm:$0xff]  ;;  %v16137_v37 = vld [vmem:[%s23649_s6 + $0x680] sm:$0xff] }
 0x835   :  { %16832 = vmatprep.subr.mxu1 %v16150_v62  ;;  %16867 = vmatprep.subr.mxu0 %v16182_v61  ;;  %v16154_v34 = vld [vmem:[%s23649_s6 + $0x708] sm:$0xff]  ;;  %v16169_v62 = vld [vmem:[%s23649_s6 + $0x780] sm:$0xff] }
 0x836   :  { %16833 = vmatpush3.msra.mxu1 %v16134_v19  ;;  %16868 = vmatpush3.msra.mxu0 %v16166_v47  ;;  %v16121_v61 = vld [vmem:[%s23649_s6 + $0x600] sm:$0xff]  ;;  %v13860_v47 = vcombine.high %v22643_v53, %v22643_v53  ;;  %v16238_v3 = vld [vmem:[%s23649_s6 + $0x9a8] sm:$0xff] }
 0x837   :  { %16834 = vmatprep.subr.mxu1 %v16149_v40  ;;  %16869 = vmatprep.subr.mxu0 %v16181_v21  ;;  %v16153_v19 = vld [vmem:[%s23649_s6 + $0x700] sm:$0xff]  ;;  %v13597_v40 = vrot.slane %v22435_v2, %v22041_v9  ;;  %v16216_v21 = vld [vmem:[%s23649_s6 + $0x8f8] sm:$0xff] }
 0x838   :  { %16835 = vmatpush3.msra.mxu1 %v16133_v35  ;;  %16870 = vmatpush3.msra.mxu0 %v16165_v58  ;;  %v13995_v35 = vcombine.high %v22652_v6, %v22652_v6  ;;  %v13732_v58 = vrot.slane %v22444_v39, %v22041_v9  ;;  %v16200_v2 = vld [vmem:[%s23649_s6 + $0x878] sm:$0xff]  ;;  %v13874_v39 = vrot.slane %v13860_v47, %v22041_v9 }
 0x839   :  { %16836 = vmatprep.subr.mxu1 %v16148_v4  ;;  %16871 = vmatprep.subr.mxu0 %v16180_v49  ;;  %v16248_v4 = vld [vmem:[%s23649_s6 + $0x9f8] sm:$0xff] }
 0x83a   :  { %16837 = vmatpush3.msra.mxu1 %v16132_v25  ;;  %16872 = vmatpush3.msra.mxu0 %v16164_v12  ;;  %v16232_v49 = vld [vmem:[%s23649_s6 + $0x978] sm:$0xff]  ;;  %v16215_v25 = vld [vmem:[%s23649_s6 + $0x8f0] sm:$0xff]  ;;  %v14009_v12 = vrot.slane %v13995_v35, %v22041_v9 }
 0x83b   :  { %16838 = vmatprep.subr.mxu1 %v16147_v42  ;;  %16873 = vmatprep.subr.mxu0 %v16179_v51  ;;  %v16247_v42 = vld [vmem:[%s23649_s6 + $0x9f0] sm:$0xff]  ;;  %v16188_v47 = vld [vmem:[%s23649_s6 + $0x818] sm:$0xff] }
 0x83c   :  { %16839 = vmatpush3.msra.mxu1 %v16131_v17  ;;  %16874 = vmatpush3.msra.mxu0 %v16163_v43  ;;  %v16199_v51 = vld [vmem:[%s23649_s6 + $0x870] sm:$0xff]  ;;  %v16214_v43 = vld [vmem:[%s23649_s6 + $0x8e8] sm:$0xff] }
 0x83d   :  { %16840 = vmatprep.subr.mxu1 %v16146_v22  ;;  %16875 = vmatprep.subr.mxu0 %v16178_v1  ;;  %v16231_v17 = vld [vmem:[%s23649_s6 + $0x970] sm:$0xff]  ;;  %v16246_v22 = vld [vmem:[%s23649_s6 + $0x9e8] sm:$0xff] }
 0x83e   :  { %16841 = vmatpush3.msra.mxu1 %v16130_v31  ;;  %16876 = vmatpush3.msra.mxu0 %v16162_v16  ;;  %v16198_v1 = vld [vmem:[%s23649_s6 + $0x868] sm:$0xff]  ;;  %v16213_v16 = vld [vmem:[%s23649_s6 + $0x8e0] sm:$0xff]  ;;  %v16203_v35 = vld [vmem:[%s23649_s6 + $0x890] sm:$0xff] }
 0x83f   :  { %16842 = vmatprep.subr.mxu1 %v16145_v60  ;;  %16877 = vmatprep.subr.mxu0 %v16177_v15  ;;  %v16230_v31 = vld [vmem:[%s23649_s6 + $0x968] sm:$0xff]  ;;  %v16245_v60 = vld [vmem:[%s23649_s6 + $0x9e0] sm:$0xff] }
 0x840   :  { %16843 = vmatpush3.msra.mxu1 %v16129_v38  ;;  %16878 = vmatpush3.msra.mxu0 %v16161_v33  ;;  %v16197_v15 = vld [vmem:[%s23649_s6 + $0x860] sm:$0xff]  ;;  %v16212_v33 = vld [vmem:[%s23649_s6 + $0x8d8] sm:$0xff] }
 0x841   :  { %16844 = vmatprep.subr.mxu1 %v16144_v18  ;;  %16879 = vmatprep.subr.mxu0 %v16176_v28  ;;  %v16229_v38 = vld [vmem:[%s23649_s6 + $0x960] sm:$0xff]  ;;  %v16244_v18 = vld [vmem:[%s23649_s6 + $0x9d8] sm:$0xff] }
 0x842   :  { %16845 = vmatpush3.msra.mxu1 %v16128_v29  ;;  %16880 = vmatpush3.msra.mxu0 %v16160_v46  ;;  %v16196_v28 = vld [vmem:[%s23649_s6 + $0x858] sm:$0xff]  ;;  %v16211_v46 = vld [vmem:[%s23649_s6 + $0x8d0] sm:$0xff] }
 0x843   :  { %16846 = vmatprep.subr.mxu1 %v16143_v32  ;;  %16881 = vmatprep.subr.mxu0 %v16175_v30  ;;  %v16228_v29 = vld [vmem:[%s23649_s6 + $0x958] sm:$0xff]  ;;  %v16243_v32 = vld [vmem:[%s23649_s6 + $0x9d0] sm:$0xff] }
 0x844   :  { %16847 = vmatpush3.msra.mxu1 %v16127_v63  ;;  %16882 = vmatpush3.msra.mxu0 %v16159_v24  ;;  %v16195_v30 = vld [vmem:[%s23649_s6 + $0x850] sm:$0xff]  ;;  %v16210_v24 = vld [vmem:[%s23649_s6 + $0x8c8] sm:$0xff] }
 0x845   :  { %16848 = vmatprep.subr.mxu1 %v16142_v59  ;;  %16883 = vmatprep.subr.mxu0 %v16174_v50  ;;  %v16227_v63 = vld [vmem:[%s23649_s6 + $0x950] sm:$0xff]  ;;  %v16242_v59 = vld [vmem:[%s23649_s6 + $0x9c8] sm:$0xff] }
 0x846   :  { %16849 = vmatpush3.msra.mxu1 %v16126_v52  ;;  %16884 = vmatpush3.msra.mxu0 %v16158_v0  ;;  %v16194_v50 = vld [vmem:[%s23649_s6 + $0x848] sm:$0xff]  ;;  %v16209_v0 = vld [vmem:[%s23649_s6 + $0x8c0] sm:$0xff] }
 0x847   :  { %16850 = vmatprep.subr.mxu1 %v16141_v10  ;;  %16885 = vmatprep.subr.mxu0 %v16173_v13  ;;  %v16226_v52 = vld [vmem:[%s23649_s6 + $0x948] sm:$0xff]  ;;  %v16241_v10 = vld [vmem:[%s23649_s6 + $0x9c0] sm:$0xff]  ;;  %v16192_v13 = vld [vmem:[%s23649_s6 + $0x838] sm:$0xff] }
 0x848   :  { %16851 = vmatpush3.msra.mxu1 %v16125_v55  ;;  %16886 = vmatpush3.msra.mxu0 %v16157_v5  ;;  %v16224_v55 = vld [vmem:[%s23649_s6 + $0x938] sm:$0xff]  ;;  %v16207_v5 = vld [vmem:[%s23649_s6 + $0x8b0] sm:$0xff] }
 0x849   :  { %16852 = vmatprep.subr.mxu1 %v16140_v23  ;;  %16887 = vmatprep.subr.mxu0 %v16172_v11  ;;  %v16239_v23 = vld [vmem:[%s23649_s6 + $0x9b0] sm:$0xff] }
 0x84a   :  { %16853 = vmatpush3.msra.mxu1 %v16124_v57  ;;  %16888 = vmatpush3.msra.mxu0 %v16156_v41  ;;  %v16223_v11 = vld [vmem:[%s23649_s6 + $0x930] sm:$0xff]  ;;  %v16206_v57 = vld [vmem:[%s23649_s6 + $0x8a8] sm:$0xff] }
 0x84b   :  { %16854 = vmatprep.subr.mxu1 %v16139_v44  ;;  %16889 = vmatprep.subr.mxu0 %v16171_v36  ;;  %v16190_v41 = vld [vmem:[%s23649_s6 + $0x828] sm:$0xff]  ;;  %v16205_v36 = vld [vmem:[%s23649_s6 + $0x8a0] sm:$0xff] }
 0x84c   :  { %16855 = vmatpush3.msra.mxu1 %v16123_v26  ;;  %16890 = vmatpush3.msra.mxu0 %v16155_v7  ;;  %v16222_v44 = vld [vmem:[%s23649_s6 + $0x928] sm:$0xff]  ;;  %v14084_v26 = vld [vmem:[#allocation4 + $0x12] ss:$8 sm:$0x3] }
 0x84d   :  { %16856 = vmatprep.subr.mxu1 %v16138_v14  ;;  %16891 = vmatprep.subr.mxu0 %v16170_v56  ;;  %v14086_v7 = vld [vmem:[#allocation4 + $0x32] ss:$8 sm:$0x3]  ;;  %v14219_v14 = vld [vmem:[#allocation4 + $0x13] ss:$8 sm:$0x3] }
 0x84e   :  { %16857 = vmatpush3.msra.mxu1 %v16122_v20  ;;  %16892 = vmatpush3.msra.mxu0 %v16154_v34  ;;  %v14221_v56 = vld [vmem:[#allocation4 + $0x33] ss:$8 sm:$0x3]  ;;  %v16237_v20 = vld [vmem:[%s23649_s6 + $0x9a0] sm:$0xff] }
 0x84f   :  { %16858 = vmatprep.subr.mxu1 %v16137_v37  ;;  %16893 = vmatprep.subr.mxu0 %v16169_v62  ;;  %v16189_v34 = vld [vmem:[%s23649_s6 + $0x820] sm:$0xff]  ;;  %v16204_v62 = vld [vmem:[%s23649_s6 + $0x898] sm:$0xff] }
 0x850   :  { %16859 = vmatpush3.msra.mxu1 %v16121_v61  ;;  %16894 = vmatpush3.msra.mxu0 %v16153_v19  ;;  %v16221_v37 = vld [vmem:[%s23649_s6 + $0x920] sm:$0xff]  ;;  %v14122_v61 = vcombine.low %v14084_v26, %v14086_v7  ;;  %v16236_v19 = vld [vmem:[%s23649_s6 + $0x998] sm:$0xff] }
 0x851   :  { %13672 = vmatmul.mubr.f32.vlgmr.msra.gmra.mxu1 %v13597_v40  ;;  %13807 = vmatmul.mubr.f32.vlgmr.msra.gmra.mxu0 %v13732_v58  ;;  %v14257_v40 = vcombine.low %v14219_v14, %v14221_v56  ;;  %v16235_v58 = vld [vmem:[%s23649_s6 + $0x990] sm:$0xff]  ;;  %v16257_v26 = vld [vmem:[%s23649_s6 + $0xa40] sm:$0xff]  ;;  %v16272_v14 = vld [vmem:[%s23649_s6 + $0xab8] sm:$0xff] }
 0x852   :  { %16898 = vmatprep.subr.mxu1 %v16216_v21  ;;  %16933 = vmatprep.subr.mxu0 %v16248_v4  ;;  %v16220_v21 = vld [vmem:[%s23649_s6 + $0x918] sm:$0xff]  ;;  %v16187_v4 = vld [vmem:[%s23649_s6 + $0x810] sm:$0xff]  ;;  %v16289_v7 = vld [vmem:[%s23649_s6 + $0xb40] sm:$0xff] }
 0x853   :  { %16899 = vmatpush3.msra.mxu1 %v16200_v2  ;;  %13941 = vmatprep.mubr.f32.mxu1 %v13874_v39  ;;  %v16219_v2 = vld [vmem:[%s23649_s6 + $0x910] sm:$0xff]  ;;  %v22851_v39 = vrot.slane %v14122_v61, %v22041_v9  ;;  %v16304_v56 = vld [vmem:[%s23649_s6 + $0xbb8] sm:$0xff] }
 0x854   :  { %16934 = vmatpush3.msra.mxu0 %v16232_v49  ;;  %14076 = vmatprep.mubr.f32.mxu0 %v14009_v12  ;;  %v16202_v49 = vld [vmem:[%s23649_s6 + $0x888] sm:$0xff]  ;;  %v16255_v61 = vld [vmem:[%s23649_s6 + $0xa30] sm:$0xff] }
 0x855   :  { %16900 = vmatprep.subr.mxu1 %v16215_v25  ;;  %16935 = vmatprep.subr.mxu0 %v16247_v42  ;;  %v16234_v25 = vld [vmem:[%s23649_s6 + $0x988] sm:$0xff]  ;;  %v22860_v42 = vrot.slane %v14257_v40, %v22041_v9 }
 0x856   :  { %16901 = vmatpush3.msra.mxu1 %v16199_v51  ;;  %16936 = vmatpush3.msra.mxu0 %v16231_v17  ;;  %v16186_v12 = vld [vmem:[%s23649_s6 + $0x808] sm:$0xff]  ;;  %v16201_v17 = vld [vmem:[%s23649_s6 + $0x880] sm:$0xff] }
 0x857   :  { %16902 = vmatprep.subr.mxu1 %v16214_v43  ;;  %16937 = vmatprep.subr.mxu0 %v16246_v22  ;;  %v16218_v51 = vld [vmem:[%s23649_s6 + $0x908] sm:$0xff]  ;;  %v16233_v43 = vld [vmem:[%s23649_s6 + $0x980] sm:$0xff] }
 0x858   :  { %16903 = vmatpush3.msra.mxu1 %v16198_v1  ;;  %16938 = vmatpush3.msra.mxu0 %v16230_v31  ;;  %v16185_v22 = vld [vmem:[%s23649_s6 + $0x800] sm:$0xff]  ;;  %v14130_v31 = vcombine.high %v22851_v39, %v22851_v39  ;;  %v16270_v40 = vld [vmem:[%s23649_s6 + $0xaa8] sm:$0xff] }
 0x859   :  { %16904 = vmatprep.subr.mxu1 %v16213_v16  ;;  %16939 = vmatprep.subr.mxu0 %v16245_v60  ;;  %v16217_v1 = vld [vmem:[%s23649_s6 + $0x900] sm:$0xff]  ;;  %v13867_v16 = vrot.slane %v22643_v53, %v22041_v9  ;;  %v16280_v60 = vld [vmem:[%s23649_s6 + $0xaf8] sm:$0xff] }
 0x85a   :  { %16905 = vmatpush3.msra.mxu1 %v16197_v15  ;;  %16940 = vmatpush3.msra.mxu0 %v16229_v38  ;;  %v14265_v15 = vcombine.high %v22860_v42, %v22860_v42  ;;  %v14002_v38 = vrot.slane %v22652_v6, %v22041_v9  ;;  %v16264_v53 = vld [vmem:[%s23649_s6 + $0xa78] sm:$0xff]  ;;  %v14144_v6 = vrot.slane %v14130_v31, %v22041_v9 }
 0x85b   :  { %16906 = vmatprep.subr.mxu1 %v16212_v33  ;;  %16941 = vmatprep.subr.mxu0 %v16244_v18  ;;  %v16312_v33 = vld [vmem:[%s23649_s6 + $0xbf8] sm:$0xff] }
 0x85c   :  { %16907 = vmatpush3.msra.mxu1 %v16196_v28  ;;  %16942 = vmatpush3.msra.mxu0 %v16228_v29  ;;  %v16296_v18 = vld [vmem:[%s23649_s6 + $0xb78] sm:$0xff]  ;;  %v16279_v28 = vld [vmem:[%s23649_s6 + $0xaf0] sm:$0xff]  ;;  %v14279_v29 = vrot.slane %v14265_v15, %v22041_v9 }
 0x85d   :  { %16908 = vmatprep.subr.mxu1 %v16211_v46  ;;  %16943 = vmatprep.subr.mxu0 %v16243_v32  ;;  %v16311_v46 = vld [vmem:[%s23649_s6 + $0xbf0] sm:$0xff]  ;;  %v16252_v31 = vld [vmem:[%s23649_s6 + $0xa18] sm:$0xff] }
 0x85e   :  { %16909 = vmatpush3.msra.mxu1 %v16195_v30  ;;  %16944 = vmatpush3.msra.mxu0 %v16227_v63  ;;  %v16263_v32 = vld [vmem:[%s23649_s6 + $0xa70] sm:$0xff]  ;;  %v16278_v63 = vld [vmem:[%s23649_s6 + $0xae8] sm:$0xff] }
 0x85f   :  { %16910 = vmatprep.subr.mxu1 %v16210_v24  ;;  %16945 = vmatprep.subr.mxu0 %v16242_v59  ;;  %v16295_v30 = vld [vmem:[%s23649_s6 + $0xb70] sm:$0xff]  ;;  %v16310_v24 = vld [vmem:[%s23649_s6 + $0xbe8] sm:$0xff] }
 0x860   :  { %16911 = vmatpush3.msra.mxu1 %v16194_v50  ;;  %16946 = vmatpush3.msra.mxu0 %v16226_v52  ;;  %v16262_v59 = vld [vmem:[%s23649_s6 + $0xa68] sm:$0xff]  ;;  %v16277_v52 = vld [vmem:[%s23649_s6 + $0xae0] sm:$0xff]  ;;  %v16267_v15 = vld [vmem:[%s23649_s6 + $0xa90] sm:$0xff] }
 0x861   :  { %16912 = vmatprep.subr.mxu1 %v16209_v0  ;;  %16947 = vmatprep.subr.mxu0 %v16241_v10  ;;  %v16294_v50 = vld [vmem:[%s23649_s6 + $0xb68] sm:$0xff]  ;;  %v16309_v0 = vld [vmem:[%s23649_s6 + $0xbe0] sm:$0xff] }
 0x862   :  { %16913 = vmatpush3.msra.mxu1 %v16193_v27  ;;  %16948 = vmatpush3.msra.mxu0 %v16225_v8  ;;  %v16261_v10 = vld [vmem:[%s23649_s6 + $0xa60] sm:$0xff]  ;;  %v16276_v8 = vld [vmem:[%s23649_s6 + $0xad8] sm:$0xff] }
 0x863   :  { %16914 = vmatprep.subr.mxu1 %v16208_v45  ;;  %16949 = vmatprep.subr.mxu0 %v16240_v48  ;;  %v16293_v27 = vld [vmem:[%s23649_s6 + $0xb60] sm:$0xff]  ;;  %v16308_v45 = vld [vmem:[%s23649_s6 + $0xbd8] sm:$0xff] }
 0x864   :  { %16915 = vmatpush3.msra.mxu1 %v16192_v13  ;;  %16950 = vmatpush3.msra.mxu0 %v16224_v55  ;;  %v16260_v48 = vld [vmem:[%s23649_s6 + $0xa58] sm:$0xff]  ;;  %v16275_v55 = vld [vmem:[%s23649_s6 + $0xad0] sm:$0xff] }
 0x865   :  { %16916 = vmatprep.subr.mxu1 %v16207_v5  ;;  %16951 = vmatprep.subr.mxu0 %v16239_v23  ;;  %v16292_v13 = vld [vmem:[%s23649_s6 + $0xb58] sm:$0xff]  ;;  %v16307_v5 = vld [vmem:[%s23649_s6 + $0xbd0] sm:$0xff] }
 0x866   :  { %16917 = vmatpush3.msra.mxu1 %v16191_v54  ;;  %16952 = vmatpush3.msra.mxu0 %v16223_v11  ;;  %v16259_v23 = vld [vmem:[%s23649_s6 + $0xa50] sm:$0xff]  ;;  %v16274_v11 = vld [vmem:[%s23649_s6 + $0xac8] sm:$0xff] }
 0x867   :  { %16918 = vmatprep.subr.mxu1 %v16206_v57  ;;  %16953 = vmatprep.subr.mxu0 %v16238_v3  ;;  %v16291_v54 = vld [vmem:[%s23649_s6 + $0xb50] sm:$0xff]  ;;  %v16306_v57 = vld [vmem:[%s23649_s6 + $0xbc8] sm:$0xff] }
 0x868   :  { %16919 = vmatpush3.msra.mxu1 %v16190_v41  ;;  %16954 = vmatpush3.msra.mxu0 %v16222_v44  ;;  %v16258_v3 = vld [vmem:[%s23649_s6 + $0xa48] sm:$0xff]  ;;  %v16273_v44 = vld [vmem:[%s23649_s6 + $0xac0] sm:$0xff] }
 0x869   :  { %16920 = vmatprep.subr.mxu1 %v16205_v36  ;;  %16955 = vmatprep.subr.mxu0 %v16237_v20  ;;  %v16290_v41 = vld [vmem:[%s23649_s6 + $0xb48] sm:$0xff]  ;;  %v16305_v36 = vld [vmem:[%s23649_s6 + $0xbc0] sm:$0xff]  ;;  %v16256_v20 = vld [vmem:[%s23649_s6 + $0xa38] sm:$0xff] }
 0x86a   :  { %16921 = vmatpush3.msra.mxu1 %v16189_v34  ;;  %16956 = vmatpush3.msra.mxu0 %v16221_v37  ;;  %v16288_v34 = vld [vmem:[%s23649_s6 + $0xb38] sm:$0xff]  ;;  %v16271_v37 = vld [vmem:[%s23649_s6 + $0xab0] sm:$0xff] }
 0x86b   :  { %16922 = vmatprep.subr.mxu1 %v16204_v62  ;;  %16957 = vmatprep.subr.mxu0 %v16236_v19  ;;  %v16303_v62 = vld [vmem:[%s23649_s6 + $0xbb0] sm:$0xff] }
 0x86c   :  { %16923 = vmatpush3.msra.mxu1 %v16188_v47  ;;  %16958 = vmatpush3.msra.mxu0 %v16220_v21  ;;  %v14354_v19 = vld [vmem:[#allocation4 + $0x14] ss:$8 sm:$0x3] }
 0x86d   :  { %16924 = vmatprep.subr.mxu1 %v16203_v35  ;;  %16959 = vmatprep.subr.mxu0 %v16235_v58  ;;  %v16287_v47 = vld [vmem:[%s23649_s6 + $0xb30] sm:$0xff]  ;;  %v16302_v35 = vld [vmem:[%s23649_s6 + $0xba8] sm:$0xff] }
 0x86e   :  { %16925 = vmatpush3.msra.mxu1 %v16187_v4  ;;  %16960 = vmatpush3.msra.mxu0 %v16219_v2  ;;  %v14356_v21 = vld [vmem:[#allocation4 + $0x34] ss:$8 sm:$0x3]  ;;  %v16254_v58 = vld [vmem:[%s23649_s6 + $0xa28] sm:$0xff] }
 0x86f   :  { %16926 = vmatprep.subr.mxu1 %v16202_v49  ;;  %16961 = vmatprep.subr.mxu0 %v16234_v25  ;;  %v14489_v4 = vld [vmem:[#allocation4 + $0x15] ss:$8 sm:$0x3]  ;;  %v16286_v2 = vld [vmem:[%s23649_s6 + $0xb28] sm:$0xff]  ;;  %v16269_v49 = vld [vmem:[%s23649_s6 + $0xaa0] sm:$0xff] }
 0x870   :  { %16927 = vmatpush3.msra.mxu1 %v16186_v12  ;;  %16962 = vmatpush3.msra.mxu0 %v16218_v51  ;;  %v14491_v25 = vld [vmem:[#allocation4 + $0x35] ss:$8 sm:$0x3]  ;;  %v16301_v12 = vld [vmem:[%s23649_s6 + $0xba0] sm:$0xff] }
 0x871   :  { %16928 = vmatprep.subr.mxu1 %v16201_v17  ;;  %16963 = vmatprep.subr.mxu0 %v16233_v43  ;;  %v16253_v51 = vld [vmem:[%s23649_s6 + $0xa20] sm:$0xff]  ;;  %v16268_v43 = vld [vmem:[%s23649_s6 + $0xa98] sm:$0xff] }
 0x872   :  { %16929 = vmatpush3.msra.mxu1 %v16185_v22  ;;  %16964 = vmatpush3.msra.mxu0 %v16217_v1  ;;  %v16285_v17 = vld [vmem:[%s23649_s6 + $0xb20] sm:$0xff]  ;;  %v14392_v22 = vcombine.low %v14354_v19, %v14356_v21  ;;  %v16300_v1 = vld [vmem:[%s23649_s6 + $0xb98] sm:$0xff]  ;;  %v16338_v19 = vld [vmem:[%s23649_s6 + $0xcc8] sm:$0xff] }
 0x873   :  { %13942 = vmatmul.mubr.f32.vlgmr.msra.gmra.mxu1 %v13867_v16  ;;  %14077 = vmatmul.mubr.f32.vlgmr.msra.gmra.mxu0 %v14002_v38  ;;  %v14527_v16 = vcombine.low %v14489_v4, %v14491_v25  ;;  %v16299_v38 = vld [vmem:[%s23649_s6 + $0xb90] sm:$0xff]  ;;  %v16354_v21 = vld [vmem:[%s23649_s6 + $0xd48] sm:$0xff]  ;;  %v16321_v4 = vld [vmem:[%s23649_s6 + $0xc40] sm:$0xff] }
 0x874   :  { %16968 = vmatprep.subr.mxu1 %v16280_v60  ;;  %17003 = vmatprep.subr.mxu0 %v16312_v33  ;;  %v16284_v60 = vld [vmem:[%s23649_s6 + $0xb18] sm:$0xff]  ;;  %v16251_v33 = vld [vmem:[%s23649_s6 + $0xa10] sm:$0xff] }
 0x875   :  { %16969 = vmatpush3.msra.mxu1 %v16264_v53  ;;  %14211 = vmatprep.mubr.f32.mxu1 %v14144_v6  ;;  %v16283_v53 = vld [vmem:[%s23649_s6 + $0xb10] sm:$0xff]  ;;  %v23059_v6 = vrot.slane %v14392_v22, %v22041_v9  ;;  %v16368_v25 = vld [vmem:[%s23649_s6 + $0xdb8] sm:$0xff] }
 0x876   :  { %17004 = vmatpush3.msra.mxu0 %v16296_v18  ;;  %14346 = vmatprep.mubr.f32.mxu0 %v14279_v29  ;;  %v16266_v18 = vld [vmem:[%s23649_s6 + $0xa88] sm:$0xff]  ;;  %v16319_v22 = vld [vmem:[%s23649_s6 + $0xc30] sm:$0xff] }
 0x877   :  { %16970 = vmatprep.subr.mxu1 %v16279_v28  ;;  %17005 = vmatprep.subr.mxu0 %v16311_v46  ;;  %v16298_v28 = vld [vmem:[%s23649_s6 + $0xb88] sm:$0xff]  ;;  %v23068_v46 = vrot.slane %v14527_v16, %v22041_v9 }
 0x878   :  { %16971 = vmatpush3.msra.mxu1 %v16263_v32  ;;  %17006 = vmatpush3.msra.mxu0 %v16295_v30  ;;  %v16250_v29 = vld [vmem:[%s23649_s6 + $0xa08] sm:$0xff]  ;;  %v16265_v30 = vld [vmem:[%s23649_s6 + $0xa80] sm:$0xff] }
 0x879   :  { %16972 = vmatprep.subr.mxu1 %v16278_v63  ;;  %17007 = vmatprep.subr.mxu0 %v16310_v24  ;;  %v16282_v32 = vld [vmem:[%s23649_s6 + $0xb08] sm:$0xff]  ;;  %v16297_v63 = vld [vmem:[%s23649_s6 + $0xb80] sm:$0xff] }
 0x87a   :  { %16973 = vmatpush3.msra.mxu1 %v16262_v59  ;;  %17008 = vmatpush3.msra.mxu0 %v16294_v50  ;;  %v16249_v24 = vld [vmem:[%s23649_s6 + $0xa00] sm:$0xff]  ;;  %v14400_v50 = vcombine.high %v23059_v6, %v23059_v6  ;;  %v16334_v16 = vld [vmem:[%s23649_s6 + $0xca8] sm:$0xff] }
 0x87b   :  { %16974 = vmatprep.subr.mxu1 %v16277_v52  ;;  %17009 = vmatprep.subr.mxu0 %v16309_v0  ;;  %v16281_v59 = vld [vmem:[%s23649_s6 + $0xb00] sm:$0xff]  ;;  %v14137_v52 = vrot.slane %v22851_v39, %v22041_v9  ;;  %v16344_v0 = vld [vmem:[%s23649_s6 + $0xcf8] sm:$0xff] }
 0x87c   :  { %16975 = vmatpush3.msra.mxu1 %v16261_v10  ;;  %17010 = vmatpush3.msra.mxu0 %v16293_v27  ;;  %v14535_v10 = vcombine.high %v23068_v46, %v23068_v46  ;;  %v14272_v27 = vrot.slane %v22860_v42, %v22041_v9  ;;  %v16328_v39 = vld [vmem:[%s23649_s6 + $0xc78] sm:$0xff]  ;;  %v14414_v42 = vrot.slane %v14400_v50, %v22041_v9 }
 0x87d   :  { %16976 = vmatprep.subr.mxu1 %v16276_v8  ;;  %17011 = vmatprep.subr.mxu0 %v16308_v45  ;;  %v16376_v8 = vld [vmem:[%s23649_s6 + $0xdf8] sm:$0xff] }
 0x87e   :  { %16977 = vmatpush3.msra.mxu1 %v16260_v48  ;;  %17012 = vmatpush3.msra.mxu0 %v16292_v13  ;;  %v16360_v45 = vld [vmem:[%s23649_s6 + $0xd78] sm:$0xff]  ;;  %v16343_v48 = vld [vmem:[%s23649_s6 + $0xcf0] sm:$0xff]  ;;  %v14549_v13 = vrot.slane %v14535_v10, %v22041_v9 }
 0x87f   :  { %16978 = vmatprep.subr.mxu1 %v16275_v55  ;;  %17013 = vmatprep.subr.mxu0 %v16307_v5  ;;  %v16375_v55 = vld [vmem:[%s23649_s6 + $0xdf0] sm:$0xff]  ;;  %v16316_v50 = vld [vmem:[%s23649_s6 + $0xc18] sm:$0xff] }
 0x880   :  { %16979 = vmatpush3.msra.mxu1 %v16259_v23  ;;  %17014 = vmatpush3.msra.mxu0 %v16291_v54  ;;  %v16327_v5 = vld [vmem:[%s23649_s6 + $0xc70] sm:$0xff]  ;;  %v16342_v54 = vld [vmem:[%s23649_s6 + $0xce8] sm:$0xff] }
 0x881   :  { %16980 = vmatprep.subr.mxu1 %v16274_v11  ;;  %17015 = vmatprep.subr.mxu0 %v16306_v57  ;;  %v16359_v23 = vld [vmem:[%s23649_s6 + $0xd70] sm:$0xff]  ;;  %v16374_v11 = vld [vmem:[%s23649_s6 + $0xde8] sm:$0xff] }
 0x882   :  { %16981 = vmatpush3.msra.mxu1 %v16258_v3  ;;  %17016 = vmatpush3.msra.mxu0 %v16290_v41  ;;  %v16326_v57 = vld [vmem:[%s23649_s6 + $0xc68] sm:$0xff]  ;;  %v16341_v41 = vld [vmem:[%s23649_s6 + $0xce0] sm:$0xff]  ;;  %v16331_v10 = vld [vmem:[%s23649_s6 + $0xc90] sm:$0xff] }
 0x883   :  { %16982 = vmatprep.subr.mxu1 %v16273_v44  ;;  %17017 = vmatprep.subr.mxu0 %v16305_v36  ;;  %v16358_v3 = vld [vmem:[%s23649_s6 + $0xd68] sm:$0xff]  ;;  %v16373_v44 = vld [vmem:[%s23649_s6 + $0xde0] sm:$0xff] }
 0x884   :  { %16983 = vmatpush3.msra.mxu1 %v16257_v26  ;;  %17018 = vmatpush3.msra.mxu0 %v16289_v7  ;;  %v16325_v36 = vld [vmem:[%s23649_s6 + $0xc60] sm:$0xff]  ;;  %v16340_v7 = vld [vmem:[%s23649_s6 + $0xcd8] sm:$0xff] }
 0x885   :  { %16984 = vmatprep.subr.mxu1 %v16272_v14  ;;  %17019 = vmatprep.subr.mxu0 %v16304_v56  ;;  %v16357_v26 = vld [vmem:[%s23649_s6 + $0xd60] sm:$0xff]  ;;  %v16372_v14 = vld [vmem:[%s23649_s6 + $0xdd8] sm:$0xff] }
 0x886   :  { %16985 = vmatpush3.msra.mxu1 %v16256_v20  ;;  %17020 = vmatpush3.msra.mxu0 %v16288_v34  ;;  %v16324_v56 = vld [vmem:[%s23649_s6 + $0xc58] sm:$0xff]  ;;  %v16339_v34 = vld [vmem:[%s23649_s6 + $0xcd0] sm:$0xff] }
 0x887   :  { %16986 = vmatprep.subr.mxu1 %v16271_v37  ;;  %17021 = vmatprep.subr.mxu0 %v16303_v62  ;;  %v16356_v20 = vld [vmem:[%s23649_s6 + $0xd58] sm:$0xff]  ;;  %v16371_v37 = vld [vmem:[%s23649_s6 + $0xdd0] sm:$0xff] }
 0x888   :  { %16987 = vmatpush3.msra.mxu1 %v16255_v61  ;;  %17022 = vmatpush3.msra.mxu0 %v16287_v47  ;;  %v16323_v62 = vld [vmem:[%s23649_s6 + $0xc50] sm:$0xff]  ;;  %v16370_v47 = vld [vmem:[%s23649_s6 + $0xdc8] sm:$0xff] }
 0x889   :  { %16988 = vmatprep.subr.mxu1 %v16270_v40  ;;  %17023 = vmatprep.subr.mxu0 %v16302_v35  ;;  %v16355_v61 = vld [vmem:[%s23649_s6 + $0xd50] sm:$0xff]  ;;  %v16322_v40 = vld [vmem:[%s23649_s6 + $0xc48] sm:$0xff]  ;;  %v16337_v35 = vld [vmem:[%s23649_s6 + $0xcc0] sm:$0xff] }
 0x88a   :  { %16989 = vmatpush3.msra.mxu1 %v16254_v58  ;;  %17024 = vmatpush3.msra.mxu0 %v16286_v2  ;;  %v16369_v58 = vld [vmem:[%s23649_s6 + $0xdc0] sm:$0xff] }
 0x88b   :  { %16990 = vmatprep.subr.mxu1 %v16269_v49  ;;  %17025 = vmatprep.subr.mxu0 %v16301_v12  ;;  %v16353_v2 = vld [vmem:[%s23649_s6 + $0xd40] sm:$0xff]  ;;  %v16336_v49 = vld [vmem:[%s23649_s6 + $0xcb8] sm:$0xff] }
 0x88c   :  { %16991 = vmatpush3.msra.mxu1 %v16253_v51  ;;  %17026 = vmatpush3.msra.mxu0 %v16285_v17  ;;  %v16320_v12 = vld [vmem:[%s23649_s6 + $0xc38] sm:$0xff]  ;;  %v16335_v17 = vld [vmem:[%s23649_s6 + $0xcb0] sm:$0xff] }
 0x88d   :  { %16992 = vmatprep.subr.mxu1 %v16268_v43  ;;  %17027 = vmatprep.subr.mxu0 %v16300_v1  ;;  %v16352_v51 = vld [vmem:[%s23649_s6 + $0xd38] sm:$0xff]  ;;  %v16367_v43 = vld [vmem:[%s23649_s6 + $0xdb0] sm:$0xff] }
 0x88e   :  { %16993 = vmatpush3.msra.mxu1 %v16252_v31  ;;  %17028 = vmatpush3.msra.mxu0 %v16284_v60  ;;  %v14624_v1 = vld [vmem:[#allocation4 + $0x16] ss:$8 sm:$0x3] }
 0x88f   :  { %16994 = vmatprep.subr.mxu1 %v16267_v15  ;;  %17029 = vmatprep.subr.mxu0 %v16299_v38  ;;  %v16351_v31 = vld [vmem:[%s23649_s6 + $0xd30] sm:$0xff]  ;;  %v16366_v15 = vld [vmem:[%s23649_s6 + $0xda8] sm:$0xff] }
 0x890   :  { %16995 = vmatpush3.msra.mxu1 %v16251_v33  ;;  %17030 = vmatpush3.msra.mxu0 %v16283_v53  ;;  %v14626_v60 = vld [vmem:[#allocation4 + $0x36] ss:$8 sm:$0x3]  ;;  %v16318_v38 = vld [vmem:[%s23649_s6 + $0xc28] sm:$0xff] }
 0x891   :  { %16996 = vmatprep.subr.mxu1 %v16266_v18  ;;  %17031 = vmatprep.subr.mxu0 %v16298_v28  ;;  %v14759_v33 = vld [vmem:[#allocation4 + $0x17] ss:$8 sm:$0x3]  ;;  %v16350_v53 = vld [vmem:[%s23649_s6 + $0xd28] sm:$0xff]  ;;  %v16333_v18 = vld [vmem:[%s23649_s6 + $0xca0] sm:$0xff] }
 0x892   :  { %16997 = vmatpush3.msra.mxu1 %v16250_v29  ;;  %17032 = vmatpush3.msra.mxu0 %v16282_v32  ;;  %v14761_v28 = vld [vmem:[#allocation4 + $0x37] ss:$8 sm:$0x3]  ;;  %v16365_v29 = vld [vmem:[%s23649_s6 + $0xda0] sm:$0xff] }
 0x893   :  { %16998 = vmatprep.subr.mxu1 %v16265_v30  ;;  %17033 = vmatprep.subr.mxu0 %v16297_v63  ;;  %v16317_v32 = vld [vmem:[%s23649_s6 + $0xc20] sm:$0xff]  ;;  %v16332_v63 = vld [vmem:[%s23649_s6 + $0xc98] sm:$0xff] }
 0x894   :  { %16999 = vmatpush3.msra.mxu1 %v16249_v24  ;;  %17034 = vmatpush3.msra.mxu0 %v16281_v59  ;;  %v16349_v30 = vld [vmem:[%s23649_s6 + $0xd20] sm:$0xff]  ;;  %v14662_v24 = vcombine.low %v14624_v1, %v14626_v60  ;;  %v16364_v59 = vld [vmem:[%s23649_s6 + $0xd98] sm:$0xff]  ;;  %v16402_v1 = vld [vmem:[%s23649_s6 + $0xec8] sm:$0xff] }
 0x895   :  { %14212 = vmatmul.mubr.f32.vlgmr.msra.gmra.mxu1 %v14137_v52  ;;  %14347 = vmatmul.mubr.f32.vlgmr.msra.gmra.mxu0 %v14272_v27  ;;  %v14797_v52 = vcombine.low %v14759_v33, %v14761_v28  ;;  %v16363_v27 = vld [vmem:[%s23649_s6 + $0xd90] sm:$0xff]  ;;  %v16418_v60 = vld [vmem:[%s23649_s6 + $0xf48] sm:$0xff]  ;;  %v16385_v33 = vld [vmem:[%s23649_s6 + $0xe40] sm:$0xff] }
 0x896   :  { %17038 = vmatprep.subr.mxu1 %v16344_v0  ;;  %17073 = vmatprep.subr.mxu0 %v16376_v8  ;;  %v16348_v0 = vld [vmem:[%s23649_s6 + $0xd18] sm:$0xff]  ;;  %v16315_v8 = vld [vmem:[%s23649_s6 + $0xc10] sm:$0xff] }
 0x897   :  { %17039 = vmatpush3.msra.mxu1 %v16328_v39  ;;  %14481 = vmatprep.mubr.f32.mxu1 %v14414_v42  ;;  %v16347_v39 = vld [vmem:[%s23649_s6 + $0xd10] sm:$0xff]  ;;  %v23267_v42 = vrot.slane %v14662_v24, %v22041_v9  ;;  %v16432_v28 = vld [vmem:[%s23649_s6 + $0xfb8] sm:$0xff] }
 0x898   :  { %17074 = vmatpush3.msra.mxu0 %v16360_v45  ;;  %14616 = vmatprep.mubr.f32.mxu0 %v14549_v13  ;;  %v16330_v45 = vld [vmem:[%s23649_s6 + $0xc88] sm:$0xff]  ;;  %v16383_v24 = vld [vmem:[%s23649_s6 + $0xe30] sm:$0xff] }
 0x899   :  { %17040 = vmatprep.subr.mxu1 %v16343_v48  ;;  %17075 = vmatprep.subr.mxu0 %v16375_v55  ;;  %v16362_v48 = vld [vmem:[%s23649_s6 + $0xd88] sm:$0xff]  ;;  %v23276_v55 = vrot.slane %v14797_v52, %v22041_v9 }
 0x89a   :  { %17041 = vmatpush3.msra.mxu1 %v16327_v5  ;;  %17076 = vmatpush3.msra.mxu0 %v16359_v23  ;;  %v16314_v13 = vld [vmem:[%s23649_s6 + $0xc08] sm:$0xff]  ;;  %v16329_v23 = vld [vmem:[%s23649_s6 + $0xc80] sm:$0xff] }
 0x89b   :  { %17042 = vmatprep.subr.mxu1 %v16342_v54  ;;  %17077 = vmatprep.subr.mxu0 %v16374_v11  ;;  %v16346_v5 = vld [vmem:[%s23649_s6 + $0xd08] sm:$0xff]  ;;  %v16361_v54 = vld [vmem:[%s23649_s6 + $0xd80] sm:$0xff] }
 0x89c   :  { %17043 = vmatpush3.msra.mxu1 %v16326_v57  ;;  %17078 = vmatpush3.msra.mxu0 %v16358_v3  ;;  %v16313_v11 = vld [vmem:[%s23649_s6 + $0xc00] sm:$0xff]  ;;  %v14670_v3 = vcombine.high %v23267_v42, %v23267_v42  ;;  %v16430_v52 = vld [vmem:[%s23649_s6 + $0xfa8] sm:$0xff] }
 0x89d   :  { %17044 = vmatprep.subr.mxu1 %v16341_v41  ;;  %17079 = vmatprep.subr.mxu0 %v16373_v44  ;;  %v16345_v57 = vld [vmem:[%s23649_s6 + $0xd00] sm:$0xff]  ;;  %v14407_v41 = vrot.slane %v23059_v6, %v22041_v9  ;;  %v16408_v44 = vld [vmem:[%s23649_s6 + $0xef8] sm:$0xff] }
 0x89e   :  { %17045 = vmatpush3.msra.mxu1 %v16325_v36  ;;  %17080 = vmatpush3.msra.mxu0 %v16357_v26  ;;  %v14805_v36 = vcombine.high %v23276_v55, %v23276_v55  ;;  %v14542_v26 = vrot.slane %v23068_v46, %v22041_v9  ;;  %v16392_v6 = vld [vmem:[%s23649_s6 + $0xe78] sm:$0xff]  ;;  %v14684_v46 = vrot.slane %v14670_v3, %v22041_v9  ;;  %v16411_v3 = vld [vmem:[%s23649_s6 + $0xf10] sm:$0xff] }
 0x89f   :  { %17046 = vmatprep.subr.mxu1 %v16340_v7  ;;  %17081 = vmatprep.subr.mxu0 %v16372_v14  ;;  %v16440_v7 = vld [vmem:[%s23649_s6 + $0xff8] sm:$0xff] }
 0x8a0   :  { %17047 = vmatpush3.msra.mxu1 %v16324_v56  ;;  %17082 = vmatpush3.msra.mxu0 %v16356_v20  ;;  %v16424_v14 = vld [vmem:[%s23649_s6 + $0xf78] sm:$0xff]  ;;  %v16407_v56 = vld [vmem:[%s23649_s6 + $0xef0] sm:$0xff]  ;;  %v14819_v20 = vrot.slane %v14805_v36, %v22041_v9  ;;  %v16378_v36 = vld [vmem:[%s23649_s6 + $0xe08] sm:$0xff] }
 0x8a1   :  { %17048 = vmatprep.subr.mxu1 %v16339_v34  ;;  %17083 = vmatprep.subr.mxu0 %v16371_v37  ;;  %v16439_v34 = vld [vmem:[%s23649_s6 + $0xff0] sm:$0xff] }
 0x8a2   :  { %17049 = vmatpush3.msra.mxu1 %v16323_v62  ;;  %17084 = vmatpush3.msra.mxu0 %v16355_v61  ;;  %v16391_v37 = vld [vmem:[%s23649_s6 + $0xe70] sm:$0xff]  ;;  %v16406_v61 = vld [vmem:[%s23649_s6 + $0xee8] sm:$0xff] }
 0x8a3   :  { %17050 = vmatprep.subr.mxu1 %v16338_v19  ;;  %17085 = vmatprep.subr.mxu0 %v16370_v47  ;;  %v16423_v62 = vld [vmem:[%s23649_s6 + $0xf70] sm:$0xff]  ;;  %v16438_v19 = vld [vmem:[%s23649_s6 + $0xfe8] sm:$0xff] }
 0x8a4   :  { %17051 = vmatpush3.msra.mxu1 %v16322_v40  ;;  %17086 = vmatpush3.msra.mxu0 %v16354_v21  ;;  %v16390_v47 = vld [vmem:[%s23649_s6 + $0xe68] sm:$0xff]  ;;  %v16405_v21 = vld [vmem:[%s23649_s6 + $0xee0] sm:$0xff] }
 0x8a5   :  { %17052 = vmatprep.subr.mxu1 %v16337_v35  ;;  %17087 = vmatprep.subr.mxu0 %v16369_v58  ;;  %v16422_v40 = vld [vmem:[%s23649_s6 + $0xf68] sm:$0xff]  ;;  %v16437_v35 = vld [vmem:[%s23649_s6 + $0xfe0] sm:$0xff] }
 0x8a6   :  { %17053 = vmatpush3.msra.mxu1 %v16321_v4  ;;  %17088 = vmatpush3.msra.mxu0 %v16353_v2  ;;  %v16389_v58 = vld [vmem:[%s23649_s6 + $0xe60] sm:$0xff]  ;;  %v16404_v2 = vld [vmem:[%s23649_s6 + $0xed8] sm:$0xff] }
 0x8a7   :  { %17054 = vmatprep.subr.mxu1 %v16336_v49  ;;  %17089 = vmatprep.subr.mxu0 %v16368_v25  ;;  %v16421_v4 = vld [vmem:[%s23649_s6 + $0xf60] sm:$0xff]  ;;  %v16436_v49 = vld [vmem:[%s23649_s6 + $0xfd8] sm:$0xff] }
 0x8a8   :  { %17055 = vmatpush3.msra.mxu1 %v16320_v12  ;;  %17090 = vmatpush3.msra.mxu0 %v16352_v51  ;;  %v16388_v25 = vld [vmem:[%s23649_s6 + $0xe58] sm:$0xff]  ;;  %v16403_v51 = vld [vmem:[%s23649_s6 + $0xed0] sm:$0xff] }
 0x8a9   :  { %17056 = vmatprep.subr.mxu1 %v16335_v17  ;;  %17091 = vmatprep.subr.mxu0 %v16367_v43  ;;  %v16420_v12 = vld [vmem:[%s23649_s6 + $0xf58] sm:$0xff]  ;;  %v16435_v17 = vld [vmem:[%s23649_s6 + $0xfd0] sm:$0xff] }
 0x8aa   :  { %17057 = vmatpush3.msra.mxu1 %v16319_v22  ;;  %17092 = vmatpush3.msra.mxu0 %v16351_v31  ;;  %v16387_v43 = vld [vmem:[%s23649_s6 + $0xe50] sm:$0xff]  ;;  %v16434_v31 = vld [vmem:[%s23649_s6 + $0xfc8] sm:$0xff] }
 0x8ab   :  { %17058 = vmatprep.subr.mxu1 %v16334_v16  ;;  %17093 = vmatprep.subr.mxu0 %v16366_v15  ;;  %v16419_v22 = vld [vmem:[%s23649_s6 + $0xf50] sm:$0xff]  ;;  %v16386_v16 = vld [vmem:[%s23649_s6 + $0xe48] sm:$0xff]  ;;  %v16401_v15 = vld [vmem:[%s23649_s6 + $0xec0] sm:$0xff] }
 0x8ac   :  { %17059 = vmatpush3.msra.mxu1 %v16318_v38  ;;  %17094 = vmatpush3.msra.mxu0 %v16350_v53  ;;  %v16433_v38 = vld [vmem:[%s23649_s6 + $0xfc0] sm:$0xff] }
 0x8ad   :  { %17060 = vmatprep.subr.mxu1 %v16333_v18  ;;  %17095 = vmatprep.subr.mxu0 %v16365_v29  ;;  %v16417_v53 = vld [vmem:[%s23649_s6 + $0xf40] sm:$0xff]  ;;  %v16400_v18 = vld [vmem:[%s23649_s6 + $0xeb8] sm:$0xff] }
 0x8ae   :  { %17061 = vmatpush3.msra.mxu1 %v16317_v32  ;;  %17096 = vmatpush3.msra.mxu0 %v16349_v30  ;;  %v16384_v29 = vld [vmem:[%s23649_s6 + $0xe38] sm:$0xff]  ;;  %v16399_v30 = vld [vmem:[%s23649_s6 + $0xeb0] sm:$0xff] }
 0x8af   :  { %17062 = vmatprep.subr.mxu1 %v16332_v63  ;;  %17097 = vmatprep.subr.mxu0 %v16364_v59  ;;  %v16416_v32 = vld [vmem:[%s23649_s6 + $0xf38] sm:$0xff]  ;;  %v16431_v63 = vld [vmem:[%s23649_s6 + $0xfb0] sm:$0xff] }
 0x8b0   :  { %17063 = vmatpush3.msra.mxu1 %v16316_v50  ;;  %17098 = vmatpush3.msra.mxu0 %v16348_v0  ;;  %v16415_v59 = vld [vmem:[%s23649_s6 + $0xf30] sm:$0xff]  ;;  %v16398_v50 = vld [vmem:[%s23649_s6 + $0xea8] sm:$0xff] }
 0x8b1   :  { %17064 = vmatprep.subr.mxu1 %v16331_v10  ;;  %17099 = vmatprep.subr.mxu0 %v16363_v27  ;;  %v16382_v0 = vld [vmem:[%s23649_s6 + $0xe28] sm:$0xff]  ;;  %v16397_v27 = vld [vmem:[%s23649_s6 + $0xea0] sm:$0xff] }
 0x8b2   :  { %17065 = vmatpush3.msra.mxu1 %v16315_v8  ;;  %17100 = vmatpush3.msra.mxu0 %v16347_v39  ;;  %v16414_v10 = vld [vmem:[%s23649_s6 + $0xf28] sm:$0xff]  ;;  %v16429_v8 = vld [vmem:[%s23649_s6 + $0xfa0] sm:$0xff] }
 0x8b3   :  { %17066 = vmatprep.subr.mxu1 %v16330_v45  ;;  %17101 = vmatprep.subr.mxu0 %v16362_v48  ;;  %v16381_v39 = vld [vmem:[%s23649_s6 + $0xe20] sm:$0xff]  ;;  %v16396_v48 = vld [vmem:[%s23649_s6 + $0xe98] sm:$0xff] }
 0x8b4   :  { %17067 = vmatpush3.msra.mxu1 %v16314_v13  ;;  %17102 = vmatpush3.msra.mxu0 %v16346_v5  ;;  %v16413_v45 = vld [vmem:[%s23649_s6 + $0xf20] sm:$0xff]  ;;  %v16428_v13 = vld [vmem:[%s23649_s6 + $0xf98] sm:$0xff] }
 0x8b5   :  { %17068 = vmatprep.subr.mxu1 %v16329_v23  ;;  %17103 = vmatprep.subr.mxu0 %v16361_v54  ;;  %v16380_v5 = vld [vmem:[%s23649_s6 + $0xe18] sm:$0xff]  ;;  %v16395_v54 = vld [vmem:[%s23649_s6 + $0xe90] sm:$0xff] }
 0x8b6   :  { %17069 = vmatpush3.msra.mxu1 %v16313_v11  ;;  %17104 = vmatpush3.msra.mxu0 %v16345_v57  ;;  %v16412_v23 = vld [vmem:[%s23649_s6 + $0xf18] sm:$0xff]  ;;  %v16427_v11 = vld [vmem:[%s23649_s6 + $0xf90] sm:$0xff] }
 0x8b7   :  { %14482 = vmatmul.mubr.f32.vlgmr.msra.gmra.mxu1 %v14407_v41  ;;  %14617 = vmatmul.mubr.f32.vlgmr.msra.gmra.mxu0 %v14542_v26  ;;  %v16379_v57 = vld [vmem:[%s23649_s6 + $0xe10] sm:$0xff]  ;;  %v16394_v41 = vld [vmem:[%s23649_s6 + $0xe88] sm:$0xff] }
 0x8b8   :  { %17108 = vmatprep.subr.mxu1 %v16408_v44  ;;  %17143 = vmatprep.subr.mxu0 %v16440_v7  ;;  %v16426_v44 = vld [vmem:[%s23649_s6 + $0xf88] sm:$0xff]  ;;  %v16393_v7 = vld [vmem:[%s23649_s6 + $0xe80] sm:$0xff] }
 0x8b9   :  { %17109 = vmatpush3.msra.mxu1 %v16392_v6  ;;  %14751 = vmatprep.mubr.f32.mxu1 %v14684_v46  ;;  %v16410_v26 = vld [vmem:[%s23649_s6 + $0xf08] sm:$0xff]  ;;  %v16425_v6 = vld [vmem:[%s23649_s6 + $0xf80] sm:$0xff] }
 0x8ba   :  { %17144 = vmatpush3.msra.mxu0 %v16424_v14  ;;  %14886 = vmatprep.mubr.f32.mxu0 %v14819_v20  ;;  %v16377_v14 = vld [vmem:[%s23649_s6 + $0xe00] sm:$0xff]  ;;  %v14812_v20 = vrot.slane %v23276_v55, %v22041_v9  ;;  %v14915_v55 = vld [vmem:[%s23651_s8 + $0x68] sm:$0xff] }
 0x8bb   :  { %17110 = vmatprep.subr.mxu1 %v16407_v56  ;;  %17145 = vmatprep.subr.mxu0 %v16439_v34  ;;  %v16409_v46 = vld [vmem:[%s23649_s6 + $0xf00] sm:$0xff]  ;;  %v14677_v56 = vrot.slane %v23267_v42, %v22041_v9  ;;  %v23723_v34 = vmov 0.0   ;;  %v14917_v42 = vld [vmem:[%s23651_s8 + $0x78] sm:$0xff]  ;;  %v14916_v9 = vld [vmem:[%s23651_s8 + $0x70] sm:$0xff] }
 0x8bc   :  { %17111 = vmatpush3.msra.mxu1 %v16391_v37  ;;  %17146 = vmatpush3.msra.mxu0 %v16423_v62  ;;  %v14914_v37 = vld [vmem:[%s23651_s8 + $0x60] sm:$0xff]  ;;  %v14913_v62 = vld [vmem:[%s23651_s8 + $0x58] sm:$0xff] }
 0x8bd   :  { %17112 = vmatprep.subr.mxu1 %v16406_v61  ;;  %17147 = vmatprep.subr.mxu0 %v16438_v19  ;;  %v14912_v61 = vld [vmem:[%s23651_s8 + $0x50] sm:$0xff]  ;;  %v14911_v19 = vld [vmem:[%s23651_s8 + $0x48] sm:$0xff] }
 0x8be   :  { %17113 = vmatpush3.msra.mxu1 %v16390_v47  ;;  %17148 = vmatpush3.msra.mxu0 %v16422_v40  ;;  %v14910_v47 = vld [vmem:[%s23651_s8 + $0x40] sm:$0xff]  ;;  %v14909_v40 = vld [vmem:[%s23651_s8 + $0x38] sm:$0xff] }
 0x8bf   :  { %17114 = vmatprep.subr.mxu1 %v16405_v21  ;;  %17149 = vmatprep.subr.mxu0 %v16437_v35  ;;  %v14908_v21 = vld [vmem:[%s23651_s8 + $0x30] sm:$0xff]  ;;  %v14907_v35 = vld [vmem:[%s23651_s8 + $0x28] sm:$0xff] }
 0x8c0   :  { %17115 = vmatpush3.msra.mxu1 %v16389_v58  ;;  %17150 = vmatpush3.msra.mxu0 %v16421_v4  ;;  %v14906_v58 = vld [vmem:[%s23651_s8 + $0x20] sm:$0xff]  ;;  %v14905_v4 = vld [vmem:[%s23651_s8 + $0x18] sm:$0xff] }
 0x8c1   :  { %17116 = vmatprep.subr.mxu1 %v16404_v2  ;;  %17151 = vmatprep.subr.mxu0 %v16436_v49  ;;  %v15011_v2 = vld [vmem:[%s23653_s10 + $0x78] sm:$0xff]  ;;  %v15010_v49 = vld [vmem:[%s23653_s10 + $0x70] sm:$0xff] }
 0x8c2   :  { %17117 = vmatpush3.msra.mxu1 %v16388_v25  ;;  %17152 = vmatpush3.msra.mxu0 %v16420_v12  ;;  %v14904_v25 = vld [vmem:[%s23651_s8 + $0x10] sm:$0xff]  ;;  %v15009_v12 = vld [vmem:[%s23653_s10 + $0x68] sm:$0xff] }
 0x8c3   :  { %17118 = vmatprep.subr.mxu1 %v16403_v51  ;;  %17153 = vmatprep.subr.mxu0 %v16435_v17  ;;  %v14903_v51 = vld [vmem:[%s23651_s8 + $0x8] sm:$0xff]  ;;  %v15008_v17 = vld [vmem:[%s23653_s10 + $0x60] sm:$0xff] }
 0x8c4   :  { %17119 = vmatpush3.msra.mxu1 %v16387_v43  ;;  %17154 = vmatpush3.msra.mxu0 %v16419_v22  ;;  %v14902_v43 = vld [vmem:[%s23651_s8] sm:$0xff]  ;;  %v15007_v22 = vld [vmem:[%s23653_s10 + $0x58] sm:$0xff] }
 0x8c5   :  { %17120 = vmatprep.subr.mxu1 %v16402_v1  ;;  %17155 = vmatprep.subr.mxu0 %v16434_v31  ;;  %v15006_v1 = vld [vmem:[%s23653_s10 + $0x50] sm:$0xff]  ;;  %v15005_v31 = vld [vmem:[%s23653_s10 + $0x48] sm:$0xff] }
 0x8c6   :  { %17121 = vmatpush3.msra.mxu1 %v16386_v16  ;;  %17156 = vmatpush3.msra.mxu0 %v16418_v60  ;;  %v15004_v16 = vld [vmem:[%s23653_s10 + $0x40] sm:$0xff]  ;;  %v15003_v60 = vld [vmem:[%s23653_s10 + $0x38] sm:$0xff] }
 0x8c7   :  { %17122 = vmatprep.subr.mxu1 %v16401_v15  ;;  %17157 = vmatprep.subr.mxu0 %v16433_v38  ;;  %v15002_v15 = vld [vmem:[%s23653_s10 + $0x30] sm:$0xff]  ;;  %v15001_v38 = vld [vmem:[%s23653_s10 + $0x28] sm:$0xff] }
 0x8c8   :  { %17123 = vmatpush3.msra.mxu1 %v16385_v33  ;;  %17158 = vmatpush3.msra.mxu0 %v16417_v53  ;;  %v15000_v33 = vld [vmem:[%s23653_s10 + $0x20] sm:$0xff]  ;;  %v14999_v53 = vld [vmem:[%s23653_s10 + $0x18] sm:$0xff] }
 0x8c9   :  { %17124 = vmatprep.subr.mxu1 %v16400_v18  ;;  %17159 = vmatprep.subr.mxu0 %v16432_v28  ;;  %v16650_v18 = vpop.f32.mrf.mxu1  ;;  %v16685_v28 = vpop.f32.mrf.mxu0 }
 0x8ca   :  { %17125 = vmatpush3.msra.mxu1 %v16384_v29  ;;  %17160 = vmatpush3.msra.mxu0 %v16416_v32 }
 0x8cb   :  { %17126 = vmatprep.subr.mxu1 %v16399_v30  ;;  %17161 = vmatprep.subr.mxu0 %v16431_v63  ;;  %v16651_v29 = vpop.f32.mrf.mxu1  ;;  %v16686_v30 = vpop.f32.mrf.mxu0 }
 0x8cc   :  { %17127 = vmatpush3.msra.mxu1 %v16383_v24  ;;  %17162 = vmatpush3.msra.mxu0 %v16415_v59  ;;  %v16652_v24 = vadd.f32 %v16651_v29, %v16650_v18  ;;  %v16687_v59 = vadd.f32 %v16686_v30, %v16685_v28  ;;  %v14997_v30 = vld [vmem:[%s23653_s10 + $0x8] sm:$0xff] }
 0x8cd   :  { %17128 = vmatprep.subr.mxu1 %v16398_v50  ;;  %17163 = vmatprep.subr.mxu0 %v16430_v52  ;;  %v16720_v32 = vpop.f32.mrf.mxu1  ;;  %v16755_v50 = vpop.f32.mrf.mxu0 }
 0x8ce   :  { %17129 = vmatpush3.msra.mxu1 %v16382_v0  ;;  %17164 = vmatpush3.msra.mxu0 %v16414_v10  ;;  %v13000_v10 = vadd.f32 %v16687_v59, %v16652_v24  ;;  %v16442_v24 = vld [vmem:[%s23652_s9] ss:$0 sm:$0xff]  ;;  %s18308_s9 = smov [#allocation5]  }
 0x8cf   :  { %17130 = vmatprep.subr.mxu1 %v16397_v27  ;;  %17165 = vmatprep.subr.mxu0 %v16429_v8  ;;  %v16721_v63 = vpop.f32.mrf.mxu1  ;;  %v16756_v27 = vpop.f32.mrf.mxu0 }
 0x8d0   :  { %17131 = vmatpush3.msra.mxu1 %v16381_v39  ;;  %17166 = vmatpush3.msra.mxu0 %v16413_v45  ;;  %v16722_v0 = vadd.f32 %v16721_v63, %v16720_v32  ;;  %v14998_v32 = vld [vmem:[%s23653_s10 + $0x10] sm:$0xff]  ;;  %v14996_v63 = vld [vmem:[%s23653_s10] sm:$0xff]  ;;  %s15116_s10 = sshll.u32 %s18308_s9, 4  ;;  %s15117_s10 = int_to_ptr.vmem [resolvable:$true] %s15116_s10 }
 0x8d1   :  { %17132 = vmatprep.subr.mxu1 %v16396_v48  ;;  %17167 = vmatprep.subr.mxu0 %v16428_v13  ;;  %v16757_v13 = vadd.f32 %v16756_v27, %v16755_v50  ;;  %p18273_p1 = scmp.lt.s32.totalorder %s15117_s10, %s15117_s10 }
 0x8d2   :  { %17133 = vmatpush3.msra.mxu1 %v16380_v5  ;;  %17168 = vmatpush3.msra.mxu0 %v16412_v23  ;;  %v13137_v39 = vadd.f32 %v16722_v0, %v13000_v10  ;;  %v16443_v10 = vld [vmem:[%s23654_s11] ss:$0 sm:$0xff]  ;;  %s18268_s11 = scalar_lea.vmem %s15117_s10, 32 }
 0x8d3   :  { %17134 = vmatprep.subr.mxu1 %v16395_v54  ;;  %17169 = vmatprep.subr.mxu0 %v16427_v11  ;;  %p18269_p0 = scmp.ne.s32.totalorder %s15117_s10, %s18268_s11  ;;  %p18274_p2 = scmp.lt.s32.totalorder %s18268_s11, %s18268_s11 }
 0x8d4   :  { %17135 = vmatpush3.msra.mxu1 %v16379_v57  ;;  %17170 = vmatpush3.msra.mxu0 %v16411_v3  ;;  %v13272_v23 = vadd.f32 %v16757_v13, %v13137_v39 }
 0x8d5   :  { %17136 = vmatprep.subr.mxu1 %v16394_v41  ;;  %17171 = vmatprep.subr.mxu0 %v16426_v44  ;;  %p18275_p3 = por %p18274_p2, %p18273_p1 }
 0x8d6   :  { %17137 = vmatpush3.msra.mxu1 %v16378_v36  ;;  %17172 = vmatpush3.msra.mxu0 %v16410_v26 }
 0x8d7   :  { %17138 = vmatprep.subr.mxu1 %v16393_v7  ;;  %17173 = vmatprep.subr.mxu0 %v16425_v6  ;;  %p18276_p4 = pnand %p18275_p3, %p18269_p0 }
 0x8d8   :  { %17139 = vmatpush3.msra.mxu1 %v16377_v14  ;;  %17174 = vmatpush3.msra.mxu0 %v16409_v46 }
 0x8d9   :  { %14752 = vmatmul.mubr.f32.vlgmr.msra.gmra.mxu1 %v14677_v56  ;;  %14887 = vmatmul.mubr.f32.vlgmr.msra.gmra.mxu0 %v14812_v20 }
 0x8da   :  { %17263 = vmatprep.subr.mxu1 %v23723_v34  ;;  %17295 = vmatprep.mubr.msk.f32.mxu1 %vm18296_vm4, %v23723_v34 }
 0x8db   :  { %17298 = vmatprep.subr.mxu0 %v23723_v34  ;;  %17330 = vmatprep.mubr.msk.f32.mxu0 %vm18296_vm4, %v23723_v34  ;;  %vm15089_vm4 = vcmask 1041408  }
 0x8dc   :  { %17264 = vmatpush3.msra.mxu1 %v14917_v42  ;;  %17299 = vmatpush3.msra.mxu0 %v15011_v2 }
 0x8dd   :  { %17265 = vmatprep.subr.mxu1 %v23723_v34  ;;  %17300 = vmatprep.subr.mxu0 %v23723_v34 }
 0x8de   :  { %17266 = vmatpush3.msra.mxu1 %v14916_v9  ;;  %17301 = vmatpush3.msra.mxu0 %v15010_v49 }
 0x8df   :  { %17267 = vmatprep.subr.mxu1 %v23723_v34  ;;  %17302 = vmatprep.subr.mxu0 %v23723_v34 }
 0x8e0   :  { %17268 = vmatpush3.msra.mxu1 %v14915_v55  ;;  %17303 = vmatpush3.msra.mxu0 %v15009_v12 }
 0x8e1   :  { %17269 = vmatprep.subr.mxu1 %v23723_v34  ;;  %17304 = vmatprep.subr.mxu0 %v23723_v34 }
 0x8e2   :  { %17270 = vmatpush3.msra.mxu1 %v14914_v37  ;;  %17305 = vmatpush3.msra.mxu0 %v15008_v17 }
 0x8e3   :  { %17271 = vmatprep.subr.mxu1 %v23723_v34  ;;  %17306 = vmatprep.subr.mxu0 %v23723_v34 }
 0x8e4   :  { %17272 = vmatpush3.msra.mxu1 %v14913_v62  ;;  %17307 = vmatpush3.msra.mxu0 %v15007_v22 }
 0x8e5   :  { %17273 = vmatprep.subr.mxu1 %v23723_v34  ;;  %17308 = vmatprep.subr.mxu0 %v23723_v34 }
 0x8e6   :  { %17274 = vmatpush3.msra.mxu1 %v14912_v61  ;;  %17309 = vmatpush3.msra.mxu0 %v15006_v1 }
 0x8e7   :  { %17275 = vmatprep.subr.mxu1 %v23723_v34  ;;  %17310 = vmatprep.subr.mxu0 %v23723_v34 }
 0x8e8   :  { %17276 = vmatpush3.msra.mxu1 %v14911_v19  ;;  %17311 = vmatpush3.msra.mxu0 %v15005_v31 }
 0x8e9   :  { %17277 = vmatprep.subr.mxu1 %v23723_v34  ;;  %17312 = vmatprep.subr.mxu0 %v23723_v34 }
 0x8ea   :  { %17278 = vmatpush3.msra.mxu1 %v14910_v47  ;;  %17313 = vmatpush3.msra.mxu0 %v15004_v16 }
 0x8eb   :  { %17279 = vmatprep.subr.mxu1 %v23723_v34  ;;  %17314 = vmatprep.subr.mxu0 %v23723_v34 }
 0x8ec   :  { %17280 = vmatpush3.msra.mxu1 %v14909_v40  ;;  %17315 = vmatpush3.msra.mxu0 %v15003_v60 }
 0x8ed   :  { %17281 = vmatprep.subr.mxu1 %v23723_v34  ;;  %17316 = vmatprep.subr.mxu0 %v23723_v34 }
 0x8ee   :  { %17282 = vmatpush3.msra.mxu1 %v14908_v21  ;;  %17317 = vmatpush3.msra.mxu0 %v15002_v15 }
 0x8ef   :  { %17283 = vmatprep.subr.mxu1 %v23723_v34  ;;  %17318 = vmatprep.subr.mxu0 %v23723_v34  ;;  %v16790_v52 = vpop.f32.mrf.mxu1  ;;  %v16825_v45 = vpop.f32.mrf.mxu0 }
 0x8f0   :  { %17284 = vmatpush3.msra.mxu1 %v14907_v35  ;;  %17319 = vmatpush3.msra.mxu0 %v15001_v38 }
 0x8f1   :  { %17285 = vmatprep.subr.mxu1 %v23723_v34  ;;  %17320 = vmatprep.subr.mxu0 %v23723_v34  ;;  %v16791_v8 = vpop.f32.mrf.mxu1  ;;  %v16826_v54 = vpop.f32.mrf.mxu0 }
 0x8f2   :  { %17286 = vmatpush3.msra.mxu1 %v14906_v58  ;;  %17321 = vmatpush3.msra.mxu0 %v15000_v33  ;;  %v16792_v5 = vadd.f32 %v16791_v8, %v16790_v52  ;;  %v16827_v44 = vadd.f32 %v16826_v54, %v16825_v45 }
 0x8f3   :  { %17287 = vmatprep.subr.mxu1 %v23723_v34  ;;  %17322 = vmatprep.subr.mxu0 %v23723_v34 }
 0x8f4   :  { %17288 = vmatpush3.msra.mxu1 %v14905_v4  ;;  %17323 = vmatpush3.msra.mxu0 %v14999_v53  ;;  %v13407_v57 = vadd.f32 %v16792_v5, %v13272_v23  ;;  %v16441_v53 = vld [vmem:[%s23650_s7] ss:$0 sm:$0xff] }
 0x8f5   :  { %17289 = vmatprep.subr.mxu1 %v23723_v34  ;;  %17324 = vmatprep.subr.mxu0 %v23723_v34 }
 0x8f6   :  { %17290 = vmatpush3.msra.mxu1 %v14904_v25  ;;  %v13542_v26 = vadd.f32 %v16827_v44, %v13407_v57  ;;  %17325 = vmatpush3.msra.mxu0 %v14998_v32 }
 0x8f7   :  { %17291 = vmatprep.subr.mxu1 %v23723_v34  ;;  %17326 = vmatprep.subr.mxu0 %v23723_v34 }
 0x8f8   :  { %17292 = vmatpush3.msra.mxu1 %v14903_v51  ;;  %17327 = vmatpush3.msra.mxu0 %v14997_v30 }
 0x8f9   :  { %17293 = vmatprep.subr.mxu1 %v23723_v34  ;;  %17328 = vmatprep.subr.mxu0 %v23723_v34 }
 0x8fa   :  { %17294 = vmatpush3.msra.mxu1 %v14902_v43  ;;  %17329 = vmatpush3.msra.mxu0 %v14996_v63 }
 0x911   :  { %v16860_v48 = vpop.f32.mrf.mxu1  ;;  %v16895_v3 = vpop.f32.mrf.mxu0 }
 0x913   :  { %v16861_v11 = vpop.f32.mrf.mxu1  ;;  %v16896_v7 = vpop.f32.mrf.mxu0 }
 0x914   :  { %v16862_v36 = vadd.f32 %v16861_v11, %v16860_v48  ;;  %v16897_v20 = vadd.f32 %v16896_v7, %v16895_v3 }
 0x916   :  { %v13677_v14 = vadd.f32 %v16862_v36, %v13542_v26 }
 0x918   :  { %v13812_v9 = vadd.f32 %v16897_v20, %v13677_v14 }
 0x933   :  { %v16930_v41 = vpop.f32.mrf.mxu1  ;;  %v16965_v46 = vpop.f32.mrf.mxu0 }
 0x935   :  { %v16931_v6 = vpop.f32.mrf.mxu1  ;;  %v16966_v55 = vpop.f32.mrf.mxu0 }
 0x936   :  { %v16932_v42 = vadd.f32 %v16931_v6, %v16930_v41  ;;  %v16967_v47 = vadd.f32 %v16966_v55, %v16965_v46 }
 0x938   :  { %v13947_v62 = vadd.f32 %v16932_v42, %v13812_v9 }
 0x93a   :  { %v14082_v21 = vadd.f32 %v16967_v47, %v13947_v62 }
 0x955   :  { %v17000_v56 = vpop.f32.mrf.mxu1  ;;  %v17035_v61 = vpop.f32.mrf.mxu0 }
 0x957   :  { %v17001_v37 = vpop.f32.mrf.mxu1  ;;  %v17036_v35 = vpop.f32.mrf.mxu0 }
 0x958   :  { %v17002_v40 = vadd.f32 %v17001_v37, %v17000_v56  ;;  %v17037_v49 = vadd.f32 %v17036_v35, %v17035_v61 }
 0x95a   :  { %v14217_v4 = vadd.f32 %v17002_v40, %v14082_v21 }
 0x95c   :  { %v14352_v12 = vadd.f32 %v17037_v49, %v14217_v4 }
 0x977   :  { %v17070_v19 = vpop.f32.mrf.mxu1  ;;  %v17105_v2 = vpop.f32.mrf.mxu0 }
 0x979   :  { %v17071_v58 = vpop.f32.mrf.mxu1  ;;  %v17106_v51 = vpop.f32.mrf.mxu0 }
 0x97a   :  { %v17072_v25 = vadd.f32 %v17071_v58, %v17070_v19  ;;  %v17107_v22 = vadd.f32 %v17106_v51, %v17105_v2 }
 0x97c   :  { %v14487_v17 = vadd.f32 %v17072_v25, %v14352_v12 }
 0x97e   :  { %v14622_v16 = vadd.f32 %v17107_v22, %v14487_v17 }
 0x999   :  { %v17140_v43 = vpop.f32.mrf.mxu1  ;;  %v17175_v1 = vpop.f32.mrf.mxu0 }
 0x99b   :  { %v17141_v31 = vpop.f32.mrf.mxu1  ;;  %v17176_v15 = vpop.f32.mrf.mxu0 }
 0x99c   :  { %v17142_v60 = vadd.f32 %v17141_v31, %v17140_v43  ;;  %v17177_v33 = vadd.f32 %v17176_v15, %v17175_v1 }
 0x99e   :  { %v14757_v38 = vadd.f32 %v17142_v60, %v14622_v16 }
 0x9a0   :  { %v14892_v18 = vadd.f32 %v17177_v33, %v14757_v38 }
 0x9a2   :  { %v14900_v28 = vadd.f32 %v16441_v53, %v14892_v18 }
 0x9a4   :  { %v14901_v29 = vmax.f32 %v14900_v28, 0.0 }
 0x9a6   :  { %17296 = vmatmul.mubr.f32.vlgmr.msra.gmra.mxu1 %v14901_v29 }
 0xa66   :  { %v14991_v59 = vpop.f32.mrf.mxu1 }
 0xa67   :  { %v14992_v50 = vadd.f32 %v16442_v24, %v14991_v59 }
 0xa68   :  { %v17297_v52 = vpop.f32.mrf.mxu1 }
 0xa69   :  { %v14995_v0 = vmax.f32 %v14992_v50, 0.0 }
 0xa6b   :  { %17331 = vmatmul.mubr.f32.vlgmr.msra.gmra.mxu0 %v14995_v0 }
 0xb2b   :  { %v15085_v27 = vpop.f32.mrf.mxu0 }
 0xb2c   :  { %v15086_v8 = vadd.f32 %v16443_v10, %v15085_v27 }
 0xb2d   :  { %v17332_v39 = vpop.f32.mrf.mxu0 }
 0xb2e   :  { %v15090_v45 = vsel %vm15089_vm4, %v15086_v8, -inf }
 0xb2f   :  { %v15091_v34 = vrot.slane %v15090_v45, 4 }
 0xb31   :  { %v15092_v48 = vmax.f32 %v15090_v45, %v15091_v34 }
 0xb33   :  { %v15093_v13 = vrot.slane %v15092_v48, 2 }
 0xb35   :  { %v15094_v5 = vmax.f32 %v15092_v48, %v15093_v13 }
 0xb37   :  { %v15095_v23 = vrot.slane %v15094_v5, 1 }
 0xb39   :  { %v15096_v54 = vmax.f32 %v15094_v5, %v15095_v23 }
 0xb3b   :  { %v15097_v11 = vsub.f32 %v15086_v8, %v15096_v54 }
 0xb3d   :  { %v15098_v57 = vmul.f32 1.442695, %v15097_v11 }
 0xb3f   :  { %18264 = vpow2.f32 %v15098_v57 }
 0xb4c   :  { %v18265_v3 = vpop.eup %18264 }
 0xb4d   :  { %v15100_v41 = vsel %vm15089_vm4, %v18265_v3, 0.0 }
 0xb4e   :  { %v15101_v44 = vrot.slane %v15100_v41, 4 }
 0xb50   :  { %v15102_v36 = vadd.f32 %v15101_v44, %v15100_v41 }
 0xb52   :  { %v15103_v26 = vrot.slane %v15102_v36, 2 }
 0xb54   :  { %v15104_v7 = vadd.f32 %v15103_v26, %v15102_v36 }
 0xb56   :  { %v15105_v6 = vrot.slane %v15104_v7, 1 }
 0xb58   :  { %v15106_v14 = vadd.f32 %v15105_v6, %v15104_v7 }
 0xb5a   :  { %18266 = vrcp.f32 %v15106_v14 }
 0xb67   :  { %v18267_v46 = vpop.eup %18266 }
 0xb68   :  { %v15108_v56 = vmul.f32 %v18267_v46, %v18265_v3 }
 0xb6a   :  { %15109 = vst [vmem:[#allocation5] sm:$0x3] %v15108_v56 }
 0xb6b   :  { %18279 = shalt.err (!%p18276_p4)
}
 0xb6c   :  { %15119 = dma.vmem_to_hbm [thread:$0]  %s15117_s10, 32, %s23655_s12, [#allocation6]  }
 0xb6d   :  { %18288 = dma.done.wait [#allocation6], 32  }
 0xb6e   :  { %18289 = vsyncadd [#allocation6], 4294967264 }
 0xb6f   :  { %15123 = vsyncpa [#allocation6], 1 }

</bundles_post_ra>
